<compile_context>
chip_gen: v7x
topology: tpu7x:2x2x1
jax: 0.10.0
libtpu: 0.0.40
codegen_flags: <defaults>
</compile_context>

<pallas_src>
import numpy as np
import jax
import jax.numpy as jnp
from jax import lax
from jax.experimental import pallas as pl
from jax.experimental.pallas import tpu as pltpu

# ----------------------------- config -------------------------------------
B = 2
C = 3
IMG = 64
PS = 8                        # patch size -> 8x8 token grid
T = (IMG // PS) ** 2          # 64 tokens
D = 32
HEADS = 4
DH = D // HEADS
NUM_CLASSES = 16
CK = C * PS * PS              # 192 patch features
P_SUB = 4                     # T == 4 * P_SUB**2   (orig: 8)
MASK_S = 2 * P_SUB            # 8                   (orig: 16)
SCALE = IMG // MASK_S         # 8                   (orig: 32)
OUT_LANES = 128               # lane-dense packed output: [logits | mask | pad]
assert NUM_CLASSES + T <= OUT_LANES


# ------------------------- fused backbone kernel ---------------------------
def _backbone_kernel(p_ref, we_ref, be_ref,
                     wqkv0_ref, bqkv0_ref, wproj0_ref, bproj0_ref,
                     wqkv1_ref, bqkv1_ref, wproj1_ref, bproj1_ref,
                     whead_ref, bhead_ref,
                     out_ref):
    """Whole batch in one invocation; all activations stay resident in VMEM."""
    f32 = jnp.float32
    bf16 = jnp.bfloat16

    def mxu(a, b_mat, dims=(((1,), (0,)), ((), ()))):
        # operands are already bf16 (casts hoisted to the call sites), f32 accumulate
        return lax.dot_general(a, b_mat, dimension_numbers=dims,
                               preferred_element_type=f32)

    # patch embedding on the flattened batch: (B*T, CK) @ (CK, D) + b
    tok = mxu(p_ref[...], we_ref[...]) + be_ref[...]                 # (BT, D) f32

    layer_params = (
        (wqkv0_ref, bqkv0_ref, wproj0_ref, bproj0_ref),
        (wqkv1_ref, bqkv1_ref, wproj1_ref, bproj1_ref),
    )
    layer_stats = []
    for wqkv_ref, bqkv_ref, wproj_ref, bproj_ref in layer_params:
        # qkv projection for the whole batch; 1/sqrt(DH) is pre-folded into the
        # q-columns of Wqkv/bqkv in the wrapper (zero in-kernel cost).
        qkv = mxu(tok.astype(bf16), wqkv_ref[...]) + bqkv_ref[...]   # (BT, 3D) f32
        qkv_bf = qkv.astype(bf16)                                    # single cast / layer

        o_rows = []
        stat_rows = []
        for b in range(B):                                           # batch unrolled
            qkv_b = qkv_bf[b * T:(b + 1) * T, :]                     # (T, 3D) static slice
            stat = jnp.zeros((1, T), f32)                            # sum_h sum_q attn
            o_heads = []
            # TODO(synk): at production shapes (18 heads, T=256) convert this static
            # unroll to lax.fori_loop + accumulator scratch to bound vreg live ranges.
            for h in range(HEADS):
                q = qkv_b[:, h * DH:(h + 1) * DH]                    # (T, DH) pre-scaled
                k = qkv_b[:, D + h * DH:D + (h + 1) * DH]
                v = qkv_b[:, 2 * D + h * DH:2 * D + (h + 1) * DH]
                # scores = q @ k^T (contract last dims; no materialized transpose)
                s = mxu(q, k, dims=(((1,), (1,)), ((), ())))         # (T, T) f32
                s = s - jnp.max(s, axis=-1, keepdims=True)
                e = jnp.exp(s)                                       # f32 on EUP
                # exact reciprocal of the tiny (T,1) column: it feeds the thresholded
                # mask statistic, so no approx here (review correctness concern #1)
                inv = 1.0 / jnp.sum(e, axis=-1, keepdims=True)
                p = e * inv                                          # (T, T) f32
                stat = stat + jnp.sum(p, axis=0, keepdims=True)      # mean/T applied later
                o_heads.append(mxu(p.astype(bf16), v))               # (T, DH) f32
            stat_rows.append(stat)
            o_rows.append(jnp.concatenate(o_heads, axis=-1))         # (T, D) f32
        layer_stats.append(jnp.concatenate(stat_rows, axis=0))       # (B, T)

        # SINGLE merged output projection for all heads and both batch elements
        o_cat = jnp.concatenate(o_rows, axis=0).astype(bf16)         # (BT, D)
        tok = tok + mxu(o_cat, wproj_ref[...]) + bproj_ref[...]      # residual, f32

    # classifier head: mean-pool over tokens + linear
    pooled = jnp.mean(tok.reshape(B, T, D), axis=1)                  # (B, D) f32
    logits = mxu(pooled.astype(bf16), whead_ref[...]) + bhead_ref[...]  # (B, NC)

    # mask: mean of the last two layers' (sum-over-heads) attention, mean over query
    # rows, thresholded per image at 0.2 * its mean (threshold before the 2x2 permute,
    # which is elementwise-equivalent to the torch ordering).
    patch = (layer_stats[0] + layer_stats[1]) * (0.5 / T)            # (B, T)
    thr = jnp.mean(patch, axis=-1, keepdims=True) * 0.2              # (B, 1)
    mask = (patch > thr).astype(f32)                                 # (B, T)

    # lane-dense packed writeback: one unmasked 128-lane store per row
    pad = jnp.zeros((B, OUT_LANES - NUM_CLASSES - T), f32)
    out_ref[...] = jnp.concatenate([logits, mask, pad], axis=-1)


def _prep_kernel_params(params):
    """Pre-cast weights to bf16 and fold the 1/sqrt(DH) scale into Wqkv's q-columns."""
    f32 = jnp.float32
    bf16 = jnp.bfloat16
    qcol = jnp.concatenate(
        [jnp.full((D,), 1.0 / float(np.sqrt(DH)), f32), jnp.ones((2 * D,), f32)])

    def scaled_qkv(w, b_vec):
        return (w * qcol[None, :]).astype(bf16), (b_vec * qcol).reshape(1, 3 * D)

    wqkv0, bqkv0 = scaled_qkv(params["Wqkv0"], params["bqkv0"])
    wqkv1, bqkv1 = scaled_qkv(params["Wqkv1"], params["bqkv1"])
    return (
        params["We"].astype(bf16), params["be"].reshape(1, D).astype(f32),
        wqkv0, bqkv0,
        params["Wproj0"].astype(bf16), params["bproj0"].reshape(1, D).astype(f32),
        wqkv1, bqkv1,
        params["Wproj1"].astype(bf16), params["bproj1"].reshape(1, D).astype(f32),
        params["Whead"].astype(bf16), params["bhead"].reshape(1, NUM_CLASSES).astype(f32),
    )


def fused_backbone(patches_flat_bf16, params):
    """patches: (B*T, CK) bf16 -> (logits (B, NUM_CLASSES), mask_flat (B, T))."""
    kparams = _prep_kernel_params(params)
    vmem = pl.BlockSpec(memory_space=pltpu.MemorySpace.VMEM)   # whole array, resident
    packed = pl.pallas_call(
        _backbone_kernel,
        out_shape=jax.ShapeDtypeStruct((B, OUT_LANES), jnp.float32),
        in_specs=[vmem] * (1 + len(kparams)),
        out_specs=pl.BlockSpec(memory_space=pltpu.MemorySpace.VMEM),
        # single invocation: no grid. TODO(synk): at production shapes add a "parallel"
        # batch grid axis (v7x 2-TC split) and set vmem_limit_bytes for the 64 MiB budget.
    )(patches_flat_bf16, *kparams)
    logits = packed[:, :NUM_CLASSES]
    mask_flat = packed[:, NUM_CLASSES:NUM_CLASSES + T]
    return logits, mask_flat


# --------------------- params & image -> patch tokens -----------------------
def init_params(key):
    keys = jax.random.split(key, 8)

    def dense(k, shape, scale=0.05):
        return (scale * jax.random.normal(k, shape)).astype(jnp.float32)

    return {
        "We": dense(keys[0], (CK, D)),
        "be": jnp.zeros((D,), jnp.float32),
        "Wqkv0": dense(keys[1], (D, 3 * D)),
        "bqkv0": jnp.zeros((3 * D,), jnp.float32),
        "Wproj0": dense(keys[2], (D, D)),
        "bproj0": jnp.zeros((D,), jnp.float32),
        "Wqkv1": dense(keys[3], (D, 3 * D)),
        "bqkv1": jnp.zeros((3 * D,), jnp.float32),
        "Wproj1": dense(keys[4], (D, D)),
        "bproj1": jnp.zeros((D,), jnp.float32),
        "Whead": dense(keys[5], (D, NUM_CLASSES)),
        "bhead": jnp.zeros((NUM_CLASSES,), jnp.float32),
    }


def extract_patches(x):
    """NCHW image -> (B*T, C*PS*PS) bf16 patch tokens (relayout done by XLA in-jit)."""
    b, c, hh, ww = x.shape
    gh, gw = hh // PS, ww // PS
    p = x.reshape(b, c, gh, PS, gw, PS)
    p = jnp.transpose(p, (0, 2, 4, 1, 3, 5))                # (B, gh, gw, C, ps, ps)
    return p.reshape(b * gh * gw, c * PS * PS).astype(jnp.bfloat16)


# ------------------- fixed-shape crop + bilinear resize ---------------------
def _bilinear_crop_resize_single(img, coord):
    """img: (C, IMG, IMG); coord: (4,) int32 = (r0, c0, r1, c1) inclusive.
    Equivalent to F.interpolate(img[:, r0:r1+1, c0:c1+1], (IMG, IMG), 'bilinear',
    align_corners=True), expressed as two dense interpolation matmuls (R @ img @ C^T)
    so it runs on the MXU and never recompiles when the bbox changes."""
    f32 = jnp.float32
    r0 = coord[0].astype(f32)
    c0 = coord[1].astype(f32)
    r1 = coord[2].astype(f32)
    c1 = coord[3].astype(f32)
    t = jnp.arange(IMG, dtype=f32) / float(IMG - 1)
    rs = r0 + (r1 - r0) * t
    cs = c0 + (c1 - c0) * t
    r_lo = jnp.floor(rs)
    c_lo = jnp.floor(cs)
    wr = rs - r_lo
    wc = cs - c_lo
    r_lo_i = r_lo.astype(jnp.int32)
    c_lo_i = c_lo.astype(jnp.int32)
    r_hi_i = jnp.minimum(r_lo_i + 1, coord[2])               # clamp inside the crop
    c_hi_i = jnp.minimum(c_lo_i + 1, coord[3])

    src = jnp.arange(IMG, dtype=jnp.int32)
    # Row / column interpolation matrices built from one-hots (no gathers).
    R = ((src[None, :] == r_lo_i[:, None]).astype(f32) * (1.0 - wr)[:, None]
         + (src[None, :] == r_hi_i[:, None]).astype(f32) * wr[:, None])      # (IMG, IMG)
    Cm = ((src[None, :] == c_lo_i[:, None]).astype(f32) * (1.0 - wc)[:, None]
          + (src[None, :] == c_hi_i[:, None]).astype(f32) * wc[:, None])     # (IMG, IMG)

    tmp = jnp.einsum('rh,chw->crw', R, img)                  # row interpolation (MXU)
    return jnp.einsum('crw,sw->crs', tmp, Cm)                # column interpolation (MXU)


# ------------------------------ jitted passes -------------------------------
@jax.jit
def first_pass(x, params):
    patches = extract_patches(x)
    logits, mask_flat = fused_backbone(patches, params)      # (B,NC), (B,T)
    # torch: patch.view(1,2,2,p,p).permute(0,1,3,2,4).view(2p,2p)
    m = mask_flat.reshape(B, 2, 2, P_SUB, P_SUB)
    m = jnp.transpose(m, (0, 1, 3, 2, 4)).reshape(B, MASK_S, MASK_S)
    return logits, m


@jax.jit
def second_pass(x, coords, params):
    # coords rows index image H, cols index image W, matching x[i,:,x0:x1+1,y0:y1+1]
    local = jax.vmap(_bilinear_crop_resize_single)(x, coords)
    local = lax.stop_gradient(local)                          # .detach()
    patches = extract_patches(local)
    logits, _ = fused_backbone(patches, params)
    return logits


# ----------------------------- host glue ------------------------------------
def largest_component_bbox(mask_np):
    """8-connectivity largest component; bbox (min_r, min_c, max_r+1, max_c+1)."""
    # TODO(synk): skimage.measure.label/regionprops has no Pallas equivalent; computed on host.
    S = mask_np.shape[0]
    visited = np.zeros_like(mask_np, dtype=bool)
    best_area, best_bbox = -1, (0, 0, S, S)
    for r in range(S):
        for c in range(S):
            if mask_np[r, c] and not visited[r, c]:
                stack = [(r, c)]
                visited[r, c] = True
                cells = []
                while stack:
                    rr, cc = stack.pop()
                    cells.append((rr, cc))
                    for dr in (-1, 0, 1):
                        for dc in (-1, 0, 1):
                            nr, nc = rr + dr, cc + dc
                            if (0 <= nr < S and 0 <= nc < S and mask_np[nr, nc]
                                    and not visited[nr, nc]):
                                visited[nr, nc] = True
                                stack.append((nr, nc))
                if len(cells) > best_area:
                    rs = [p[0] for p in cells]
                    cs = [p[1] for p in cells]
                    best_area = len(cells)
                    best_bbox = (min(rs), min(cs), max(rs) + 1, max(cs) + 1)
    return best_bbox


def mainnet_forward(x, params):
    out, m = first_pass(x, params)
    m_np = np.asarray(jax.device_get(m))

    coords = []
    for i in range(m_np.shape[0]):
        bbox = largest_component_bbox(m_np[i] > 0.5)
        r0 = max(bbox[0] * SCALE - 1, 0)
        c0 = max(bbox[1] * SCALE - 1, 0)
        r1 = bbox[2] * SCALE - 1
        c1 = bbox[3] * SCALE - 1
        coords.append((int(r0), int(c0), int(r1), int(c1)))
    coords = jnp.asarray(np.array(coords, dtype=np.int32))    # (B, 4) device tensor

    out2 = second_pass(x, coords, params)
    return out, out2


# ------------------------------ main ----------------------------------------
if __name__ == "__main__":
    key = jax.random.PRNGKey(0)
    xkey, pkey = jax.random.split(key)
    x = jax.random.normal(xkey, (B, C, IMG, IMG), dtype=jnp.float32)
    params = init_params(pkey)

    out, out2 = mainnet_forward(x, params)
    jax.block_until_ready((out, out2))
    assert out.shape == (B, NUM_CLASSES) and out2.shape == (B, NUM_CLASSES)
    assert bool(jnp.all(jnp.isfinite(out))) and bool(jnp.all(jnp.isfinite(out2)))
    print("KERNEL_OK")
</pallas_src>

<mosaic_0001>
module attributes {stable_mosaic.version = 11 : i64} {
  func.func @_backbone_kernel(%arg0: memref<128x192xbf16, #tpu.memory_space<vmem>>, %arg1: memref<192x32xbf16, #tpu.memory_space<vmem>>, %arg2: memref<1x32xf32, #tpu.memory_space<vmem>>, %arg3: memref<32x96xbf16, #tpu.memory_space<vmem>>, %arg4: memref<1x96xf32, #tpu.memory_space<vmem>>, %arg5: memref<32x32xbf16, #tpu.memory_space<vmem>>, %arg6: memref<1x32xf32, #tpu.memory_space<vmem>>, %arg7: memref<32x96xbf16, #tpu.memory_space<vmem>>, %arg8: memref<1x96xf32, #tpu.memory_space<vmem>>, %arg9: memref<32x32xbf16, #tpu.memory_space<vmem>>, %arg10: memref<1x32xf32, #tpu.memory_space<vmem>>, %arg11: memref<32x16xbf16, #tpu.memory_space<vmem>>, %arg12: memref<1x16xf32, #tpu.memory_space<vmem>>, %arg13: memref<2x128xf32, #tpu.memory_space<vmem>>) attributes {dimension_semantics = [], scalar_prefetch = 0 : i64, scratch_operands = 0 : i64, tpu.core_type = #tpu.core_type<tc>} {
    %c0 = arith.constant 0 : index
    %c0_0 = arith.constant 0 : index
    %0 = vector.load %arg0[%c0, %c0_0] : memref<128x192xbf16, #tpu.memory_space<vmem>>, vector<128x192xbf16>
    %c0_1 = arith.constant 0 : index
    %c0_2 = arith.constant 0 : index
    %1 = vector.load %arg1[%c0_1, %c0_2] : memref<192x32xbf16, #tpu.memory_space<vmem>>, vector<192x32xbf16>
    %cst = arith.constant dense<0.000000e+00> : vector<128x32xf32>
    %2 = tpu.matmul %0, %1, %cst {dimension_numbers = #tpu.dot_dimension_numbers<[1], [0], [0], [1], [0, 0, 1, 1], [], []>} : vector<128x192xbf16>, vector<192x32xbf16>, vector<128x32xf32> -> vector<128x32xf32>
    %c0_3 = arith.constant 0 : index
    %c0_4 = arith.constant 0 : index
    %3 = vector.load %arg2[%c0_3, %c0_4] : memref<1x32xf32, #tpu.memory_space<vmem>>, vector<1x32xf32>
    %4 = vector.broadcast %3 : vector<1x32xf32> to vector<128x32xf32>
    %5 = arith.addf %2, %4 : vector<128x32xf32>
    %6 = arith.truncf %5 : vector<128x32xf32> to vector<128x32xbf16>
    %c0_5 = arith.constant 0 : index
    %c0_6 = arith.constant 0 : index
    %7 = vector.load %arg3[%c0_5, %c0_6] : memref<32x96xbf16, #tpu.memory_space<vmem>>, vector<32x96xbf16>
    %cst_7 = arith.constant dense<0.000000e+00> : vector<128x96xf32>
    %8 = tpu.matmul %6, %7, %cst_7 {dimension_numbers = #tpu.dot_dimension_numbers<[1], [0], [0], [1], [0, 0, 1, 1], [], []>} : vector<128x32xbf16>, vector<32x96xbf16>, vector<128x96xf32> -> vector<128x96xf32>
    %c0_8 = arith.constant 0 : index
    %c0_9 = arith.constant 0 : index
    %9 = vector.load %arg4[%c0_8, %c0_9] : memref<1x96xf32, #tpu.memory_space<vmem>>, vector<1x96xf32>
    %10 = vector.broadcast %9 : vector<1x96xf32> to vector<128x96xf32>
    %11 = arith.addf %8, %10 : vector<128x96xf32>
    %12 = arith.truncf %11 : vector<128x96xf32> to vector<128x96xbf16>
    %13 = vector.extract_strided_slice %12 {offsets = [0, 0], sizes = [64, 96], strides = [1, 1]} : vector<128x96xbf16> to vector<64x96xbf16>
    %cst_10 = arith.constant 0.000000e+00 : f32
    %14 = vector.broadcast %cst_10 : f32 to vector<1x64xf32>
    %15 = vector.extract_strided_slice %13 {offsets = [0, 0], sizes = [64, 8], strides = [1, 1]} : vector<64x96xbf16> to vector<64x8xbf16>
    %16 = vector.extract_strided_slice %13 {offsets = [0, 32], sizes = [64, 8], strides = [1, 1]} : vector<64x96xbf16> to vector<64x8xbf16>
    %17 = vector.extract_strided_slice %13 {offsets = [0, 64], sizes = [64, 8], strides = [1, 1]} : vector<64x96xbf16> to vector<64x8xbf16>
    %cst_11 = arith.constant dense<0.000000e+00> : vector<64x64xf32>
    %18 = tpu.matmul %15, %16, %cst_11 {dimension_numbers = #tpu.dot_dimension_numbers<[1], [1], [0], [0], [0, 0, 1, 0], [], []>} : vector<64x8xbf16>, vector<64x8xbf16>, vector<64x64xf32> -> vector<64x64xf32>
    %cst_12 = arith.constant dense<0xFF800000> : vector<64xf32>
    %19 = vector.multi_reduction <maximumf>, %18, %cst_12 [1] : vector<64x64xf32> to vector<64xf32>
    %20 = vector.shape_cast %19 : vector<64xf32> to vector<64x1xf32>
    %21 = vector.broadcast %20 : vector<64x1xf32> to vector<64x64xf32>
    %22 = arith.subf %18, %21 : vector<64x64xf32>
    %23 = math.exp %22 : vector<64x64xf32>
    %cst_13 = arith.constant dense<0.000000e+00> : vector<64xf32>
    %24 = vector.multi_reduction <add>, %23, %cst_13 [1] : vector<64x64xf32> to vector<64xf32>
    %25 = vector.shape_cast %24 : vector<64xf32> to vector<64x1xf32>
    %cst_14 = arith.constant 1.000000e+00 : f32
    %26 = vector.broadcast %cst_14 : f32 to vector<64x1xf32>
    %27 = arith.divf %26, %25 : vector<64x1xf32>
    %28 = vector.broadcast %27 : vector<64x1xf32> to vector<64x64xf32>
    %29 = arith.mulf %23, %28 : vector<64x64xf32>
    %cst_15 = arith.constant dense<0.000000e+00> : vector<64xf32>
    %30 = vector.multi_reduction <add>, %29, %cst_15 [0] : vector<64x64xf32> to vector<64xf32>
    %31 = vector.shape_cast %30 : vector<64xf32> to vector<1x64xf32>
    %32 = arith.addf %14, %31 : vector<1x64xf32>
    %33 = arith.truncf %29 : vector<64x64xf32> to vector<64x64xbf16>
    %cst_16 = arith.constant dense<0.000000e+00> : vector<64x8xf32>
    %34 = tpu.matmul %33, %17, %cst_16 {dimension_numbers = #tpu.dot_dimension_numbers<[1], [0], [0], [1], [0, 0, 1, 1], [], []>} : vector<64x64xbf16>, vector<64x8xbf16>, vector<64x8xf32> -> vector<64x8xf32>
    %35 = vector.extract_strided_slice %13 {offsets = [0, 8], sizes = [64, 8], strides = [1, 1]} : vector<64x96xbf16> to vector<64x8xbf16>
    %36 = vector.extract_strided_slice %13 {offsets = [0, 40], sizes = [64, 8], strides = [1, 1]} : vector<64x96xbf16> to vector<64x8xbf16>
    %37 = vector.extract_strided_slice %13 {offsets = [0, 72], sizes = [64, 8], strides = [1, 1]} : vector<64x96xbf16> to vector<64x8xbf16>
    %cst_17 = arith.constant dense<0.000000e+00> : vector<64x64xf32>
    %38 = tpu.matmul %35, %36, %cst_17 {dimension_numbers = #tpu.dot_dimension_numbers<[1], [1], [0], [0], [0, 0, 1, 0], [], []>} : vector<64x8xbf16>, vector<64x8xbf16>, vector<64x64xf32> -> vector<64x64xf32>
    %cst_18 = arith.constant dense<0xFF800000> : vector<64xf32>
    %39 = vector.multi_reduction <maximumf>, %38, %cst_18 [1] : vector<64x64xf32> to vector<64xf32>
    %40 = vector.shape_cast %39 : vector<64xf32> to vector<64x1xf32>
    %41 = vector.broadcast %40 : vector<64x1xf32> to vector<64x64xf32>
    %42 = arith.subf %38, %41 : vector<64x64xf32>
    %43 = math.exp %42 : vector<64x64xf32>
    %cst_19 = arith.constant dense<0.000000e+00> : vector<64xf32>
    %44 = vector.multi_reduction <add>, %43, %cst_19 [1] : vector<64x64xf32> to vector<64xf32>
    %45 = vector.shape_cast %44 : vector<64xf32> to vector<64x1xf32>
    %cst_20 = arith.constant 1.000000e+00 : f32
    %46 = vector.broadcast %cst_20 : f32 to vector<64x1xf32>
    %47 = arith.divf %46, %45 : vector<64x1xf32>
    %48 = vector.broadcast %47 : vector<64x1xf32> to vector<64x64xf32>
    %49 = arith.mulf %43, %48 : vector<64x64xf32>
    %cst_21 = arith.constant dense<0.000000e+00> : vector<64xf32>
    %50 = vector.multi_reduction <add>, %49, %cst_21 [0] : vector<64x64xf32> to vector<64xf32>
    %51 = vector.shape_cast %50 : vector<64xf32> to vector<1x64xf32>
    %52 = arith.addf %32, %51 : vector<1x64xf32>
    %53 = arith.truncf %49 : vector<64x64xf32> to vector<64x64xbf16>
    %cst_22 = arith.constant dense<0.000000e+00> : vector<64x8xf32>
    %54 = tpu.matmul %53, %37, %cst_22 {dimension_numbers = #tpu.dot_dimension_numbers<[1], [0], [0], [1], [0, 0, 1, 1], [], []>} : vector<64x64xbf16>, vector<64x8xbf16>, vector<64x8xf32> -> vector<64x8xf32>
    %55 = vector.extract_strided_slice %13 {offsets = [0, 16], sizes = [64, 8], strides = [1, 1]} : vector<64x96xbf16> to vector<64x8xbf16>
    %56 = vector.extract_strided_slice %13 {offsets = [0, 48], sizes = [64, 8], strides = [1, 1]} : vector<64x96xbf16> to vector<64x8xbf16>
    %57 = vector.extract_strided_slice %13 {offsets = [0, 80], sizes = [64, 8], strides = [1, 1]} : vector<64x96xbf16> to vector<64x8xbf16>
    %cst_23 = arith.constant dense<0.000000e+00> : vector<64x64xf32>
    %58 = tpu.matmul %55, %56, %cst_23 {dimension_numbers = #tpu.dot_dimension_numbers<[1], [1], [0], [0], [0, 0, 1, 0], [], []>} : vector<64x8xbf16>, vector<64x8xbf16>, vector<64x64xf32> -> vector<64x64xf32>
    %cst_24 = arith.constant dense<0xFF800000> : vector<64xf32>
    %59 = vector.multi_reduction <maximumf>, %58, %cst_24 [1] : vector<64x64xf32> to vector<64xf32>
    %60 = vector.shape_cast %59 : vector<64xf32> to vector<64x1xf32>
    %61 = vector.broadcast %60 : vector<64x1xf32> to vector<64x64xf32>
    %62 = arith.subf %58, %61 : vector<64x64xf32>
    %63 = math.exp %62 : vector<64x64xf32>
    %cst_25 = arith.constant dense<0.000000e+00> : vector<64xf32>
    %64 = vector.multi_reduction <add>, %63, %cst_25 [1] : vector<64x64xf32> to vector<64xf32>
    %65 = vector.shape_cast %64 : vector<64xf32> to vector<64x1xf32>
    %cst_26 = arith.constant 1.000000e+00 : f32
    %66 = vector.broadcast %cst_26 : f32 to vector<64x1xf32>
    %67 = arith.divf %66, %65 : vector<64x1xf32>
    %68 = vector.broadcast %67 : vector<64x1xf32> to vector<64x64xf32>
    %69 = arith.mulf %63, %68 : vector<64x64xf32>
    %cst_27 = arith.constant dense<0.000000e+00> : vector<64xf32>
    %70 = vector.multi_reduction <add>, %69, %cst_27 [0] : vector<64x64xf32> to vector<64xf32>
    %71 = vector.shape_cast %70 : vector<64xf32> to vector<1x64xf32>
    %72 = arith.addf %52, %71 : vector<1x64xf32>
    %73 = arith.truncf %69 : vector<64x64xf32> to vector<64x64xbf16>
    %cst_28 = arith.constant dense<0.000000e+00> : vector<64x8xf32>
    %74 = tpu.matmul %73, %57, %cst_28 {dimension_numbers = #tpu.dot_dimension_numbers<[1], [0], [0], [1], [0, 0, 1, 1], [], []>} : vector<64x64xbf16>, vector<64x8xbf16>, vector<64x8xf32> -> vector<64x8xf32>
    %75 = vector.extract_strided_slice %13 {offsets = [0, 24], sizes = [64, 8], strides = [1, 1]} : vector<64x96xbf16> to vector<64x8xbf16>
    %76 = vector.extract_strided_slice %13 {offsets = [0, 56], sizes = [64, 8], strides = [1, 1]} : vector<64x96xbf16> to vector<64x8xbf16>
    %77 = vector.extract_strided_slice %13 {offsets = [0, 88], sizes = [64, 8], strides = [1, 1]} : vector<64x96xbf16> to vector<64x8xbf16>
    %cst_29 = arith.constant dense<0.000000e+00> : vector<64x64xf32>
    %78 = tpu.matmul %75, %76, %cst_29 {dimension_numbers = #tpu.dot_dimension_numbers<[1], [1], [0], [0], [0, 0, 1, 0], [], []>} : vector<64x8xbf16>, vector<64x8xbf16>, vector<64x64xf32> -> vector<64x64xf32>
    %cst_30 = arith.constant dense<0xFF800000> : vector<64xf32>
    %79 = vector.multi_reduction <maximumf>, %78, %cst_30 [1] : vector<64x64xf32> to vector<64xf32>
    %80 = vector.shape_cast %79 : vector<64xf32> to vector<64x1xf32>
    %81 = vector.broadcast %80 : vector<64x1xf32> to vector<64x64xf32>
    %82 = arith.subf %78, %81 : vector<64x64xf32>
    %83 = math.exp %82 : vector<64x64xf32>
    %cst_31 = arith.constant dense<0.000000e+00> : vector<64xf32>
    %84 = vector.multi_reduction <add>, %83, %cst_31 [1] : vector<64x64xf32> to vector<64xf32>
    %85 = vector.shape_cast %84 : vector<64xf32> to vector<64x1xf32>
    %cst_32 = arith.constant 1.000000e+00 : f32
    %86 = vector.broadcast %cst_32 : f32 to vector<64x1xf32>
    %87 = arith.divf %86, %85 : vector<64x1xf32>
    %88 = vector.broadcast %87 : vector<64x1xf32> to vector<64x64xf32>
    %89 = arith.mulf %83, %88 : vector<64x64xf32>
    %cst_33 = arith.constant dense<0.000000e+00> : vector<64xf32>
    %90 = vector.multi_reduction <add>, %89, %cst_33 [0] : vector<64x64xf32> to vector<64xf32>
    %91 = vector.shape_cast %90 : vector<64xf32> to vector<1x64xf32>
    %92 = arith.addf %72, %91 : vector<1x64xf32>
    %93 = arith.truncf %89 : vector<64x64xf32> to vector<64x64xbf16>
    %cst_34 = arith.constant dense<0.000000e+00> : vector<64x8xf32>
    %94 = tpu.matmul %93, %77, %cst_34 {dimension_numbers = #tpu.dot_dimension_numbers<[1], [0], [0], [1], [0, 0, 1, 1], [], []>} : vector<64x64xbf16>, vector<64x8xbf16>, vector<64x8xf32> -> vector<64x8xf32>
    %95 = tpu.concatenate %34, %54, %74, %94 in 1 : vector<64x8xf32>, vector<64x8xf32>, vector<64x8xf32>, vector<64x8xf32> -> vector<64x32xf32>
    %96 = vector.extract_strided_slice %12 {offsets = [64, 0], sizes = [64, 96], strides = [1, 1]} : vector<128x96xbf16> to vector<64x96xbf16>
    %cst_35 = arith.constant 0.000000e+00 : f32
    %97 = vector.broadcast %cst_35 : f32 to vector<1x64xf32>
    %98 = vector.extract_strided_slice %96 {offsets = [0, 0], sizes = [64, 8], strides = [1, 1]} : vector<64x96xbf16> to vector<64x8xbf16>
    %99 = vector.extract_strided_slice %96 {offsets = [0, 32], sizes = [64, 8], strides = [1, 1]} : vector<64x96xbf16> to vector<64x8xbf16>
    %100 = vector.extract_strided_slice %96 {offsets = [0, 64], sizes = [64, 8], strides = [1, 1]} : vector<64x96xbf16> to vector<64x8xbf16>
    %cst_36 = arith.constant dense<0.000000e+00> : vector<64x64xf32>
    %101 = tpu.matmul %98, %99, %cst_36 {dimension_numbers = #tpu.dot_dimension_numbers<[1], [1], [0], [0], [0, 0, 1, 0], [], []>} : vector<64x8xbf16>, vector<64x8xbf16>, vector<64x64xf32> -> vector<64x64xf32>
    %cst_37 = arith.constant dense<0xFF800000> : vector<64xf32>
    %102 = vector.multi_reduction <maximumf>, %101, %cst_37 [1] : vector<64x64xf32> to vector<64xf32>
    %103 = vector.shape_cast %102 : vector<64xf32> to vector<64x1xf32>
    %104 = vector.broadcast %103 : vector<64x1xf32> to vector<64x64xf32>
    %105 = arith.subf %101, %104 : vector<64x64xf32>
    %106 = math.exp %105 : vector<64x64xf32>
    %cst_38 = arith.constant dense<0.000000e+00> : vector<64xf32>
    %107 = vector.multi_reduction <add>, %106, %cst_38 [1] : vector<64x64xf32> to vector<64xf32>
    %108 = vector.shape_cast %107 : vector<64xf32> to vector<64x1xf32>
    %cst_39 = arith.constant 1.000000e+00 : f32
    %109 = vector.broadcast %cst_39 : f32 to vector<64x1xf32>
    %110 = arith.divf %109, %108 : vector<64x1xf32>
    %111 = vector.broadcast %110 : vector<64x1xf32> to vector<64x64xf32>
    %112 = arith.mulf %106, %111 : vector<64x64xf32>
    %cst_40 = arith.constant dense<0.000000e+00> : vector<64xf32>
    %113 = vector.multi_reduction <add>, %112, %cst_40 [0] : vector<64x64xf32> to vector<64xf32>
    %114 = vector.shape_cast %113 : vector<64xf32> to vector<1x64xf32>
    %115 = arith.addf %97, %114 : vector<1x64xf32>
    %116 = arith.truncf %112 : vector<64x64xf32> to vector<64x64xbf16>
    %cst_41 = arith.constant dense<0.000000e+00> : vector<64x8xf32>
    %117 = tpu.matmul %116, %100, %cst_41 {dimension_numbers = #tpu.dot_dimension_numbers<[1], [0], [0], [1], [0, 0, 1, 1], [], []>} : vector<64x64xbf16>, vector<64x8xbf16>, vector<64x8xf32> -> vector<64x8xf32>
    %118 = vector.extract_strided_slice %96 {offsets = [0, 8], sizes = [64, 8], strides = [1, 1]} : vector<64x96xbf16> to vector<64x8xbf16>
    %119 = vector.extract_strided_slice %96 {offsets = [0, 40], sizes = [64, 8], strides = [1, 1]} : vector<64x96xbf16> to vector<64x8xbf16>
    %120 = vector.extract_strided_slice %96 {offsets = [0, 72], sizes = [64, 8], strides = [1, 1]} : vector<64x96xbf16> to vector<64x8xbf16>
    %cst_42 = arith.constant dense<0.000000e+00> : vector<64x64xf32>
    %121 = tpu.matmul %118, %119, %cst_42 {dimension_numbers = #tpu.dot_dimension_numbers<[1], [1], [0], [0], [0, 0, 1, 0], [], []>} : vector<64x8xbf16>, vector<64x8xbf16>, vector<64x64xf32> -> vector<64x64xf32>
    %cst_43 = arith.constant dense<0xFF800000> : vector<64xf32>
    %122 = vector.multi_reduction <maximumf>, %121, %cst_43 [1] : vector<64x64xf32> to vector<64xf32>
    %123 = vector.shape_cast %122 : vector<64xf32> to vector<64x1xf32>
    %124 = vector.broadcast %123 : vector<64x1xf32> to vector<64x64xf32>
    %125 = arith.subf %121, %124 : vector<64x64xf32>
    %126 = math.exp %125 : vector<64x64xf32>
    %cst_44 = arith.constant dense<0.000000e+00> : vector<64xf32>
    %127 = vector.multi_reduction <add>, %126, %cst_44 [1] : vector<64x64xf32> to vector<64xf32>
    %128 = vector.shape_cast %127 : vector<64xf32> to vector<64x1xf32>
    %cst_45 = arith.constant 1.000000e+00 : f32
    %129 = vector.broadcast %cst_45 : f32 to vector<64x1xf32>
    %130 = arith.divf %129, %128 : vector<64x1xf32>
    %131 = vector.broadcast %130 : vector<64x1xf32> to vector<64x64xf32>
    %132 = arith.mulf %126, %131 : vector<64x64xf32>
    %cst_46 = arith.constant dense<0.000000e+00> : vector<64xf32>
    %133 = vector.multi_reduction <add>, %132, %cst_46 [0] : vector<64x64xf32> to vector<64xf32>
    %134 = vector.shape_cast %133 : vector<64xf32> to vector<1x64xf32>
    %135 = arith.addf %115, %134 : vector<1x64xf32>
    %136 = arith.truncf %132 : vector<64x64xf32> to vector<64x64xbf16>
    %cst_47 = arith.constant dense<0.000000e+00> : vector<64x8xf32>
    %137 = tpu.matmul %136, %120, %cst_47 {dimension_numbers = #tpu.dot_dimension_numbers<[1], [0], [0], [1], [0, 0, 1, 1], [], []>} : vector<64x64xbf16>, vector<64x8xbf16>, vector<64x8xf32> -> vector<64x8xf32>
    %138 = vector.extract_strided_slice %96 {offsets = [0, 16], sizes = [64, 8], strides = [1, 1]} : vector<64x96xbf16> to vector<64x8xbf16>
    %139 = vector.extract_strided_slice %96 {offsets = [0, 48], sizes = [64, 8], strides = [1, 1]} : vector<64x96xbf16> to vector<64x8xbf16>
    %140 = vector.extract_strided_slice %96 {offsets = [0, 80], sizes = [64, 8], strides = [1, 1]} : vector<64x96xbf16> to vector<64x8xbf16>
    %cst_48 = arith.constant dense<0.000000e+00> : vector<64x64xf32>
    %141 = tpu.matmul %138, %139, %cst_48 {dimension_numbers = #tpu.dot_dimension_numbers<[1], [1], [0], [0], [0, 0, 1, 0], [], []>} : vector<64x8xbf16>, vector<64x8xbf16>, vector<64x64xf32> -> vector<64x64xf32>
    %cst_49 = arith.constant dense<0xFF800000> : vector<64xf32>
    %142 = vector.multi_reduction <maximumf>, %141, %cst_49 [1] : vector<64x64xf32> to vector<64xf32>
    %143 = vector.shape_cast %142 : vector<64xf32> to vector<64x1xf32>
    %144 = vector.broadcast %143 : vector<64x1xf32> to vector<64x64xf32>
    %145 = arith.subf %141, %144 : vector<64x64xf32>
    %146 = math.exp %145 : vector<64x64xf32>
    %cst_50 = arith.constant dense<0.000000e+00> : vector<64xf32>
    %147 = vector.multi_reduction <add>, %146, %cst_50 [1] : vector<64x64xf32> to vector<64xf32>
    %148 = vector.shape_cast %147 : vector<64xf32> to vector<64x1xf32>
    %cst_51 = arith.constant 1.000000e+00 : f32
    %149 = vector.broadcast %cst_51 : f32 to vector<64x1xf32>
    %150 = arith.divf %149, %148 : vector<64x1xf32>
    %151 = vector.broadcast %150 : vector<64x1xf32> to vector<64x64xf32>
    %152 = arith.mulf %146, %151 : vector<64x64xf32>
    %cst_52 = arith.constant dense<0.000000e+00> : vector<64xf32>
    %153 = vector.multi_reduction <add>, %152, %cst_52 [0] : vector<64x64xf32> to vector<64xf32>
    %154 = vector.shape_cast %153 : vector<64xf32> to vector<1x64xf32>
    %155 = arith.addf %135, %154 : vector<1x64xf32>
    %156 = arith.truncf %152 : vector<64x64xf32> to vector<64x64xbf16>
    %cst_53 = arith.constant dense<0.000000e+00> : vector<64x8xf32>
    %157 = tpu.matmul %156, %140, %cst_53 {dimension_numbers = #tpu.dot_dimension_numbers<[1], [0], [0], [1], [0, 0, 1, 1], [], []>} : vector<64x64xbf16>, vector<64x8xbf16>, vector<64x8xf32> -> vector<64x8xf32>
    %158 = vector.extract_strided_slice %96 {offsets = [0, 24], sizes = [64, 8], strides = [1, 1]} : vector<64x96xbf16> to vector<64x8xbf16>
    %159 = vector.extract_strided_slice %96 {offsets = [0, 56], sizes = [64, 8], strides = [1, 1]} : vector<64x96xbf16> to vector<64x8xbf16>
    %160 = vector.extract_strided_slice %96 {offsets = [0, 88], sizes = [64, 8], strides = [1, 1]} : vector<64x96xbf16> to vector<64x8xbf16>
    %cst_54 = arith.constant dense<0.000000e+00> : vector<64x64xf32>
    %161 = tpu.matmul %158, %159, %cst_54 {dimension_numbers = #tpu.dot_dimension_numbers<[1], [1], [0], [0], [0, 0, 1, 0], [], []>} : vector<64x8xbf16>, vector<64x8xbf16>, vector<64x64xf32> -> vector<64x64xf32>
    %cst_55 = arith.constant dense<0xFF800000> : vector<64xf32>
    %162 = vector.multi_reduction <maximumf>, %161, %cst_55 [1] : vector<64x64xf32> to vector<64xf32>
    %163 = vector.shape_cast %162 : vector<64xf32> to vector<64x1xf32>
    %164 = vector.broadcast %163 : vector<64x1xf32> to vector<64x64xf32>
    %165 = arith.subf %161, %164 : vector<64x64xf32>
    %166 = math.exp %165 : vector<64x64xf32>
    %cst_56 = arith.constant dense<0.000000e+00> : vector<64xf32>
    %167 = vector.multi_reduction <add>, %166, %cst_56 [1] : vector<64x64xf32> to vector<64xf32>
    %168 = vector.shape_cast %167 : vector<64xf32> to vector<64x1xf32>
    %cst_57 = arith.constant 1.000000e+00 : f32
    %169 = vector.broadcast %cst_57 : f32 to vector<64x1xf32>
    %170 = arith.divf %169, %168 : vector<64x1xf32>
    %171 = vector.broadcast %170 : vector<64x1xf32> to vector<64x64xf32>
    %172 = arith.mulf %166, %171 : vector<64x64xf32>
    %cst_58 = arith.constant dense<0.000000e+00> : vector<64xf32>
    %173 = vector.multi_reduction <add>, %172, %cst_58 [0] : vector<64x64xf32> to vector<64xf32>
    %174 = vector.shape_cast %173 : vector<64xf32> to vector<1x64xf32>
    %175 = arith.addf %155, %174 : vector<1x64xf32>
    %176 = arith.truncf %172 : vector<64x64xf32> to vector<64x64xbf16>
    %cst_59 = arith.constant dense<0.000000e+00> : vector<64x8xf32>
    %177 = tpu.matmul %176, %160, %cst_59 {dimension_numbers = #tpu.dot_dimension_numbers<[1], [0], [0], [1], [0, 0, 1, 1], [], []>} : vector<64x64xbf16>, vector<64x8xbf16>, vector<64x8xf32> -> vector<64x8xf32>
    %178 = tpu.concatenate %117, %137, %157, %177 in 1 : vector<64x8xf32>, vector<64x8xf32>, vector<64x8xf32>, vector<64x8xf32> -> vector<64x32xf32>
    %179 = tpu.concatenate %92, %175 in 0 : vector<1x64xf32>, vector<1x64xf32> -> vector<2x64xf32>
    %180 = tpu.concatenate %95, %178 in 0 : vector<64x32xf32>, vector<64x32xf32> -> vector<128x32xf32>
    %181 = arith.truncf %180 : vector<128x32xf32> to vector<128x32xbf16>
    %c0_60 = arith.constant 0 : index
    %c0_61 = arith.constant 0 : index
    %182 = vector.load %arg5[%c0_60, %c0_61] : memref<32x32xbf16, #tpu.memory_space<vmem>>, vector<32x32xbf16>
    %cst_62 = arith.constant dense<0.000000e+00> : vector<128x32xf32>
    %183 = tpu.matmul %181, %182, %cst_62 {dimension_numbers = #tpu.dot_dimension_numbers<[1], [0], [0], [1], [0, 0, 1, 1], [], []>} : vector<128x32xbf16>, vector<32x32xbf16>, vector<128x32xf32> -> vector<128x32xf32>
    %184 = arith.addf %5, %183 : vector<128x32xf32>
    %c0_63 = arith.constant 0 : index
    %c0_64 = arith.constant 0 : index
    %185 = vector.load %arg6[%c0_63, %c0_64] : memref<1x32xf32, #tpu.memory_space<vmem>>, vector<1x32xf32>
    %186 = vector.broadcast %185 : vector<1x32xf32> to vector<128x32xf32>
    %187 = arith.addf %184, %186 : vector<128x32xf32>
    %188 = arith.truncf %187 : vector<128x32xf32> to vector<128x32xbf16>
    %c0_65 = arith.constant 0 : index
    %c0_66 = arith.constant 0 : index
    %189 = vector.load %arg7[%c0_65, %c0_66] : memref<32x96xbf16, #tpu.memory_space<vmem>>, vector<32x96xbf16>
    %cst_67 = arith.constant dense<0.000000e+00> : vector<128x96xf32>
    %190 = tpu.matmul %188, %189, %cst_67 {dimension_numbers = #tpu.dot_dimension_numbers<[1], [0], [0], [1], [0, 0, 1, 1], [], []>} : vector<128x32xbf16>, vector<32x96xbf16>, vector<128x96xf32> -> vector<128x96xf32>
    %c0_68 = arith.constant 0 : index
    %c0_69 = arith.constant 0 : index
    %191 = vector.load %arg8[%c0_68, %c0_69] : memref<1x96xf32, #tpu.memory_space<vmem>>, vector<1x96xf32>
    %192 = vector.broadcast %191 : vector<1x96xf32> to vector<128x96xf32>
    %193 = arith.addf %190, %192 : vector<128x96xf32>
    %194 = arith.truncf %193 : vector<128x96xf32> to vector<128x96xbf16>
    %195 = vector.extract_strided_slice %194 {offsets = [0, 0], sizes = [64, 96], strides = [1, 1]} : vector<128x96xbf16> to vector<64x96xbf16>
    %cst_70 = arith.constant 0.000000e+00 : f32
    %196 = vector.broadcast %cst_70 : f32 to vector<1x64xf32>
    %197 = vector.extract_strided_slice %195 {offsets = [0, 0], sizes = [64, 8], strides = [1, 1]} : vector<64x96xbf16> to vector<64x8xbf16>
    %198 = vector.extract_strided_slice %195 {offsets = [0, 32], sizes = [64, 8], strides = [1, 1]} : vector<64x96xbf16> to vector<64x8xbf16>
    %199 = vector.extract_strided_slice %195 {offsets = [0, 64], sizes = [64, 8], strides = [1, 1]} : vector<64x96xbf16> to vector<64x8xbf16>
    %cst_71 = arith.constant dense<0.000000e+00> : vector<64x64xf32>
    %200 = tpu.matmul %197, %198, %cst_71 {dimension_numbers = #tpu.dot_dimension_numbers<[1], [1], [0], [0], [0, 0, 1, 0], [], []>} : vector<64x8xbf16>, vector<64x8xbf16>, vector<64x64xf32> -> vector<64x64xf32>
    %cst_72 = arith.constant dense<0xFF800000> : vector<64xf32>
    %201 = vector.multi_reduction <maximumf>, %200, %cst_72 [1] : vector<64x64xf32> to vector<64xf32>
    %202 = vector.shape_cast %201 : vector<64xf32> to vector<64x1xf32>
    %203 = vector.broadcast %202 : vector<64x1xf32> to vector<64x64xf32>
    %204 = arith.subf %200, %203 : vector<64x64xf32>
    %205 = math.exp %204 : vector<64x64xf32>
    %cst_73 = arith.constant dense<0.000000e+00> : vector<64xf32>
    %206 = vector.multi_reduction <add>, %205, %cst_73 [1] : vector<64x64xf32> to vector<64xf32>
    %207 = vector.shape_cast %206 : vector<64xf32> to vector<64x1xf32>
    %cst_74 = arith.constant 1.000000e+00 : f32
    %208 = vector.broadcast %cst_74 : f32 to vector<64x1xf32>
    %209 = arith.divf %208, %207 : vector<64x1xf32>
    %210 = vector.broadcast %209 : vector<64x1xf32> to vector<64x64xf32>
    %211 = arith.mulf %205, %210 : vector<64x64xf32>
    %cst_75 = arith.constant dense<0.000000e+00> : vector<64xf32>
    %212 = vector.multi_reduction <add>, %211, %cst_75 [0] : vector<64x64xf32> to vector<64xf32>
    %213 = vector.shape_cast %212 : vector<64xf32> to vector<1x64xf32>
    %214 = arith.addf %196, %213 : vector<1x64xf32>
    %215 = arith.truncf %211 : vector<64x64xf32> to vector<64x64xbf16>
    %cst_76 = arith.constant dense<0.000000e+00> : vector<64x8xf32>
    %216 = tpu.matmul %215, %199, %cst_76 {dimension_numbers = #tpu.dot_dimension_numbers<[1], [0], [0], [1], [0, 0, 1, 1], [], []>} : vector<64x64xbf16>, vector<64x8xbf16>, vector<64x8xf32> -> vector<64x8xf32>
    %217 = vector.extract_strided_slice %195 {offsets = [0, 8], sizes = [64, 8], strides = [1, 1]} : vector<64x96xbf16> to vector<64x8xbf16>
    %218 = vector.extract_strided_slice %195 {offsets = [0, 40], sizes = [64, 8], strides = [1, 1]} : vector<64x96xbf16> to vector<64x8xbf16>
    %219 = vector.extract_strided_slice %195 {offsets = [0, 72], sizes = [64, 8], strides = [1, 1]} : vector<64x96xbf16> to vector<64x8xbf16>
    %cst_77 = arith.constant dense<0.000000e+00> : vector<64x64xf32>
    %220 = tpu.matmul %217, %218, %cst_77 {dimension_numbers = #tpu.dot_dimension_numbers<[1], [1], [0], [0], [0, 0, 1, 0], [], []>} : vector<64x8xbf16>, vector<64x8xbf16>, vector<64x64xf32> -> vector<64x64xf32>
    %cst_78 = arith.constant dense<0xFF800000> : vector<64xf32>
    %221 = vector.multi_reduction <maximumf>, %220, %cst_78 [1] : vector<64x64xf32> to vector<64xf32>
    %222 = vector.shape_cast %221 : vector<64xf32> to vector<64x1xf32>
    %223 = vector.broadcast %222 : vector<64x1xf32> to vector<64x64xf32>
    %224 = arith.subf %220, %223 : vector<64x64xf32>
    %225 = math.exp %224 : vector<64x64xf32>
    %cst_79 = arith.constant dense<0.000000e+00> : vector<64xf32>
    %226 = vector.multi_reduction <add>, %225, %cst_79 [1] : vector<64x64xf32> to vector<64xf32>
    %227 = vector.shape_cast %226 : vector<64xf32> to vector<64x1xf32>
    %cst_80 = arith.constant 1.000000e+00 : f32
    %228 = vector.broadcast %cst_80 : f32 to vector<64x1xf32>
    %229 = arith.divf %228, %227 : vector<64x1xf32>
    %230 = vector.broadcast %229 : vector<64x1xf32> to vector<64x64xf32>
    %231 = arith.mulf %225, %230 : vector<64x64xf32>
    %cst_81 = arith.constant dense<0.000000e+00> : vector<64xf32>
    %232 = vector.multi_reduction <add>, %231, %cst_81 [0] : vector<64x64xf32> to vector<64xf32>
    %233 = vector.shape_cast %232 : vector<64xf32> to vector<1x64xf32>
    %234 = arith.addf %214, %233 : vector<1x64xf32>
    %235 = arith.truncf %231 : vector<64x64xf32> to vector<64x64xbf16>
    %cst_82 = arith.constant dense<0.000000e+00> : vector<64x8xf32>
    %236 = tpu.matmul %235, %219, %cst_82 {dimension_numbers = #tpu.dot_dimension_numbers<[1], [0], [0], [1], [0, 0, 1, 1], [], []>} : vector<64x64xbf16>, vector<64x8xbf16>, vector<64x8xf32> -> vector<64x8xf32>
    %237 = vector.extract_strided_slice %195 {offsets = [0, 16], sizes = [64, 8], strides = [1, 1]} : vector<64x96xbf16> to vector<64x8xbf16>
    %238 = vector.extract_strided_slice %195 {offsets = [0, 48], sizes = [64, 8], strides = [1, 1]} : vector<64x96xbf16> to vector<64x8xbf16>
    %239 = vector.extract_strided_slice %195 {offsets = [0, 80], sizes = [64, 8], strides = [1, 1]} : vector<64x96xbf16> to vector<64x8xbf16>
    %cst_83 = arith.constant dense<0.000000e+00> : vector<64x64xf32>
    %240 = tpu.matmul %237, %238, %cst_83 {dimension_numbers = #tpu.dot_dimension_numbers<[1], [1], [0], [0], [0, 0, 1, 0], [], []>} : vector<64x8xbf16>, vector<64x8xbf16>, vector<64x64xf32> -> vector<64x64xf32>
    %cst_84 = arith.constant dense<0xFF800000> : vector<64xf32>
    %241 = vector.multi_reduction <maximumf>, %240, %cst_84 [1] : vector<64x64xf32> to vector<64xf32>
    %242 = vector.shape_cast %241 : vector<64xf32> to vector<64x1xf32>
    %243 = vector.broadcast %242 : vector<64x1xf32> to vector<64x64xf32>
    %244 = arith.subf %240, %243 : vector<64x64xf32>
    %245 = math.exp %244 : vector<64x64xf32>
    %cst_85 = arith.constant dense<0.000000e+00> : vector<64xf32>
    %246 = vector.multi_reduction <add>, %245, %cst_85 [1] : vector<64x64xf32> to vector<64xf32>
    %247 = vector.shape_cast %246 : vector<64xf32> to vector<64x1xf32>
    %cst_86 = arith.constant 1.000000e+00 : f32
    %248 = vector.broadcast %cst_86 : f32 to vector<64x1xf32>
    %249 = arith.divf %248, %247 : vector<64x1xf32>
    %250 = vector.broadcast %249 : vector<64x1xf32> to vector<64x64xf32>
    %251 = arith.mulf %245, %250 : vector<64x64xf32>
    %cst_87 = arith.constant dense<0.000000e+00> : vector<64xf32>
    %252 = vector.multi_reduction <add>, %251, %cst_87 [0] : vector<64x64xf32> to vector<64xf32>
    %253 = vector.shape_cast %252 : vector<64xf32> to vector<1x64xf32>
    %254 = arith.addf %234, %253 : vector<1x64xf32>
    %255 = arith.truncf %251 : vector<64x64xf32> to vector<64x64xbf16>
    %cst_88 = arith.constant dense<0.000000e+00> : vector<64x8xf32>
    %256 = tpu.matmul %255, %239, %cst_88 {dimension_numbers = #tpu.dot_dimension_numbers<[1], [0], [0], [1], [0, 0, 1, 1], [], []>} : vector<64x64xbf16>, vector<64x8xbf16>, vector<64x8xf32> -> vector<64x8xf32>
    %257 = vector.extract_strided_slice %195 {offsets = [0, 24], sizes = [64, 8], strides = [1, 1]} : vector<64x96xbf16> to vector<64x8xbf16>
    %258 = vector.extract_strided_slice %195 {offsets = [0, 56], sizes = [64, 8], strides = [1, 1]} : vector<64x96xbf16> to vector<64x8xbf16>
    %259 = vector.extract_strided_slice %195 {offsets = [0, 88], sizes = [64, 8], strides = [1, 1]} : vector<64x96xbf16> to vector<64x8xbf16>
    %cst_89 = arith.constant dense<0.000000e+00> : vector<64x64xf32>
    %260 = tpu.matmul %257, %258, %cst_89 {dimension_numbers = #tpu.dot_dimension_numbers<[1], [1], [0], [0], [0, 0, 1, 0], [], []>} : vector<64x8xbf16>, vector<64x8xbf16>, vector<64x64xf32> -> vector<64x64xf32>
    %cst_90 = arith.constant dense<0xFF800000> : vector<64xf32>
    %261 = vector.multi_reduction <maximumf>, %260, %cst_90 [1] : vector<64x64xf32> to vector<64xf32>
    %262 = vector.shape_cast %261 : vector<64xf32> to vector<64x1xf32>
    %263 = vector.broadcast %262 : vector<64x1xf32> to vector<64x64xf32>
    %264 = arith.subf %260, %263 : vector<64x64xf32>
    %265 = math.exp %264 : vector<64x64xf32>
    %cst_91 = arith.constant dense<0.000000e+00> : vector<64xf32>
    %266 = vector.multi_reduction <add>, %265, %cst_91 [1] : vector<64x64xf32> to vector<64xf32>
    %267 = vector.shape_cast %266 : vector<64xf32> to vector<64x1xf32>
    %cst_92 = arith.constant 1.000000e+00 : f32
    %268 = vector.broadcast %cst_92 : f32 to vector<64x1xf32>
    %269 = arith.divf %268, %267 : vector<64x1xf32>
    %270 = vector.broadcast %269 : vector<64x1xf32> to vector<64x64xf32>
    %271 = arith.mulf %265, %270 : vector<64x64xf32>
    %cst_93 = arith.constant dense<0.000000e+00> : vector<64xf32>
    %272 = vector.multi_reduction <add>, %271, %cst_93 [0] : vector<64x64xf32> to vector<64xf32>
    %273 = vector.shape_cast %272 : vector<64xf32> to vector<1x64xf32>
    %274 = arith.addf %254, %273 : vector<1x64xf32>
    %275 = arith.truncf %271 : vector<64x64xf32> to vector<64x64xbf16>
    %cst_94 = arith.constant dense<0.000000e+00> : vector<64x8xf32>
    %276 = tpu.matmul %275, %259, %cst_94 {dimension_numbers = #tpu.dot_dimension_numbers<[1], [0], [0], [1], [0, 0, 1, 1], [], []>} : vector<64x64xbf16>, vector<64x8xbf16>, vector<64x8xf32> -> vector<64x8xf32>
    %277 = tpu.concatenate %216, %236, %256, %276 in 1 : vector<64x8xf32>, vector<64x8xf32>, vector<64x8xf32>, vector<64x8xf32> -> vector<64x32xf32>
    %278 = vector.extract_strided_slice %194 {offsets = [64, 0], sizes = [64, 96], strides = [1, 1]} : vector<128x96xbf16> to vector<64x96xbf16>
    %cst_95 = arith.constant 0.000000e+00 : f32
    %279 = vector.broadcast %cst_95 : f32 to vector<1x64xf32>
    %280 = vector.extract_strided_slice %278 {offsets = [0, 0], sizes = [64, 8], strides = [1, 1]} : vector<64x96xbf16> to vector<64x8xbf16>
    %281 = vector.extract_strided_slice %278 {offsets = [0, 32], sizes = [64, 8], strides = [1, 1]} : vector<64x96xbf16> to vector<64x8xbf16>
    %282 = vector.extract_strided_slice %278 {offsets = [0, 64], sizes = [64, 8], strides = [1, 1]} : vector<64x96xbf16> to vector<64x8xbf16>
    %cst_96 = arith.constant dense<0.000000e+00> : vector<64x64xf32>
    %283 = tpu.matmul %280, %281, %cst_96 {dimension_numbers = #tpu.dot_dimension_numbers<[1], [1], [0], [0], [0, 0, 1, 0], [], []>} : vector<64x8xbf16>, vector<64x8xbf16>, vector<64x64xf32> -> vector<64x64xf32>
    %cst_97 = arith.constant dense<0xFF800000> : vector<64xf32>
    %284 = vector.multi_reduction <maximumf>, %283, %cst_97 [1] : vector<64x64xf32> to vector<64xf32>
    %285 = vector.shape_cast %284 : vector<64xf32> to vector<64x1xf32>
    %286 = vector.broadcast %285 : vector<64x1xf32> to vector<64x64xf32>
    %287 = arith.subf %283, %286 : vector<64x64xf32>
    %288 = math.exp %287 : vector<64x64xf32>
    %cst_98 = arith.constant dense<0.000000e+00> : vector<64xf32>
    %289 = vector.multi_reduction <add>, %288, %cst_98 [1] : vector<64x64xf32> to vector<64xf32>
    %290 = vector.shape_cast %289 : vector<64xf32> to vector<64x1xf32>
    %cst_99 = arith.constant 1.000000e+00 : f32
    %291 = vector.broadcast %cst_99 : f32 to vector<64x1xf32>
    %292 = arith.divf %291, %290 : vector<64x1xf32>
    %293 = vector.broadcast %292 : vector<64x1xf32> to vector<64x64xf32>
    %294 = arith.mulf %288, %293 : vector<64x64xf32>
    %cst_100 = arith.constant dense<0.000000e+00> : vector<64xf32>
    %295 = vector.multi_reduction <add>, %294, %cst_100 [0] : vector<64x64xf32> to vector<64xf32>
    %296 = vector.shape_cast %295 : vector<64xf32> to vector<1x64xf32>
    %297 = arith.addf %279, %296 : vector<1x64xf32>
    %298 = arith.truncf %294 : vector<64x64xf32> to vector<64x64xbf16>
    %cst_101 = arith.constant dense<0.000000e+00> : vector<64x8xf32>
    %299 = tpu.matmul %298, %282, %cst_101 {dimension_numbers = #tpu.dot_dimension_numbers<[1], [0], [0], [1], [0, 0, 1, 1], [], []>} : vector<64x64xbf16>, vector<64x8xbf16>, vector<64x8xf32> -> vector<64x8xf32>
    %300 = vector.extract_strided_slice %278 {offsets = [0, 8], sizes = [64, 8], strides = [1, 1]} : vector<64x96xbf16> to vector<64x8xbf16>
    %301 = vector.extract_strided_slice %278 {offsets = [0, 40], sizes = [64, 8], strides = [1, 1]} : vector<64x96xbf16> to vector<64x8xbf16>
    %302 = vector.extract_strided_slice %278 {offsets = [0, 72], sizes = [64, 8], strides = [1, 1]} : vector<64x96xbf16> to vector<64x8xbf16>
    %cst_102 = arith.constant dense<0.000000e+00> : vector<64x64xf32>
    %303 = tpu.matmul %300, %301, %cst_102 {dimension_numbers = #tpu.dot_dimension_numbers<[1], [1], [0], [0], [0, 0, 1, 0], [], []>} : vector<64x8xbf16>, vector<64x8xbf16>, vector<64x64xf32> -> vector<64x64xf32>
    %cst_103 = arith.constant dense<0xFF800000> : vector<64xf32>
    %304 = vector.multi_reduction <maximumf>, %303, %cst_103 [1] : vector<64x64xf32> to vector<64xf32>
    %305 = vector.shape_cast %304 : vector<64xf32> to vector<64x1xf32>
    %306 = vector.broadcast %305 : vector<64x1xf32> to vector<64x64xf32>
    %307 = arith.subf %303, %306 : vector<64x64xf32>
    %308 = math.exp %307 : vector<64x64xf32>
    %cst_104 = arith.constant dense<0.000000e+00> : vector<64xf32>
    %309 = vector.multi_reduction <add>, %308, %cst_104 [1] : vector<64x64xf32> to vector<64xf32>
    %310 = vector.shape_cast %309 : vector<64xf32> to vector<64x1xf32>
    %cst_105 = arith.constant 1.000000e+00 : f32
    %311 = vector.broadcast %cst_105 : f32 to vector<64x1xf32>
    %312 = arith.divf %311, %310 : vector<64x1xf32>
    %313 = vector.broadcast %312 : vector<64x1xf32> to vector<64x64xf32>
    %314 = arith.mulf %308, %313 : vector<64x64xf32>
    %cst_106 = arith.constant dense<0.000000e+00> : vector<64xf32>
    %315 = vector.multi_reduction <add>, %314, %cst_106 [0] : vector<64x64xf32> to vector<64xf32>
    %316 = vector.shape_cast %315 : vector<64xf32> to vector<1x64xf32>
    %317 = arith.addf %297, %316 : vector<1x64xf32>
    %318 = arith.truncf %314 : vector<64x64xf32> to vector<64x64xbf16>
    %cst_107 = arith.constant dense<0.000000e+00> : vector<64x8xf32>
    %319 = tpu.matmul %318, %302, %cst_107 {dimension_numbers = #tpu.dot_dimension_numbers<[1], [0], [0], [1], [0, 0, 1, 1], [], []>} : vector<64x64xbf16>, vector<64x8xbf16>, vector<64x8xf32> -> vector<64x8xf32>
    %320 = vector.extract_strided_slice %278 {offsets = [0, 16], sizes = [64, 8], strides = [1, 1]} : vector<64x96xbf16> to vector<64x8xbf16>
    %321 = vector.extract_strided_slice %278 {offsets = [0, 48], sizes = [64, 8], strides = [1, 1]} : vector<64x96xbf16> to vector<64x8xbf16>
    %322 = vector.extract_strided_slice %278 {offsets = [0, 80], sizes = [64, 8], strides = [1, 1]} : vector<64x96xbf16> to vector<64x8xbf16>
    %cst_108 = arith.constant dense<0.000000e+00> : vector<64x64xf32>
    %323 = tpu.matmul %320, %321, %cst_108 {dimension_numbers = #tpu.dot_dimension_numbers<[1], [1], [0], [0], [0, 0, 1, 0], [], []>} : vector<64x8xbf16>, vector<64x8xbf16>, vector<64x64xf32> -> vector<64x64xf32>
    %cst_109 = arith.constant dense<0xFF800000> : vector<64xf32>
    %324 = vector.multi_reduction <maximumf>, %323, %cst_109 [1] : vector<64x64xf32> to vector<64xf32>
    %325 = vector.shape_cast %324 : vector<64xf32> to vector<64x1xf32>
    %326 = vector.broadcast %325 : vector<64x1xf32> to vector<64x64xf32>
    %327 = arith.subf %323, %326 : vector<64x64xf32>
    %328 = math.exp %327 : vector<64x64xf32>
    %cst_110 = arith.constant dense<0.000000e+00> : vector<64xf32>
    %329 = vector.multi_reduction <add>, %328, %cst_110 [1] : vector<64x64xf32> to vector<64xf32>
    %330 = vector.shape_cast %329 : vector<64xf32> to vector<64x1xf32>
    %cst_111 = arith.constant 1.000000e+00 : f32
    %331 = vector.broadcast %cst_111 : f32 to vector<64x1xf32>
    %332 = arith.divf %331, %330 : vector<64x1xf32>
    %333 = vector.broadcast %332 : vector<64x1xf32> to vector<64x64xf32>
    %334 = arith.mulf %328, %333 : vector<64x64xf32>
    %cst_112 = arith.constant dense<0.000000e+00> : vector<64xf32>
    %335 = vector.multi_reduction <add>, %334, %cst_112 [0] : vector<64x64xf32> to vector<64xf32>
    %336 = vector.shape_cast %335 : vector<64xf32> to vector<1x64xf32>
    %337 = arith.addf %317, %336 : vector<1x64xf32>
    %338 = arith.truncf %334 : vector<64x64xf32> to vector<64x64xbf16>
    %cst_113 = arith.constant dense<0.000000e+00> : vector<64x8xf32>
    %339 = tpu.matmul %338, %322, %cst_113 {dimension_numbers = #tpu.dot_dimension_numbers<[1], [0], [0], [1], [0, 0, 1, 1], [], []>} : vector<64x64xbf16>, vector<64x8xbf16>, vector<64x8xf32> -> vector<64x8xf32>
    %340 = vector.extract_strided_slice %278 {offsets = [0, 24], sizes = [64, 8], strides = [1, 1]} : vector<64x96xbf16> to vector<64x8xbf16>
    %341 = vector.extract_strided_slice %278 {offsets = [0, 56], sizes = [64, 8], strides = [1, 1]} : vector<64x96xbf16> to vector<64x8xbf16>
    %342 = vector.extract_strided_slice %278 {offsets = [0, 88], sizes = [64, 8], strides = [1, 1]} : vector<64x96xbf16> to vector<64x8xbf16>
    %cst_114 = arith.constant dense<0.000000e+00> : vector<64x64xf32>
    %343 = tpu.matmul %340, %341, %cst_114 {dimension_numbers = #tpu.dot_dimension_numbers<[1], [1], [0], [0], [0, 0, 1, 0], [], []>} : vector<64x8xbf16>, vector<64x8xbf16>, vector<64x64xf32> -> vector<64x64xf32>
    %cst_115 = arith.constant dense<0xFF800000> : vector<64xf32>
    %344 = vector.multi_reduction <maximumf>, %343, %cst_115 [1] : vector<64x64xf32> to vector<64xf32>
    %345 = vector.shape_cast %344 : vector<64xf32> to vector<64x1xf32>
    %346 = vector.broadcast %345 : vector<64x1xf32> to vector<64x64xf32>
    %347 = arith.subf %343, %346 : vector<64x64xf32>
    %348 = math.exp %347 : vector<64x64xf32>
    %cst_116 = arith.constant dense<0.000000e+00> : vector<64xf32>
    %349 = vector.multi_reduction <add>, %348, %cst_116 [1] : vector<64x64xf32> to vector<64xf32>
    %350 = vector.shape_cast %349 : vector<64xf32> to vector<64x1xf32>
    %cst_117 = arith.constant 1.000000e+00 : f32
    %351 = vector.broadcast %cst_117 : f32 to vector<64x1xf32>
    %352 = arith.divf %351, %350 : vector<64x1xf32>
    %353 = vector.broadcast %352 : vector<64x1xf32> to vector<64x64xf32>
    %354 = arith.mulf %348, %353 : vector<64x64xf32>
    %cst_118 = arith.constant dense<0.000000e+00> : vector<64xf32>
    %355 = vector.multi_reduction <add>, %354, %cst_118 [0] : vector<64x64xf32> to vector<64xf32>
    %356 = vector.shape_cast %355 : vector<64xf32> to vector<1x64xf32>
    %357 = arith.addf %337, %356 : vector<1x64xf32>
    %358 = arith.truncf %354 : vector<64x64xf32> to vector<64x64xbf16>
    %cst_119 = arith.constant dense<0.000000e+00> : vector<64x8xf32>
    %359 = tpu.matmul %358, %342, %cst_119 {dimension_numbers = #tpu.dot_dimension_numbers<[1], [0], [0], [1], [0, 0, 1, 1], [], []>} : vector<64x64xbf16>, vector<64x8xbf16>, vector<64x8xf32> -> vector<64x8xf32>
    %360 = tpu.concatenate %299, %319, %339, %359 in 1 : vector<64x8xf32>, vector<64x8xf32>, vector<64x8xf32>, vector<64x8xf32> -> vector<64x32xf32>
    %361 = tpu.concatenate %274, %357 in 0 : vector<1x64xf32>, vector<1x64xf32> -> vector<2x64xf32>
    %362 = tpu.concatenate %277, %360 in 0 : vector<64x32xf32>, vector<64x32xf32> -> vector<128x32xf32>
    %363 = arith.truncf %362 : vector<128x32xf32> to vector<128x32xbf16>
    %c0_120 = arith.constant 0 : index
    %c0_121 = arith.constant 0 : index
    %364 = vector.load %arg9[%c0_120, %c0_121] : memref<32x32xbf16, #tpu.memory_space<vmem>>, vector<32x32xbf16>
    %cst_122 = arith.constant dense<0.000000e+00> : vector<128x32xf32>
    %365 = tpu.matmul %363, %364, %cst_122 {dimension_numbers = #tpu.dot_dimension_numbers<[1], [0], [0], [1], [0, 0, 1, 1], [], []>} : vector<128x32xbf16>, vector<32x32xbf16>, vector<128x32xf32> -> vector<128x32xf32>
    %366 = arith.addf %187, %365 : vector<128x32xf32>
    %c0_123 = arith.constant 0 : index
    %c0_124 = arith.constant 0 : index
    %367 = vector.load %arg10[%c0_123, %c0_124] : memref<1x32xf32, #tpu.memory_space<vmem>>, vector<1x32xf32>
    %368 = vector.broadcast %367 : vector<1x32xf32> to vector<128x32xf32>
    %369 = arith.addf %366, %368 : vector<128x32xf32>
    %370 = vector.shape_cast %369 : vector<128x32xf32> to vector<2x64x32xf32>
    %cst_125 = arith.constant dense<0.000000e+00> : vector<2x32xf32>
    %371 = vector.multi_reduction <add>, %370, %cst_125 [1] : vector<2x64x32xf32> to vector<2x32xf32>
    %cst_126 = arith.constant 6.400000e+01 : f32
    %372 = vector.broadcast %cst_126 : f32 to vector<2x32xf32>
    %373 = arith.divf %371, %372 : vector<2x32xf32>
    %374 = arith.truncf %373 : vector<2x32xf32> to vector<2x32xbf16>
    %c0_127 = arith.constant 0 : index
    %c0_128 = arith.constant 0 : index
    %375 = vector.load %arg11[%c0_127, %c0_128] : memref<32x16xbf16, #tpu.memory_space<vmem>>, vector<32x16xbf16>
    %cst_129 = arith.constant dense<0.000000e+00> : vector<2x16xf32>
    %376 = tpu.matmul %374, %375, %cst_129 {dimension_numbers = #tpu.dot_dimension_numbers<[1], [0], [0], [1], [0, 0, 1, 1], [], []>} : vector<2x32xbf16>, vector<32x16xbf16>, vector<2x16xf32> -> vector<2x16xf32>
    %c0_130 = arith.constant 0 : index
    %c0_131 = arith.constant 0 : index
    %377 = vector.load %arg12[%c0_130, %c0_131] : memref<1x16xf32, #tpu.memory_space<vmem>>, vector<1x16xf32>
    %378 = vector.broadcast %377 : vector<1x16xf32> to vector<2x16xf32>
    %379 = arith.addf %376, %378 : vector<2x16xf32>
    %380 = arith.addf %179, %361 : vector<2x64xf32>
    %cst_132 = arith.constant 7.812500e-03 : f32
    %381 = vector.broadcast %cst_132 : f32 to vector<2x64xf32>
    %382 = arith.mulf %380, %381 : vector<2x64xf32>
    %cst_133 = arith.constant dense<0.000000e+00> : vector<2xf32>
    %383 = vector.multi_reduction <add>, %382, %cst_133 [1] : vector<2x64xf32> to vector<2xf32>
    %384 = vector.shape_cast %383 : vector<2xf32> to vector<2x1xf32>
    %cst_134 = arith.constant 6.400000e+01 : f32
    %385 = vector.broadcast %cst_134 : f32 to vector<2x1xf32>
    %386 = arith.divf %384, %385 : vector<2x1xf32>
    %cst_135 = arith.constant 2.000000e-01 : f32
    %387 = vector.broadcast %cst_135 : f32 to vector<2x1xf32>
    %388 = arith.mulf %386, %387 : vector<2x1xf32>
    %389 = vector.broadcast %388 : vector<2x1xf32> to vector<2x64xf32>
    %390 = arith.cmpf ogt, %382, %389 : vector<2x64xf32>
    %391 = arith.extui %390 : vector<2x64xi1> to vector<2x64xi32>
    %392 = arith.sitofp %391 : vector<2x64xi32> to vector<2x64xf32>
    %cst_136 = arith.constant 0.000000e+00 : f32
    %393 = vector.broadcast %cst_136 : f32 to vector<2x48xf32>
    %394 = tpu.concatenate %379, %392, %393 in 1 : vector<2x16xf32>, vector<2x64xf32>, vector<2x48xf32> -> vector<2x128xf32>
    %c0_137 = arith.constant 0 : index
    %c0_138 = arith.constant 0 : index
    %395 = vector.load %arg13[%c0_137, %c0_138] : memref<2x128xf32, #tpu.memory_space<vmem>>, vector<2x128xf32>
    tpu.vector_store %arg13[%c0_137, %c0_138], %394 {strides = array<i32>} : memref<2x128xf32, #tpu.memory_space<vmem>>, vector<2x128xf32>,
    return
  }
}

</mosaic_0001>

<bundles_post_ra>
// kernel: first_pass.1
= control target key start
LH: loop header
LB: loop body
LE: loop exit
PB: predicated region body
PF: predicated region fallthrough
CT: control target
= control target key end

     0   :  { %v8716_v0 = vmov 0   ;;  %vm236_vm0 = vcmask 523264   ;;  %vm389_vm1 = vcmask 261120   ;;  %vm531_vm2 = vcmask 64512   ;;  %s8719_s17 = smov 88   ;;  %s8720_s18 = smov 80   ;;  %s11611_s1 = inlined_call_operand.vmem [shape: bf16[192,32], index: 1, kind: input, shape index: {}]   ;;  %s11612_s0 = inlined_call_operand.vmem [shape: bf16[128,192], index: 0, kind: input, shape index: {}]   ;;  %s11613_s3 = inlined_call_operand.vmem [shape: bf16[32,96], index: 3, kind: input, shape index: {}]   ;;  %s11614_s2 = inlined_call_operand.vmem [shape: f32[1,32], index: 2, kind: input, shape index: {}]   ;;  %s11615_s4 = inlined_call_operand.vmem [shape: f32[1,96], index: 4, kind: input, shape index: {}]   ;;  %s11616_s5 = inlined_call_operand.vmem [shape: bf16[32,32], index: 5, kind: input, shape index: {}]   ;;  %s11617_s7 = inlined_call_operand.vmem [shape: bf16[32,96], index: 7, kind: input, shape index: {}]   ;;  %s11618_s6 = inlined_call_operand.vmem [shape: f32[1,32], index: 6, kind: input, shape index: {}]   ;;  %s11619_s8 = inlined_call_operand.vmem [shape: f32[1,96], index: 8, kind: input, shape index: {}]   ;;  %s11620_s9 = inlined_call_operand.vmem [shape: bf16[32,32], index: 9, kind: input, shape index: {}]   ;;  %s11621_s10 = inlined_call_operand.vmem [shape: f32[1,32], index: 10, kind: input, shape index: {}]   ;;  %s11622_s11 = inlined_call_operand.vmem [shape: bf16[32,16], index: 11, kind: input, shape index: {}]   ;;  %s11623_s12 = inlined_call_operand.vmem [shape: f32[1,16], index: 12, kind: input, shape index: {}]   ;;  %s11624_s13 = inlined_call_operand.vmem [shape: f32[2,128], index: 13, kind: output, shape index: {}]  }
   0x1   :  { %261 = vmatprep.subr.bf16.mxu0 %v8716_v0  ;;  %v8158_v1 = vld [vmem:[%s11611_s1] sm:$0xff]   ;;  %v8159_v2 = vld [vmem:[%s11611_s1 + $0x8] sm:$0xff]   ;;  %v8160_v3 = vld [vmem:[%s11611_s1 + $0x10] sm:$0xff]   ;;  %s8721_s19 = smov 120   ;;  %s8722_s20 = smov 72   ;;  %vm1884_vm3 = vcmask 130048  }
   0x2   :  { %262 = vmatpush1.bf16.msra.mxu0 %v8158_v1  ;;  %v8161_v4 = vld [vmem:[%s11611_s1 + $0x18] sm:$0xff]   ;;  %v8172_v5 = vld [vmem:[%s11612_s0 + $0x4] ss:$8 sps:$4 sm:$0xff]   ;;  %v8164_v8 = vld [vmem:[%s11611_s1 + $0x30] sm:$0xff]   ;;  %s8723_s21 = smov 112   ;;  %s8724_s22 = smov 104  }
   0x3   :  { %263 = vmatprep.subr.bf16.mxu0 %v8716_v0  ;;  %v8162_v6 = vld [vmem:[%s11611_s1 + $0x20] sm:$0xff]   ;;  %6745 = vmatprep.mubr.msk.bf16.mxu0 %vm236_vm0, %v8172_v5  ;;  %v8163_v7 = vld [vmem:[%s11611_s1 + $0x28] sm:$0xff]   ;;  %v8165_v9 = vld [vmem:[%s11611_s1 + $0x38] sm:$0xff]   ;;  %s8725_s23 = smov 56   ;;  %s8726_s24 = smov 48   ;;  %vm1893_vm4 = vcmask 195584  }
   0x4   :  { %v8166_v10 = vld [vmem:[%s11611_s1 + $0x40] sm:$0xff]   ;;  %v8167_v11 = vld [vmem:[%s11611_s1 + $0x48] sm:$0xff]   ;;  %v8168_v12 = vld [vmem:[%s11611_s1 + $0x50] sm:$0xff]   ;;  %s8728_s25 = smov 8   ;;  %s8729_s26 = smov 16   ;;  %vm3282_vm5 = vcmask 1040384  }
   0x5   :  { %v8169_v13 = vld [vmem:[%s11611_s1 + $0x58] sm:$0xff]   ;;  %v8170_v14 = vld [vmem:[%s11612_s0] ss:$8 sps:$4 sm:$0xff]   ;;  %v8176_v17 = vld [vmem:[%s11612_s0 + $0x24] ss:$8 sps:$4 sm:$0xff]   ;;  %s8727_s1 = smov 40  }
   0x6   :  { %264 = vmatpush1.bf16.msra.mxu0 %v8159_v2  ;;  %v8173_v15 = vld [vmem:[%s11612_s0 + $0x14] ss:$8 sps:$4 sm:$0xff]   ;;  %v8175_v16 = vld [vmem:[%s11612_s0 + $0x10] ss:$8 sps:$4 sm:$0xff]   ;;  %v8178_v18 = vld [vmem:[%s11612_s0 + $0x20] ss:$8 sps:$4 sm:$0xff]  }
   0x7   :  { %265 = vmatprep.subr.bf16.mxu0 %v8716_v0  ;;  %v8179_v19 = vld [vmem:[%s11612_s0 + $0x34] ss:$8 sps:$4 sm:$0xff]   ;;  %v8181_v20 = vld [vmem:[%s11612_s0 + $0x30] ss:$8 sps:$4 sm:$0xff]   ;;  %v8182_v21 = vld [vmem:[%s11612_s0 + $0x44] ss:$8 sps:$4 sm:$0xff]  }
   0x8   :  { %v8184_v22 = vld [vmem:[%s11612_s0 + $0x40] ss:$8 sps:$4 sm:$0xff]   ;;  %v8185_v23 = vld [vmem:[%s11612_s0 + $0x54] ss:$8 sps:$4 sm:$0xff]   ;;  %v8187_v24 = vld [vmem:[%s11612_s0 + $0x50] ss:$8 sps:$4 sm:$0xff]  }
   0x9   :  { %v8188_v25 = vld [vmem:[%s11612_s0 + $0x64] ss:$8 sps:$4 sm:$0xff]   ;;  %v8190_v26 = vld [vmem:[%s11612_s0 + $0x60] ss:$8 sps:$4 sm:$0xff]   ;;  %v8193_v29 = vld [vmem:[%s11612_s0 + $0x74] ss:$8 sps:$4 sm:$0xff]  }
   0xa   :  { %266 = vmatpush1.bf16.msra.mxu0 %v8160_v3  ;;  %v8191_v27 = vld [vmem:[%s11613_s3] sm:$0xff]   ;;  %v8192_v28 = vld [vmem:[%s11613_s3 + $0x8] sm:$0xff]   ;;  %v8195_v30 = vld [vmem:[%s11612_s0 + $0x70] ss:$8 sps:$4 sm:$0xff]   ;;  %s8717_s3 = smov 96   ;;  %s8730_s27 = smov 24  }
   0xb   :  { %267 = vmatprep.subr.bf16.mxu0 %v8716_v0  ;;  %7229 = vmatprep.subr.bf16.mxu1 %v8191_v27  ;;  %v6716_v31 = vld [vmem:[%s11614_s2] ss:$0 sm:$0xff]  ;;  %vm6695_vm6 = vcmask 517120   ;;  %vm8732_vm8 = vmmov 0   ;;  %vm6635_vm9 = vcmask 1041409   ;;  %vm6709_vm10 = vcmask 654336  }
   0xc   :  { %7230 = vmatpush3.bf16.msra.mxu1 %v8191_v27 }
   0xd   :  { %7231 = vmatprep.subr.bf16.mxu1 %v8192_v28 }
   0xe   :  { %268 = vmatpush1.bf16.msra.mxu0 %v8161_v4 }
   0xf   :  { %269 = vmatprep.subr.bf16.mxu0 %v8716_v0 }
  0x10   :  { %7232 = vmatpush3.bf16.msra.mxu1 %v8192_v28 }
  0x12   :  { %270 = vmatpush1.bf16.msra.mxu0 %v8162_v6 }
  0x13   :  { %271 = vmatprep.subr.bf16.mxu0 %v8716_v0 }
  0x16   :  { %272 = vmatpush1.bf16.msra.mxu0 %v8163_v7 }
  0x17   :  { %273 = vmatprep.subr.bf16.mxu0 %v8716_v0 }
  0x1a   :  { %274 = vmatpush1.bf16.msra.mxu0 %v8164_v8 }
  0x1b   :  { %275 = vmatprep.subr.bf16.mxu0 %v8716_v0 }
  0x1e   :  { %276 = vmatpush1.bf16.msra.mxu0 %v8165_v9 }
  0x1f   :  { %277 = vmatprep.subr.bf16.mxu0 %v8716_v0 }
  0x22   :  { %278 = vmatpush1.bf16.msra.mxu0 %v8166_v10 }
  0x23   :  { %279 = vmatprep.subr.bf16.mxu0 %v8716_v0 }
  0x26   :  { %280 = vmatpush1.bf16.msra.mxu0 %v8167_v11 }
  0x27   :  { %281 = vmatprep.subr.bf16.mxu0 %v8716_v0 }
  0x2a   :  { %282 = vmatpush1.bf16.msra.mxu0 %v8168_v12 }
  0x2b   :  { %283 = vmatprep.subr.bf16.mxu0 %v8716_v0 }
  0x2e   :  { %284 = vmatpush1.bf16.msra.mxu0 %v8169_v13 }
  0x31   :  { %294 = vmatmul.mubr.bf16.vlgmr.msra.gmra.mrb[0].mxu0 %v8170_v14 }
  0x32   :  { %6746 = vmatprep.mubr.msk.bf16.mxu0 %vm236_vm0, %v8173_v15 }
  0x39   :  { %302 = vmatmul.mubr.bf16.gmra.mrb[4].mxu0 %v8175_v16 }
  0x3a   :  { %6747 = vmatprep.mubr.msk.bf16.mxu0 %vm236_vm0, %v8176_v17 }
  0x41   :  { %310 = vmatmul.mubr.bf16.gmra.mrb[8].mxu0 %v8178_v18 }
  0x42   :  { %6748 = vmatprep.mubr.msk.bf16.mxu0 %vm236_vm0, %v8179_v19 }
  0x49   :  { %318 = vmatmul.mubr.bf16.gmra.mrb[12].mxu0 %v8181_v20 }
  0x4a   :  { %6749 = vmatprep.mubr.msk.bf16.mxu0 %vm236_vm0, %v8182_v21 }
  0x51   :  { %326 = vmatmul.mubr.bf16.gmra.mrb[16].mxu0 %v8184_v22 }
  0x52   :  { %6750 = vmatprep.mubr.msk.bf16.mxu0 %vm236_vm0, %v8185_v23 }
  0x59   :  { %334 = vmatmul.mubr.bf16.gmra.mrb[20].mxu0 %v8187_v24 }
  0x5a   :  { %6751 = vmatprep.mubr.msk.bf16.mxu0 %vm236_vm0, %v8188_v25  ;;  %v6753_v25 = vld [vmem:[%s11615_s4] ss:$0 sm:$0xff]  ;;  %s8718_s4 = smov 64  }
  0x61   :  { %342 = vmatmul.mubr.bf16.gmra.mrb[24].mxu0 %v8190_v26 }
  0x62   :  { %6752 = vmatprep.mubr.msk.bf16.mxu0 %vm236_vm0, %v8193_v29 }
  0x69   :  { %350 = vmatmul.mubr.bf16.gmra.mrb[28].mxu0 %v8195_v30 }
 0x104   :  { %v295_v32 = vpop.f32.mrb[0].mxu0 }
 0x105   :  { %v297_v33 = vpop.f32.mrb[1].mxu0  ;;  %v8904_v35 = vadd.f32 %v6716_v31, %v295_v32 }
 0x106   :  { %v298_v34 = vpop.f32.mrb[2].mxu0 }
 0x107   :  { %11666 = vst [vmem:[#allocation2_spill] sm:$0xff] %v8904_v35  ;;  %v8906_v36 = vadd.f32 %v6716_v31, %v298_v34  ;;  %v300_v37 = vpop.f32.mrb[3].mxu0 }
 0x109   :  { %11667 = vst [vmem:[#allocation3_spill] sm:$0xff] %v8906_v36  ;;  %v358_v38 = vpack.c.bf16 %v8906_v36, %v8904_v35 }
 0x10b   :  { %7233 = vmatprep.mubr.msk.bf16.mxu1 %vm389_vm1, %v358_v38 }
 0x10c   :  { %v303_v39 = vpop.f32.mrb[4].mxu0 }
 0x10d   :  { %v305_v40 = vpop.f32.mrb[5].mxu0  ;;  %v8911_v42 = vadd.f32 %v6716_v31, %v303_v39 }
 0x10e   :  { %v306_v41 = vpop.f32.mrb[6].mxu0 }
 0x10f   :  { %11668 = vst [vmem:[#allocation4_spill] sm:$0xff] %v8911_v42  ;;  %v8913_v43 = vadd.f32 %v6716_v31, %v306_v41  ;;  %v308_v44 = vpop.f32.mrb[7].mxu0 }
 0x111   :  { %11669 = vst [vmem:[#allocation5_spill] sm:$0xff] %v8913_v43  ;;  %v359_v45 = vpack.c.bf16 %v8913_v43, %v8911_v42 }
 0x113   :  { %7234 = vmatmul.mubr.msk.bf16.vlgmr.msra.gmra.mrb[0].mxu1 %vm389_vm1, %v359_v45 }
 0x114   :  { %v311_v46 = vpop.f32.mrb[8].mxu0 }
 0x115   :  { %v313_v47 = vpop.f32.mrb[9].mxu0  ;;  %v8918_v49 = vadd.f32 %v6716_v31, %v311_v46 }
 0x116   :  { %v314_v48 = vpop.f32.mrb[10].mxu0 }
 0x117   :  { %11670 = vst [vmem:[#allocation6_spill] sm:$0xff] %v8918_v49  ;;  %v8920_v50 = vadd.f32 %v6716_v31, %v314_v48  ;;  %v316_v51 = vpop.f32.mrb[11].mxu0 }
 0x119   :  { %11671 = vst [vmem:[#allocation7_spill] sm:$0xff] %v8920_v50  ;;  %v360_v52 = vpack.c.bf16 %v8920_v50, %v8918_v49 }
 0x11b   :  { %7237 = vmatprep.mubr.msk.bf16.mxu1 %vm389_vm1, %v360_v52 }
 0x11c   :  { %v319_v53 = vpop.f32.mrb[12].mxu0 }
 0x11d   :  { %v321_v54 = vpop.f32.mrb[13].mxu0  ;;  %v8925_v56 = vadd.f32 %v6716_v31, %v319_v53 }
 0x11e   :  { %v322_v55 = vpop.f32.mrb[14].mxu0 }
 0x11f   :  { %11672 = vst [vmem:[#allocation8_spill] sm:$0xff] %v8925_v56  ;;  %v8927_v57 = vadd.f32 %v6716_v31, %v322_v55  ;;  %v324_v58 = vpop.f32.mrb[15].mxu0 }
 0x121   :  { %11673 = vst [vmem:[#allocation9_spill] sm:$0xff] %v8927_v57  ;;  %v361_v59 = vpack.c.bf16 %v8927_v57, %v8925_v56 }
 0x123   :  { %7238 = vmatmul.mubr.msk.bf16.gmra.mrb[4].mxu1 %vm389_vm1, %v361_v59 }
 0x124   :  { %v327_v60 = vpop.f32.mrb[16].mxu0 }
 0x125   :  { %v8932_v61 = vadd.f32 %v6716_v31, %v327_v60  ;;  %v329_v62 = vpop.f32.mrb[17].mxu0 }
 0x126   :  { %v330_v63 = vpop.f32.mrb[18].mxu0 }
 0x127   :  { %11674 = vst [vmem:[#allocation10_spill] sm:$0xff] %v8932_v61  ;;  %v8934_v0 = vadd.f32 %v6716_v31, %v330_v63  ;;  %v332_v1 = vpop.f32.mrb[19].mxu0 }
 0x129   :  { %11675 = vst [vmem:[#allocation11_spill] sm:$0xff] %v8934_v0  ;;  %v362_v2 = vpack.c.bf16 %v8934_v0, %v8932_v61 }
 0x12b   :  { %7241 = vmatprep.mubr.msk.bf16.mxu1 %vm389_vm1, %v362_v2 }
 0x12c   :  { %v335_v3 = vpop.f32.mrb[20].mxu0 }
 0x12d   :  { %v8939_v4 = vadd.f32 %v6716_v31, %v335_v3  ;;  %v337_v5 = vpop.f32.mrb[21].mxu0 }
 0x12e   :  { %v338_v6 = vpop.f32.mrb[22].mxu0 }
 0x12f   :  { %11676 = vst [vmem:[#allocation12_spill] sm:$0xff] %v8939_v4  ;;  %v8941_v7 = vadd.f32 %v6716_v31, %v338_v6  ;;  %v340_v8 = vpop.f32.mrb[23].mxu0 }
 0x131   :  { %11677 = vst [vmem:[#allocation13_spill] sm:$0xff] %v8941_v7  ;;  %v363_v9 = vpack.c.bf16 %v8941_v7, %v8939_v4 }
 0x133   :  { %7242 = vmatmul.mubr.msk.bf16.gmra.mrb[8].mxu1 %vm389_vm1, %v363_v9 }
 0x134   :  { %v343_v10 = vpop.f32.mrb[24].mxu0 }
 0x135   :  { %v8946_v11 = vadd.f32 %v6716_v31, %v343_v10  ;;  %v345_v12 = vpop.f32.mrb[25].mxu0 }
 0x136   :  { %v346_v13 = vpop.f32.mrb[26].mxu0 }
 0x137   :  { %11678 = vst [vmem:[#allocation14_spill] sm:$0xff] %v8946_v11  ;;  %v8948_v14 = vadd.f32 %v6716_v31, %v346_v13  ;;  %v348_v15 = vpop.f32.mrb[27].mxu0 }
 0x139   :  { %11679 = vst [vmem:[#allocation15_spill] sm:$0xff] %v8948_v14  ;;  %v364_v16 = vpack.c.bf16 %v8948_v14, %v8946_v11 }
 0x13b   :  { %7245 = vmatprep.mubr.msk.bf16.mxu1 %vm389_vm1, %v364_v16 }
 0x13c   :  { %v351_v17 = vpop.f32.mrb[28].mxu0 }
 0x13d   :  { %v8953_v18 = vadd.f32 %v6716_v31, %v351_v17  ;;  %v353_v19 = vpop.f32.mrb[29].mxu0 }
 0x13e   :  { %v354_v20 = vpop.f32.mrb[30].mxu0 }
 0x13f   :  { %11680 = vst [vmem:[#allocation16_spill] sm:$0xff] %v8953_v18  ;;  %v8955_v21 = vadd.f32 %v6716_v31, %v354_v20  ;;  %v356_v22 = vpop.f32.mrb[31].mxu0 }
 0x141   :  { %11681 = vst [vmem:[#allocation17_spill] sm:$0xff] %v8955_v21  ;;  %v365_v23 = vpack.c.bf16 %v8955_v21, %v8953_v18 }
 0x143   :  { %7246 = vmatmul.mubr.msk.bf16.gmra.mrb[12].mxu1 %vm389_vm1, %v365_v23 }
 0x1e6   :  { %v7235_v24 = vpop.f32.mrb[0].mxu1 }
 0x1e7   :  { %v448_v26 = vpop.f32.mrb[1].mxu1  ;;  %v457_v28 = vadd.f32 %v7235_v24, %v6753_v25 }
 0x1e8   :  { %v7236_v27 = vpop.f32.mrb[2].mxu1  ;;  %v449_v32 = vadd.f32 %v6753_v25, %v448_v26 }
 0x1e9   :  { %v460_v29 = vadd.f32 %v7236_v27, %v6753_v25  ;;  %v451_v30 = vpop.f32.mrb[3].mxu1 }
 0x1ea   :  { %v452_v33 = vadd.f32 %v6753_v25, %v451_v30 }
 0x1eb   :  { %v8963_v31 = vpack.c.bf16 %v460_v29, %v457_v28 }
 0x1ec   :  { %v8965_v34 = vpack.c.bf16 %v452_v33, %v449_v32 }
 0x1ee   :  { %523 = vrot.lane.b32.xlu0 %v8965_v34, %s8717_s3  ;;  %7257 = vmatprep.mubr.msk.bf16.mxu1 %vm531_vm2, %v8965_v34 }
 0x1f2   :  { %525 = vrot.lane.b32.xlu0 %v8963_v31, %s8717_s3 }
 0x1f6   :  { %v7239_v37 = vpop.f32.mrb[4].mxu1  ;;  %745 = vrot.lane.b32.xlu0 %v8963_v31, %s8718_s4 }
 0x1f7   :  { %v464_v38 = vpop.f32.mrb[5].mxu1  ;;  %v473_v40 = vadd.f32 %v7239_v37, %v6753_v25 }
 0x1f8   :  { %v7240_v39 = vpop.f32.mrb[6].mxu1  ;;  %v465_v45 = vadd.f32 %v6753_v25, %v464_v38 }
 0x1f9   :  { %v476_v41 = vadd.f32 %v7240_v39, %v6753_v25  ;;  %v467_v44 = vpop.f32.mrb[7].mxu1 }
 0x1fa   :  { %v468_v46 = vadd.f32 %v6753_v25, %v467_v44 }
 0x1fb   :  { %v8975_v47 = vpack.c.bf16 %v476_v41, %v473_v40 }
 0x1fc   :  { %v8977_v48 = vpack.c.bf16 %v468_v46, %v465_v45 }
 0x1fe   :  { %527 = vrot.lane.b32.xlu1 %v8977_v48, %s8717_s3 }
 0x202   :  { %529 = vrot.lane.b32.xlu1 %v8975_v47, %s8717_s3 }
 0x206   :  { %743 = vrot.lane.b32.xlu1 %v8965_v34, %s8718_s4  ;;  %v7243_v51 = vpop.f32.mrb[8].mxu1 }
 0x207   :  { %v489_v52 = vadd.f32 %v7243_v51, %v6753_v25  ;;  %v480_v53 = vpop.f32.mrb[9].mxu1 }
 0x208   :  { %v481_v54 = vadd.f32 %v6753_v25, %v480_v53  ;;  %v7244_v55 = vpop.f32.mrb[10].mxu1 }
 0x209   :  { %v492_v58 = vadd.f32 %v7244_v55, %v6753_v25  ;;  %v483_v59 = vpop.f32.mrb[11].mxu1 }
 0x20a   :  { %749 = vrot.lane.b32.xlu1 %v8975_v47, %s8718_s4  ;;  %v484_v60 = vadd.f32 %v6753_v25, %v483_v59 }
 0x20b   :  { %v8991_v62 = vpack.c.bf16 %v492_v58, %v489_v52 }
 0x20c   :  { %v8993_v63 = vpack.c.bf16 %v484_v60, %v481_v54 }
 0x20e   :  { %840 = vrot.lane.b32.xlu1 %v8965_v34, %s8719_s17 }
 0x212   :  { %747 = vrot.lane.b32.xlu1 %v8977_v48, %s8718_s4 }
 0x216   :  { %v7247_v1 = vpop.f32.mrb[12].mxu1 }
 0x217   :  { %v505_v2 = vadd.f32 %v7247_v1, %v6753_v25  ;;  %v496_v3 = vpop.f32.mrb[13].mxu1 }
 0x218   :  { %v497_v5 = vadd.f32 %v6753_v25, %v496_v3  ;;  %v7248_v6 = vpop.f32.mrb[14].mxu1 }
 0x219   :  { %v508_v8 = vadd.f32 %v7248_v6, %v6753_v25  ;;  %v499_v9 = vpop.f32.mrb[15].mxu1 }
 0x21a   :  { %v500_v10 = vadd.f32 %v6753_v25, %v499_v9 }
 0x21b   :  { %v8995_v12 = vpack.c.bf16 %v508_v8, %v505_v2 }
 0x21c   :  { %v8997_v13 = vpack.c.bf16 %v500_v10, %v497_v5 }
 0x260   :  { %v524_v15 = vpop.permute.xlu0 %523 }
 0x261   :  { %7837 = vmatprep.subr.msk.bf16.mxu1 %vm531_vm2, %v524_v15  ;;  %v545_v16 = vsel %vm531_vm2, %v524_v15, 0 }
 0x262   :  { %7250 = vmatpush3.bf16.xpose.msra.mxu1 %v545_v16 }
 0x264   :  { %v526_v17 = vpop.permute.xlu0 %525 }
 0x265   :  { %7838 = vmatprep.subr.msk.bf16.mxu1 %vm531_vm2, %v526_v17  ;;  %v548_v19 = vsel %vm531_vm2, %v526_v17, 0 }
 0x268   :  { %v746_v28 = vpop.permute.xlu0 %745 }
 0x26a   :  { %7252 = vmatpush3.bf16.xpose.msra.mxu1 %v548_v19 }
 0x270   :  { %v528_v20 = vpop.permute.xlu1 %527 }
 0x271   :  { %7839 = vmatprep.subr.msk.bf16.mxu1 %vm531_vm2, %v528_v20  ;;  %v551_v22 = vsel %vm531_vm2, %v528_v20, 0 }
 0x272   :  { %7254 = vmatpush3.bf16.xpose.msra.mxu1 %v551_v22 }
 0x274   :  { %v530_v23 = vpop.permute.xlu1 %529 }
 0x275   :  { %7840 = vmatprep.subr.msk.bf16.mxu1 %vm531_vm2, %v530_v23  ;;  %v554_v25 = vsel %vm531_vm2, %v530_v23, 0 }
 0x278   :  { %v744_v24 = vpop.permute.xlu1 %743 }
 0x27a   :  { %7256 = vmatpush3.bf16.xpose.msra.mxu1 %v554_v25 }
 0x27b   :  { %7265 = vmatprep.subr.bf16.mxu1 %v744_v24 }
 0x27c   :  { %v750_v26 = vpop.permute.xlu1 %749 }
 0x280   :  { %v9007_v27 = vpop.permute.xlu1 %840 }
 0x281   :  { %7258 = vmatmul.mubr.msk.bf16.vlgmr.msra.gmra.mrb[16].mxu1 %vm531_vm2, %v8963_v31 }
 0x282   :  { %7261 = vmatprep.mubr.msk.bf16.mxu1 %vm531_vm2, %v8977_v48  ;;  %7266 = vmatpush3.bf16.msra.mxu1 %v744_v24 }
 0x283   :  { %7267 = vmatprep.subr.bf16.mxu1 %v746_v28 }
 0x284   :  { %v748_v29 = vpop.permute.xlu1 %747 }
 0x286   :  { %7268 = vmatpush3.bf16.msra.mxu1 %v746_v28 }
 0x287   :  { %7269 = vmatprep.subr.bf16.mxu1 %v748_v29 }
 0x289   :  { %7262 = vmatmul.mubr.msk.bf16.gmra.mrb[20].mxu1 %vm531_vm2, %v8975_v47 }
 0x28a   :  { %7270 = vmatpush3.bf16.msra.mxu1 %v748_v29 }
 0x28b   :  { %7271 = vmatprep.subr.bf16.mxu1 %v750_v26 }
 0x28e   :  { %7272 = vmatpush3.bf16.msra.mxu1 %v750_v26 }
 0x28f   :  { %7841 = vmatprep.subr.msk.bf16.mxu1 %vm531_vm2, %v9007_v27 }
 0x354   :  { %v7259_v30 = vpop.f32.mrb[16].mxu1 }
 0x355   :  { %v590_v32 = vpop.f32.mrb[17].mxu1  ;;  %v627_v33 = vsel %vm236_vm0, %v7259_v30, -inf }
 0x356   :  { %628 = vmax.xlane.f32.xlu0 %v627_v33  ;;  %v7260_v37 = vpop.f32.mrb[18].mxu1  ;;  %v621_v40 = vsel %vm236_vm0, %v590_v32, -inf }
 0x357   :  { %v593_v38 = vpop.f32.mrb[19].mxu1  ;;  %v630_v45 = vsel %vm236_vm0, %v7260_v37, -inf }
 0x358   :  { %v624_v39 = vsel %vm236_vm0, %v593_v38, -inf }
 0x359   :  { %625 = vmax.xlane.f32.xlu1 %v624_v39 }
 0x35a   :  { %622 = vmax.xlane.f32.xlu0 %v621_v40 }
 0x35c   :  { %v9020_v41 = vpop.f32.mrb[20].mxu1 }
 0x35d   :  { %v9022_v44 = vpop.f32.mrb[21].mxu1  ;;  %v639_v46 = vsel %vm236_vm0, %v9020_v41, -inf }
 0x35e   :  { %631 = vmax.xlane.f32.xlu0 %v630_v45  ;;  %640 = vmax.xlane.f32.xlu1 %v639_v46  ;;  %v9027_v51 = vpop.f32.mrb[22].mxu1  ;;  %v633_v53 = vsel %vm236_vm0, %v9022_v44, -inf }
 0x35f   :  { %v609_v52 = vpop.f32.mrb[23].mxu1  ;;  %v642_v54 = vsel %vm236_vm0, %v9027_v51, -inf }
 0x360   :  { %v636_v55 = vsel %vm236_vm0, %v609_v52, -inf }
 0x362   :  { %634 = vmax.xlane.f32.xlu1 %v633_v53  ;;  %643 = vmax.xlane.f32.xlu0 %v642_v54 }
 0x366   :  { %637 = vmax.xlane.f32.xlu0 %v636_v55 }
 0x373   :  { %842 = vrot.lane.b32.xlu1 %v8963_v31, %s8719_s17 }
 0x377   :  { %1158 = vrot.lane.b32.xlu1 %v8963_v31, %s8720_s18 }
 0x37c   :  { %1156 = vrot.lane.b32.xlu0 %v8965_v34, %s8720_s18 }
 0x3e3   :  { %v629_v58 = vpop.xlane.xlu0 %628 }
 0x3e4   :  { %v647_v59 = vsub.f32 %v7259_v30, %v629_v58 }
 0x3e6   :  { %v657_v60 = vmul.f32 1.442695, %v647_v59  ;;  %v626_v1 = vpop.xlane.xlu1 %625 }
 0x3e7   :  { %v623_v2 = vpop.xlane.xlu0 %622  ;;  %v646_v5 = vsub.f32 %v593_v38, %v626_v1 }
 0x3e8   :  { %8204 = vpow2.f32 %v657_v60  ;;  %v645_v3 = vsub.f32 %v590_v32, %v623_v2 }
 0x3e9   :  { %v655_v15 = vmul.f32 1.442695, %v646_v5 }
 0x3ea   :  { %v653_v6 = vmul.f32 1.442695, %v645_v3 }
 0x3eb   :  { %v632_v8 = vpop.xlane.xlu0 %631  ;;  %v641_v9 = vpop.xlane.xlu1 %640 }
 0x3ec   :  { %8206 = vpow2.f32 %v653_v6  ;;  %v648_v10 = vsub.f32 %v7260_v37, %v632_v8  ;;  %v651_v46 = vsub.f32 %v9020_v41, %v641_v9 }
 0x3ee   :  { %v659_v16 = vmul.f32 1.442695, %v648_v10  ;;  %v665_v53 = vmul.f32 1.442695, %v651_v46 }
 0x3ef   :  { %v635_v17 = vpop.xlane.xlu1 %634  ;;  %v644_v19 = vpop.xlane.xlu0 %643 }
 0x3f0   :  { %8208 = vpow2.f32 %v659_v16  ;;  %v649_v54 = vsub.f32 %v9022_v44, %v635_v17  ;;  %v652_v58 = vsub.f32 %v9027_v51, %v644_v19 }
 0x3f1   :  { %8210 = vpow2.f32 %v655_v15 }
 0x3f2   :  { %v9040_v20 = vpop.eup %8204  ;;  %v661_v55 = vmul.f32 1.442695, %v649_v54  ;;  %v667_v60 = vmul.f32 1.442695, %v652_v58 }
 0x3f3   :  { %v9042_v22 = vpop.permute.xlu1 %842  ;;  %v638_v23 = vpop.xlane.xlu0 %637  ;;  %v675_v24 = vsel %vm236_vm0, %v9040_v20, 0.0 }
 0x3f4   :  { %676 = vadd.xlane.f32.xlu1 %v675_v24  ;;  %v650_v40 = vsub.f32 %v609_v52, %v638_v23 }
 0x3f6   :  { %v9046_v25 = vpop.eup %8206  ;;  %v663_v45 = vmul.f32 1.442695, %v650_v40 }
 0x3f7   :  { %v1157_v26 = vpop.permute.xlu0 %1156  ;;  %v669_v28 = vsel %vm236_vm0, %v9046_v25, 0.0  ;;  %v1159_v30 = vpop.permute.xlu1 %1158 }
 0x3f8   :  { %670 = vadd.xlane.f32.xlu1 %v669_v28  ;;  %7845 = vmatprep.subr.msk.bf16.mxu0 %vm531_vm2, %v1157_v26  ;;  %v1177_v29 = vsel %vm531_vm2, %v1157_v26, 0  ;;  %v1180_v39 = vsel %vm531_vm2, %v1159_v30, 0  ;;  %8212 = vpow2.f32 %v663_v45 }
 0x3f9   :  { %7314 = vmatpush3.bf16.xpose.msra.mxu0 %v1177_v29  ;;  %8214 = vpow2.f32 %v665_v53 }
 0x3fa   :  { %v9052_v32 = vpop.eup %8208  ;;  %7846 = vmatprep.subr.msk.bf16.mxu0 %vm531_vm2, %v1159_v30  ;;  %8216 = vpow2.f32 %v661_v55 }
 0x3fb   :  { %v678_v33 = vsel %vm236_vm0, %v9052_v32, 0.0  ;;  %v9057_v37 = vpop.eup %8210  ;;  %8218 = vpow2.f32 %v667_v60 }
 0x3fc   :  { %679 = vadd.xlane.f32.xlu0 %v678_v33  ;;  %v672_v38 = vsel %vm236_vm0, %v9057_v37, 0.0 }
 0x400   :  { %673 = vadd.xlane.f32.xlu0 %v672_v38 }
 0x401   :  { %7316 = vmatpush3.bf16.xpose.msra.mxu0 %v1180_v39 }
 0x402   :  { %v9069_v59 = vpop.eup %8212 }
 0x403   :  { %v684_v1 = vsel %vm236_vm0, %v9069_v59, 0.0  ;;  %v9073_v52 = vpop.eup %8214 }
 0x404   :  { %v687_v41 = vsel %vm236_vm0, %v9073_v52, 0.0  ;;  %v9077_v2 = vpop.eup %8216 }
 0x405   :  { %v681_v44 = vsel %vm236_vm0, %v9077_v2, 0.0  ;;  %v9081_v51 = vpop.eup %8218 }
 0x406   :  { %v690_v3 = vsel %vm236_vm0, %v9081_v51, 0.0 }
 0x409   :  { %1160 = vrot.lane.b32.xlu1 %v8977_v48, %s8720_s18 }
 0x416   :  { %844 = vrot.lane.b32.xlu0 %v8977_v48, %s8719_s17 }
 0x42d   :  { %685 = vadd.xlane.f32.xlu1 %v684_v1 }
 0x435   :  { %688 = vadd.xlane.f32.xlu0 %v687_v41 }
 0x439   :  { %682 = vadd.xlane.f32.xlu0 %v681_v44 }
 0x43d   :  { %691 = vadd.xlane.f32.xlu0 %v690_v3 }
 0x43e   :  { %1162 = vrot.lane.b32.xlu1 %v8975_v47, %s8720_s18 }
 0x442   :  { %834 = vrot.lane.b32.xlu1 %v8963_v31, %s8721_s19 }
 0x446   :  { %1472 = vrot.lane.b32.xlu1 %v8965_v34, %s8722_s20 }
 0x44a   :  { %836 = vrot.lane.b32.xlu1 %v8977_v48, %s8721_s19 }
 0x44e   :  { %1474 = vrot.lane.b32.xlu1 %v8963_v31, %s8722_s20 }
 0x452   :  { %1152 = vrot.lane.b32.xlu1 %v8977_v48, %s8723_s21 }
 0x453   :  { %846 = vrot.lane.b32.xlu0 %v8975_v47, %s8719_s17 }
 0x456   :  { %1478 = vrot.lane.b32.xlu1 %v8975_v47, %s8722_s20 }
 0x457   :  { %832 = vrot.lane.b32.xlu0 %v8965_v34, %s8721_s19 }
 0x45a   :  { %1466 = vrot.lane.b32.xlu1 %v8963_v31, %s8724_s22 }
 0x45b   :  { %1148 = vrot.lane.b32.xlu0 %v8965_v34, %s8723_s21 }
 0x45e   :  { %1470 = vrot.lane.b32.xlu1 %v8975_v47, %s8724_s22 }
 0x45f   :  { %1150 = vrot.lane.b32.xlu0 %v8963_v31, %s8723_s21 }
 0x463   :  { %838 = vrot.lane.b32.xlu0 %v8975_v47, %s8721_s19 }
 0x467   :  { %1476 = vrot.lane.b32.xlu0 %v8977_v48, %s8722_s20 }
 0x46b   :  { %1154 = vrot.lane.b32.xlu0 %v8975_v47, %s8723_s21 }
 0x46f   :  { %1464 = vrot.lane.b32.xlu0 %v8965_v34, %s8724_s22 }
 0x473   :  { %1468 = vrot.lane.b32.xlu0 %v8977_v48, %s8724_s22 }
 0x481   :  { %v677_v5 = vpop.xlane.xlu1 %676 }
 0x485   :  { %v671_v6 = vpop.xlane.xlu1 %670 }
 0x486   :  { %8220 = vrcp.f32 %v671_v6 }
 0x489   :  { %v1161_v8 = vpop.permute.xlu1 %1160  ;;  %v680_v9 = vpop.xlane.xlu0 %679 }
 0x48a   :  { %7847 = vmatprep.subr.msk.bf16.mxu0 %vm531_vm2, %v1161_v8  ;;  %v1183_v10 = vsel %vm531_vm2, %v1161_v8, 0  ;;  %8222 = vrcp.f32 %v680_v9 }
 0x48b   :  { %7318 = vmatpush3.bf16.xpose.msra.mxu0 %v1183_v10  ;;  %8224 = vrcp.f32 %v677_v5 }
 0x48d   :  { %v674_v15 = vpop.xlane.xlu0 %673 }
 0x48e   :  { %8226 = vrcp.f32 %v674_v15 }
 0x490   :  { %v8221_v16 = vpop.eup %8220 }
 0x491   :  { %v709_v23 = vmul.f32 %v8221_v16, %v9046_v25  ;;  %v861_v25 = vsel %vm531_vm2, %v9007_v27, 0  ;;  %v845_v53 = vpop.permute.xlu0 %844 }
 0x492   :  { %v867_v54 = vsel %vm531_vm2, %v845_v53, 0 }
 0x493   :  { %v717_v30 = vsel %vm236_vm0, %v709_v23, 0.0 }
 0x494   :  { %v8223_v17 = vpop.eup %8222 }
 0x495   :  { %v8225_v19 = vpop.eup %8224  ;;  %v712_v26 = vmul.f32 %v8223_v17, %v9052_v32 }
 0x496   :  { %v711_v28 = vmul.f32 %v8225_v19, %v9040_v20 }
 0x497   :  { %v722_v20 = vsel %vm236_vm0, %v712_v26, 0.0 }
 0x498   :  { %v8227_v24 = vpop.eup %8226  ;;  %v740_v39 = vpack.c.bf16 %v712_v26, %v711_v28  ;;  %v720_v45 = vsel %vm236_vm0, %v711_v28, 0.0 }
 0x499   :  { %v710_v29 = vmul.f32 %v8227_v24, %v9057_v37  ;;  %v864_v37 = vsel %vm531_vm2, %v9042_v22, 0 }
 0x49b   :  { %v718_v33 = vsel %vm236_vm0, %v710_v29, 0.0  ;;  %v739_v38 = vpack.c.bf16 %v710_v29, %v709_v23 }
 0x49c   :  { %v719_v40 = vadd.f32 %v718_v33, %v717_v30 }
 0x49d   :  { %7273 = vmatprep.mubr.msk.bf16.mxu1 %vm236_vm0, %v739_v38 }
 0x49e   :  { %v721_v46 = vadd.f32 %v720_v45, %v719_v40  ;;  %7274 = vmatmul.mubr.msk.bf16.vlgmr.msra.gmra.mrb[24].mxu1 %vm236_vm0, %v740_v39 }
 0x49f   :  { %7282 = vmatpush3.bf16.xpose.msra.mxu1 %v861_v25 }
 0x4a0   :  { %7842 = vmatprep.subr.msk.bf16.mxu1 %vm531_vm2, %v9042_v22  ;;  %v723_v32 = vadd.f32 %v722_v20, %v721_v46 }
 0x4a7   :  { %7284 = vmatpush3.bf16.xpose.msra.mxu1 %v864_v37 }
 0x4a8   :  { %7843 = vmatprep.subr.msk.bf16.mxu1 %vm531_vm2, %v845_v53 }
 0x4af   :  { %7286 = vmatpush3.bf16.xpose.msra.mxu1 %v867_v54 }
 0x4ba   :  { %v686_v55 = vpop.xlane.xlu1 %685 }
 0x4bb   :  { %8228 = vrcp.f32 %v686_v55 }
 0x4be   :  { %v1163_v58 = vpop.permute.xlu1 %1162 }
 0x4bf   :  { %7848 = vmatprep.subr.msk.bf16.mxu0 %vm531_vm2, %v1163_v58  ;;  %v1186_v27 = vsel %vm531_vm2, %v1163_v58, 0 }
 0x4c0   :  { %7320 = vmatpush3.bf16.xpose.msra.mxu0 %v1186_v27 }
 0x4c2   :  { %v835_v60 = vpop.permute.xlu1 %834  ;;  %v689_v1 = vpop.xlane.xlu0 %688 }
 0x4c3   :  { %8230 = vrcp.f32 %v689_v1 }
 0x4c5   :  { %v8229_v5 = vpop.eup %8228 }
 0x4c6   :  { %v1473_v41 = vpop.permute.xlu1 %1472  ;;  %v683_v22 = vpop.xlane.xlu0 %682  ;;  %v714_v17 = vmul.f32 %v8229_v5, %v9069_v59 }
 0x4c7   :  { %8232 = vrcp.f32 %v683_v22  ;;  %7849 = vmatprep.subr.msk.bf16.mxu0 %vm531_vm2, %v1473_v41 }
 0x4c8   :  { %v726_v30 = vsel %vm236_vm0, %v714_v17, 0.0 }
 0x4ca   :  { %v692_v44 = vpop.xlane.xlu0 %691  ;;  %v837_v6 = vpop.permute.xlu1 %836 }
 0x4cb   :  { %8234 = vrcp.f32 %v692_v44 }
 0x4cd   :  { %v8231_v9 = vpop.eup %8230 }
 0x4ce   :  { %v847_v3 = vpop.permute.xlu0 %846  ;;  %v715_v24 = vmul.f32 %v8231_v9, %v9073_v52  ;;  %v1475_v28 = vpop.permute.xlu1 %1474 }
 0x4cf   :  { %7844 = vmatprep.subr.msk.bf16.mxu1 %vm531_vm2, %v847_v3  ;;  %v870_v8 = vsel %vm531_vm2, %v847_v3, 0  ;;  %v1496_v37 = vsel %vm531_vm2, %v1475_v28, 0 }
 0x4d0   :  { %7288 = vmatpush3.bf16.xpose.msra.mxu1 %v870_v8  ;;  %v728_v59 = vsel %vm236_vm0, %v715_v24, 0.0 }
 0x4d1   :  { %v8233_v10 = vpop.eup %8232 }
 0x4d2   :  { %v833_v15 = vpop.permute.xlu0 %832  ;;  %v713_v16 = vmul.f32 %v8233_v10, %v9077_v2  ;;  %v1153_v46 = vpop.permute.xlu1 %1152 }
 0x4d4   :  { %v724_v19 = vsel %vm236_vm0, %v713_v16, 0.0  ;;  %v741_v23 = vpack.c.bf16 %v714_v17, %v713_v16 }
 0x4d5   :  { %v8235_v26 = vpop.eup %8234  ;;  %v725_v29 = vadd.f32 %v724_v19, %v723_v32 }
 0x4d6   :  { %7277 = vmatprep.mubr.msk.bf16.mxu1 %vm236_vm0, %v741_v23  ;;  %v1149_v33 = vpop.permute.xlu0 %1148  ;;  %v716_v38 = vmul.f32 %v8235_v26, %v9081_v51  ;;  %v1493_v51 = vsel %vm531_vm2, %v1473_v41, 0  ;;  %v1479_v58 = vpop.permute.xlu1 %1478 }
 0x4d7   :  { %v727_v39 = vadd.f32 %v726_v30, %v725_v29  ;;  %7321 = vmatprep.mubr.msk.bf16.mxu0 %vm531_vm2, %v1149_v33  ;;  %v1502_v27 = vsel %vm531_vm2, %v1479_v58, 0 }
 0x4d8   :  { %v742_v2 = vpack.c.bf16 %v716_v38, %v715_v24  ;;  %v730_v45 = vsel %vm236_vm0, %v716_v38, 0.0 }
 0x4d9   :  { %v729_v40 = vadd.f32 %v728_v59, %v727_v39 }
 0x4da   :  { %7278 = vmatmul.mubr.msk.bf16.gmra.mrb[28].mxu1 %vm236_vm0, %v742_v2  ;;  %v1151_v52 = vpop.permute.xlu0 %1150 }
 0x4db   :  { %v9157_v25 = vadd.f32 %v730_v45, %v729_v40  ;;  %7289 = vmatprep.mubr.msk.bf16.mxu1 %vm531_vm2, %v833_v15  ;;  %7322 = vmatmul.mubr.msk.bf16.vlgmr.msra.gmra.mrb[32].mxu0 %vm531_vm2, %v1151_v52 }
 0x4dc   :  { %7346 = vmatpush3.bf16.xpose.msra.mxu0 %v1493_v51  ;;  %7325 = vmatprep.mubr.msk.bf16.mxu0 %vm531_vm2, %v1153_v46 }
 0x4dd   :  { %7850 = vmatprep.subr.msk.bf16.mxu0 %vm531_vm2, %v1475_v28 }
 0x4de   :  { %v839_v20 = vpop.permute.xlu0 %838 }
 0x4e2   :  { %7290 = vmatmul.mubr.msk.bf16.vlgmr.msra.gmra.mrb[32].mxu1 %vm531_vm2, %v835_v60  ;;  %v1477_v32 = vpop.permute.xlu0 %1476  ;;  %v1467_v60 = vpop.permute.xlu1 %1466 }
 0x4e3   :  { %7293 = vmatprep.mubr.msk.bf16.mxu1 %vm531_vm2, %v837_v6  ;;  %v1499_v55 = vsel %vm531_vm2, %v1477_v32, 0 }
 0x4e4   :  { %7348 = vmatpush3.bf16.xpose.msra.mxu0 %v1496_v37 }
 0x4e5   :  { %7851 = vmatprep.subr.msk.bf16.mxu0 %vm531_vm2, %v1477_v32 }
 0x4e6   :  { %v1155_v53 = vpop.permute.xlu0 %1154  ;;  %v1471_v41 = vpop.permute.xlu1 %1470 }
 0x4e7   :  { %7326 = vmatmul.mubr.msk.bf16.gmra.mrb[36].mxu0 %vm531_vm2, %v1155_v53 }
 0x4ea   :  { %7294 = vmatmul.mubr.msk.bf16.gmra.mrb[36].mxu1 %vm531_vm2, %v839_v20  ;;  %v1465_v54 = vpop.permute.xlu0 %1464 }
 0x4eb   :  { %7353 = vmatprep.mubr.msk.bf16.mxu0 %vm531_vm2, %v1465_v54 }
 0x4ec   :  { %7350 = vmatpush3.bf16.xpose.msra.mxu0 %v1499_v55 }
 0x4ed   :  { %7852 = vmatprep.subr.msk.bf16.mxu0 %vm531_vm2, %v1479_v58 }
 0x4ee   :  { %v1469_v1 = vpop.permute.xlu0 %1468 }
 0x4f4   :  { %7352 = vmatpush3.bf16.xpose.msra.mxu0 %v1502_v27 }
 0x4fb   :  { %7354 = vmatmul.mubr.msk.bf16.vlgmr.msra.gmra.mrb[40].mxu0 %vm531_vm2, %v1467_v60 }
 0x4fc   :  { %7357 = vmatprep.mubr.msk.bf16.mxu0 %vm531_vm2, %v1469_v1 }
 0x503   :  { %7358 = vmatmul.mubr.msk.bf16.gmra.mrb[44].mxu0 %vm531_vm2, %v1471_v41 }
 0x571   :  { %v9177_v22 = vpop.f32.mrb[24].mxu1 }
 0x572   :  { %v9179_v44 = vpop.f32.mrb[25].mxu1 }
 0x573   :  { %v9181_v3 = vpop.f32.mrb[26].mxu1 }
 0x574   :  { %v9183_v5 = vpop.f32.mrb[27].mxu1 }
 0x5ad   :  { %v9185_v6 = vpop.f32.mrb[28].mxu1 }
 0x5ae   :  { %11682 = vst [vmem:[#allocation18_spill] sm:$0xff] %v9185_v6  ;;  %v9187_v8 = vpop.f32.mrb[29].mxu1  ;;  %v9189_v9 = vpop.f32.mrb[32].mxu0 }
 0x5af   :  { %11683 = vst [vmem:[#allocation19_spill] sm:$0xff] %v9187_v8  ;;  %v9191_v10 = vpop.f32.mrb[30].mxu1  ;;  %v1222_v15 = vpop.f32.mrb[33].mxu0  ;;  %v1259_v26 = vsel %vm236_vm0, %v9189_v9, -inf }
 0x5b0   :  { %11684 = vst [vmem:[#allocation20_spill] sm:$0xff] %v9191_v10  ;;  %v9193_v16 = vpop.f32.mrb[31].mxu1  ;;  %v9195_v17 = vpop.f32.mrb[34].mxu0  ;;  %v1253_v19 = vsel %vm236_vm0, %v1222_v15, -inf }
 0x5b1   :  { %11685 = vst [vmem:[#allocation21_spill] sm:$0xff] %v9193_v16  ;;  %1254 = vmax.xlane.f32.xlu1 %v1253_v19  ;;  %v1225_v23 = vpop.f32.mrb[35].mxu0  ;;  %v1262_v30 = vsel %vm236_vm0, %v9195_v17, -inf }
 0x5b2   :  { %v1256_v24 = vsel %vm236_vm0, %v1225_v23, -inf }
 0x5b3   :  { %1257 = vmax.xlane.f32.xlu0 %v1256_v24 }
 0x5b5   :  { %v9201_v28 = vpop.f32.mrb[32].mxu1  ;;  %1260 = vmax.xlane.f32.xlu1 %v1259_v26 }
 0x5b6   :  { %v9203_v29 = vpop.f32.mrb[33].mxu1 }
 0x5b7   :  { %v9207_v33 = vpop.f32.mrb[34].mxu1  ;;  %1263 = vmax.xlane.f32.xlu0 %v1262_v30 }
 0x5b8   :  { %v9209_v38 = vpop.f32.mrb[35].mxu1 }
 0x5ba   :  { %v9211_v39 = vpop.f32.mrb[36].mxu0 }
 0x5bb   :  { %v9213_v59 = vpop.f32.mrb[37].mxu0  ;;  %v1271_v37 = vsel %vm236_vm0, %v9211_v39, -inf }
 0x5bc   :  { %v9215_v2 = vpop.f32.mrb[38].mxu0  ;;  %v1265_v40 = vsel %vm236_vm0, %v9213_v59, -inf }
 0x5bd   :  { %v9219_v45 = vpop.f32.mrb[36].mxu1  ;;  %1266 = vmax.xlane.f32.xlu1 %v1265_v40  ;;  %v9221_v52 = vpop.f32.mrb[39].mxu0  ;;  %v1274_v53 = vsel %vm236_vm0, %v9215_v2, -inf }
 0x5be   :  { %v9223_v46 = vpop.f32.mrb[37].mxu1  ;;  %v1268_v51 = vsel %vm236_vm0, %v9221_v52, -inf }
 0x5bf   :  { %v9227_v20 = vpop.f32.mrb[38].mxu1  ;;  %1269 = vmax.xlane.f32.xlu0 %v1268_v51 }
 0x5c0   :  { %v9229_v32 = vpop.f32.mrb[39].mxu1 }
 0x5c1   :  { %1272 = vmax.xlane.f32.xlu1 %v1271_v37 }
 0x5c3   :  { %1275 = vmax.xlane.f32.xlu0 %v1274_v53 }
 0x5ce   :  { %v9235_v54 = vpop.f32.mrb[40].mxu0 }
 0x5cf   :  { %v9237_v55 = vpop.f32.mrb[41].mxu0  ;;  %v1575_v41 = vsel %vm236_vm0, %v9235_v54, -inf }
 0x5d0   :  { %v9239_v58 = vpop.f32.mrb[42].mxu0  ;;  %v1569_v27 = vsel %vm236_vm0, %v9237_v55, -inf }
 0x5d1   :  { %1570 = vmax.xlane.f32.xlu1 %v1569_v27  ;;  %v9243_v60 = vpop.f32.mrb[43].mxu0  ;;  %v1578_v24 = vsel %vm236_vm0, %v9239_v58, -inf }
 0x5d2   :  { %v1572_v1 = vsel %vm236_vm0, %v9243_v60, -inf }
 0x5d3   :  { %1573 = vmax.xlane.f32.xlu0 %v1572_v1 }
 0x5d5   :  { %1576 = vmax.xlane.f32.xlu1 %v1575_v41 }
 0x5d6   :  { %v9249_v19 = vpop.f32.mrb[44].mxu0 }
 0x5d7   :  { %1579 = vmax.xlane.f32.xlu0 %v1578_v24  ;;  %v9253_v26 = vpop.f32.mrb[45].mxu0  ;;  %v1587_v53 = vsel %vm236_vm0, %v9249_v19, -inf }
 0x5d8   :  { %v9255_v30 = vpop.f32.mrb[46].mxu0  ;;  %v1581_v40 = vsel %vm236_vm0, %v9253_v26, -inf }
 0x5d9   :  { %1582 = vmax.xlane.f32.xlu1 %v1581_v40  ;;  %v9259_v51 = vpop.f32.mrb[47].mxu0  ;;  %v1590_v27 = vsel %vm236_vm0, %v9255_v30, -inf }
 0x5da   :  { %v1584_v37 = vsel %vm236_vm0, %v9259_v51, -inf }
 0x5db   :  { %1585 = vmax.xlane.f32.xlu0 %v1584_v37 }
 0x5dd   :  { %1588 = vmax.xlane.f32.xlu1 %v1587_v53 }
 0x5df   :  { %1591 = vmax.xlane.f32.xlu0 %v1590_v27 }
 0x5ee   :  { %1059 = vrot.lane.b32.xlu1 %v8965_v34, %s8725_s23 }
 0x63e   :  { %v1255_v1 = vpop.xlane.xlu1 %1254 }
 0x63f   :  { %v1277_v41 = vsub.f32 %v1222_v15, %v1255_v1 }
 0x640   :  { %v1258_v24 = vpop.xlane.xlu0 %1257 }
 0x641   :  { %v1285_v40 = vmul.f32 1.442695, %v1277_v41  ;;  %v1278_v14 = vsub.f32 %v1225_v23, %v1258_v24 }
 0x642   :  { %v1261_v21 = vpop.xlane.xlu1 %1260 }
 0x643   :  { %8236 = vpow2.f32 %v1285_v40  ;;  %v1287_v37 = vmul.f32 1.442695, %v1278_v14  ;;  %v1279_v18 = vsub.f32 %v9189_v9, %v1261_v21 }
 0x644   :  { %v1264_v40 = vpop.xlane.xlu0 %1263 }
 0x645   :  { %8238 = vpow2.f32 %v1287_v37  ;;  %v1289_v53 = vmul.f32 1.442695, %v1279_v18 }
 0x647   :  { %8240 = vpow2.f32 %v1289_v53  ;;  %v1280_v53 = vsub.f32 %v9195_v17, %v1264_v40 }
 0x64a   :  { %v1267_v18 = vpop.xlane.xlu1 %1266 }
 0x64c   :  { %v1270_v17 = vpop.xlane.xlu0 %1269 }
 0x64d   :  { %v9270_v11 = vpop.eup %8236 }
 0x64e   :  { %v1301_v27 = vsel %vm236_vm0, %v9270_v11, 0.0  ;;  %v1273_v21 = vpop.xlane.xlu1 %1272 }
 0x64f   :  { %v9274_v0 = vpop.eup %8238  ;;  %1302 = vadd.xlane.f32.xlu0 %v1301_v27  ;;  %v1281_v27 = vsub.f32 %v9213_v59, %v1267_v18  ;;  %v1283_v59 = vsub.f32 %v9211_v39, %v1273_v21 }
 0x650   :  { %v1304_v14 = vsel %vm236_vm0, %v9274_v0, 0.0  ;;  %v1276_v18 = vpop.xlane.xlu0 %1275 }
 0x651   :  { %v9276_v15 = vpop.eup %8240  ;;  %v1297_v40 = vmul.f32 1.442695, %v1283_v59 }
 0x652   :  { %v1307_v23 = vsel %vm236_vm0, %v9276_v15, 0.0 }
 0x653   :  { %1308 = vadd.xlane.f32.xlu1 %v1307_v23  ;;  %1305 = vadd.xlane.f32.xlu0 %v1304_v14  ;;  %v1291_v23 = vmul.f32 1.442695, %v1280_v53  ;;  %v1293_v14 = vmul.f32 1.442695, %v1281_v27 }
 0x655   :  { %8242 = vpow2.f32 %v1291_v23 }
 0x656   :  { %8244 = vpow2.f32 %v1293_v14 }
 0x657   :  { %8246 = vpow2.f32 %v1297_v40  ;;  %v943_v40 = vsel %vm236_vm0, %v9201_v28, -inf }
 0x65e   :  { %v1571_v9 = vpop.xlane.xlu1 %1570 }
 0x65f   :  { %v9292_v7 = vpop.eup %8242  ;;  %v1593_v23 = vsub.f32 %v9237_v55, %v1571_v9 }
 0x660   :  { %v9294_v4 = vpop.eup %8244  ;;  %v1310_v50 = vsel %vm236_vm0, %v9292_v7, 0.0  ;;  %v9309_v27 = vpop.xlane.xlu0 %1573 }
 0x661   :  { %v1313_v61 = vsel %vm236_vm0, %v9294_v4, 0.0  ;;  %v9312_v14 = vpop.eup %8246  ;;  %v1601_v57 = vmul.f32 1.442695, %v1593_v23 }
 0x662   :  { %v1577_v1 = vpop.xlane.xlu1 %1576 }
 0x663   :  { %v1595_v39 = vsub.f32 %v9235_v54, %v1577_v1  ;;  %v955_v1 = vsel %vm236_vm0, %v9219_v45, -inf }
 0x664   :  { %1063 = vrot.lane.b32.xlu1 %v8977_v48, %s8725_s23  ;;  %v1580_v21 = vpop.xlane.xlu0 %1579 }
 0x666   :  { %v9284_v41 = vpop.xlane.xlu1 %1582 }
 0x669   :  { %1061 = vrot.lane.b32.xlu0 %v8963_v31, %s8725_s23 }
 0x66a   :  { %v9288_v24 = vpop.xlane.xlu1 %1588 }
 0x66e   :  { %v1060_v37 = vpop.permute.xlu1 %1059 }
 0x66f   :  { %7297 = vmatprep.subr.bf16.mxu1 %v1060_v37 }
 0x670   :  { %7298 = vmatpush3.bf16.msra.mxu1 %v1060_v37  ;;  %v1284_v37 = vsub.f32 %v9215_v2, %v1276_v18  ;;  %v1319_v2 = vsel %vm236_vm0, %v9312_v14, 0.0  ;;  %v940_v18 = vsel %vm236_vm0, %v9209_v38, -inf }
 0x688   :  { %1314 = vadd.xlane.f32.xlu1 %v1313_v61  ;;  %1311 = vadd.xlane.f32.xlu0 %v1310_v50  ;;  %v1282_v61 = vsub.f32 %v9221_v52, %v1270_v17  ;;  %v1299_v50 = vmul.f32 1.442695, %v1284_v37  ;;  %v1605_v52 = vmul.f32 1.442695, %v1595_v39  ;;  %v1596_v17 = vsub.f32 %v9239_v58, %v1580_v21 }
 0x689   :  { %v949_v58 = vsel %vm236_vm0, %v9223_v46, -inf  ;;  %v946_v39 = vsel %vm236_vm0, %v9207_v33, -inf }
 0x68a   :  { %v1295_v53 = vmul.f32 1.442695, %v1282_v61  ;;  %8248 = vpow2.f32 %v1299_v50  ;;  %v1607_v54 = vmul.f32 1.442695, %v1596_v17  ;;  %v937_v50 = vsel %vm236_vm0, %v9203_v29, -inf }
 0x68c   :  { %8250 = vpow2.f32 %v1295_v53 }
 0x68d   :  { %8252 = vpow2.f32 %v1601_v57 }
 0x68e   :  { %8254 = vpow2.f32 %v1605_v52  ;;  %v958_v52 = vsel %vm236_vm0, %v9227_v20, -inf }
 0x68f   :  { %8256 = vpow2.f32 %v1607_v54 }
 0x694   :  { %v9317_v59 = vpop.eup %8248 }
 0x695   :  { %v1322_v55 = vsel %vm236_vm0, %v9317_v59, 0.0 }
 0x696   :  { %v9324_v9 = vpop.eup %8250 }
 0x697   :  { %v1316_v57 = vsel %vm236_vm0, %v9324_v9, 0.0  ;;  %v9334_v37 = vpop.eup %8252 }
 0x698   :  { %v1617_v61 = vsel %vm236_vm0, %v9334_v37, 0.0  ;;  %v9340_v53 = vpop.eup %8254 }
 0x699   :  { %1375 = vrot.lane.b32.xlu1 %v8965_v34, %s8726_s24  ;;  %v1623_v23 = vsel %vm236_vm0, %v9340_v53, 0.0  ;;  %v9346_v21 = vpop.eup %8256 }
 0x69a   :  { %v1626_v17 = vsel %vm236_vm0, %v9346_v21, 0.0 }
 0x69d   :  { %1377 = vrot.lane.b32.xlu1 %v8963_v31, %s8726_s24 }
 0x69e   :  { %1065 = vrot.lane.b32.xlu0 %v8975_v47, %s8725_s23 }
 0x6bd   :  { %1320 = vadd.xlane.f32.xlu0 %v1319_v2  ;;  %v9348_v2 = vpop.xlane.xlu0 %1585 }
 0x6c1   :  { %941 = vmax.xlane.f32.xlu1 %v940_v18  ;;  %1323 = vadd.xlane.f32.xlu0 %v1322_v55  ;;  %v9354_v18 = vpop.xlane.xlu0 %1591  ;;  %v952_v55 = vsel %vm236_vm0, %v9229_v32, -inf }
 0x6c5   :  { %956 = vmax.xlane.f32.xlu1 %v955_v1  ;;  %1317 = vadd.xlane.f32.xlu0 %v1316_v57 }
 0x6c9   :  { %950 = vmax.xlane.f32.xlu1 %v949_v58  ;;  %944 = vmax.xlane.f32.xlu0 %v943_v40 }
 0x6cd   :  { %1618 = vadd.xlane.f32.xlu1 %v1617_v61  ;;  %938 = vmax.xlane.f32.xlu0 %v937_v50 }
 0x6d1   :  { %1624 = vadd.xlane.f32.xlu1 %v1623_v23  ;;  %947 = vmax.xlane.f32.xlu0 %v946_v39 }
 0x6d5   :  { %959 = vmax.xlane.f32.xlu0 %v958_v52  ;;  %1627 = vadd.xlane.f32.xlu1 %v1626_v17 }
 0x6d9   :  { %953 = vmax.xlane.f32.xlu0 %v952_v55 }
 0x6dc   :  { %v1303_v54 = vpop.xlane.xlu0 %1302 }
 0x6dd   :  { %8258 = vrcp.f32 %v1303_v54 }
 0x6e0   :  { %v1309_v1 = vpop.xlane.xlu1 %1308  ;;  %v1306_v57 = vpop.xlane.xlu0 %1305 }
 0x6e1   :  { %8260 = vrcp.f32 %v1309_v1 }
 0x6e2   :  { %8262 = vrcp.f32 %v1306_v57 }
 0x6e4   :  { %v1062_v58 = vpop.permute.xlu0 %1061  ;;  %v1064_v40 = vpop.permute.xlu1 %1063 }
 0x6e5   :  { %7299 = vmatprep.subr.bf16.mxu1 %v1062_v58 }
 0x6e6   :  { %1381 = vrot.lane.b32.xlu1 %v8975_v47, %s8726_s24  ;;  %7300 = vmatpush3.bf16.msra.mxu1 %v1062_v58 }
 0x6e7   :  { %7301 = vmatprep.subr.bf16.mxu1 %v1064_v40  ;;  %v8259_v61 = vpop.eup %8258 }
 0x6e8   :  { %v9361_v23 = vmul.f32 %v8259_v61, %v9270_v11 }
 0x6ea   :  { %7302 = vmatpush3.bf16.msra.mxu1 %v1064_v40  ;;  %v1349_v55 = vsel %vm236_vm0, %v9361_v23, 0.0 }
 0x6eb   :  { %v8261_v50 = vpop.eup %8260 }
 0x6ec   :  { %v8263_v39 = vpop.eup %8262  ;;  %v9364_v52 = vmul.f32 %v8261_v50, %v9276_v15  ;;  %v1594_v15 = vsub.f32 %v9243_v60, %v9309_v27 }
 0x6ed   :  { %v9367_v17 = vmul.f32 %v8263_v39, %v9274_v0 }
 0x6ee   :  { %v1352_v11 = vsel %vm236_vm0, %v9364_v52, 0.0  ;;  %v1603_v58 = vmul.f32 1.442695, %v1594_v15 }
 0x6ef   :  { %1379 = vrot.lane.b32.xlu0 %v8977_v48, %s8726_s24  ;;  %v1350_v54 = vsel %vm236_vm0, %v9367_v17, 0.0 }
 0x6f0   :  { %v1351_v1 = vadd.f32 %v1350_v54, %v1349_v55  ;;  %8264 = vpow2.f32 %v1603_v58 }
 0x6f2   :  { %v1353_v57 = vadd.f32 %v1352_v11, %v1351_v1 }
 0x6fa   :  { %v9379_v0 = vpop.eup %8264 }
 0x6fb   :  { %v1620_v40 = vsel %vm236_vm0, %v9379_v0, 0.0 }
 0x70e   :  { %1621 = vadd.xlane.f32.xlu0 %v1620_v40 }
 0x715   :  { %v1315_v61 = vpop.xlane.xlu1 %1314  ;;  %v1312_v50 = vpop.xlane.xlu0 %1311 }
 0x716   :  { %8266 = vrcp.f32 %v1315_v61 }
 0x717   :  { %8268 = vrcp.f32 %v1312_v50 }
 0x719   :  { %v1066_v39 = vpop.permute.xlu0 %1065  ;;  %v9383_v55 = vpop.permute.xlu1 %1375 }
 0x71a   :  { %7303 = vmatprep.subr.bf16.mxu1 %v1066_v39 }
 0x71b   :  { %7304 = vmatpush3.bf16.msra.mxu1 %v1066_v39 }
 0x71c   :  { %7329 = vmatprep.subr.bf16.mxu1 %v9383_v55 }
 0x71d   :  { %v9396_v50 = vpop.permute.xlu1 %1377 }
 0x720   :  { %v8267_v60 = vpop.eup %8266 }
 0x721   :  { %v8269_v27 = vpop.eup %8268  ;;  %v9390_v1 = vmul.f32 %v8267_v60, %v9294_v4 }
 0x722   :  { %v9387_v54 = vmul.f32 %v8269_v27, %v9292_v7 }
 0x723   :  { %v1356_v58 = vsel %vm236_vm0, %v9390_v1, 0.0 }
 0x724   :  { %v1354_v11 = vsel %vm236_vm0, %v9387_v54, 0.0 }
 0x725   :  { %v1355_v15 = vadd.f32 %v1354_v11, %v1353_v57 }
 0x727   :  { %v1357_v40 = vadd.f32 %v1356_v58, %v1355_v15 }
 0x74a   :  { %v1321_v61 = vpop.xlane.xlu0 %1320 }
 0x74b   :  { %8270 = vrcp.f32 %v1321_v61 }
 0x74e   :  { %v1324_v39 = vpop.xlane.xlu0 %1323  ;;  %v942_v56 = vpop.xlane.xlu1 %941 }
 0x74f   :  { %8272 = vrcp.f32 %v1324_v39  ;;  %v962_v42 = vsub.f32 %v9209_v38, %v942_v56 }
 0x752   :  { %v1318_v49 = vpop.xlane.xlu0 %1317  ;;  %v957_v7 = vpop.xlane.xlu1 %956 }
 0x753   :  { %8274 = vrcp.f32 %v1318_v49  ;;  %v967_v57 = vsub.f32 %v9219_v45, %v957_v7 }
 0x755   :  { %v8271_v58 = vpop.eup %8270  ;;  %v981_v39 = vmul.f32 1.442695, %v967_v57 }
 0x756   :  { %v945_v4 = vpop.xlane.xlu0 %944  ;;  %v951_v36 = vpop.xlane.xlu1 %950  ;;  %v9408_v7 = vmul.f32 %v8271_v58, %v9312_v14 }
 0x757   :  { %v963_v60 = vsub.f32 %v9201_v28, %v945_v4  ;;  %v965_v49 = vsub.f32 %v9223_v46, %v951_v36 }
 0x759   :  { %v973_v27 = vmul.f32 1.442695, %v963_v60  ;;  %v8273_v43 = vpop.eup %8272  ;;  %v977_v36 = vmul.f32 1.442695, %v965_v49 }
 0x75a   :  { %v939_v11 = vpop.xlane.xlu0 %938  ;;  %v9413_v38 = vmul.f32 %v8273_v43, %v9317_v59 }
 0x75b   :  { %v961_v15 = vsub.f32 %v9203_v29, %v939_v11  ;;  %8276 = vpow2.f32 %v973_v27  ;;  %v971_v29 = vmul.f32 1.442695, %v962_v42 }
 0x75c   :  { %v1362_v14 = vsel %vm236_vm0, %v9413_v38, 0.0 }
 0x75d   :  { %v969_v61 = vmul.f32 1.442695, %v961_v15  ;;  %v8275_v35 = vpop.eup %8274 }
 0x75e   :  { %v948_v8 = vpop.xlane.xlu0 %947  ;;  %v9405_v45 = vmul.f32 %v8275_v35, %v9324_v9  ;;  %v1360_v35 = vsel %vm236_vm0, %v9408_v7, 0.0 }
 0x75f   :  { %8278 = vpow2.f32 %v969_v61  ;;  %v964_v28 = vsub.f32 %v9207_v33, %v948_v8 }
 0x760   :  { %v1358_v56 = vsel %vm236_vm0, %v9405_v45, 0.0  ;;  %8280 = vpow2.f32 %v981_v39 }
 0x761   :  { %v975_v4 = vmul.f32 1.442695, %v964_v28  ;;  %v1359_v60 = vadd.f32 %v1358_v56, %v1357_v40 }
 0x762   :  { %v960_v46 = vpop.xlane.xlu0 %959 }
 0x763   :  { %8282 = vpow2.f32 %v975_v4  ;;  %v968_v8 = vsub.f32 %v9227_v20, %v960_v46  ;;  %v1361_v33 = vadd.f32 %v1360_v35, %v1359_v60  ;;  %v1619_v60 = vpop.xlane.xlu1 %1618 }
 0x764   :  { %8284 = vpow2.f32 %v971_v29 }
 0x765   :  { %v983_v42 = vmul.f32 1.442695, %v968_v8  ;;  %v9420_v9 = vpop.eup %8276  ;;  %8286 = vpow2.f32 %v977_v36  ;;  %v9422_v59 = vadd.f32 %v1362_v14, %v1361_v33 }
 0x766   :  { %v954_v43 = vpop.xlane.xlu0 %953  ;;  %v991_v20 = vsel %vm236_vm0, %v9420_v9, 0.0 }
 0x767   :  { %v966_v40 = vsub.f32 %v9229_v32, %v954_v43  ;;  %992 = vadd.xlane.f32.xlu1 %v991_v20  ;;  %8288 = vpow2.f32 %v983_v42  ;;  %v1625_v8 = vpop.xlane.xlu1 %1624  ;;  %v1597_v42 = vsub.f32 %v9253_v26, %v9284_v41  ;;  %v1600_v20 = vsub.f32 %v9255_v30, %v9354_v18 }
 0x769   :  { %v9427_v27 = vpop.eup %8278  ;;  %v979_v57 = vmul.f32 1.442695, %v966_v40  ;;  %v1609_v14 = vmul.f32 1.442695, %v1597_v42 }
 0x76a   :  { %v985_v11 = vsel %vm236_vm0, %v9427_v27, 0.0  ;;  %v9431_v15 = vpop.eup %8280  ;;  %v9463_v35 = vpop.permute.xlu0 %1379 }
 0x76b   :  { %986 = vadd.xlane.f32.xlu1 %v985_v11  ;;  %8290 = vpow2.f32 %v979_v57  ;;  %v1003_v39 = vsel %vm236_vm0, %v9431_v15, 0.0  ;;  %v1628_v33 = vpop.xlane.xlu1 %1627 }
 0x76c   :  { %8292 = vrcp.f32 %v1619_v60 }
 0x76d   :  { %v9433_v58 = vpop.eup %8282  ;;  %8294 = vrcp.f32 %v1625_v8 }
 0x76e   :  { %v994_v32 = vsel %vm236_vm0, %v9433_v58, 0.0  ;;  %v9437_v61 = vpop.eup %8284  ;;  %8296 = vrcp.f32 %v1628_v33 }
 0x76f   :  { %995 = vadd.xlane.f32.xlu0 %v994_v32  ;;  %v9441_v49 = vpop.eup %8286  ;;  %1004 = vadd.xlane.f32.xlu1 %v1003_v39  ;;  %v988_v28 = vsel %vm236_vm0, %v9437_v61, 0.0  ;;  %v9519_v42 = vpop.permute.xlu1 %1381 }
 0x770   :  { %v997_v4 = vsel %vm236_vm0, %v9441_v49, 0.0 }
 0x771   :  { %v9445_v29 = vpop.eup %8288 }
 0x772   :  { %v1006_v56 = vsel %vm236_vm0, %v9445_v29, 0.0 }
 0x773   :  { %989 = vadd.xlane.f32.xlu0 %v988_v28  ;;  %998 = vadd.xlane.f32.xlu1 %v997_v4 }
 0x775   :  { %v9451_v36 = vpop.eup %8290 }
 0x776   :  { %v1000_v46 = vsel %vm236_vm0, %v9451_v36, 0.0  ;;  %v8293_v43 = vpop.eup %8292 }
 0x777   :  { %1007 = vadd.xlane.f32.xlu0 %v1006_v56  ;;  %v8295_v26 = vpop.eup %8294  ;;  %v9474_v57 = vmul.f32 %v8293_v43, %v9334_v37 }
 0x778   :  { %v8297_v41 = vpop.eup %8296  ;;  %v9477_v11 = vmul.f32 %v8295_v26, %v9340_v53 }
 0x779   :  { %v1665_v30 = vsel %vm236_vm0, %v9474_v57, 0.0 }
 0x77a   :  { %v1668_v32 = vsel %vm236_vm0, %v9477_v11, 0.0 }
 0x77b   :  { %1001 = vadd.xlane.f32.xlu0 %v1000_v46 }
 0x784   :  { %1693 = vrot.lane.b32.xlu1 %v8963_v31, %s8727_s1  ;;  %v1598_v31 = vsub.f32 %v9259_v51, %v9348_v2  ;;  %v1615_v2 = vmul.f32 1.442695, %v1600_v20 }
 0x788   :  { %1695 = vrot.lane.b32.xlu1 %v8977_v48, %s8727_s1 }
 0x78c   :  { %1697 = vrot.lane.b32.xlu1 %v8975_v47, %s8727_s1  ;;  %v1599_v47 = vsub.f32 %v9249_v19, %v9288_v24  ;;  %v9483_v24 = vmul.f32 %v8297_v41, %v9346_v21 }
 0x78e   :  { %v1613_v40 = vmul.f32 1.442695, %v1599_v47  ;;  %v1670_v21 = vsel %vm236_vm0, %v9483_v24, 0.0 }
 0x791   :  { %1691 = vrot.lane.b32.xlu0 %v8965_v34, %s8727_s1  ;;  %v1611_v34 = vmul.f32 1.442695, %v1598_v31 }
 0x79b   :  { %v1622_v48 = vpop.xlane.xlu0 %1621 }
 0x79c   :  { %8298 = vrcp.f32 %v1622_v48 }
 0x79d   :  { %8300 = vpow2.f32 %v1609_v14 }
 0x79e   :  { %8302 = vpow2.f32 %v1611_v34 }
 0x79f   :  { %8304 = vpow2.f32 %v1613_v40 }
 0x7a0   :  { %8306 = vpow2.f32 %v1615_v2 }
 0x7a6   :  { %v8299_v51 = vpop.eup %8298 }
 0x7a7   :  { %v9480_v19 = vmul.f32 %v8299_v51, %v9379_v0  ;;  %v9491_v39 = vpop.eup %8300 }
 0x7a8   :  { %v9493_v28 = vpop.eup %8302  ;;  %v1629_v4 = vsel %vm236_vm0, %v9491_v39, 0.0 }
 0x7a9   :  { %v1666_v18 = vsel %vm236_vm0, %v9480_v19, 0.0  ;;  %v9501_v56 = vpop.eup %8304  ;;  %v1632_v46 = vsel %vm236_vm0, %v9493_v28, 0.0 }
 0x7aa   :  { %v1667_v37 = vadd.f32 %v1666_v18, %v1665_v30  ;;  %v1635_v60 = vsel %vm236_vm0, %v9501_v56, 0.0  ;;  %v9507_v8 = vpop.eup %8306 }
 0x7ab   :  { %v1638_v33 = vsel %vm236_vm0, %v9507_v8, 0.0 }
 0x7ac   :  { %v1669_v53 = vadd.f32 %v1668_v32, %v1667_v37 }
 0x7ae   :  { %v9497_v0 = vadd.f32 %v1670_v21, %v1669_v53 }
 0x7b0   :  { %1630 = vadd.xlane.f32.xlu0 %v1629_v4  ;;  %1633 = vadd.xlane.f32.xlu1 %v1632_v46 }
 0x7b4   :  { %1636 = vadd.xlane.f32.xlu0 %v1635_v60 }
 0x7b8   :  { %1639 = vadd.xlane.f32.xlu0 %v1638_v33 }
 0x7c1   :  { %1906 = vrot.lane.b32.xlu1 %v8993_v63, %s8717_s3 }
 0x7c5   :  { %1910 = vrot.lane.b32.xlu1 %v8997_v13, %s8717_s3 }
 0x7c9   :  { %1912 = vrot.lane.b32.xlu1 %v8995_v12, %s8717_s3 }
 0x7ce   :  { %1908 = vrot.lane.b32.xlu0 %v8991_v62, %s8717_s3 }
 0x7f4   :  { %v993_v31 = vpop.xlane.xlu1 %992 }
 0x7f8   :  { %v987_v48 = vpop.xlane.xlu1 %986 }
 0x7f9   :  { %8308 = vrcp.f32 %v987_v48 }
 0x7fc   :  { %v996_v14 = vpop.xlane.xlu0 %995  ;;  %v1005_v47 = vpop.xlane.xlu1 %1004 }
 0x7fd   :  { %8310 = vrcp.f32 %v996_v14 }
 0x7fe   :  { %8312 = vrcp.f32 %v993_v31 }
 0x800   :  { %v990_v34 = vpop.xlane.xlu0 %989  ;;  %v999_v43 = vpop.xlane.xlu1 %998 }
 0x801   :  { %8314 = vrcp.f32 %v990_v34 }
 0x802   :  { %8316 = vrcp.f32 %v999_v43 }
 0x803   :  { %v8309_v20 = vpop.eup %8308 }
 0x804   :  { %v1008_v40 = vpop.xlane.xlu0 %1007  ;;  %v1025_v2 = vmul.f32 %v8309_v20, %v9427_v27 }
 0x805   :  { %8318 = vrcp.f32 %v1008_v40 }
 0x806   :  { %8320 = vrcp.f32 %v1005_v47  ;;  %v1033_v21 = vsel %vm236_vm0, %v1025_v2, 0.0  ;;  %v732_v47 = vrot.slane %v9157_v25, 4 }
 0x807   :  { %v8311_v26 = vpop.eup %8310 }
 0x808   :  { %v1002_v41 = vpop.xlane.xlu0 %1001  ;;  %v8313_v51 = vpop.eup %8312  ;;  %v1028_v18 = vmul.f32 %v8311_v26, %v9433_v58 }
 0x809   :  { %8322 = vrcp.f32 %v1002_v41  ;;  %v1027_v37 = vmul.f32 %v8313_v51, %v9420_v9  ;;  %v1364_v41 = vrot.slane %v9422_v59, 4 }
 0x80a   :  { %v1038_v9 = vsel %vm236_vm0, %v1028_v18, 0.0 }
 0x80b   :  { %v8315_v30 = vpop.eup %8314  ;;  %v1056_v60 = vpack.c.bf16 %v1028_v18, %v1027_v37  ;;  %v1036_v48 = vsel %vm236_vm0, %v1027_v37, 0.0 }
 0x80c   :  { %v1026_v32 = vmul.f32 %v8315_v30, %v9437_v61  ;;  %v8317_v53 = vpop.eup %8316 }
 0x80d   :  { %v1029_v27 = vmul.f32 %v8317_v53, %v9441_v49 }
 0x80e   :  { %v1034_v4 = vsel %vm236_vm0, %v1026_v32, 0.0  ;;  %v1055_v46 = vpack.c.bf16 %v1026_v32, %v1025_v2  ;;  %v733_v2 = vadd.f32 %v732_v47, %v9157_v25 }
 0x80f   :  { %v1035_v33 = vadd.f32 %v1034_v4, %v1033_v21  ;;  %v8319_v31 = vpop.eup %8318  ;;  %v1040_v49 = vsel %vm236_vm0, %v1029_v27, 0.0  ;;  %v1694_v4 = vpop.permute.xlu1 %1693 }
 0x810   :  { %7305 = vmatprep.mubr.msk.bf16.mxu1 %vm236_vm0, %v1055_v46  ;;  %v8321_v58 = vpop.eup %8320  ;;  %v1032_v43 = vmul.f32 %v8319_v31, %v9445_v29  ;;  %v734_v25 = vrot.slane %v733_v2, 2  ;;  %v1692_v46 = vpop.permute.xlu0 %1691 }
 0x811   :  { %v1037_v14 = vadd.f32 %v1036_v48, %v1035_v33  ;;  %7306 = vmatmul.mubr.msk.bf16.vlgmr.msra.gmra.mrb[40].mxu1 %vm236_vm0, %v1056_v60  ;;  %v1031_v20 = vmul.f32 %v8321_v58, %v9431_v15  ;;  %v1371_v15 = vpack.c.bf16 %v9367_v17, %v9361_v23  ;;  %v1372_v17 = vpack.c.bf16 %v9387_v54, %v9364_v52 }
 0x812   :  { %7330 = vmatpush3.bf16.msra.mxu1 %v9383_v55  ;;  %v1046_v37 = vsel %vm236_vm0, %v1032_v43, 0.0  ;;  %v735_v23 = vadd.f32 %v734_v25, %v733_v2  ;;  %v1374_v52 = vpack.c.bf16 %v9413_v38, %v9408_v7 }
 0x813   :  { %v8323_v61 = vpop.eup %8322  ;;  %7331 = vmatprep.subr.bf16.mxu1 %v9396_v50  ;;  %v1039_v34 = vadd.f32 %v1038_v9, %v1037_v14  ;;  %v1058_v29 = vpack.c.bf16 %v1032_v43, %v1031_v20 }
 0x814   :  { %v1030_v40 = vmul.f32 %v8323_v61, %v9451_v36  ;;  %v1044_v36 = vsel %vm236_vm0, %v1031_v20, 0.0  ;;  %v736_v48 = vrot.slane %v735_v23, 1 }
 0x815   :  { %v1041_v26 = vadd.f32 %v1040_v49, %v1039_v34  ;;  %v1688_v34 = vpack.c.bf16 %v9483_v24, %v9477_v11 }
 0x816   :  { %7332 = vmatpush3.bf16.msra.mxu1 %v9396_v50  ;;  %v1042_v55 = vsel %vm236_vm0, %v1030_v40, 0.0  ;;  %v1057_v51 = vpack.c.bf16 %v1030_v40, %v1029_v27  ;;  %v1365_v50 = vadd.f32 %v1364_v41, %v9422_v59  ;;  %v737_v54 = vadd.f32 %v736_v48, %v735_v23 }
 0x817   :  { %7333 = vmatprep.subr.bf16.mxu1 %v9463_v35  ;;  %v1043_v30 = vadd.f32 %v1042_v55, %v1041_v26 }
 0x818   :  { %7309 = vmatprep.mubr.msk.bf16.mxu1 %vm236_vm0, %v1057_v51  ;;  %v1366_v21 = vrot.slane %v1365_v50, 2 }
 0x819   :  { %v1045_v18 = vadd.f32 %v1044_v36, %v1043_v30  ;;  %7310 = vmatmul.mubr.msk.bf16.gmra.mrb[44].mxu1 %vm236_vm0, %v1058_v29 }
 0x81a   :  { %7334 = vmatpush3.bf16.msra.mxu1 %v9463_v35  ;;  %7337 = vmatprep.mubr.msk.bf16.mxu1 %vm236_vm0, %v1371_v15  ;;  %v1373_v35 = vpack.c.bf16 %v9405_v45, %v9390_v1  ;;  %v1367_v33 = vadd.f32 %v1366_v21, %v1365_v50  ;;  %v1687_v45 = vpack.c.bf16 %v9480_v19, %v9474_v57 }
 0x81b   :  { %v1047_v32 = vadd.f32 %v1046_v37, %v1045_v18  ;;  %7335 = vmatprep.subr.bf16.mxu1 %v9519_v42 }
 0x81c   :  { %v1368_v58 = vrot.slane %v1367_v33, 1 }
 0x81d   :  { %v1048_v53 = vrot.slane %v1047_v32, 4 }
 0x81e   :  { %7336 = vmatpush3.bf16.msra.mxu1 %v9519_v42  ;;  %v1696_v42 = vpop.permute.xlu1 %1695  ;;  %v1369_v9 = vadd.f32 %v1368_v58, %v1367_v33 }
 0x81f   :  { %v1049_v59 = vadd.f32 %v1048_v53, %v1047_v32  ;;  %7361 = vmatprep.subr.bf16.mxu1 %v1692_v46 }
 0x821   :  { %v1050_v60 = vrot.slane %v1049_v59, 2  ;;  %7338 = vmatmul.mubr.msk.bf16.vlgmr.msra.gmra.mrb[48].mxu1 %vm236_vm0, %v1372_v17 }
 0x822   :  { %7362 = vmatpush3.bf16.msra.mxu1 %v1692_v46  ;;  %7341 = vmatprep.mubr.msk.bf16.mxu1 %vm236_vm0, %v1373_v35  ;;  %v1698_v61 = vpop.permute.xlu1 %1697 }
 0x823   :  { %v1051_v31 = vadd.f32 %v1050_v60, %v1049_v59  ;;  %7363 = vmatprep.subr.bf16.mxu1 %v1694_v4 }
 0x825   :  { %v1052_v27 = vrot.slane %v1051_v31, 1 }
 0x826   :  { %7364 = vmatpush3.bf16.msra.mxu1 %v1694_v4 }
 0x827   :  { %7365 = vmatprep.subr.bf16.mxu1 %v1696_v42  ;;  %v1053_v1 = vadd.f32 %v1052_v27, %v1051_v31 }
 0x829   :  { %7342 = vmatmul.mubr.msk.bf16.gmra.mrb[52].mxu1 %vm236_vm0, %v1374_v52  ;;  %v1054_v14 = vadd.f32 %v1053_v1, %v737_v54 }
 0x82a   :  { %7366 = vmatpush3.bf16.msra.mxu1 %v1696_v42  ;;  %7369 = vmatprep.mubr.msk.bf16.mxu1 %vm236_vm0, %v1687_v45 }
 0x82b   :  { %7367 = vmatprep.subr.bf16.mxu1 %v1698_v61  ;;  %v1370_v47 = vadd.f32 %v1369_v9, %v1054_v14 }
 0x82e   :  { %7368 = vmatpush3.bf16.msra.mxu1 %v1698_v61 }
 0x831   :  { %7370 = vmatmul.mubr.msk.bf16.vlgmr.msra.gmra.mrb[56].mxu1 %vm236_vm0, %v1688_v34 }
 0x83d   :  { %v1631_v7 = vpop.xlane.xlu0 %1630  ;;  %v1634_v38 = vpop.xlane.xlu1 %1633 }
 0x83e   :  { %8324 = vrcp.f32 %v1631_v7 }
 0x83f   :  { %8326 = vrcp.f32 %v1634_v38 }
 0x841   :  { %v1637_v57 = vpop.xlane.xlu0 %1636  ;;  %v1907_v19 = vpop.permute.xlu1 %1906 }
 0x842   :  { %8328 = vrcp.f32 %v1637_v57  ;;  %7853 = vmatprep.subr.msk.bf16.mxu1 %vm531_vm2, %v1907_v19  ;;  %v1927_v43 = vsel %vm531_vm2, %v1907_v19, 0 }
 0x843   :  { %7378 = vmatpush3.bf16.xpose.msra.mxu1 %v1927_v43 }
 0x845   :  { %v1640_v40 = vpop.xlane.xlu0 %1639  ;;  %v1911_v2 = vpop.permute.xlu1 %1910 }
 0x846   :  { %8330 = vrcp.f32 %v1640_v40  ;;  %v1933_v25 = vsel %vm531_vm2, %v1911_v2, 0 }
 0x848   :  { %v8325_v49 = vpop.eup %8324 }
 0x849   :  { %v8327_v20 = vpop.eup %8326  ;;  %v1909_v26 = vpop.permute.xlu0 %1908  ;;  %v1661_v11 = vmul.f32 %v8325_v49, %v9491_v39 }
 0x84a   :  { %7854 = vmatprep.subr.msk.bf16.mxu1 %vm531_vm2, %v1909_v26  ;;  %v1930_v24 = vsel %vm531_vm2, %v1909_v26, 0  ;;  %v1662_v41 = vmul.f32 %v8327_v20, %v9493_v28  ;;  %v1913_v53 = vpop.permute.xlu1 %1912 }
 0x84b   :  { %v1672_v55 = vsel %vm236_vm0, %v1661_v11, 0.0  ;;  %7380 = vmatpush3.bf16.xpose.msra.mxu1 %v1930_v24 }
 0x84c   :  { %v8329_v51 = vpop.eup %8328  ;;  %v1673_v30 = vadd.f32 %v1672_v55, %v9497_v0  ;;  %v1689_v29 = vpack.c.bf16 %v1662_v41, %v1661_v11  ;;  %7855 = vmatprep.subr.msk.bf16.mxu1 %vm531_vm2, %v1911_v2  ;;  %v1674_v36 = vsel %vm236_vm0, %v1662_v41, 0.0 }
 0x84d   :  { %v1663_v39 = vmul.f32 %v8329_v51, %v9501_v56 }
 0x84e   :  { %v1675_v15 = vadd.f32 %v1674_v36, %v1673_v30  ;;  %7373 = vmatprep.mubr.msk.bf16.mxu1 %vm236_vm0, %v1689_v29 }
 0x84f   :  { %v1676_v18 = vsel %vm236_vm0, %v1663_v39, 0.0 }
 0x850   :  { %v8331_v28 = vpop.eup %8330  ;;  %v1677_v50 = vadd.f32 %v1676_v18, %v1675_v15 }
 0x851   :  { %v1664_v37 = vmul.f32 %v8331_v28, %v9507_v8  ;;  %v1936_v8 = vsel %vm531_vm2, %v1913_v53, 0 }
 0x853   :  { %v1678_v0 = vsel %vm236_vm0, %v1664_v37, 0.0  ;;  %v1690_v32 = vpack.c.bf16 %v1664_v37, %v1663_v39  ;;  %7382 = vmatpush3.bf16.xpose.msra.mxu1 %v1933_v25 }
 0x854   :  { %v1679_v21 = vadd.f32 %v1678_v0, %v1677_v50  ;;  %7856 = vmatprep.subr.msk.bf16.mxu1 %vm531_vm2, %v1913_v53 }
 0x855   :  { %7374 = vmatmul.mubr.msk.bf16.gmra.mrb[60].mxu1 %vm236_vm0, %v1690_v32 }
 0x856   :  { %v1680_v56 = vrot.slane %v1679_v21, 4  ;;  %7385 = vmatprep.mubr.msk.bf16.mxu1 %vm531_vm2, %v8993_v63 }
 0x858   :  { %v1681_v4 = vadd.f32 %v1680_v56, %v1679_v21 }
 0x85a   :  { %v1682_v46 = vrot.slane %v1681_v4, 2 }
 0x85b   :  { %7384 = vmatpush3.bf16.xpose.msra.mxu1 %v1936_v8 }
 0x85c   :  { %v1683_v23 = vadd.f32 %v1682_v46, %v1681_v4 }
 0x85e   :  { %v1684_v17 = vrot.slane %v1683_v23, 1 }
 0x860   :  { %v1685_v59 = vadd.f32 %v1684_v17, %v1683_v23 }
 0x862   :  { %v9591_v35 = vadd.f32 %v1685_v59, %v1370_v47  ;;  %7386 = vmatmul.mubr.msk.bf16.vlgmr.msra.gmra.mrb[64].mxu1 %vm531_vm2, %v8991_v62 }
 0x863   :  { %7389 = vmatprep.mubr.msk.bf16.mxu1 %vm531_vm2, %v8997_v13 }
 0x864   :  { %11686 = vst [vmem:[#allocation22_spill] sm:$0xff] %v9591_v35 }
 0x86a   :  { %7390 = vmatmul.mubr.msk.bf16.gmra.mrb[68].mxu1 %vm531_vm2, %v8995_v12 }
 0x8e4   :  { %v9599_v60 = vpop.f32.mrb[40].mxu1 }
 0x8e5   :  { %v9601_v33 = vpop.f32.mrb[41].mxu1 }
 0x8e6   :  { %v9603_v31 = vpop.f32.mrb[42].mxu1 }
 0x8e7   :  { %v9607_v42 = vpop.f32.mrb[43].mxu1 }
 0x8ec   :  { %v9611_v58 = vpop.f32.mrb[44].mxu1 }
 0x8ed   :  { %v9613_v52 = vpop.f32.mrb[45].mxu1 }
 0x8ee   :  { %v9615_v54 = vpop.f32.mrb[46].mxu1 }
 0x8ef   :  { %v9619_v45 = vpop.f32.mrb[47].mxu1 }
 0x8f4   :  { %v9623_v9 = vpop.f32.mrb[48].mxu1 }
 0x8f5   :  { %v9625_v61 = vpop.f32.mrb[49].mxu1 }
 0x8f6   :  { %v9627_v47 = vpop.f32.mrb[50].mxu1 }
 0x8f7   :  { %v9631_v7 = vpop.f32.mrb[51].mxu1 }
 0x8fc   :  { %v9635_v57 = vpop.f32.mrb[52].mxu1 }
 0x8fd   :  { %v9637_v19 = vpop.f32.mrb[53].mxu1 }
 0x8fe   :  { %v9639_v43 = vpop.f32.mrb[54].mxu1 }
 0x8ff   :  { %v9643_v49 = vpop.f32.mrb[55].mxu1 }
 0x904   :  { %v9647_v26 = vpop.f32.mrb[56].mxu1 }
 0x905   :  { %v9649_v11 = vpop.f32.mrb[57].mxu1 }
 0x906   :  { %v9651_v24 = vpop.f32.mrb[58].mxu1 }
 0x907   :  { %v9655_v55 = vpop.f32.mrb[59].mxu1 }
 0x928   :  { %v9659_v2 = vpop.f32.mrb[60].mxu1 }
 0x929   :  { %v9661_v30 = vpop.f32.mrb[61].mxu1 }
 0x92a   :  { %v9663_v29 = vpop.f32.mrb[62].mxu1 }
 0x92b   :  { %v9667_v39 = vpop.f32.mrb[63].mxu1 }
 0x935   :  { %v7387_v18 = vpop.f32.mrb[64].mxu1 }
 0x936   :  { %v1972_v28 = vpop.f32.mrb[65].mxu1  ;;  %v2009_v50 = vsel %vm236_vm0, %v7387_v18, -inf }
 0x937   :  { %2010 = vmax.xlane.f32.xlu0 %v2009_v50  ;;  %v7388_v37 = vpop.f32.mrb[66].mxu1  ;;  %v2003_v32 = vsel %vm236_vm0, %v1972_v28, -inf }
 0x938   :  { %v1975_v25 = vpop.f32.mrb[67].mxu1  ;;  %v2012_v56 = vsel %vm236_vm0, %v7388_v37, -inf }
 0x939   :  { %v2006_v0 = vsel %vm236_vm0, %v1975_v25, -inf }
 0x93a   :  { %2007 = vmax.xlane.f32.xlu1 %v2006_v0 }
 0x93b   :  { %2004 = vmax.xlane.f32.xlu0 %v2003_v32 }
 0x93d   :  { %v7391_v53 = vpop.f32.mrb[68].mxu1 }
 0x93e   :  { %v1988_v21 = vpop.f32.mrb[69].mxu1  ;;  %v2021_v4 = vsel %vm236_vm0, %v7391_v53, -inf }
 0x93f   :  { %2013 = vmax.xlane.f32.xlu0 %v2012_v56  ;;  %2022 = vmax.xlane.f32.xlu1 %v2021_v4  ;;  %v7392_v46 = vpop.f32.mrb[70].mxu1  ;;  %v2015_v17 = vsel %vm236_vm0, %v1988_v21, -inf }
 0x940   :  { %v9676_v8 = vpop.f32.mrb[71].mxu1  ;;  %v2024_v59 = vsel %vm236_vm0, %v7392_v46, -inf }
 0x941   :  { %v2018_v23 = vsel %vm236_vm0, %v9676_v8, -inf }
 0x943   :  { %2016 = vmax.xlane.f32.xlu1 %v2015_v17  ;;  %2019 = vmax.xlane.f32.xlu0 %v2018_v23 }
 0x947   :  { %2025 = vmax.xlane.f32.xlu0 %v2024_v59 }
 0x954   :  { %2125 = vrot.lane.b32.xlu1 %v8993_v63, %s8718_s4 }
 0x958   :  { %2129 = vrot.lane.b32.xlu1 %v8997_v13, %s8718_s4 }
 0x95c   :  { %2131 = vrot.lane.b32.xlu1 %v8995_v12, %s8718_s4 }
 0x95d   :  { %2127 = vrot.lane.b32.xlu0 %v8991_v62, %s8718_s4 }
 0x960   :  { %2222 = vrot.lane.b32.xlu1 %v8993_v63, %s8719_s17 }
 0x9c4   :  { %v2011_v50 = vpop.xlane.xlu0 %2010 }
 0x9c5   :  { %v2029_v0 = vsub.f32 %v7387_v18, %v2011_v50 }
 0x9c7   :  { %v2039_v32 = vmul.f32 1.442695, %v2029_v0  ;;  %v2008_v56 = vpop.xlane.xlu1 %2007 }
 0x9c8   :  { %v2005_v4 = vpop.xlane.xlu0 %2004  ;;  %v2028_v17 = vsub.f32 %v1975_v25, %v2008_v56 }
 0x9c9   :  { %8332 = vpow2.f32 %v2039_v32  ;;  %v2027_v23 = vsub.f32 %v1972_v28, %v2005_v4 }
 0x9ca   :  { %v2037_v36 = vmul.f32 1.442695, %v2028_v17 }
 0x9cb   :  { %v2035_v59 = vmul.f32 1.442695, %v2027_v23 }
 0x9cc   :  { %v2014_v15 = vpop.xlane.xlu0 %2013  ;;  %v2023_v20 = vpop.xlane.xlu1 %2022 }
 0x9cd   :  { %8334 = vpow2.f32 %v2035_v59  ;;  %v2030_v14 = vsub.f32 %v7388_v37, %v2014_v15  ;;  %v2033_v40 = vsub.f32 %v7391_v53, %v2023_v20 }
 0x9cf   :  { %v2041_v51 = vmul.f32 1.442695, %v2030_v14  ;;  %v2047_v18 = vmul.f32 1.442695, %v2033_v40 }
 0x9d0   :  { %v2017_v38 = vpop.xlane.xlu1 %2016  ;;  %v2020_v1 = vpop.xlane.xlu0 %2019 }
 0x9d1   :  { %8336 = vpow2.f32 %v2041_v51  ;;  %v2031_v50 = vsub.f32 %v1988_v21, %v2017_v38 }
 0x9d2   :  { %8338 = vpow2.f32 %v2037_v36 }
 0x9d3   :  { %v9692_v41 = vpop.eup %8332  ;;  %8340 = vpow2.f32 %v2047_v18  ;;  %v2043_v14 = vmul.f32 1.442695, %v2031_v50 }
 0x9d4   :  { %v2126_v0 = vpop.permute.xlu1 %2125  ;;  %v2026_v32 = vpop.xlane.xlu0 %2025  ;;  %v2057_v28 = vsel %vm236_vm0, %v9692_v41, 0.0 }
 0x9d5   :  { %2058 = vadd.xlane.f32.xlu1 %v2057_v28  ;;  %7393 = vmatprep.subr.bf16.mxu0 %v2126_v0  ;;  %v2034_v20 = vsub.f32 %v7392_v46, %v2026_v32  ;;  %8342 = vpow2.f32 %v2043_v14 }
 0x9d6   :  { %7394 = vmatpush3.bf16.msra.mxu0 %v2126_v0  ;;  %v2032_v0 = vsub.f32 %v9676_v8, %v2020_v1 }
 0x9d7   :  { %v8335_v15 = vpop.eup %8334  ;;  %v2049_v40 = vmul.f32 1.442695, %v2034_v20 }
 0x9d8   :  { %v2130_v37 = vpop.permute.xlu1 %2129  ;;  %v2128_v25 = vpop.permute.xlu0 %2127  ;;  %v2051_v51 = vsel %vm236_vm0, %v8335_v15, 0.0  ;;  %v2045_v32 = vmul.f32 1.442695, %v2032_v0 }
 0x9d9   :  { %2052 = vadd.xlane.f32.xlu1 %v2051_v51  ;;  %7395 = vmatprep.subr.bf16.mxu0 %v2128_v25  ;;  %8344 = vpow2.f32 %v2049_v40 }
 0x9da   :  { %7396 = vmatpush3.bf16.msra.mxu0 %v2128_v25  ;;  %8346 = vpow2.f32 %v2045_v32 }
 0x9db   :  { %v8337_v38 = vpop.eup %8336  ;;  %7397 = vmatprep.subr.bf16.mxu0 %v2130_v37 }
 0x9dc   :  { %v2132_v36 = vpop.permute.xlu1 %2131  ;;  %v2060_v53 = vsel %vm236_vm0, %v8337_v38, 0.0  ;;  %v8339_v21 = vpop.eup %8338 }
 0x9dd   :  { %2061 = vadd.xlane.f32.xlu0 %v2060_v53  ;;  %v2054_v46 = vsel %vm236_vm0, %v8339_v21, 0.0  ;;  %v9699_v56 = vpop.eup %8340 }
 0x9de   :  { %7398 = vmatpush3.bf16.msra.mxu0 %v2130_v37  ;;  %v2069_v23 = vsel %vm236_vm0, %v9699_v56, 0.0 }
 0x9df   :  { %7399 = vmatprep.subr.bf16.mxu0 %v2132_v36  ;;  %v8343_v17 = vpop.eup %8342 }
 0x9e0   :  { %v2223_v4 = vpop.permute.xlu1 %2222  ;;  %v2063_v59 = vsel %vm236_vm0, %v8343_v17, 0.0 }
 0x9e1   :  { %2055 = vadd.xlane.f32.xlu0 %v2054_v46 }
 0x9e2   :  { %7400 = vmatpush3.bf16.msra.mxu0 %v2132_v36 }
 0x9e3   :  { %7857 = vmatprep.subr.msk.bf16.mxu0 %vm531_vm2, %v2223_v4  ;;  %v9705_v18 = vpop.eup %8344 }
 0x9e4   :  { %v2072_v50 = vsel %vm236_vm0, %v9705_v18, 0.0  ;;  %v9716_v28 = vpop.eup %8346 }
 0x9e5   :  { %2070 = vadd.xlane.f32.xlu0 %v2069_v23  ;;  %v2066_v14 = vsel %vm236_vm0, %v9716_v28, 0.0 }
 0x9e9   :  { %2064 = vadd.xlane.f32.xlu0 %v2063_v59 }
 0x9ea   :  { %2226 = vrot.lane.b32.xlu1 %v8997_v13, %s8719_s17 }
 0x9ed   :  { %2073 = vadd.xlane.f32.xlu0 %v2072_v50 }
 0xa03   :  { %2224 = vrot.lane.b32.xlu0 %v8991_v62, %s8719_s17 }
 0xa07   :  { %2214 = vrot.lane.b32.xlu0 %v8993_v63, %s8721_s19 }
 0xa0b   :  { %2218 = vrot.lane.b32.xlu0 %v8997_v13, %s8721_s19 }
 0xa0e   :  { %2067 = vadd.xlane.f32.xlu1 %v2066_v14 }
 0xa1f   :  { %2228 = vrot.lane.b32.xlu1 %v8995_v12, %s8719_s17 }
 0xa23   :  { %2216 = vrot.lane.b32.xlu1 %v8991_v62, %s8721_s19 }
 0xa27   :  { %2220 = vrot.lane.b32.xlu1 %v8995_v12, %s8721_s19 }
 0xa62   :  { %v2059_v1 = vpop.xlane.xlu1 %2058 }
 0xa66   :  { %v2053_v8 = vpop.xlane.xlu1 %2052 }
 0xa67   :  { %8348 = vrcp.f32 %v2053_v8 }
 0xa6a   :  { %v2062_v20 = vpop.xlane.xlu0 %2061 }
 0xa6b   :  { %8350 = vrcp.f32 %v2062_v20 }
 0xa6c   :  { %8352 = vrcp.f32 %v2059_v1 }
 0xa6e   :  { %v2056_v37 = vpop.xlane.xlu0 %2055 }
 0xa6f   :  { %8354 = vrcp.f32 %v2056_v37 }
 0xa71   :  { %v8349_v51 = vpop.eup %8348 }
 0xa72   :  { %v2071_v25 = vpop.xlane.xlu0 %2070  ;;  %v2091_v46 = vmul.f32 %v8349_v51, %v8335_v15  ;;  %v2243_v15 = vsel %vm531_vm2, %v2223_v4, 0 }
 0xa74   :  { %v2099_v14 = vsel %vm236_vm0, %v2091_v46, 0.0 }
 0xa75   :  { %v8351_v40 = vpop.eup %8350 }
 0xa76   :  { %v2065_v36 = vpop.xlane.xlu0 %2064  ;;  %v8353_v53 = vpop.eup %8352  ;;  %v2094_v59 = vmul.f32 %v8351_v40, %v8337_v38 }
 0xa77   :  { %8356 = vrcp.f32 %v2065_v36  ;;  %v2093_v50 = vmul.f32 %v8353_v53, %v9692_v41 }
 0xa78   :  { %v2104_v41 = vsel %vm236_vm0, %v2094_v59, 0.0 }
 0xa79   :  { %v8355_v23 = vpop.eup %8354  ;;  %v2122_v20 = vpack.c.bf16 %v2094_v59, %v2093_v50  ;;  %v2102_v34 = vsel %vm236_vm0, %v2093_v50, 0.0 }
 0xa7a   :  { %v2074_v0 = vpop.xlane.xlu0 %2073  ;;  %v2092_v32 = vmul.f32 %v8355_v23, %v8339_v21  ;;  %v2227_v23 = vpop.permute.xlu1 %2226 }
 0xa7b   :  { %8358 = vrcp.f32 %v2074_v0 }
 0xa7c   :  { %v2100_v8 = vsel %vm236_vm0, %v2092_v32, 0.0  ;;  %v2121_v1 = vpack.c.bf16 %v2092_v32, %v2091_v46  ;;  %8360 = vrcp.f32 %v2071_v25 }
 0xa7d   :  { %v2101_v37 = vadd.f32 %v2100_v8, %v2099_v14 }
 0xa7e   :  { %7401 = vmatprep.mubr.msk.bf16.mxu0 %vm236_vm0, %v2121_v1  ;;  %v2225_v27 = vpop.permute.xlu0 %2224 }
 0xa7f   :  { %v2103_v36 = vadd.f32 %v2102_v34, %v2101_v37  ;;  %7402 = vmatmul.mubr.msk.bf16.vlgmr.msra.gmra.mrb[48].mxu0 %vm236_vm0, %v2122_v20  ;;  %v2246_v46 = vsel %vm531_vm2, %v2225_v27, 0  ;;  %v2249_v34 = vsel %vm531_vm2, %v2227_v23, 0 }
 0xa80   :  { %7410 = vmatpush3.bf16.xpose.msra.mxu0 %v2243_v15 }
 0xa81   :  { %v8357_v38 = vpop.eup %8356  ;;  %7858 = vmatprep.subr.msk.bf16.mxu0 %vm531_vm2, %v2225_v27  ;;  %v2105_v21 = vadd.f32 %v2104_v41, %v2103_v36 }
 0xa82   :  { %v2095_v51 = vmul.f32 %v8357_v38, %v8343_v17  ;;  %v2215_v15 = vpop.permute.xlu0 %2214 }
 0xa84   :  { %v2106_v40 = vsel %vm236_vm0, %v2095_v51, 0.0 }
 0xa85   :  { %v2107_v53 = vadd.f32 %v2106_v40, %v2105_v21  ;;  %v8359_v50 = vpop.eup %8358 }
 0xa86   :  { %v8361_v32 = vpop.eup %8360  ;;  %v2098_v14 = vmul.f32 %v8359_v50, %v9705_v18 }
 0xa87   :  { %v2097_v1 = vmul.f32 %v8361_v32, %v9699_v56 }
 0xa88   :  { %7412 = vmatpush3.bf16.xpose.msra.mxu0 %v2246_v46  ;;  %v2112_v38 = vsel %vm236_vm0, %v2098_v14, 0.0 }
 0xa89   :  { %7859 = vmatprep.subr.msk.bf16.mxu0 %vm531_vm2, %v2227_v23  ;;  %v2124_v37 = vpack.c.bf16 %v2098_v14, %v2097_v1  ;;  %v2110_v36 = vsel %vm236_vm0, %v2097_v1, 0.0 }
 0xa90   :  { %7414 = vmatpush3.bf16.xpose.msra.mxu0 %v2249_v34 }
 0xa9b   :  { %v2068_v4 = vpop.xlane.xlu1 %2067 }
 0xa9c   :  { %8362 = vrcp.f32 %v2068_v4 }
 0xa9f   :  { %v2229_v59 = vpop.permute.xlu1 %2228 }
 0xaa0   :  { %7860 = vmatprep.subr.msk.bf16.mxu0 %vm531_vm2, %v2229_v59  ;;  %v2252_v17 = vsel %vm531_vm2, %v2229_v59, 0 }
 0xaa1   :  { %7416 = vmatpush3.bf16.xpose.msra.mxu0 %v2252_v17 }
 0xaa3   :  { %v2217_v56 = vpop.permute.xlu1 %2216 }
 0xaa6   :  { %v8363_v27 = vpop.eup %8362 }
 0xaa7   :  { %v2096_v8 = vmul.f32 %v8363_v27, %v9716_v28  ;;  %v2219_v28 = vpop.permute.xlu0 %2218  ;;  %v2221_v21 = vpop.permute.xlu1 %2220 }
 0xaa9   :  { %v2108_v0 = vsel %vm236_vm0, %v2096_v8, 0.0  ;;  %v2123_v25 = vpack.c.bf16 %v2096_v8, %v2095_v51 }
 0xaaa   :  { %v2109_v20 = vadd.f32 %v2108_v0, %v2107_v53 }
 0xaab   :  { %7405 = vmatprep.mubr.msk.bf16.mxu0 %vm236_vm0, %v2123_v25 }
 0xaac   :  { %v2111_v41 = vadd.f32 %v2110_v36, %v2109_v20  ;;  %7406 = vmatmul.mubr.msk.bf16.gmra.mrb[52].mxu0 %vm236_vm0, %v2124_v37 }
 0xaad   :  { %7417 = vmatprep.mubr.msk.bf16.mxu0 %vm531_vm2, %v2215_v15 }
 0xaae   :  { %v9752_v18 = vadd.f32 %v2112_v38, %v2111_v41 }
 0xab4   :  { %7418 = vmatmul.mubr.msk.bf16.vlgmr.msra.gmra.mrb[56].mxu0 %vm531_vm2, %v2217_v56 }
 0xab5   :  { %7421 = vmatprep.mubr.msk.bf16.mxu0 %vm531_vm2, %v2219_v28 }
 0xabc   :  { %7422 = vmatmul.mubr.msk.bf16.gmra.mrb[60].mxu0 %vm531_vm2, %v2221_v21 }
 0xb52   :  { %v9757_v51 = vpop.f32.mrb[48].mxu0 }
 0xb53   :  { %11687 = vst [vmem:[#allocation23_spill] sm:$0xff] %v9757_v51  ;;  %v9759_v40 = vpop.f32.mrb[49].mxu0 }
 0xb54   :  { %11688 = vst [vmem:[#allocation24_spill] sm:$0xff] %v9759_v40  ;;  %v9761_v53 = vpop.f32.mrb[50].mxu0 }
 0xb55   :  { %11689 = vst [vmem:[#allocation25_spill] sm:$0xff] %v9761_v53  ;;  %v9763_v46 = vpop.f32.mrb[51].mxu0 }
 0xb56   :  { %11690 = vst [vmem:[#allocation26_spill] sm:$0xff] %v9763_v46 }
 0xb7f   :  { %v9765_v23 = vpop.f32.mrb[52].mxu0 }
 0xb80   :  { %11691 = vst [vmem:[#allocation27_spill] sm:$0xff] %v9765_v23  ;;  %v9767_v34 = vpop.f32.mrb[53].mxu0 }
 0xb81   :  { %11692 = vst [vmem:[#allocation28_spill] sm:$0xff] %v9767_v34  ;;  %v9769_v4 = vpop.f32.mrb[54].mxu0 }
 0xb82   :  { %11693 = vst [vmem:[#allocation29_spill] sm:$0xff] %v9769_v4  ;;  %v9771_v59 = vpop.f32.mrb[55].mxu0 }
 0xb83   :  { %11694 = vst [vmem:[#allocation30_spill] sm:$0xff] %v9771_v59 }
 0xb87   :  { %v7419_v17 = vpop.f32.mrb[56].mxu0 }
 0xb88   :  { %v2288_v50 = vpop.f32.mrb[57].mxu0  ;;  %v2325_v32 = vsel %vm236_vm0, %v7419_v17, -inf }
 0xb89   :  { %2326 = vmax.xlane.f32.xlu0 %v2325_v32  ;;  %v7420_v27 = vpop.f32.mrb[58].mxu0  ;;  %v2319_v1 = vsel %vm236_vm0, %v2288_v50, -inf }
 0xb8a   :  { %v2291_v14 = vpop.f32.mrb[59].mxu0  ;;  %v2328_v20 = vsel %vm236_vm0, %v7420_v27, -inf }
 0xb8b   :  { %v2322_v8 = vsel %vm236_vm0, %v2291_v14, -inf }
 0xb8c   :  { %2323 = vmax.xlane.f32.xlu1 %v2322_v8 }
 0xb8d   :  { %2320 = vmax.xlane.f32.xlu0 %v2319_v1 }
 0xb8f   :  { %v7423_v0 = vpop.f32.mrb[60].mxu0 }
 0xb90   :  { %v2304_v25 = vpop.f32.mrb[61].mxu0  ;;  %v2337_v37 = vsel %vm236_vm0, %v7423_v0, -inf }
 0xb91   :  { %2329 = vmax.xlane.f32.xlu0 %v2328_v20  ;;  %2338 = vmax.xlane.f32.xlu1 %v2337_v37  ;;  %v7424_v36 = vpop.f32.mrb[62].mxu0  ;;  %v2331_v38 = vsel %vm236_vm0, %v2304_v25, -inf }
 0xb92   :  { %v9778_v15 = vpop.f32.mrb[63].mxu0  ;;  %v2340_v56 = vsel %vm236_vm0, %v7424_v36, -inf }
 0xb93   :  { %v2334_v41 = vsel %vm236_vm0, %v9778_v15, -inf }
 0xb95   :  { %2332 = vmax.xlane.f32.xlu1 %v2331_v38  ;;  %2335 = vmax.xlane.f32.xlu0 %v2334_v41 }
 0xb99   :  { %2341 = vmax.xlane.f32.xlu0 %v2340_v56 }
 0xba6   :  { %2441 = vrot.lane.b32.xlu1 %v8993_v63, %s8725_s23 }
 0xbaa   :  { %2445 = vrot.lane.b32.xlu1 %v8997_v13, %s8725_s23 }
 0xbae   :  { %2447 = vrot.lane.b32.xlu1 %v8995_v12, %s8725_s23 }
 0xbaf   :  { %2443 = vrot.lane.b32.xlu0 %v8991_v62, %s8725_s23 }
 0xbb2   :  { %2538 = vrot.lane.b32.xlu1 %v8993_v63, %s8720_s18 }
 0xc16   :  { %v2327_v28 = vpop.xlane.xlu0 %2326 }
 0xc17   :  { %v2345_v21 = vsub.f32 %v7419_v17, %v2327_v28 }
 0xc19   :  { %v2355_v32 = vmul.f32 1.442695, %v2345_v21  ;;  %v2324_v8 = vpop.xlane.xlu1 %2323 }
 0xc1a   :  { %v2321_v1 = vpop.xlane.xlu0 %2320  ;;  %v2344_v41 = vsub.f32 %v2291_v14, %v2324_v8 }
 0xc1b   :  { %8364 = vpow2.f32 %v2355_v32  ;;  %v2343_v20 = vsub.f32 %v2288_v50, %v2321_v1 }
 0xc1c   :  { %v2353_v4 = vmul.f32 1.442695, %v2344_v41 }
 0xc1d   :  { %v2351_v37 = vmul.f32 1.442695, %v2343_v20 }
 0xc1e   :  { %v2339_v38 = vpop.xlane.xlu1 %2338  ;;  %v2330_v56 = vpop.xlane.xlu0 %2329 }
 0xc1f   :  { %8366 = vpow2.f32 %v2351_v37  ;;  %v2346_v48 = vsub.f32 %v7420_v27, %v2330_v56  ;;  %v2349_v34 = vsub.f32 %v7423_v0, %v2339_v38 }
 0xc21   :  { %v2357_v23 = vmul.f32 1.442695, %v2346_v48  ;;  %v2363_v17 = vmul.f32 1.442695, %v2349_v34 }
 0xc22   :  { %v2333_v59 = vpop.xlane.xlu1 %2332  ;;  %v2336_v40 = vpop.xlane.xlu0 %2335 }
 0xc23   :  { %8368 = vpow2.f32 %v2357_v23  ;;  %v2347_v28 = vsub.f32 %v2304_v25, %v2333_v59 }
 0xc24   :  { %8370 = vpow2.f32 %v2353_v4 }
 0xc25   :  { %v9794_v46 = vpop.eup %8364  ;;  %8372 = vpow2.f32 %v2363_v17  ;;  %v2359_v48 = vmul.f32 1.442695, %v2347_v28 }
 0xc26   :  { %v2442_v21 = vpop.permute.xlu1 %2441  ;;  %v2342_v32 = vpop.xlane.xlu0 %2341  ;;  %v2373_v50 = vsel %vm236_vm0, %v9794_v46, 0.0 }
 0xc27   :  { %7425 = vmatprep.subr.bf16.mxu1 %v2442_v21  ;;  %2374 = vadd.xlane.f32.xlu1 %v2373_v50  ;;  %v2350_v14 = vsub.f32 %v7424_v36, %v2342_v32  ;;  %8374 = vpow2.f32 %v2359_v48 }
 0xc28   :  { %7426 = vmatpush3.bf16.msra.mxu1 %v2442_v21  ;;  %v2348_v21 = vsub.f32 %v9778_v15, %v2336_v40 }
 0xc29   :  { %v8367_v27 = vpop.eup %8366  ;;  %v2365_v4 = vmul.f32 1.442695, %v2350_v14 }
 0xc2a   :  { %v2446_v0 = vpop.permute.xlu1 %2445  ;;  %v2444_v8 = vpop.permute.xlu0 %2443  ;;  %v2367_v23 = vsel %vm236_vm0, %v8367_v27, 0.0  ;;  %v2361_v32 = vmul.f32 1.442695, %v2348_v21 }
 0xc2b   :  { %2368 = vadd.xlane.f32.xlu1 %v2367_v23  ;;  %7427 = vmatprep.subr.bf16.mxu1 %v2444_v8  ;;  %8376 = vpow2.f32 %v2365_v4 }
 0xc2c   :  { %7428 = vmatpush3.bf16.msra.mxu1 %v2444_v8  ;;  %8378 = vpow2.f32 %v2361_v32 }
 0xc2d   :  { %7429 = vmatprep.subr.bf16.mxu1 %v2446_v0  ;;  %v8369_v34 = vpop.eup %8368 }
 0xc2e   :  { %v2448_v59 = vpop.permute.xlu1 %2447  ;;  %v2376_v25 = vsel %vm236_vm0, %v8369_v34, 0.0  ;;  %v8371_v1 = vpop.eup %8370 }
 0xc2f   :  { %2377 = vadd.xlane.f32.xlu0 %v2376_v25  ;;  %v2370_v36 = vsel %vm236_vm0, %v8371_v1, 0.0  ;;  %v9801_v20 = vpop.eup %8372 }
 0xc30   :  { %7430 = vmatpush3.bf16.msra.mxu1 %v2446_v0  ;;  %v2385_v41 = vsel %vm236_vm0, %v9801_v20, 0.0 }
 0xc31   :  { %7431 = vmatprep.subr.bf16.mxu1 %v2448_v59  ;;  %v8375_v38 = vpop.eup %8374 }
 0xc32   :  { %v2539_v37 = vpop.permute.xlu1 %2538  ;;  %v2379_v56 = vsel %vm236_vm0, %v8375_v38, 0.0 }
 0xc33   :  { %2371 = vadd.xlane.f32.xlu0 %v2370_v36 }
 0xc34   :  { %7432 = vmatpush3.bf16.msra.mxu1 %v2448_v59 }
 0xc35   :  { %7861 = vmatprep.subr.msk.bf16.mxu1 %vm531_vm2, %v2539_v37  ;;  %v9807_v17 = vpop.eup %8376 }
 0xc36   :  { %v2388_v28 = vsel %vm236_vm0, %v9807_v17, 0.0  ;;  %v9818_v50 = vpop.eup %8378 }
 0xc37   :  { %2386 = vadd.xlane.f32.xlu0 %v2385_v41  ;;  %v2382_v48 = vsel %vm236_vm0, %v9818_v50, 0.0 }
 0xc3b   :  { %2380 = vadd.xlane.f32.xlu0 %v2379_v56 }
 0xc3c   :  { %2542 = vrot.lane.b32.xlu1 %v8997_v13, %s8720_s18 }
 0xc3f   :  { %2389 = vadd.xlane.f32.xlu0 %v2388_v28 }
 0xc55   :  { %2540 = vrot.lane.b32.xlu0 %v8991_v62, %s8720_s18 }
 0xc59   :  { %2530 = vrot.lane.b32.xlu0 %v8993_v63, %s8723_s21 }
 0xc5d   :  { %2534 = vrot.lane.b32.xlu0 %v8997_v13, %s8723_s21 }
 0xc60   :  { %2383 = vadd.xlane.f32.xlu1 %v2382_v48 }
 0xc71   :  { %2544 = vrot.lane.b32.xlu1 %v8995_v12, %s8720_s18 }
 0xc75   :  { %2532 = vrot.lane.b32.xlu1 %v8991_v62, %s8723_s21 }
 0xc79   :  { %2536 = vrot.lane.b32.xlu1 %v8995_v12, %s8723_s21 }
 0xcb4   :  { %v2375_v40 = vpop.xlane.xlu1 %2374 }
 0xcb8   :  { %v2369_v15 = vpop.xlane.xlu1 %2368 }
 0xcb9   :  { %8380 = vrcp.f32 %v2369_v15 }
 0xcbc   :  { %v2378_v14 = vpop.xlane.xlu0 %2377 }
 0xcbd   :  { %8382 = vrcp.f32 %v2378_v14 }
 0xcbe   :  { %8384 = vrcp.f32 %v2375_v40 }
 0xcc0   :  { %v2372_v0 = vpop.xlane.xlu0 %2371 }
 0xcc1   :  { %8386 = vrcp.f32 %v2372_v0 }
 0xcc3   :  { %v8381_v23 = vpop.eup %8380 }
 0xcc4   :  { %v2387_v8 = vpop.xlane.xlu0 %2386  ;;  %v2407_v36 = vmul.f32 %v8381_v23, %v8367_v27  ;;  %v2559_v27 = vsel %vm531_vm2, %v2539_v37, 0 }
 0xcc6   :  { %v2415_v48 = vsel %vm236_vm0, %v2407_v36, 0.0 }
 0xcc7   :  { %v8383_v4 = vpop.eup %8382 }
 0xcc8   :  { %v2381_v59 = vpop.xlane.xlu0 %2380  ;;  %v8385_v25 = vpop.eup %8384  ;;  %v2410_v56 = vmul.f32 %v8383_v4, %v8369_v34 }
 0xcc9   :  { %8388 = vrcp.f32 %v2381_v59  ;;  %v2409_v28 = vmul.f32 %v8385_v25, %v9794_v46 }
 0xcca   :  { %v2420_v46 = vsel %vm236_vm0, %v2410_v56, 0.0 }
 0xccb   :  { %v8387_v41 = vpop.eup %8386  ;;  %v2438_v14 = vpack.c.bf16 %v2410_v56, %v2409_v28  ;;  %v2418_v51 = vsel %vm236_vm0, %v2409_v28, 0.0 }
 0xccc   :  { %v2390_v21 = vpop.xlane.xlu0 %2389  ;;  %v2408_v32 = vmul.f32 %v8387_v41, %v8371_v1  ;;  %v2543_v41 = vpop.permute.xlu1 %2542 }
 0xccd   :  { %8390 = vrcp.f32 %v2390_v21 }
 0xcce   :  { %v2416_v15 = vsel %vm236_vm0, %v2408_v32, 0.0  ;;  %v2437_v40 = vpack.c.bf16 %v2408_v32, %v2407_v36  ;;  %8392 = vrcp.f32 %v2387_v8 }
 0xccf   :  { %v2417_v0 = vadd.f32 %v2416_v15, %v2415_v48  ;;  %v2114_v48 = vrot.slane %v9752_v18, 4 }
 0xcd0   :  { %7433 = vmatprep.mubr.msk.bf16.mxu1 %vm236_vm0, %v2437_v40  ;;  %v2541_v53 = vpop.permute.xlu0 %2540 }
 0xcd1   :  { %v2419_v59 = vadd.f32 %v2418_v51, %v2417_v0  ;;  %7434 = vmatmul.mubr.msk.bf16.vlgmr.msra.gmra.mrb[72].mxu1 %vm236_vm0, %v2438_v14  ;;  %v2562_v36 = vsel %vm531_vm2, %v2541_v53, 0  ;;  %v2565_v51 = vsel %vm531_vm2, %v2543_v41, 0  ;;  %v2115_v0 = vadd.f32 %v2114_v48, %v9752_v18 }
 0xcd2   :  { %7442 = vmatpush3.bf16.xpose.msra.mxu1 %v2559_v27 }
 0xcd3   :  { %v8389_v34 = vpop.eup %8388  ;;  %7862 = vmatprep.subr.msk.bf16.mxu1 %vm531_vm2, %v2541_v53  ;;  %v2421_v1 = vadd.f32 %v2420_v46, %v2419_v59 }
 0xcd4   :  { %v2411_v23 = vmul.f32 %v8389_v34, %v8375_v38  ;;  %v2531_v34 = vpop.permute.xlu0 %2530 }
 0xcd6   :  { %v2422_v4 = vsel %vm236_vm0, %v2411_v23, 0.0 }
 0xcd7   :  { %v2423_v25 = vadd.f32 %v2422_v4, %v2421_v1  ;;  %v8391_v28 = vpop.eup %8390 }
 0xcd8   :  { %v8393_v32 = vpop.eup %8392  ;;  %v2414_v15 = vmul.f32 %v8391_v28, %v9807_v17 }
 0xcd9   :  { %v2413_v21 = vmul.f32 %v8393_v32, %v9801_v20  ;;  %v2116_v20 = vrot.slane %v2115_v0, 2 }
 0xcda   :  { %7444 = vmatpush3.bf16.xpose.msra.mxu1 %v2562_v36  ;;  %v2428_v17 = vsel %vm236_vm0, %v2414_v15, 0.0 }
 0xcdb   :  { %7863 = vmatprep.subr.msk.bf16.mxu1 %vm531_vm2, %v2543_v41  ;;  %v2440_v27 = vpack.c.bf16 %v2414_v15, %v2413_v21  ;;  %v2426_v46 = vsel %vm236_vm0, %v2413_v21, 0.0 }
 0xce2   :  { %7446 = vmatpush3.bf16.xpose.msra.mxu1 %v2565_v51 }
 0xced   :  { %v2384_v37 = vpop.xlane.xlu1 %2383 }
 0xcee   :  { %8394 = vrcp.f32 %v2384_v37 }
 0xcf1   :  { %v2545_v56 = vpop.permute.xlu1 %2544 }
 0xcf2   :  { %7864 = vmatprep.subr.msk.bf16.mxu1 %vm531_vm2, %v2545_v56  ;;  %v2568_v38 = vsel %vm531_vm2, %v2545_v56, 0 }
 0xcf3   :  { %7448 = vmatpush3.bf16.xpose.msra.mxu1 %v2568_v38 }
 0xcf5   :  { %v2533_v18 = vpop.permute.xlu1 %2532 }
 0xcf8   :  { %v8395_v53 = vpop.eup %8394 }
 0xcf9   :  { %v2412_v40 = vmul.f32 %v8395_v53, %v9818_v50  ;;  %v2537_v32 = vpop.permute.xlu1 %2536 }
 0xcfb   :  { %v2424_v8 = vsel %vm236_vm0, %v2412_v40, 0.0  ;;  %v2439_v14 = vpack.c.bf16 %v2412_v40, %v2411_v23  ;;  %v2117_v23 = vadd.f32 %v2116_v20, %v2115_v0 }
 0xcfc   :  { %v2425_v59 = vadd.f32 %v2424_v8, %v2423_v25  ;;  %v2535_v25 = vpop.permute.xlu0 %2534 }
 0xcfd   :  { %7437 = vmatprep.mubr.msk.bf16.mxu1 %vm236_vm0, %v2439_v14  ;;  %v2118_v37 = vrot.slane %v2117_v23, 1 }
 0xcfe   :  { %v2427_v1 = vadd.f32 %v2426_v46, %v2425_v59  ;;  %7438 = vmatmul.mubr.msk.bf16.gmra.mrb[76].mxu1 %vm236_vm0, %v2440_v27 }
 0xcff   :  { %7449 = vmatprep.mubr.msk.bf16.mxu1 %vm531_vm2, %v2531_v34  ;;  %v2119_v38 = vadd.f32 %v2118_v37, %v2117_v23 }
 0xd00   :  { %v2429_v50 = vadd.f32 %v2428_v17, %v2427_v1 }
 0xd02   :  { %v2430_v4 = vrot.slane %v2429_v50, 4 }
 0xd04   :  { %v2431_v36 = vadd.f32 %v2430_v4, %v2429_v50 }
 0xd06   :  { %v2432_v41 = vrot.slane %v2431_v36, 2  ;;  %7450 = vmatmul.mubr.msk.bf16.vlgmr.msra.gmra.mrb[80].mxu1 %vm531_vm2, %v2533_v18 }
 0xd07   :  { %7453 = vmatprep.mubr.msk.bf16.mxu1 %vm531_vm2, %v2535_v25 }
 0xd08   :  { %v2433_v51 = vadd.f32 %v2432_v41, %v2431_v36 }
 0xd0a   :  { %v2434_v56 = vrot.slane %v2433_v51, 1 }
 0xd0c   :  { %v2435_v28 = vadd.f32 %v2434_v56, %v2433_v51 }
 0xd0e   :  { %7454 = vmatmul.mubr.msk.bf16.gmra.mrb[84].mxu1 %vm531_vm2, %v2537_v32  ;;  %v9859_v53 = vadd.f32 %v2435_v28, %v2119_v38 }
 0xda4   :  { %v9861_v48 = vpop.f32.mrb[72].mxu1 }
 0xda5   :  { %v9863_v15 = vpop.f32.mrb[73].mxu1 }
 0xda6   :  { %v9865_v40 = vpop.f32.mrb[74].mxu1 }
 0xda7   :  { %v9869_v8 = vpop.f32.mrb[75].mxu1 }
 0xdd1   :  { %v9873_v0 = vpop.f32.mrb[76].mxu1 }
 0xdd2   :  { %11695 = vst [vmem:[#allocation31_spill] sm:$0xff] %v9873_v0  ;;  %v9875_v59 = vpop.f32.mrb[77].mxu1 }
 0xdd3   :  { %11696 = vst [vmem:[#allocation32_spill] sm:$0xff] %v9875_v59  ;;  %v9877_v27 = vpop.f32.mrb[78].mxu1 }
 0xdd4   :  { %11697 = vst [vmem:[#allocation33_spill] sm:$0xff] %v9877_v27  ;;  %v9881_v34 = vpop.f32.mrb[79].mxu1 }
 0xdd5   :  { %11698 = vst [vmem:[#allocation34_spill] sm:$0xff] %v9881_v34 }
 0xdd9   :  { %v7451_v17 = vpop.f32.mrb[80].mxu1 }
 0xdda   :  { %v2604_v20 = vpop.f32.mrb[81].mxu1  ;;  %v2641_v50 = vsel %vm236_vm0, %v7451_v17, -inf }
 0xddb   :  { %2642 = vmax.xlane.f32.xlu0 %v2641_v50  ;;  %v7452_v4 = vpop.f32.mrb[82].mxu1  ;;  %v2635_v18 = vsel %vm236_vm0, %v2604_v20, -inf }
 0xddc   :  { %v2607_v23 = vpop.f32.mrb[83].mxu1  ;;  %v2644_v51 = vsel %vm236_vm0, %v7452_v4, -inf }
 0xddd   :  { %v2638_v36 = vsel %vm236_vm0, %v2607_v23, -inf }
 0xdde   :  { %2639 = vmax.xlane.f32.xlu1 %v2638_v36 }
 0xddf   :  { %2636 = vmax.xlane.f32.xlu0 %v2635_v18 }
 0xde1   :  { %v7455_v25 = vpop.f32.mrb[84].mxu1 }
 0xde2   :  { %v2620_v41 = vpop.f32.mrb[85].mxu1  ;;  %v2653_v37 = vsel %vm236_vm0, %v7455_v25, -inf }
 0xde3   :  { %2645 = vmax.xlane.f32.xlu0 %v2644_v51  ;;  %2654 = vmax.xlane.f32.xlu1 %v2653_v37  ;;  %v7456_v56 = vpop.f32.mrb[86].mxu1  ;;  %v2647_v32 = vsel %vm236_vm0, %v2620_v41, -inf }
 0xde4   :  { %v9890_v38 = vpop.f32.mrb[87].mxu1  ;;  %v2656_v50 = vsel %vm236_vm0, %v7456_v56, -inf }
 0xde5   :  { %v2650_v28 = vsel %vm236_vm0, %v9890_v38, -inf }
 0xde7   :  { %2648 = vmax.xlane.f32.xlu1 %v2647_v32  ;;  %2651 = vmax.xlane.f32.xlu0 %v2650_v28 }
 0xdeb   :  { %2657 = vmax.xlane.f32.xlu0 %v2656_v50 }
 0xdf8   :  { %2757 = vrot.lane.b32.xlu1 %v8993_v63, %s8726_s24 }
 0xdfc   :  { %2761 = vrot.lane.b32.xlu1 %v8997_v13, %s8726_s24 }
 0xe00   :  { %2763 = vrot.lane.b32.xlu1 %v8995_v12, %s8726_s24 }
 0xe01   :  { %2759 = vrot.lane.b32.xlu0 %v8991_v62, %s8726_s24 }
 0xe04   :  { %2854 = vrot.lane.b32.xlu1 %v8993_v63, %s8722_s20 }
 0xe68   :  { %v2643_v36 = vpop.xlane.xlu0 %2642 }
 0xe69   :  { %v2661_v18 = vsub.f32 %v7451_v17, %v2643_v36 }
 0xe6b   :  { %v2671_v51 = vmul.f32 1.442695, %v2661_v18  ;;  %v2640_v37 = vpop.xlane.xlu1 %2639 }
 0xe6c   :  { %v2637_v28 = vpop.xlane.xlu0 %2636  ;;  %v2660_v46 = vsub.f32 %v2607_v23, %v2640_v37 }
 0xe6d   :  { %8396 = vpow2.f32 %v2671_v51  ;;  %v2659_v32 = vsub.f32 %v2604_v20, %v2637_v28 }
 0xe6e   :  { %v2669_v27 = vmul.f32 1.442695, %v2660_v46 }
 0xe6f   :  { %v2667_v50 = vmul.f32 1.442695, %v2659_v32 }
 0xe70   :  { %v2655_v1 = vpop.xlane.xlu1 %2654  ;;  %v2646_v14 = vpop.xlane.xlu0 %2645 }
 0xe71   :  { %8398 = vpow2.f32 %v2667_v50  ;;  %v2662_v21 = vsub.f32 %v7452_v4, %v2646_v14  ;;  %v2665_v59 = vsub.f32 %v7455_v25, %v2655_v1 }
 0xe73   :  { %v2673_v0 = vmul.f32 1.442695, %v2662_v21  ;;  %v2679_v17 = vmul.f32 1.442695, %v2665_v59 }
 0xe74   :  { %v2649_v34 = vpop.xlane.xlu1 %2648  ;;  %v2652_v35 = vpop.xlane.xlu0 %2651 }
 0xe75   :  { %8400 = vpow2.f32 %v2673_v0  ;;  %v2663_v36 = vsub.f32 %v2620_v41, %v2649_v34 }
 0xe76   :  { %8402 = vpow2.f32 %v2669_v27 }
 0xe77   :  { %v9906_v16 = vpop.eup %8396  ;;  %8404 = vpow2.f32 %v2679_v17  ;;  %v2675_v21 = vmul.f32 1.442695, %v2663_v36 }
 0xe78   :  { %v2758_v18 = vpop.permute.xlu1 %2757  ;;  %v2658_v51 = vpop.xlane.xlu0 %2657  ;;  %v2689_v20 = vsel %vm236_vm0, %v9906_v16, 0.0 }
 0xe79   :  { %7457 = vmatprep.subr.bf16.mxu0 %v2758_v18  ;;  %2690 = vadd.xlane.f32.xlu1 %v2689_v20  ;;  %v2666_v46 = vsub.f32 %v7456_v56, %v2658_v51  ;;  %8406 = vpow2.f32 %v2675_v21 }
 0xe7a   :  { %7458 = vmatpush3.bf16.msra.mxu0 %v2758_v18  ;;  %v2664_v18 = vsub.f32 %v9890_v38, %v2652_v35 }
 0xe7b   :  { %v8399_v14 = vpop.eup %8398  ;;  %v2681_v27 = vmul.f32 1.442695, %v2666_v46 }
 0xe7c   :  { %v2762_v1 = vpop.permute.xlu1 %2761  ;;  %v2760_v4 = vpop.permute.xlu0 %2759  ;;  %v2683_v0 = vsel %vm236_vm0, %v8399_v14, 0.0  ;;  %v2677_v51 = vmul.f32 1.442695, %v2664_v18 }
 0xe7d   :  { %2684 = vadd.xlane.f32.xlu1 %v2683_v0  ;;  %7459 = vmatprep.subr.bf16.mxu0 %v2760_v4  ;;  %8408 = vpow2.f32 %v2681_v27 }
 0xe7e   :  { %7460 = vmatpush3.bf16.msra.mxu0 %v2760_v4  ;;  %8410 = vpow2.f32 %v2677_v51 }
 0xe7f   :  { %7461 = vmatprep.subr.bf16.mxu0 %v2762_v1  ;;  %v8401_v59 = vpop.eup %8400 }
 0xe80   :  { %v2764_v34 = vpop.permute.xlu1 %2763  ;;  %v2692_v23 = vsel %vm236_vm0, %v8401_v59, 0.0  ;;  %v8403_v25 = vpop.eup %8402 }
 0xe81   :  { %2693 = vadd.xlane.f32.xlu0 %v2692_v23  ;;  %v2686_v41 = vsel %vm236_vm0, %v8403_v25, 0.0  ;;  %v9913_v56 = vpop.eup %8404 }
 0xe82   :  { %7462 = vmatpush3.bf16.msra.mxu0 %v2762_v1  ;;  %v2701_v28 = vsel %vm236_vm0, %v9913_v56, 0.0 }
 0xe83   :  { %7463 = vmatprep.subr.bf16.mxu0 %v2764_v34  ;;  %v8407_v32 = vpop.eup %8406 }
 0xe84   :  { %v2855_v37 = vpop.permute.xlu1 %2854  ;;  %v2695_v50 = vsel %vm236_vm0, %v8407_v32, 0.0 }
 0xe85   :  { %2687 = vadd.xlane.f32.xlu0 %v2686_v41 }
 0xe86   :  { %7464 = vmatpush3.bf16.msra.mxu0 %v2764_v34 }
 0xe87   :  { %7865 = vmatprep.subr.msk.bf16.mxu0 %vm531_vm2, %v2855_v37  ;;  %v9919_v17 = vpop.eup %8408 }
 0xe88   :  { %v2704_v36 = vsel %vm236_vm0, %v9919_v17, 0.0  ;;  %v9930_v20 = vpop.eup %8410 }
 0xe89   :  { %2702 = vadd.xlane.f32.xlu0 %v2701_v28  ;;  %v2698_v21 = vsel %vm236_vm0, %v9930_v20, 0.0 }
 0xe8d   :  { %2696 = vadd.xlane.f32.xlu0 %v2695_v50 }
 0xe8e   :  { %2858 = vrot.lane.b32.xlu1 %v8997_v13, %s8722_s20 }
 0xe91   :  { %2705 = vadd.xlane.f32.xlu0 %v2704_v36 }
 0xea7   :  { %2856 = vrot.lane.b32.xlu0 %v8991_v62, %s8722_s20 }
 0xeab   :  { %2846 = vrot.lane.b32.xlu0 %v8993_v63, %s8724_s22 }
 0xeaf   :  { %2850 = vrot.lane.b32.xlu0 %v8997_v13, %s8724_s22 }
 0xeb2   :  { %2699 = vadd.xlane.f32.xlu1 %v2698_v21 }
 0xec3   :  { %2860 = vrot.lane.b32.xlu1 %v8995_v12, %s8722_s20 }
 0xec7   :  { %2848 = vrot.lane.b32.xlu1 %v8991_v62, %s8724_s22 }
 0xecb   :  { %2852 = vrot.lane.b32.xlu1 %v8995_v12, %s8724_s22 }
 0xf06   :  { %v2691_v35 = vpop.xlane.xlu1 %2690 }
 0xf0a   :  { %v2685_v38 = vpop.xlane.xlu1 %2684 }
 0xf0b   :  { %8412 = vrcp.f32 %v2685_v38 }
 0xf0e   :  { %v2694_v46 = vpop.xlane.xlu0 %2693 }
 0xf0f   :  { %8414 = vrcp.f32 %v2694_v46 }
 0xf10   :  { %8416 = vrcp.f32 %v2691_v35 }
 0xf12   :  { %v2688_v1 = vpop.xlane.xlu0 %2687 }
 0xf13   :  { %8418 = vrcp.f32 %v2688_v1 }
 0xf15   :  { %v8413_v0 = vpop.eup %8412 }
 0xf16   :  { %v2703_v4 = vpop.xlane.xlu0 %2702  ;;  %v2723_v41 = vmul.f32 %v8413_v0, %v8399_v14  ;;  %v2875_v14 = vsel %vm531_vm2, %v2855_v37, 0 }
 0xf18   :  { %v2731_v21 = vsel %vm236_vm0, %v2723_v41, 0.0 }
 0xf19   :  { %v8415_v27 = vpop.eup %8414 }
 0xf1a   :  { %v2697_v34 = vpop.xlane.xlu0 %2696  ;;  %v8417_v23 = vpop.eup %8416  ;;  %v2726_v50 = vmul.f32 %v8415_v27, %v8401_v59 }
 0xf1b   :  { %8420 = vrcp.f32 %v2697_v34  ;;  %v2725_v36 = vmul.f32 %v8417_v23, %v9906_v16 }
 0xf1c   :  { %v2736_v16 = vsel %vm236_vm0, %v2726_v50, 0.0 }
 0xf1d   :  { %v8419_v28 = vpop.eup %8418  ;;  %v2754_v46 = vpack.c.bf16 %v2726_v50, %v2725_v36  ;;  %v2734_v6 = vsel %vm236_vm0, %v2725_v36, 0.0 }
 0xf1e   :  { %v2706_v18 = vpop.xlane.xlu0 %2705  ;;  %v2724_v51 = vmul.f32 %v8419_v28, %v8403_v25  ;;  %v2859_v28 = vpop.permute.xlu1 %2858 }
 0xf1f   :  { %8422 = vrcp.f32 %v2706_v18 }
 0xf20   :  { %v2732_v38 = vsel %vm236_vm0, %v2724_v51, 0.0  ;;  %v2753_v35 = vpack.c.bf16 %v2724_v51, %v2723_v41  ;;  %8424 = vrcp.f32 %v2703_v4 }
 0xf21   :  { %v2733_v1 = vadd.f32 %v2732_v38, %v2731_v21 }
 0xf22   :  { %7465 = vmatprep.mubr.msk.bf16.mxu0 %vm236_vm0, %v2753_v35  ;;  %v2857_v10 = vpop.permute.xlu0 %2856 }
 0xf23   :  { %v2735_v34 = vadd.f32 %v2734_v6, %v2733_v1  ;;  %7466 = vmatmul.mubr.msk.bf16.vlgmr.msra.gmra.mrb[64].mxu0 %vm236_vm0, %v2754_v46  ;;  %v2878_v41 = vsel %vm531_vm2, %v2857_v10, 0  ;;  %v2881_v6 = vsel %vm531_vm2, %v2859_v28, 0 }
 0xf24   :  { %7474 = vmatpush3.bf16.xpose.msra.mxu0 %v2875_v14 }
 0xf25   :  { %v8421_v59 = vpop.eup %8420  ;;  %7866 = vmatprep.subr.msk.bf16.mxu0 %vm531_vm2, %v2857_v10  ;;  %v2737_v25 = vadd.f32 %v2736_v16, %v2735_v34 }
 0xf26   :  { %v2727_v0 = vmul.f32 %v8421_v59, %v8407_v32  ;;  %v2847_v14 = vpop.permute.xlu0 %2846 }
 0xf28   :  { %v2738_v27 = vsel %vm236_vm0, %v2727_v0, 0.0 }
 0xf29   :  { %v2739_v23 = vadd.f32 %v2738_v27, %v2737_v25  ;;  %v8423_v36 = vpop.eup %8422 }
 0xf2a   :  { %v8425_v51 = vpop.eup %8424  ;;  %v2730_v21 = vmul.f32 %v8423_v36, %v9919_v17  ;;  %v2851_v27 = vpop.permute.xlu0 %2850 }
 0xf2b   :  { %v2729_v35 = vmul.f32 %v8425_v51, %v9913_v56 }
 0xf2c   :  { %7476 = vmatpush3.bf16.xpose.msra.mxu0 %v2878_v41  ;;  %v2744_v59 = vsel %vm236_vm0, %v2730_v21, 0.0 }
 0xf2d   :  { %7867 = vmatprep.subr.msk.bf16.mxu0 %vm531_vm2, %v2859_v28  ;;  %v2756_v1 = vpack.c.bf16 %v2730_v21, %v2729_v35  ;;  %v2742_v34 = vsel %vm236_vm0, %v2729_v35, 0.0 }
 0xf34   :  { %7478 = vmatpush3.bf16.xpose.msra.mxu0 %v2881_v6 }
 0xf3f   :  { %v2700_v37 = vpop.xlane.xlu1 %2699 }
 0xf40   :  { %8426 = vrcp.f32 %v2700_v37 }
 0xf43   :  { %v2861_v50 = vpop.permute.xlu1 %2860 }
 0xf44   :  { %7868 = vmatprep.subr.msk.bf16.mxu0 %vm531_vm2, %v2861_v50  ;;  %v2884_v32 = vsel %vm531_vm2, %v2861_v50, 0 }
 0xf45   :  { %7480 = vmatpush3.bf16.xpose.msra.mxu0 %v2884_v32 }
 0xf47   :  { %v2849_v25 = vpop.permute.xlu1 %2848 }
 0xf4a   :  { %v8427_v10 = vpop.eup %8426 }
 0xf4b   :  { %v2728_v38 = vmul.f32 %v8427_v10, %v9930_v20  ;;  %v2853_v6 = vpop.permute.xlu1 %2852 }
 0xf4d   :  { %v2740_v18 = vsel %vm236_vm0, %v2728_v38, 0.0  ;;  %v2755_v4 = vpack.c.bf16 %v2728_v38, %v2727_v0 }
 0xf4e   :  { %v2741_v46 = vadd.f32 %v2740_v18, %v2739_v23 }
 0xf4f   :  { %7469 = vmatprep.mubr.msk.bf16.mxu0 %vm236_vm0, %v2755_v4 }
 0xf50   :  { %v2743_v16 = vadd.f32 %v2742_v34, %v2741_v46  ;;  %7470 = vmatmul.mubr.msk.bf16.gmra.mrb[68].mxu0 %vm236_vm0, %v2756_v1 }
 0xf51   :  { %7481 = vmatprep.mubr.msk.bf16.mxu0 %vm531_vm2, %v2847_v14 }
 0xf52   :  { %v2745_v17 = vadd.f32 %v2744_v59, %v2743_v16 }
 0xf54   :  { %v2746_v20 = vrot.slane %v2745_v17, 4 }
 0xf56   :  { %v2747_v56 = vadd.f32 %v2746_v20, %v2745_v17 }
 0xf58   :  { %v2748_v0 = vrot.slane %v2747_v56, 2  ;;  %7482 = vmatmul.mubr.msk.bf16.vlgmr.msra.gmra.mrb[72].mxu0 %vm531_vm2, %v2849_v25 }
 0xf59   :  { %7485 = vmatprep.mubr.msk.bf16.mxu0 %vm531_vm2, %v2851_v27 }
 0xf5a   :  { %v2749_v23 = vadd.f32 %v2748_v0, %v2747_v56 }
 0xf5c   :  { %v2750_v41 = vrot.slane %v2749_v23, 1 }
 0xf5e   :  { %v2751_v28 = vadd.f32 %v2750_v41, %v2749_v23 }
 0xf60   :  { %7486 = vmatmul.mubr.msk.bf16.gmra.mrb[76].mxu0 %vm531_vm2, %v2853_v6  ;;  %v9970_v37 = vadd.f32 %v2751_v28, %v9859_v53 }
 0xff6   :  { %v9972_v50 = vpop.f32.mrb[64].mxu0 }
 0xff7   :  { %v9974_v32 = vpop.f32.mrb[65].mxu0 }
 0xff8   :  { %v9976_v36 = vpop.f32.mrb[66].mxu0 }
 0xff9   :  { %v9980_v10 = vpop.f32.mrb[67].mxu0 }
0x1023   :  { %v9984_v38 = vpop.f32.mrb[68].mxu0 }
0x1024   :  { %v9986_v35 = vpop.f32.mrb[69].mxu0 }
0x1025   :  { %v9988_v53 = vpop.f32.mrb[70].mxu0 }
0x1026   :  { %v9992_v4 = vpop.f32.mrb[71].mxu0 }
0x102b   :  { %v7483_v1 = vpop.f32.mrb[72].mxu0 }
0x102c   :  { %v2920_v34 = vpop.f32.mrb[73].mxu0  ;;  %v2957_v20 = vsel %vm236_vm0, %v7483_v1, -inf }
0x102d   :  { %v7484_v14 = vpop.f32.mrb[74].mxu0  ;;  %v2951_v16 = vsel %vm236_vm0, %v2920_v34, -inf }
0x102e   :  { %2952 = vmax.xlane.f32.xlu0 %v2951_v16  ;;  %v2923_v59 = vpop.f32.mrb[75].mxu0  ;;  %v2960_v0 = vsel %vm236_vm0, %v7484_v14, -inf }
0x102f   :  { %v2954_v17 = vsel %vm236_vm0, %v2923_v59, -inf }
0x1030   :  { %2955 = vmax.xlane.f32.xlu1 %v2954_v17  ;;  %v11699_v17 = vpack.i.bf16 %v9603_v31, %v9599_v60 }
0x1032   :  { %2958 = vmax.xlane.f32.xlu0 %v2957_v20  ;;  %v11700_v20 = vpack.i.bf16 %v9607_v42, %v9601_v33 }
0x1033   :  { %v7487_v56 = vpop.f32.mrb[76].mxu0 }
0x1034   :  { %v2936_v25 = vpop.f32.mrb[77].mxu0  ;;  %v2969_v28 = vsel %vm236_vm0, %v7487_v56, -inf }
0x1035   :  { %v7488_v27 = vpop.f32.mrb[78].mxu0  ;;  %v2963_v23 = vsel %vm236_vm0, %v2936_v25, -inf }
0x1036   :  { %2961 = vmax.xlane.f32.xlu0 %v2960_v0  ;;  %2964 = vmax.xlane.f32.xlu1 %v2963_v23  ;;  %v2939_v41 = vpop.f32.mrb[79].mxu0  ;;  %v2972_v16 = vsel %vm236_vm0, %v7488_v27, -inf }
0x1037   :  { %v2966_v6 = vsel %vm236_vm0, %v2939_v41, -inf }
0x103a   :  { %2970 = vmax.xlane.f32.xlu1 %v2969_v28  ;;  %2967 = vmax.xlane.f32.xlu0 %v2966_v6 }
0x103e   :  { %2973 = vmax.xlane.f32.xlu0 %v2972_v16 }
0x104b   :  { %3073 = vrot.lane.b32.xlu1 %v8993_v63, %s8727_s1 }
0x104f   :  { %3077 = vrot.lane.b32.xlu1 %v8997_v13, %s8727_s1 }
0x1053   :  { %3079 = vrot.lane.b32.xlu1 %v8995_v12, %s8727_s1 }
0x1054   :  { %3075 = vrot.lane.b32.xlu0 %v8991_v62, %s8727_s1 }
0x1057   :  { %7924 = vrot.lane.b32.xlu1 %v11699_v17, %s8728_s25 }
0x1058   :  { %7919 = vrot.lane.b32.xlu0 %v11700_v20, %s8728_s25 }
0x10bb   :  { %v2953_v63 = vpop.xlane.xlu0 %2952 }
0x10bc   :  { %v2975_v0 = vsub.f32 %v2920_v34, %v2953_v63 }
0x10bd   :  { %v2956_v13 = vpop.xlane.xlu1 %2955 }
0x10be   :  { %v2983_v12 = vmul.f32 1.442695, %v2975_v0  ;;  %v2976_v16 = vsub.f32 %v2923_v59, %v2956_v13 }
0x10bf   :  { %v2959_v23 = vpop.xlane.xlu0 %2958 }
0x10c0   :  { %v2977_v28 = vsub.f32 %v7483_v1, %v2959_v23  ;;  %v2985_v17 = vmul.f32 1.442695, %v2976_v16 }
0x10c2   :  { %v2987_v6 = vmul.f32 1.442695, %v2977_v28 }
0x10c3   :  { %v2965_v62 = vpop.xlane.xlu1 %2964  ;;  %v2962_v18 = vpop.xlane.xlu0 %2961 }
0x10c4   :  { %8428 = vpow2.f32 %v2987_v6  ;;  %v2978_v46 = vsub.f32 %v7484_v14, %v2962_v18  ;;  %v2979_v60 = vsub.f32 %v2936_v25, %v2965_v62 }
0x10c5   :  { %8430 = vpow2.f32 %v2983_v12 }
0x10c6   :  { %v2989_v31 = vmul.f32 1.442695, %v2978_v46  ;;  %v2991_v42 = vmul.f32 1.442695, %v2979_v60 }
0x10c7   :  { %v2971_v21 = vpop.xlane.xlu1 %2970  ;;  %v2968_v51 = vpop.xlane.xlu0 %2967 }
0x10c8   :  { %v2981_v33 = vsub.f32 %v7487_v56, %v2971_v21  ;;  %8432 = vpow2.f32 %v2989_v31  ;;  %v2980_v20 = vsub.f32 %v2939_v41, %v2968_v51 }
0x10c9   :  { %8434 = vpow2.f32 %v2985_v17 }
0x10ca   :  { %v2995_v34 = vmul.f32 1.442695, %v2981_v33  ;;  %v2993_v46 = vmul.f32 1.442695, %v2980_v20  ;;  %v11703_v20 = vpack.i.bf16 %v9615_v54, %v9611_v58  ;;  %v11706_v58 = vpack.i.bf16 %v9655_v55, %v9649_v11 }
0x10cb   :  { %v3074_v1 = vpop.permute.xlu1 %3073  ;;  %v2974_v63 = vpop.xlane.xlu0 %2973  ;;  %v11707_v54 = vpack.i.bf16 %v9663_v29, %v9659_v2 }
0x10cc   :  { %8436 = vpow2.f32 %v2995_v34  ;;  %v2982_v59 = vsub.f32 %v7488_v27, %v2974_v63  ;;  %7489 = vmatprep.subr.bf16.mxu1 %v3074_v1  ;;  %v11702_v34 = vpack.i.bf16 %v9651_v24, %v9647_v26 }
0x10cd   :  { %7490 = vmatpush3.bf16.msra.mxu1 %v3074_v1  ;;  %8438 = vpow2.f32 %v2991_v42  ;;  %v11701_v42 = vpack.i.bf16 %v9627_v47, %v9623_v9  ;;  %v11704_v1 = vpack.i.bf16 %v9631_v7, %v9625_v61  ;;  %v11705_v9 = vpack.i.bf16 %v9639_v43, %v9635_v57  ;;  %v10075_v47 = vld [vmem:[%s11616_s5] sm:$0xff]  }
0x10ce   :  { %v10020_v0 = vpop.eup %8428  ;;  %v2997_v18 = vmul.f32 1.442695, %v2982_v59  ;;  %v11708_v61 = vpack.i.bf16 %v9619_v45, %v9613_v52  ;;  %v11709_v7 = vpack.i.bf16 %v9865_v40, %v9861_v48  ;;  %v11710_v57 = vpack.i.bf16 %v9643_v49, %v9637_v19 }
0x10cf   :  { %v3078_v14 = vpop.permute.xlu1 %3077  ;;  %v3076_v25 = vpop.permute.xlu0 %3075  ;;  %v3005_v21 = vsel %vm236_vm0, %v10020_v0, 0.0  ;;  %v11711_v43 = vpack.i.bf16 %v9667_v39, %v9661_v30  ;;  %v11712_v52 = vpack.i.bf16 %v9869_v8, %v9863_v15 }
0x10d0   :  { %v10024_v56 = vpop.eup %8430  ;;  %8440 = vpow2.f32 %v2997_v18  ;;  %3006 = vadd.xlane.f32.xlu1 %v3005_v21  ;;  %7491 = vmatprep.subr.bf16.mxu1 %v3076_v25 }
0x10d1   :  { %7492 = vmatpush3.bf16.msra.mxu1 %v3076_v25  ;;  %8442 = vpow2.f32 %v2993_v46  ;;  %v2999_v27 = vsel %vm236_vm0, %v10024_v56, 0.0 }
0x10d2   :  { %7493 = vmatprep.subr.bf16.mxu1 %v3078_v14  ;;  %v10026_v51 = vpop.eup %8432 }
0x10d3   :  { %v3008_v41 = vsel %vm236_vm0, %v10026_v51, 0.0  ;;  %v10032_v13 = vpop.eup %8434  ;;  %v3080_v23 = vpop.permute.xlu1 %3079 }
0x10d4   :  { %3000 = vadd.xlane.f32.xlu1 %v2999_v27  ;;  %3009 = vadd.xlane.f32.xlu0 %v3008_v41  ;;  %v3002_v16 = vsel %vm236_vm0, %v10032_v13, 0.0  ;;  %v7920_v11 = vpop.permute.xlu0 %7919 }
0x10d5   :  { %7494 = vmatpush3.bf16.msra.mxu1 %v3078_v14  ;;  %v7922_v14 = vunpack.i.h.bf16 %v7920_v11  ;;  %v7921_v25 = vunpack.i.l.bf16 %v7920_v11 }
0x10d6   :  { %v10034_v28 = vpop.eup %8436  ;;  %7495 = vmatprep.subr.bf16.mxu1 %v3080_v23 }
0x10d7   :  { %v3017_v12 = vsel %vm236_vm0, %v10034_v28, 0.0  ;;  %v10038_v6 = vpop.eup %8438  ;;  %v7925_v45 = vpop.permute.xlu1 %7924 }
0x10d8   :  { %3018 = vadd.xlane.f32.xlu1 %v3017_v12  ;;  %3003 = vadd.xlane.f32.xlu0 %v3002_v16  ;;  %v3011_v60 = vsel %vm236_vm0, %v10038_v6, 0.0  ;;  %v7927_v39 = vunpack.i.h.bf16 %v7925_v45  ;;  %v7926_v15 = vunpack.i.l.bf16 %v7925_v45 }
0x10d9   :  { %7496 = vmatpush3.bf16.msra.mxu1 %v3080_v23 }
0x10da   :  { %v10042_v62 = vpop.eup %8440  ;;  %7505 = vmatprep.subr.bf16.mxu1 %v10075_v47  ;;  %v1879_v21 = vsel %vm531_vm2, %v9181_v3, %v7927_v39  ;;  %v1878_v41 = vsel %vm531_vm2, %v9177_v22, %v7926_v15 }
0x10db   :  { %v3020_v31 = vsel %vm236_vm0, %v10042_v62, 0.0  ;;  %v10048_v17 = vpop.eup %8442 }
0x10dc   :  { %3012 = vadd.xlane.f32.xlu1 %v3011_v60  ;;  %3021 = vadd.xlane.f32.xlu0 %v3020_v31  ;;  %v3014_v33 = vsel %vm236_vm0, %v10048_v17, 0.0 }
0x10e0   :  { %3015 = vadd.xlane.f32.xlu0 %v3014_v33 }
0x10ed   :  { %7934 = vrot.lane.b32.xlu1 %v11701_v42, %s8729_s26 }
0x10f1   :  { %7944 = vrot.lane.b32.xlu1 %v11702_v34, %s8730_s27 }
0x10f5   :  { %7954 = vrot.lane.b32.xlu1 %v11703_v20, %s8728_s25 }
0x10f6   :  { %7929 = vrot.lane.b32.xlu0 %v11704_v1, %s8729_s26 }
0x10f9   :  { %7964 = vrot.lane.b32.xlu1 %v11705_v9, %s8729_s26 }
0x10fa   :  { %7939 = vrot.lane.b32.xlu0 %v11706_v58, %s8730_s27 }
0x10fd   :  { %7974 = vrot.lane.b32.xlu1 %v11707_v54, %s8730_s27 }
0x10fe   :  { %7949 = vrot.lane.b32.xlu0 %v11708_v61, %s8728_s25 }
0x1101   :  { %7984 = vrot.lane.b32.xlu1 %v11709_v7, %s8728_s25 }
0x1102   :  { %7959 = vrot.lane.b32.xlu0 %v11710_v57, %s8729_s26 }
0x1106   :  { %7969 = vrot.lane.b32.xlu0 %v11711_v43, %s8730_s27 }
0x110a   :  { %7979 = vrot.lane.b32.xlu0 %v11712_v52, %s8728_s25  ;;  %v8197_v52 = vld [vmem:[%s11616_s5 + $0x8] sm:$0xff]  }
0x115d   :  { %v3007_v26 = vpop.xlane.xlu1 %3006 }
0x1161   :  { %v3001_v24 = vpop.xlane.xlu1 %3000  ;;  %v3010_v55 = vpop.xlane.xlu0 %3009 }
0x1162   :  { %8444 = vrcp.f32 %v3001_v24 }
0x1163   :  { %8446 = vrcp.f32 %v3007_v26  ;;  %v1876_v26 = vsel %vm531_vm2, %v9179_v44, %v7921_v25 }
0x1164   :  { %8448 = vrcp.f32 %v3010_v55 }
0x1165   :  { %v3019_v19 = vpop.xlane.xlu1 %3018  ;;  %v3004_v49 = vpop.xlane.xlu0 %3003 }
0x1166   :  { %8450 = vrcp.f32 %v3004_v49 }
0x1167   :  { %8452 = vrcp.f32 %v3019_v19 }
0x1169   :  { %v3013_v2 = vpop.xlane.xlu1 %3012  ;;  %v3022_v30 = vpop.xlane.xlu0 %3021 }
0x116a   :  { %8454 = vrcp.f32 %v3013_v2 }
0x116b   :  { %8456 = vrcp.f32 %v3022_v30 }
0x116c   :  { %v8445_v29 = vpop.eup %8444 }
0x116d   :  { %v8447_v48 = vpop.eup %8446  ;;  %v7935_v40 = vpop.permute.xlu1 %7934  ;;  %v3039_v59 = vmul.f32 %v8445_v29, %v10024_v56 }
0x116e   :  { %v8449_v8 = vpop.eup %8448  ;;  %v3016_v63 = vpop.xlane.xlu0 %3015  ;;  %v7937_v18 = vunpack.i.h.bf16 %v7935_v40  ;;  %v7936_v46 = vunpack.i.l.bf16 %v7935_v40  ;;  %v3041_v23 = vmul.f32 %v8447_v48, %v10020_v0 }
0x116f   :  { %8458 = vrcp.f32 %v3016_v63  ;;  %v3042_v12 = vmul.f32 %v8449_v8, %v10026_v51  ;;  %v3047_v42 = vsel %vm236_vm0, %v3039_v59, 0.0 }
0x1170   :  { %v8451_v27 = vpop.eup %8450  ;;  %v1888_v3 = vsel %vm1884_vm3, %v1879_v21, %v7937_v18  ;;  %v1887_v20 = vsel %vm1884_vm3, %v1878_v41, %v7936_v46  ;;  %v3050_v11 = vsel %vm236_vm0, %v3041_v23, 0.0 }
0x1171   :  { %v7945_v16 = vpop.permute.xlu1 %7944  ;;  %v3040_v33 = vmul.f32 %v8451_v27, %v10032_v13  ;;  %v8453_v34 = vpop.eup %8452  ;;  %v1877_v13 = vsel %vm531_vm2, %v9183_v5, %v7922_v14  ;;  %v3070_v61 = vpack.c.bf16 %v3042_v12, %v3041_v23  ;;  %v3052_v24 = vsel %vm236_vm0, %v3042_v12, 0.0  ;;  %v11713_v12 = vld [vmem:[#allocation20_spill] sm:$0xff] }
0x1172   :  { %v7947_v56 = vunpack.i.h.bf16 %v7945_v16  ;;  %v7946_v60 = vunpack.i.l.bf16 %v7945_v16  ;;  %v7930_v31 = vpop.permute.xlu0 %7929  ;;  %v3045_v30 = vmul.f32 %v8453_v34, %v10034_v28 }
0x1173   :  { %v7932_v1 = vunpack.i.h.bf16 %v7930_v31  ;;  %v7931_v22 = vunpack.i.l.bf16 %v7930_v31  ;;  %v3048_v58 = vsel %vm236_vm0, %v3040_v33, 0.0  ;;  %v3069_v54 = vpack.c.bf16 %v3040_v33, %v3039_v59 }
0x1174   :  { %v8455_v9 = vpop.eup %8454  ;;  %v10118_v0 = vsel %vm1893_vm4, %v1887_v20, %v7946_v60  ;;  %v10121_v51 = vsel %vm1893_vm4, %v1888_v3, %v7947_v56  ;;  %v3049_v43 = vadd.f32 %v3048_v58, %v3047_v42  ;;  %v3058_v23 = vsel %vm236_vm0, %v3045_v30, 0.0 }
0x1175   :  { %v3285_v7 = vpack.c.bf16 %v10121_v51, %v10118_v0  ;;  %v7955_v57 = vpop.permute.xlu1 %7954  ;;  %v8457_v45 = vpop.eup %8456  ;;  %7497 = vmatprep.mubr.msk.bf16.mxu1 %vm236_vm0, %v3069_v54  ;;  %v3043_v55 = vmul.f32 %v8455_v9, %v10038_v6  ;;  %v1885_v29 = vsel %vm1884_vm3, %v1876_v26, %v7931_v22  ;;  %v1886_v44 = vsel %vm1884_vm3, %v1877_v13, %v7932_v1  ;;  %v8198_v0 = vld [vmem:[%s11617_s7] sm:$0xff]   ;;  %v8199_v51 = vld [vmem:[%s11617_s7 + $0x8] sm:$0xff]  }
0x1176   :  { %v7940_v5 = vpop.permute.xlu0 %7939  ;;  %v3051_v19 = vadd.f32 %v3050_v11, %v3049_v43  ;;  %7498 = vmatmul.mubr.msk.bf16.vlgmr.msra.gmra.mrb[88].mxu1 %vm236_vm0, %v3070_v61  ;;  %v7957_v39 = vunpack.i.h.bf16 %v7955_v57  ;;  %v7956_v48 = vunpack.i.l.bf16 %v7955_v57  ;;  %v3046_v59 = vmul.f32 %v8457_v45, %v10042_v62  ;;  %v11714_v62 = vld [vmem:[#allocation18_spill] sm:$0xff]  ;;  %v11715_v45 = vld [vmem:[#allocation21_spill] sm:$0xff]  ;;  %7525 = vmatprep.subr.bf16.mxu0 %v8198_v0 }
0x1177   :  { %v7942_v49 = vunpack.i.h.bf16 %v7940_v5  ;;  %v7941_v2 = vunpack.i.l.bf16 %v7940_v5  ;;  %7506 = vmatpush3.bf16.msra.mxu1 %v10075_v47  ;;  %v3054_v46 = vsel %vm236_vm0, %v3043_v55, 0.0  ;;  %7526 = vmatpush3.bf16.msra.mxu0 %v8198_v0 }
0x1178   :  { %v3053_v63 = vadd.f32 %v3052_v24, %v3051_v19  ;;  %7507 = vmatprep.subr.bf16.mxu1 %v8197_v52  ;;  %v1883_v16 = vsel %vm531_vm2, %v11713_v12, %v7957_v39  ;;  %v1882_v56 = vsel %vm531_vm2, %v11714_v62, %v7956_v48  ;;  %v3072_v31 = vpack.c.bf16 %v3046_v59, %v3045_v30  ;;  %v11716_v24 = vld [vmem:[#allocation19_spill] sm:$0xff] }
0x1179   :  { %v8459_v15 = vpop.eup %8458  ;;  %v1894_v40 = vsel %vm1893_vm4, %v1885_v29, %v7941_v2  ;;  %v1895_v6 = vsel %vm1893_vm4, %v1886_v44, %v7942_v49  ;;  %v7965_v8 = vpop.permute.xlu1 %7964  ;;  %v3060_v20 = vsel %vm236_vm0, %v3046_v59, 0.0  ;;  %v11717_v59 = vld [vmem:[#allocation22_spill] sm:$0xff]  ;;  %7527 = vmatprep.subr.bf16.mxu0 %v8199_v51 }
0x117a   :  { %v7950_v18 = vpop.permute.xlu0 %7949  ;;  %v3044_v28 = vmul.f32 %v8459_v15, %v10048_v17  ;;  %v3284_v14 = vpack.c.bf16 %v1895_v6, %v1894_v40  ;;  %v7967_v25 = vunpack.i.h.bf16 %v7965_v8  ;;  %v7966_v21 = vunpack.i.l.bf16 %v7965_v8 }
0x117b   :  { %v3055_v27 = vadd.f32 %v3054_v46, %v3053_v63  ;;  %7508 = vmatpush3.bf16.msra.mxu1 %v8197_v52  ;;  %v7952_v33 = vunpack.i.h.bf16 %v7950_v18  ;;  %v7951_v9 = vunpack.i.l.bf16 %v7950_v18  ;;  %7528 = vmatpush3.bf16.msra.mxu0 %v8199_v51 }
0x117c   :  { %v3056_v47 = vsel %vm236_vm0, %v3044_v28, 0.0  ;;  %v3071_v41 = vpack.c.bf16 %v3044_v28, %v3043_v55  ;;  %v1891_v1 = vsel %vm1884_vm3, %v1882_v56, %v7966_v21  ;;  %v1892_v22 = vsel %vm1884_vm3, %v1883_v16, %v7967_v25  ;;  %v11719_v56 = vld [vmem:[#allocation2_spill] sm:$0xff] }
0x117d   :  { %v7975_v60 = vpop.permute.xlu1 %7974  ;;  %v3057_v17 = vadd.f32 %v3056_v47, %v3055_v27  ;;  %v1881_v26 = vsel %vm531_vm2, %v11715_v45, %v7952_v33  ;;  %v1880_v5 = vsel %vm531_vm2, %v11716_v24, %v7951_v9  ;;  %v11727_v45 = vld [vmem:[#allocation6_spill] sm:$0xff]  ;;  %v11728_v24 = vld [vmem:[#allocation8_spill] sm:$0xff] }
0x117e   :  { %v7977_v42 = vunpack.i.h.bf16 %v7975_v60  ;;  %v7976_v34 = vunpack.i.l.bf16 %v7975_v60  ;;  %7501 = vmatprep.mubr.msk.bf16.mxu1 %vm236_vm0, %v3071_v41  ;;  %v7960_v3 = vpop.permute.xlu0 %7959 }
0x117f   :  { %v3059_v58 = vadd.f32 %v3058_v23, %v3057_v17  ;;  %7502 = vmatmul.mubr.msk.bf16.gmra.mrb[92].mxu1 %vm236_vm0, %v3072_v31  ;;  %v7962_v61 = vunpack.i.h.bf16 %v7960_v3  ;;  %v7961_v57 = vunpack.i.l.bf16 %v7960_v3  ;;  %v11720_v31 = vld [vmem:[#allocation4_spill] sm:$0xff] }
0x1180   :  { %v1900_v54 = vsel %vm1893_vm4, %v1891_v1, %v7976_v34  ;;  %v1901_v13 = vsel %vm1893_vm4, %v1892_v22, %v7977_v42  ;;  %7509 = vmatprep.mubr.msk.bf16.mxu1 %vm389_vm1, %v3284_v14  ;;  %v10215_v42 = vld [vmem:[%s11618_s6] ss:$0 sm:$0xff]  ;;  %v11721_v34 = vld [vmem:[#allocation5_spill] sm:$0xff]  ;;  %v11722_v1 = vld [vmem:[#allocation3_spill] sm:$0xff] }
0x1181   :  { %v3061_v43 = vadd.f32 %v3060_v20, %v3059_v58  ;;  %v3287_v52 = vpack.c.bf16 %v1901_v13, %v1900_v54  ;;  %v1889_v2 = vsel %vm1884_vm3, %v1880_v5, %v7961_v57  ;;  %v1890_v30 = vsel %vm1884_vm3, %v1881_v26, %v7962_v61 }
0x1182   :  { %v7970_v11 = vpop.permute.xlu0 %7969 }
0x1183   :  { %v3062_v55 = vrot.slane %v3061_v43, 4  ;;  %v7972_v19 = vunpack.i.h.bf16 %v7970_v11  ;;  %v7971_v49 = vunpack.i.l.bf16 %v7970_v11 }
0x1185   :  { %v3063_v29 = vadd.f32 %v3062_v55, %v3061_v43  ;;  %v1898_v44 = vsel %vm1893_vm4, %v1889_v2, %v7971_v49  ;;  %v1899_v39 = vsel %vm1893_vm4, %v1890_v30, %v7972_v19  ;;  %v11729_v55 = vld [vmem:[#allocation9_spill] sm:$0xff]  ;;  %v11730_v2 = vld [vmem:[#allocation7_spill] sm:$0xff] }
0x1186   :  { %v3286_v48 = vpack.c.bf16 %v1899_v39, %v1898_v44 }
0x1187   :  { %7510 = vmatmul.mubr.msk.bf16.vlgmr.msra.gmra.mrb[96].mxu1 %vm389_vm1, %v3285_v7  ;;  %v3064_v15 = vrot.slane %v3063_v29, 2 }
0x1188   :  { %7513 = vmatprep.mubr.msk.bf16.mxu1 %vm389_vm1, %v3286_v48 }
0x1189   :  { %v3065_v40 = vadd.f32 %v3064_v15, %v3063_v29 }
0x118b   :  { %v3066_v6 = vrot.slane %v3065_v40, 1 }
0x118d   :  { %v3067_v8 = vadd.f32 %v3066_v6, %v3065_v40 }
0x118f   :  { %7514 = vmatmul.mubr.msk.bf16.gmra.mrb[100].mxu1 %vm389_vm1, %v3287_v52  ;;  %v3068_v63 = vadd.f32 %v3067_v8, %v9970_v37  ;;  %v10262_v8 = vld [vmem:[%s11619_s8] ss:$0 sm:$0xff] }
0x1191   :  { %v10178_v18 = vsel %vm3282_vm5, %v11717_v59, %v3068_v63 }
0x1192   :  { %11718 = vst [vmem:[#allocation20_spill] sm:$0xff] %v10178_v18 }
0x1249   :  { %v10186_v7 = vpop.f32.mrb[88].mxu1 }
0x124a   :  { %v10188_v28 = vpop.f32.mrb[89].mxu1 }
0x124b   :  { %v10190_v37 = vpop.f32.mrb[90].mxu1 }
0x124c   :  { %v8003_v46 = vpack.i.bf16 %v10190_v37, %v10186_v7  ;;  %v10194_v14 = vpop.f32.mrb[91].mxu1  ;;  %v11743_v7 = vpack.i.bf16 %v9992_v4, %v9986_v35  ;;  %v7980_v35 = vpop.permute.xlu0 %7979 }
0x124d   :  { %v7998_v25 = vpack.i.bf16 %v10194_v14, %v10188_v28  ;;  %v11744_v28 = vpack.i.bf16 %v9988_v53, %v9984_v38  ;;  %v7985_v38 = vpop.permute.xlu1 %7984 }
0x124e   :  { %v7986_v14 = vunpack.i.l.bf16 %v7985_v38 }
0x1252   :  { %v10198_v21 = vpop.f32.mrb[92].mxu1 }
0x1253   :  { %v10200_v27 = vpop.f32.mrb[93].mxu1 }
0x1254   :  { %v10202_v47 = vpop.f32.mrb[94].mxu1 }
0x1255   :  { %v8033_v41 = vpack.i.bf16 %v10202_v47, %v10198_v21  ;;  %v10206_v23 = vpop.f32.mrb[95].mxu1 }
0x1256   :  { %v8028_v12 = vpack.i.bf16 %v10206_v23, %v10200_v27  ;;  %v7981_v27 = vunpack.i.l.bf16 %v7980_v35 }
0x125a   :  { %v7511_v16 = vpop.f32.mrb[96].mxu1 }
0x125b   :  { %v3366_v62 = vpop.f32.mrb[97].mxu1  ;;  %v3431_v33 = vadd.f32 %v7511_v16, %v11720_v31 }
0x125c   :  { %v3429_v60 = vadd.f32 %v3366_v62, %v11719_v56  ;;  %v7512_v17 = vpop.f32.mrb[98].mxu1 }
0x125d   :  { %v3432_v3 = vadd.f32 %v7512_v17, %v11721_v34  ;;  %v3369_v20 = vpop.f32.mrb[99].mxu1  ;;  %v10229_v13 = vadd.f32 %v10215_v42, %v3431_v33 }
0x125e   :  { %v3430_v22 = vadd.f32 %v3369_v20, %v11722_v1  ;;  %v10223_v58 = vadd.f32 %v10215_v42, %v3429_v60  ;;  %v11735_v1 = vpack.i.bf16 %v9976_v36, %v9972_v50  ;;  %v11737_v50 = vld [vmem:[#allocation34_spill] sm:$0xff]  ;;  %v11738_v36 = vld [vmem:[#allocation32_spill] sm:$0xff] }
0x125f   :  { %v10220_v9 = vadd.f32 %v10215_v42, %v3432_v3  ;;  %11726 = vst [vmem:[#allocation22_spill] sm:$0xff] %v10229_v13 }
0x1260   :  { %11724 = vst [vmem:[#allocation21_spill] sm:$0xff] %v10223_v58  ;;  %v10226_v54 = vadd.f32 %v10215_v42, %v3430_v22 }
0x1261   :  { %11723 = vst [vmem:[#allocation18_spill] sm:$0xff] %v10220_v9  ;;  %v3469_v43 = vpack.c.bf16 %v10220_v9, %v10229_v13 }
0x1262   :  { %11725 = vst [vmem:[#allocation19_spill] sm:$0xff] %v10226_v54  ;;  %v3468_v61 = vpack.c.bf16 %v10226_v54, %v10223_v58  ;;  %v7515_v57 = vpop.f32.mrb[100].mxu1 }
0x1263   :  { %v3382_v52 = vpop.f32.mrb[101].mxu1  ;;  %v3435_v5 = vadd.f32 %v7515_v57, %v11728_v24 }
0x1264   :  { %v3433_v26 = vadd.f32 %v3382_v52, %v11727_v45  ;;  %v7516_v11 = vpop.f32.mrb[102].mxu1  ;;  %7529 = vmatprep.mubr.msk.bf16.mxu0 %vm389_vm1, %v3468_v61 }
0x1265   :  { %v3436_v19 = vadd.f32 %v7516_v11, %v11729_v55  ;;  %v3385_v49 = vpop.f32.mrb[103].mxu1  ;;  %7530 = vmatmul.mubr.msk.bf16.vlgmr.msra.gmra.mrb[80].mxu0 %vm389_vm1, %v3469_v43  ;;  %v10251_v48 = vadd.f32 %v10215_v42, %v3435_v5  ;;  %v11736_v43 = vpack.i.bf16 %v9980_v10, %v9974_v32  ;;  %v11740_v32 = vld [vmem:[#allocation33_spill] sm:$0xff]  ;;  %v11741_v10 = vld [vmem:[#allocation31_spill] sm:$0xff] }
0x1266   :  { %v3434_v30 = vadd.f32 %v3385_v49, %v11730_v2  ;;  %v10245_v44 = vadd.f32 %v10215_v42, %v3433_v26  ;;  %v11739_v26 = vpack.i.bf16 %v11737_v50, %v11738_v36  ;;  %v11742_v11 = vpack.i.bf16 %v11740_v32, %v11741_v10  ;;  %v11745_v5 = vld [vmem:[#allocation25_spill] sm:$0xff]  ;;  %v11747_v2 = vld [vmem:[#allocation26_spill] sm:$0xff] }
0x1267   :  { %v10242_v29 = vadd.f32 %v10215_v42, %v3436_v19  ;;  %11734 = vst [vmem:[#allocation3_spill] sm:$0xff] %v10251_v48  ;;  %v11746_v19 = vld [vmem:[#allocation23_spill] sm:$0xff] }
0x1268   :  { %11732 = vst [vmem:[#allocation4_spill] sm:$0xff] %v10245_v44  ;;  %v10248_v39 = vadd.f32 %v10215_v42, %v3434_v30  ;;  %v3260_v49 = vsel %vm531_vm2, %v11746_v19, %v7986_v14 }
0x1269   :  { %11731 = vst [vmem:[#allocation2_spill] sm:$0xff] %v10242_v29  ;;  %v3471_v40 = vpack.c.bf16 %v10242_v29, %v10251_v48 }
0x126a   :  { %11733 = vst [vmem:[#allocation5_spill] sm:$0xff] %v10248_v39  ;;  %v3470_v15 = vpack.c.bf16 %v10248_v39, %v10245_v44 }
0x126c   :  { %7533 = vmatprep.mubr.msk.bf16.mxu0 %vm389_vm1, %v3470_v15 }
0x126d   :  { %7534 = vmatmul.mubr.msk.bf16.gmra.mrb[84].mxu0 %vm389_vm1, %v3471_v40  ;;  %v11748_v40 = vld [vmem:[#allocation24_spill] sm:$0xff] }
0x1338   :  { %v7531_v6 = vpop.f32.mrb[80].mxu0 }
0x1339   :  { %v3557_v63 = vpop.f32.mrb[81].mxu0  ;;  %v3566_v0 = vadd.f32 %v7531_v6, %v10262_v8  ;;  %v3258_v6 = vsel %vm531_vm2, %v11748_v40, %v7981_v27  ;;  %v11752_v40 = vld [vmem:[#allocation27_spill] sm:$0xff] }
0x133a   :  { %v7532_v59 = vpop.f32.mrb[82].mxu0  ;;  %v3558_v62 = vadd.f32 %v10262_v8, %v3557_v63 }
0x133b   :  { %v3569_v51 = vadd.f32 %v7532_v59, %v10262_v8  ;;  %v3560_v16 = vpop.f32.mrb[83].mxu0 }
0x133c   :  { %v3561_v56 = vadd.f32 %v10262_v8, %v3560_v16 }
0x133d   :  { %v10268_v60 = vpack.c.bf16 %v3569_v51, %v3566_v0 }
0x133e   :  { %v10270_v17 = vpack.c.bf16 %v3561_v56, %v3558_v62 }
0x133f   :  { %3634 = vrot.lane.b32.xlu1 %v10268_v60, %s8717_s3 }
0x1340   :  { %3632 = vrot.lane.b32.xlu0 %v10270_v17, %s8717_s3  ;;  %v7535_v31 = vpop.f32.mrb[84].mxu0 }
0x1341   :  { %v3573_v33 = vpop.f32.mrb[85].mxu0  ;;  %v3582_v3 = vadd.f32 %v7535_v31, %v10262_v8 }
0x1342   :  { %v7536_v34 = vpop.f32.mrb[86].mxu0  ;;  %v3574_v61 = vadd.f32 %v10262_v8, %v3573_v33 }
0x1343   :  { %v3585_v20 = vadd.f32 %v7536_v34, %v10262_v8  ;;  %7994 = vrot.lane.b32.xlu1 %v11735_v1, %s8729_s26  ;;  %v3576_v22 = vpop.f32.mrb[87].mxu0 }
0x1344   :  { %v3577_v57 = vadd.f32 %v10262_v8, %v3576_v22  ;;  %7989 = vrot.lane.b32.xlu0 %v11736_v43, %s8729_s26 }
0x1345   :  { %v10288_v52 = vpack.c.bf16 %v3585_v20, %v3582_v3 }
0x1346   :  { %v10290_v45 = vpack.c.bf16 %v3577_v57, %v3574_v61 }
0x1347   :  { %8004 = vrot.lane.b32.xlu1 %v8003_v46, %s8730_s27  ;;  %v7987_v46 = vunpack.i.h.bf16 %v7985_v38 }
0x1348   :  { %7999 = vrot.lane.b32.xlu0 %v7998_v25, %s8730_s27  ;;  %v7982_v25 = vunpack.i.h.bf16 %v7980_v35  ;;  %v11749_v35 = vld [vmem:[#allocation30_spill] sm:$0xff] }
0x1349   :  { %v3261_v55 = vsel %vm531_vm2, %v11745_v5, %v7987_v46 }
0x134a   :  { %v3259_v30 = vsel %vm531_vm2, %v11747_v2, %v7982_v25 }
0x134b   :  { %8009 = vrot.lane.b32.xlu1 %v11739_v26, %s8728_s25 }
0x134c   :  { %8014 = vrot.lane.b32.xlu0 %v11742_v11, %s8728_s25 }
0x134f   :  { %8019 = vrot.lane.b32.xlu1 %v11743_v7, %s8729_s26 }
0x1350   :  { %3636 = vrot.lane.b32.xlu0 %v10290_v45, %s8717_s3 }
0x1353   :  { %8029 = vrot.lane.b32.xlu1 %v8028_v12, %s8730_s27 }
0x1354   :  { %8024 = vrot.lane.b32.xlu0 %v11744_v28, %s8729_s26 }
0x1357   :  { %3638 = vrot.lane.b32.xlu1 %v10288_v52, %s8717_s3 }
0x1358   :  { %8034 = vrot.lane.b32.xlu0 %v8033_v41, %s8730_s27 }
0x135b   :  { %3950 = vrot.lane.b32.xlu1 %v10268_v60, %s8719_s17 }
0x135c   :  { %3948 = vrot.lane.b32.xlu0 %v10270_v17, %s8719_s17 }
0x135f   :  { %3954 = vrot.lane.b32.xlu1 %v10288_v52, %s8719_s17 }
0x1360   :  { %3952 = vrot.lane.b32.xlu0 %v10290_v45, %s8719_s17 }
0x1363   :  { %3942 = vrot.lane.b32.xlu1 %v10268_v60, %s8721_s19 }
0x1364   :  { %3940 = vrot.lane.b32.xlu0 %v10270_v17, %s8721_s19 }
0x1367   :  { %3946 = vrot.lane.b32.xlu1 %v10288_v52, %s8721_s19 }
0x1368   :  { %3944 = vrot.lane.b32.xlu0 %v10290_v45, %s8721_s19 }
0x136b   :  { %3851 = vrot.lane.b32.xlu1 %v10270_v17, %s8718_s4 }
0x136c   :  { %3853 = vrot.lane.b32.xlu0 %v10268_v60, %s8718_s4 }
0x136f   :  { %3855 = vrot.lane.b32.xlu1 %v10290_v45, %s8718_s4 }
0x13b1   :  { %v3635_v53 = vpop.permute.xlu1 %3634 }
0x13b2   :  { %v3633_v4 = vpop.permute.xlu0 %3632  ;;  %v3656_v51 = vsel %vm531_vm2, %v3635_v53, 0 }
0x13b3   :  { %7869 = vmatprep.subr.msk.bf16.mxu1 %vm531_vm2, %v3633_v4  ;;  %v3653_v37 = vsel %vm531_vm2, %v3633_v4, 0  ;;  %v11750_v4 = vld [vmem:[#allocation28_spill] sm:$0xff] }
0x13b4   :  { %7546 = vmatpush3.bf16.xpose.msra.mxu1 %v3653_v37 }
0x13b5   :  { %v7995_v21 = vpop.permute.xlu1 %7994  ;;  %7870 = vmatprep.subr.msk.bf16.mxu1 %vm531_vm2, %v3635_v53 }
0x13b6   :  { %v7990_v47 = vpop.permute.xlu0 %7989  ;;  %v7997_v41 = vunpack.i.h.bf16 %v7995_v21  ;;  %v7996_v23 = vunpack.i.l.bf16 %v7995_v21 }
0x13b7   :  { %v7992_v12 = vunpack.i.h.bf16 %v7990_v47  ;;  %v7991_v24 = vunpack.i.l.bf16 %v7990_v47 }
0x13b8   :  { %v3269_v16 = vsel %vm1884_vm3, %v3261_v55, %v7997_v41  ;;  %v3268_v62 = vsel %vm1884_vm3, %v3260_v49, %v7996_v23 }
0x13b9   :  { %v8005_v15 = vpop.permute.xlu1 %8004  ;;  %v3267_v33 = vsel %vm1884_vm3, %v3259_v30, %v7992_v12  ;;  %v3266_v34 = vsel %vm1884_vm3, %v3258_v6, %v7991_v24  ;;  %v11751_v30 = vld [vmem:[#allocation29_spill] sm:$0xff] }
0x13ba   :  { %v8007_v63 = vunpack.i.h.bf16 %v8005_v15  ;;  %v8006_v59 = vunpack.i.l.bf16 %v8005_v15  ;;  %v8000_v0 = vpop.permute.xlu0 %7999 }
0x13bb   :  { %v8002_v56 = vunpack.i.h.bf16 %v8000_v0  ;;  %v8001_v31 = vunpack.i.l.bf16 %v8000_v0 }
0x13bc   :  { %v3276_v3 = vsel %vm1893_vm4, %v3268_v62, %v8006_v59  ;;  %v3277_v20 = vsel %vm1893_vm4, %v3269_v16, %v8007_v63  ;;  %7548 = vmatpush3.bf16.xpose.msra.mxu1 %v3656_v51 }
0x13bd   :  { %v3274_v1 = vsel %vm1893_vm4, %v3266_v34, %v8001_v31  ;;  %v3275_v22 = vsel %vm1893_vm4, %v3267_v33, %v8002_v56  ;;  %v8010_v61 = vpop.permute.xlu1 %8009  ;;  %v3289_v57 = vpack.c.bf16 %v3277_v20, %v3276_v3 }
0x13be   :  { %v8015_v43 = vpop.permute.xlu0 %8014  ;;  %v3288_v50 = vpack.c.bf16 %v3275_v22, %v3274_v1  ;;  %v8012_v26 = vunpack.i.h.bf16 %v8010_v61  ;;  %v8011_v32 = vunpack.i.l.bf16 %v8010_v61 }
0x13bf   :  { %v8017_v21 = vunpack.i.h.bf16 %v8015_v43  ;;  %v8016_v27 = vunpack.i.l.bf16 %v8015_v43 }
0x13c0   :  { %7517 = vmatprep.mubr.msk.bf16.mxu1 %vm389_vm1, %v3288_v50  ;;  %v3263_v53 = vsel %vm531_vm2, %v11749_v35, %v8012_v26  ;;  %v3262_v37 = vsel %vm531_vm2, %v11750_v4, %v8011_v32 }
0x13c1   :  { %v8020_v36 = vpop.permute.xlu1 %8019  ;;  %7518 = vmatmul.mubr.msk.bf16.gmra.mrb[104].mxu1 %vm389_vm1, %v3289_v57  ;;  %v3265_v15 = vsel %vm531_vm2, %v11751_v30, %v8017_v21  ;;  %v3264_v6 = vsel %vm531_vm2, %v11752_v40, %v8016_v27  ;;  %v11762_v30 = vld [vmem:[#allocation16_spill] sm:$0xff]  ;;  %v11763_v40 = vld [vmem:[#allocation17_spill] sm:$0xff] }
0x13c2   :  { %v3637_v10 = vpop.permute.xlu0 %3636  ;;  %v8022_v11 = vunpack.i.h.bf16 %v8020_v36  ;;  %v8021_v7 = vunpack.i.l.bf16 %v8020_v36 }
0x13c3   :  { %7871 = vmatprep.subr.msk.bf16.mxu1 %vm531_vm2, %v3637_v10  ;;  %v3659_v28 = vsel %vm531_vm2, %v3637_v10, 0 }
0x13c4   :  { %7550 = vmatpush3.bf16.xpose.msra.mxu1 %v3659_v28  ;;  %v3270_v47 = vsel %vm1884_vm3, %v3262_v37, %v8021_v7  ;;  %v3271_v41 = vsel %vm1884_vm3, %v3263_v53, %v8022_v11  ;;  %v11753_v28 = vld [vmem:[#allocation10_spill] sm:$0xff]  ;;  %v11754_v53 = vld [vmem:[#allocation12_spill] sm:$0xff]  ;;  %v11755_v37 = vld [vmem:[#allocation13_spill] sm:$0xff] }
0x13c5   :  { %v8030_v38 = vpop.permute.xlu1 %8029 }
0x13c6   :  { %v8032_v46 = vunpack.i.h.bf16 %v8030_v38  ;;  %v8031_v14 = vunpack.i.l.bf16 %v8030_v38  ;;  %v8025_v25 = vpop.permute.xlu0 %8024 }
0x13c7   :  { %v8027_v24 = vunpack.i.h.bf16 %v8025_v25  ;;  %v8026_v5 = vunpack.i.l.bf16 %v8025_v25  ;;  %v11756_v25 = vld [vmem:[#allocation11_spill] sm:$0xff] }
0x13c8   :  { %v3278_v23 = vsel %vm1893_vm4, %v3270_v47, %v8031_v14  ;;  %v3279_v12 = vsel %vm1893_vm4, %v3271_v41, %v8032_v46 }
0x13c9   :  { %v3639_v55 = vpop.permute.xlu1 %3638  ;;  %v3290_v19 = vpack.c.bf16 %v3279_v12, %v3278_v23  ;;  %v3273_v0 = vsel %vm1884_vm3, %v3265_v15, %v8027_v24  ;;  %v3272_v51 = vsel %vm1884_vm3, %v3264_v6, %v8026_v5 }
0x13ca   :  { %7872 = vmatprep.subr.msk.bf16.mxu1 %vm531_vm2, %v3639_v55  ;;  %v8035_v49 = vpop.permute.xlu0 %8034  ;;  %v3662_v2 = vsel %vm531_vm2, %v3639_v55, 0 }
0x13cb   :  { %v8037_v63 = vunpack.i.h.bf16 %v8035_v49  ;;  %v8036_v59 = vunpack.i.l.bf16 %v8035_v49  ;;  %7521 = vmatprep.mubr.msk.bf16.mxu1 %vm389_vm1, %v3290_v19  ;;  %v11761_v19 = vld [vmem:[#allocation14_spill] sm:$0xff] }
0x13cc   :  { %7552 = vmatpush3.bf16.xpose.msra.mxu1 %v3662_v2 }
0x13cd   :  { %v3280_v16 = vsel %vm1893_vm4, %v3272_v51, %v8036_v59  ;;  %v3281_v62 = vsel %vm1893_vm4, %v3273_v0, %v8037_v63  ;;  %v3951_v56 = vpop.permute.xlu1 %3950  ;;  %v11764_v59 = vld [vmem:[#allocation15_spill] sm:$0xff] }
0x13ce   :  { %v3949_v31 = vpop.permute.xlu0 %3948  ;;  %v3291_v33 = vpack.c.bf16 %v3281_v62, %v3280_v16  ;;  %v3972_v36 = vsel %vm531_vm2, %v3951_v56, 0 }
0x13cf   :  { %7873 = vmatprep.subr.msk.bf16.mxu1 %vm531_vm2, %v3949_v31  ;;  %v3969_v22 = vsel %vm531_vm2, %v3949_v31, 0 }
0x13d0   :  { %7522 = vmatmul.mubr.msk.bf16.gmra.mrb[108].mxu1 %vm389_vm1, %v3291_v33 }
0x13d1   :  { %v3955_v34 = vpop.permute.xlu1 %3954  ;;  %7553 = vmatprep.mubr.msk.bf16.mxu1 %vm531_vm2, %v10270_v17 }
0x13d2   :  { %v3953_v3 = vpop.permute.xlu0 %3952  ;;  %v3978_v10 = vsel %vm531_vm2, %v3955_v34, 0 }
0x13d3   :  { %v3975_v32 = vsel %vm531_vm2, %v3953_v3, 0 }
0x13d5   :  { %v3943_v20 = vpop.permute.xlu1 %3942 }
0x13d6   :  { %v3941_v1 = vpop.permute.xlu0 %3940 }
0x13d8   :  { %7554 = vmatmul.mubr.msk.bf16.vlgmr.msra.gmra.mrb[112].mxu1 %vm531_vm2, %v10268_v60 }
0x13d9   :  { %7578 = vmatpush3.bf16.xpose.msra.mxu1 %v3969_v22  ;;  %v3947_v61 = vpop.permute.xlu1 %3946  ;;  %7557 = vmatprep.mubr.msk.bf16.mxu1 %vm531_vm2, %v10290_v45 }
0x13da   :  { %7874 = vmatprep.subr.msk.bf16.mxu1 %vm531_vm2, %v3951_v56  ;;  %v3945_v57 = vpop.permute.xlu0 %3944 }
0x13dd   :  { %v3852_v43 = vpop.permute.xlu1 %3851 }
0x13de   :  { %7561 = vmatprep.subr.bf16.mxu0 %v3852_v43  ;;  %v3854_v50 = vpop.permute.xlu0 %3853 }
0x13df   :  { %7562 = vmatpush3.bf16.msra.mxu0 %v3852_v43 }
0x13e0   :  { %7558 = vmatmul.mubr.msk.bf16.gmra.mrb[116].mxu1 %vm531_vm2, %v10288_v52  ;;  %7563 = vmatprep.subr.bf16.mxu0 %v3854_v50 }
0x13e1   :  { %7580 = vmatpush3.bf16.xpose.msra.mxu1 %v3972_v36  ;;  %7585 = vmatprep.mubr.msk.bf16.mxu1 %vm531_vm2, %v3941_v1  ;;  %v3856_v26 = vpop.permute.xlu1 %3855 }
0x13e2   :  { %7875 = vmatprep.subr.msk.bf16.mxu1 %vm531_vm2, %v3953_v3 }
0x13e3   :  { %7564 = vmatpush3.bf16.msra.mxu0 %v3854_v50 }
0x13e4   :  { %7565 = vmatprep.subr.bf16.mxu0 %v3856_v26 }
0x13e7   :  { %7566 = vmatpush3.bf16.msra.mxu0 %v3856_v26 }
0x13e9   :  { %7582 = vmatpush3.bf16.xpose.msra.mxu1 %v3975_v32 }
0x13ea   :  { %7876 = vmatprep.subr.msk.bf16.mxu1 %vm531_vm2, %v3955_v34 }
0x13f1   :  { %7584 = vmatpush3.bf16.xpose.msra.mxu1 %v3978_v10 }
0x13f8   :  { %7586 = vmatmul.mubr.msk.bf16.vlgmr.msra.gmra.mrb[120].mxu1 %vm531_vm2, %v3943_v20 }
0x13f9   :  { %7589 = vmatprep.mubr.msk.bf16.mxu1 %vm531_vm2, %v3945_v57 }
0x1400   :  { %7590 = vmatmul.mubr.msk.bf16.gmra.mrb[124].mxu1 %vm531_vm2, %v3947_v61 }
0x1494   :  { %v7519_v11 = vpop.f32.mrb[104].mxu1 }
0x1495   :  { %v3398_v7 = vpop.f32.mrb[105].mxu1  ;;  %v3439_v4 = vadd.f32 %v7519_v11, %v11754_v53 }
0x1496   :  { %v3437_v38 = vadd.f32 %v3398_v7, %v11753_v28  ;;  %v7520_v35 = vpop.f32.mrb[106].mxu1 }
0x1497   :  { %v3440_v46 = vadd.f32 %v7520_v35, %v11755_v37  ;;  %v3401_v14 = vpop.f32.mrb[107].mxu1  ;;  %v10428_v23 = vadd.f32 %v10215_v42, %v3439_v4 }
0x1498   :  { %v3438_v21 = vadd.f32 %v3401_v14, %v11756_v25  ;;  %v10422_v47 = vadd.f32 %v10215_v42, %v3437_v38 }
0x1499   :  { %v10419_v27 = vadd.f32 %v10215_v42, %v3440_v46  ;;  %11760 = vst [vmem:[#allocation7_spill] sm:$0xff] %v10428_v23 }
0x149a   :  { %11758 = vst [vmem:[#allocation8_spill] sm:$0xff] %v10422_v47  ;;  %v10425_v41 = vadd.f32 %v10215_v42, %v3438_v21 }
0x149b   :  { %11757 = vst [vmem:[#allocation6_spill] sm:$0xff] %v10419_v27  ;;  %v3473_v24 = vpack.c.bf16 %v10419_v27, %v10428_v23 }
0x149c   :  { %11759 = vst [vmem:[#allocation9_spill] sm:$0xff] %v10425_v41  ;;  %v3472_v12 = vpack.c.bf16 %v10425_v41, %v10422_v47 }
0x149e   :  { %7537 = vmatprep.mubr.msk.bf16.mxu0 %vm389_vm1, %v3472_v12 }
0x149f   :  { %7538 = vmatmul.mubr.msk.bf16.gmra.mrb[88].mxu0 %vm389_vm1, %v3473_v24 }
0x14a3   :  { %v7523_v5 = vpop.f32.mrb[108].mxu1 }
0x14a4   :  { %v3414_v55 = vpop.f32.mrb[109].mxu1  ;;  %v3443_v15 = vadd.f32 %v7523_v5, %v11762_v30 }
0x14a5   :  { %v3441_v49 = vadd.f32 %v3414_v55, %v11761_v19  ;;  %v7524_v2 = vpop.f32.mrb[110].mxu1 }
0x14a6   :  { %v3444_v6 = vadd.f32 %v7524_v2, %v11763_v40  ;;  %v3417_v63 = vpop.f32.mrb[111].mxu1  ;;  %v10450_v56 = vadd.f32 %v10215_v42, %v3443_v15 }
0x14a7   :  { %v3442_v0 = vadd.f32 %v3417_v63, %v11764_v59  ;;  %v10444_v16 = vadd.f32 %v10215_v42, %v3441_v49 }
0x14a8   :  { %v10441_v51 = vadd.f32 %v10215_v42, %v3444_v6  ;;  %11768 = vst [vmem:[#allocation31_spill] sm:$0xff] %v10450_v56 }
0x14a9   :  { %11766 = vst [vmem:[#allocation32_spill] sm:$0xff] %v10444_v16  ;;  %v10447_v62 = vadd.f32 %v10215_v42, %v3442_v0 }
0x14aa   :  { %11765 = vst [vmem:[#allocation34_spill] sm:$0xff] %v10441_v51  ;;  %v3475_v34 = vpack.c.bf16 %v10441_v51, %v10450_v56 }
0x14ab   :  { %11767 = vst [vmem:[#allocation33_spill] sm:$0xff] %v10447_v62  ;;  %v3474_v31 = vpack.c.bf16 %v10447_v62, %v10444_v16  ;;  %v7555_v33 = vpop.f32.mrb[112].mxu1 }
0x14ac   :  { %v10456_v3 = vpop.f32.mrb[113].mxu1  ;;  %v3735_v20 = vsel %vm236_vm0, %v7555_v33, -inf }
0x14ad   :  { %3736 = vmax.xlane.f32.xlu0 %v3735_v20  ;;  %7541 = vmatprep.mubr.msk.bf16.mxu0 %vm389_vm1, %v3474_v31  ;;  %v10460_v1 = vpop.f32.mrb[114].mxu1  ;;  %v3729_v61 = vsel %vm236_vm0, %v10456_v3, -inf }
0x14ae   :  { %7542 = vmatmul.mubr.msk.bf16.gmra.mrb[92].mxu0 %vm389_vm1, %v3475_v34  ;;  %v3701_v42 = vpop.f32.mrb[115].mxu1  ;;  %v3738_v50 = vsel %vm236_vm0, %v10460_v1, -inf }
0x14af   :  { %v3732_v22 = vsel %vm236_vm0, %v3701_v42, -inf }
0x14b0   :  { %3733 = vmax.xlane.f32.xlu1 %v3732_v22 }
0x14b1   :  { %3730 = vmax.xlane.f32.xlu0 %v3729_v61 }
0x14b3   :  { %v10466_v57 = vpop.f32.mrb[116].mxu1 }
0x14b4   :  { %v10468_v43 = vpop.f32.mrb[117].mxu1  ;;  %v3747_v36 = vsel %vm236_vm0, %v10466_v57, -inf }
0x14b5   :  { %3739 = vmax.xlane.f32.xlu0 %v3738_v50  ;;  %3748 = vmax.xlane.f32.xlu1 %v3747_v36  ;;  %v10474_v26 = vpop.f32.mrb[118].mxu1  ;;  %v3741_v10 = vsel %vm236_vm0, %v10468_v43, -inf }
0x14b6   :  { %v10476_v32 = vpop.f32.mrb[119].mxu1  ;;  %v3750_v11 = vsel %vm236_vm0, %v10474_v26, -inf }
0x14b7   :  { %v3744_v7 = vsel %vm236_vm0, %v10476_v32, -inf }
0x14b9   :  { %3742 = vmax.xlane.f32.xlu1 %v3741_v10  ;;  %3751 = vmax.xlane.f32.xlu0 %v3750_v11 }
0x14bd   :  { %3745 = vmax.xlane.f32.xlu0 %v3744_v7 }
0x14cb   :  { %v10484_v28 = vpop.f32.mrb[120].mxu1 }
0x14cc   :  { %v10486_v38 = vpop.f32.mrb[121].mxu1  ;;  %v4051_v35 = vsel %vm236_vm0, %v10484_v28, -inf }
0x14cd   :  { %4052 = vmax.xlane.f32.xlu1 %v4051_v35  ;;  %v10490_v53 = vpop.f32.mrb[122].mxu1  ;;  %v4045_v46 = vsel %vm236_vm0, %v10486_v38, -inf }
0x14ce   :  { %v10492_v4 = vpop.f32.mrb[123].mxu1  ;;  %v4054_v37 = vsel %vm236_vm0, %v10490_v53, -inf }
0x14cf   :  { %4055 = vmax.xlane.f32.xlu0 %v4054_v37  ;;  %v4048_v14 = vsel %vm236_vm0, %v10492_v4, -inf }
0x14d1   :  { %4046 = vmax.xlane.f32.xlu1 %v4045_v46 }
0x14d3   :  { %v10500_v25 = vpop.f32.mrb[124].mxu1  ;;  %4049 = vmax.xlane.f32.xlu0 %v4048_v14 }
0x14d4   :  { %v10502_v21 = vpop.f32.mrb[125].mxu1  ;;  %v4063_v55 = vsel %vm236_vm0, %v10500_v25, -inf }
0x14d5   :  { %v10504_v12 = vpop.f32.mrb[126].mxu1  ;;  %v4057_v49 = vsel %vm236_vm0, %v10502_v21, -inf }
0x14d6   :  { %v10506_v24 = vpop.f32.mrb[127].mxu1  ;;  %v4066_v5 = vsel %vm236_vm0, %v10504_v12, -inf }
0x14d7   :  { %v4060_v19 = vsel %vm236_vm0, %v10506_v24, -inf }
0x14e2   :  { %4167 = vrot.lane.b32.xlu1 %v10270_v17, %s8725_s23 }
0x14e6   :  { %4169 = vrot.lane.b32.xlu1 %v10268_v60, %s8725_s23 }
0x14e9   :  { %3857 = vrot.lane.b32.xlu0 %v10288_v52, %s8718_s4 }
0x1508   :  { %4067 = vmax.xlane.f32.xlu0 %v4066_v5 }
0x150a   :  { %4064 = vmax.xlane.f32.xlu1 %v4063_v55 }
0x150c   :  { %4061 = vmax.xlane.f32.xlu0 %v4060_v19 }
0x150e   :  { %4058 = vmax.xlane.f32.xlu1 %v4057_v49 }
0x151f   :  { %4173 = vrot.lane.b32.xlu1 %v10288_v52, %s8725_s23 }
0x1522   :  { %4171 = vrot.lane.b32.xlu0 %v10290_v45, %s8725_s23 }
0x1523   :  { %4264 = vrot.lane.b32.xlu1 %v10270_v17, %s8720_s18 }
0x153a   :  { %v3737_v2 = vpop.xlane.xlu0 %3736 }
0x153b   :  { %v3755_v30 = vsub.f32 %v7555_v33, %v3737_v2 }
0x153d   :  { %v3765_v15 = vmul.f32 1.442695, %v3755_v30  ;;  %v3734_v40 = vpop.xlane.xlu1 %3733 }
0x153e   :  { %v3731_v6 = vpop.xlane.xlu0 %3730  ;;  %v3754_v59 = vsub.f32 %v3701_v42, %v3734_v40 }
0x153f   :  { %8460 = vpow2.f32 %v3765_v15  ;;  %v3753_v63 = vsub.f32 %v10456_v3, %v3731_v6 }
0x1540   :  { %v3763_v22 = vmul.f32 1.442695, %v3754_v59 }
0x1541   :  { %v3761_v0 = vmul.f32 1.442695, %v3753_v63 }
0x1542   :  { %v3740_v31 = vpop.xlane.xlu0 %3739  ;;  %v3749_v34 = vpop.xlane.xlu1 %3748 }
0x1543   :  { %8462 = vpow2.f32 %v3761_v0  ;;  %v3756_v20 = vsub.f32 %v10460_v1, %v3740_v31  ;;  %v3759_v50 = vsub.f32 %v10466_v57, %v3749_v34 }
0x1545   :  { %v3767_v61 = vmul.f32 1.442695, %v3756_v20  ;;  %v3773_v3 = vmul.f32 1.442695, %v3759_v50 }
0x1546   :  { %v3743_v36 = vpop.xlane.xlu1 %3742  ;;  %v3752_v10 = vpop.xlane.xlu0 %3751 }
0x1547   :  { %8464 = vpow2.f32 %v3767_v61  ;;  %v3757_v33 = vsub.f32 %v10468_v43, %v3743_v36  ;;  %v3760_v7 = vsub.f32 %v10474_v26, %v3752_v10 }
0x1548   :  { %8466 = vpow2.f32 %v3763_v22 }
0x1549   :  { %v10532_v11 = vpop.eup %8460  ;;  %v3769_v42 = vmul.f32 1.442695, %v3757_v33  ;;  %v3775_v57 = vmul.f32 1.442695, %v3760_v7 }
0x154a   :  { %v3746_v35 = vpop.xlane.xlu0 %3745  ;;  %v3783_v1 = vsel %vm236_vm0, %v10532_v11, 0.0 }
0x154b   :  { %8468 = vpow2.f32 %v3769_v42  ;;  %3784 = vadd.xlane.f32.xlu1 %v3783_v1  ;;  %v3758_v46 = vsub.f32 %v10476_v32, %v3746_v35 }
0x154c   :  { %8470 = vpow2.f32 %v3773_v3 }
0x154d   :  { %v10537_v37 = vpop.eup %8462  ;;  %8472 = vpow2.f32 %v3775_v57  ;;  %v3771_v26 = vmul.f32 1.442695, %v3758_v46 }
0x154e   :  { %v3777_v43 = vsel %vm236_vm0, %v10537_v37, 0.0 }
0x154f   :  { %3778 = vadd.xlane.f32.xlu1 %v3777_v43  ;;  %8474 = vpow2.f32 %v3771_v26 }
0x1551   :  { %v10542_v14 = vpop.eup %8464 }
0x1552   :  { %v3786_v5 = vsel %vm236_vm0, %v10542_v14, 0.0  ;;  %v10546_v55 = vpop.eup %8466 }
0x1553   :  { %3787 = vadd.xlane.f32.xlu0 %v3786_v5  ;;  %v3780_v49 = vsel %vm236_vm0, %v10546_v55, 0.0 }
0x1555   :  { %v10548_v19 = vpop.eup %8468 }
0x1556   :  { %v3789_v32 = vsel %vm236_vm0, %v10548_v19, 0.0  ;;  %v10554_v2 = vpop.eup %8470 }
0x1557   :  { %3790 = vadd.xlane.f32.xlu1 %v3789_v32  ;;  %3781 = vadd.xlane.f32.xlu0 %v3780_v49  ;;  %v3795_v15 = vsel %vm236_vm0, %v10554_v2, 0.0  ;;  %v10558_v40 = vpop.eup %8472 }
0x1558   :  { %v3798_v34 = vsel %vm236_vm0, %v10558_v40, 0.0 }
0x1559   :  { %v10564_v20 = vpop.eup %8474 }
0x155a   :  { %v4053_v30 = vpop.xlane.xlu1 %4052  ;;  %v3792_v10 = vsel %vm236_vm0, %v10564_v20, 0.0 }
0x155b   :  { %v4071_v6 = vsub.f32 %v10484_v28, %v4053_v30  ;;  %3796 = vadd.xlane.f32.xlu0 %v3795_v15 }
0x155c   :  { %v4056_v63 = vpop.xlane.xlu0 %4055 }
0x155d   :  { %v4081_v59 = vmul.f32 1.442695, %v4071_v6  ;;  %v4072_v0 = vsub.f32 %v10490_v53, %v4056_v63 }
0x155e   :  { %v4047_v31 = vpop.xlane.xlu1 %4046 }
0x155f   :  { %8476 = vpow2.f32 %v4081_v59  ;;  %v4069_v22 = vsub.f32 %v10486_v38, %v4047_v31  ;;  %3799 = vadd.xlane.f32.xlu0 %v3798_v34  ;;  %v4083_v61 = vmul.f32 1.442695, %v4072_v0 }
0x1560   :  { %v4050_v50 = vpop.xlane.xlu0 %4049 }
0x1561   :  { %v4077_v36 = vmul.f32 1.442695, %v4069_v22  ;;  %v4070_v28 = vsub.f32 %v10492_v4, %v4050_v50 }
0x1562   :  { %v10570_v3 = vpop.permute.xlu1 %4167 }
0x1563   :  { %8478 = vpow2.f32 %v4077_v36  ;;  %v4079_v53 = vmul.f32 1.442695, %v4070_v28  ;;  %3793 = vadd.xlane.f32.xlu0 %v3792_v10 }
0x1564   :  { %8480 = vpow2.f32 %v4083_v61  ;;  %v3858_v33 = vpop.permute.xlu0 %3857 }
0x1565   :  { %8482 = vpow2.f32 %v4079_v53  ;;  %7567 = vmatprep.subr.bf16.mxu0 %v3858_v33 }
0x1566   :  { %7568 = vmatpush3.bf16.msra.mxu0 %v3858_v33  ;;  %v10607_v33 = vpop.permute.xlu1 %4169 }
0x1567   :  { %7593 = vmatprep.subr.bf16.mxu0 %v10570_v3 }
0x1569   :  { %v10573_v38 = vpop.eup %8476 }
0x156a   :  { %v4099_v4 = vsel %vm236_vm0, %v10573_v38, 0.0 }
0x156b   :  { %4100 = vadd.xlane.f32.xlu1 %v4099_v4 }
0x156d   :  { %v10577_v42 = vpop.eup %8478 }
0x156e   :  { %v10579_v7 = vpop.eup %8480  ;;  %v4093_v35 = vsel %vm236_vm0, %v10577_v42, 0.0 }
0x156f   :  { %v10583_v1 = vpop.eup %8482  ;;  %4094 = vadd.xlane.f32.xlu1 %v4093_v35  ;;  %v4102_v43 = vsel %vm236_vm0, %v10579_v7, 0.0 }
0x1570   :  { %v4096_v57 = vsel %vm236_vm0, %v10583_v1, 0.0 }
0x1571   :  { %4097 = vadd.xlane.f32.xlu0 %v4096_v57 }
0x1572   :  { %v7539_v46 = vpop.f32.mrb[88].mxu0 }
0x1573   :  { %4103 = vadd.xlane.f32.xlu1 %v4102_v43  ;;  %v3589_v26 = vpop.f32.mrb[89].mxu0  ;;  %v3598_v32 = vadd.f32 %v7539_v46, %v10262_v8 }
0x1574   :  { %v7540_v5 = vpop.f32.mrb[90].mxu0  ;;  %v3590_v15 = vadd.f32 %v10262_v8, %v3589_v26 }
0x1575   :  { %v3601_v49 = vadd.f32 %v7540_v5, %v10262_v8  ;;  %v3592_v30 = vpop.f32.mrb[91].mxu0 }
0x1576   :  { %v3593_v6 = vadd.f32 %v10262_v8, %v3592_v30 }
0x1577   :  { %v10593_v63 = vpack.c.bf16 %v3601_v49, %v3598_v32 }
0x1578   :  { %v10595_v59 = vpack.c.bf16 %v3593_v6, %v3590_v15 }
0x1581   :  { %v7543_v0 = vpop.f32.mrb[92].mxu0 }
0x1582   :  { %v3605_v31 = vpop.f32.mrb[93].mxu0  ;;  %v3614_v22 = vadd.f32 %v7543_v0, %v10262_v8 }
0x1583   :  { %v7544_v34 = vpop.f32.mrb[94].mxu0  ;;  %v3606_v36 = vadd.f32 %v10262_v8, %v3605_v31 }
0x1584   :  { %4268 = vrot.lane.b32.xlu1 %v10290_v45, %s8720_s18  ;;  %v3617_v61 = vadd.f32 %v7544_v34, %v10262_v8  ;;  %v3608_v50 = vpop.f32.mrb[95].mxu0 }
0x1585   :  { %v3609_v28 = vadd.f32 %v10262_v8, %v3608_v50 }
0x1586   :  { %v10603_v10 = vpack.c.bf16 %v3617_v61, %v3614_v22 }
0x1587   :  { %v10605_v53 = vpack.c.bf16 %v3609_v28, %v3606_v36 }
0x1595   :  { %v4068_v4 = vpop.xlane.xlu0 %4067 }
0x1596   :  { %v4076_v43 = vsub.f32 %v10504_v12, %v4068_v4 }
0x1597   :  { %v4065_v35 = vpop.xlane.xlu1 %4064 }
0x1598   :  { %v4075_v57 = vsub.f32 %v10500_v25, %v4065_v35  ;;  %v4091_v30 = vmul.f32 1.442695, %v4076_v43 }
0x1599   :  { %v4062_v46 = vpop.xlane.xlu0 %4061 }
0x159a   :  { %v4089_v26 = vmul.f32 1.442695, %v4075_v57  ;;  %v4074_v5 = vsub.f32 %v10506_v24, %v4062_v46 }
0x159b   :  { %v4059_v32 = vpop.xlane.xlu1 %4058 }
0x159c   :  { %8484 = vpow2.f32 %v4089_v26  ;;  %v4087_v49 = vmul.f32 1.442695, %v4074_v5  ;;  %v4073_v8 = vsub.f32 %v10502_v21, %v4059_v32 }
0x159d   :  { %v4172_v36 = vpop.permute.xlu0 %4171 }
0x159e   :  { %8486 = vpow2.f32 %v4087_v49  ;;  %v4085_v15 = vmul.f32 1.442695, %v4073_v8 }
0x159f   :  { %v10641_v22 = vpop.permute.xlu1 %4173 }
0x15a0   :  { %8488 = vpow2.f32 %v4085_v15 }
0x15a1   :  { %8490 = vpow2.f32 %v4091_v30 }
0x15a3   :  { %v10643_v61 = vpop.permute.xlu1 %4264 }
0x15a6   :  { %v10613_v6 = vpop.eup %8484 }
0x15a7   :  { %v4111_v25 = vsel %vm236_vm0, %v10613_v6, 0.0 }
0x15a8   :  { %v10617_v0 = vpop.eup %8486  ;;  %4112 = vadd.xlane.f32.xlu0 %v4111_v25 }
0x15a9   :  { %v4108_v12 = vsel %vm236_vm0, %v10617_v0, 0.0 }
0x15aa   :  { %v10621_v24 = vpop.eup %8488  ;;  %4109 = vadd.xlane.f32.xlu1 %v4108_v12 }
0x15ab   :  { %v4105_v21 = vsel %vm236_vm0, %v10621_v24, 0.0  ;;  %v10625_v31 = vpop.eup %8490 }
0x15ac   :  { %4106 = vadd.xlane.f32.xlu0 %v4105_v21  ;;  %v4114_v34 = vsel %vm236_vm0, %v10625_v31, 0.0 }
0x15b0   :  { %4115 = vadd.xlane.f32.xlu0 %v4114_v34 }
0x15bb   :  { %4270 = vrot.lane.b32.xlu1 %v10288_v52, %s8720_s18 }
0x15bf   :  { %4258 = vrot.lane.b32.xlu1 %v10268_v60, %s8723_s21 }
0x15c3   :  { %4262 = vrot.lane.b32.xlu1 %v10288_v52, %s8723_s21 }
0x15c6   :  { %4266 = vrot.lane.b32.xlu0 %v10268_v60, %s8720_s18 }
0x15ca   :  { %4256 = vrot.lane.b32.xlu0 %v10270_v17, %s8723_s21 }
0x15ce   :  { %4260 = vrot.lane.b32.xlu0 %v10290_v45, %s8723_s21 }
0x15d8   :  { %v3785_v50 = vpop.xlane.xlu1 %3784 }
0x15dc   :  { %v3779_v28 = vpop.xlane.xlu1 %3778 }
0x15dd   :  { %8492 = vrcp.f32 %v3779_v28 }
0x15e0   :  { %v3788_v4 = vpop.xlane.xlu0 %3787 }
0x15e1   :  { %8494 = vrcp.f32 %v3788_v4 }
0x15e2   :  { %8496 = vrcp.f32 %v3785_v50 }
0x15e4   :  { %v3782_v35 = vpop.xlane.xlu0 %3781  ;;  %v3791_v57 = vpop.xlane.xlu1 %3790 }
0x15e5   :  { %8498 = vrcp.f32 %v3782_v35 }
0x15e6   :  { %8500 = vrcp.f32 %v3791_v57 }
0x15e7   :  { %v8493_v43 = vpop.eup %8492 }
0x15e8   :  { %v3797_v46 = vpop.xlane.xlu0 %3796  ;;  %v3817_v49 = vmul.f32 %v8493_v43, %v10537_v37 }
0x15ea   :  { %v3825_v34 = vsel %vm236_vm0, %v3817_v49, 0.0 }
0x15eb   :  { %v8495_v5 = vpop.eup %8494 }
0x15ec   :  { %v3800_v26 = vpop.xlane.xlu0 %3799  ;;  %v8497_v32 = vpop.eup %8496  ;;  %v3820_v30 = vmul.f32 %v8495_v5, %v10542_v14 }
0x15ed   :  { %8502 = vrcp.f32 %v3800_v26  ;;  %v3819_v25 = vmul.f32 %v8497_v32, %v10532_v11 }
0x15ee   :  { %8504 = vrcp.f32 %v3797_v46  ;;  %v3830_v11 = vsel %vm236_vm0, %v3820_v30, 0.0 }
0x15ef   :  { %v8499_v8 = vpop.eup %8498  ;;  %v3848_v4 = vpack.c.bf16 %v3820_v30, %v3819_v25  ;;  %v3828_v57 = vsel %vm236_vm0, %v3819_v25, 0.0 }
0x15f0   :  { %v3794_v15 = vpop.xlane.xlu0 %3793  ;;  %v3818_v12 = vmul.f32 %v8499_v8, %v10546_v55  ;;  %v8501_v21 = vpop.eup %8500 }
0x15f1   :  { %8506 = vrcp.f32 %v3794_v15  ;;  %v3821_v37 = vmul.f32 %v8501_v21, %v10548_v19 }
0x15f2   :  { %v3826_v50 = vsel %vm236_vm0, %v3818_v12, 0.0  ;;  %v3847_v28 = vpack.c.bf16 %v3818_v12, %v3817_v49 }
0x15f3   :  { %v3827_v35 = vadd.f32 %v3826_v50, %v3825_v34  ;;  %v3832_v5 = vsel %vm236_vm0, %v3821_v37, 0.0 }
0x15f4   :  { %7569 = vmatprep.mubr.msk.bf16.mxu0 %vm236_vm0, %v3847_v28 }
0x15f5   :  { %v3829_v14 = vadd.f32 %v3828_v57, %v3827_v35  ;;  %7570 = vmatmul.mubr.msk.bf16.vlgmr.msra.gmra.mrb[96].mxu0 %vm236_vm0, %v3848_v4 }
0x15f6   :  { %7594 = vmatpush3.bf16.msra.mxu0 %v10570_v3 }
0x15f7   :  { %v8503_v55 = vpop.eup %8502  ;;  %7595 = vmatprep.subr.bf16.mxu0 %v10607_v33  ;;  %v3831_v43 = vadd.f32 %v3830_v11, %v3829_v14 }
0x15f8   :  { %v4101_v46 = vpop.xlane.xlu1 %4100  ;;  %v8505_v26 = vpop.eup %8504  ;;  %v3824_v19 = vmul.f32 %v8503_v55, %v10558_v40 }
0x15f9   :  { %v3833_v32 = vadd.f32 %v3832_v5, %v3831_v43  ;;  %8508 = vrcp.f32 %v4101_v46  ;;  %v3823_v3 = vmul.f32 %v8505_v26, %v10554_v2 }
0x15fa   :  { %7596 = vmatpush3.bf16.msra.mxu0 %v10607_v33  ;;  %v3838_v2 = vsel %vm236_vm0, %v3824_v19, 0.0 }
0x15fb   :  { %v8507_v49 = vpop.eup %8506  ;;  %7597 = vmatprep.subr.bf16.mxu0 %v4172_v36  ;;  %v3850_v34 = vpack.c.bf16 %v3824_v19, %v3823_v3  ;;  %v3836_v40 = vsel %vm236_vm0, %v3823_v3, 0.0 }
0x15fc   :  { %v4095_v8 = vpop.xlane.xlu1 %4094  ;;  %v3822_v30 = vmul.f32 %v8507_v49, %v10564_v20 }
0x15fd   :  { %8510 = vrcp.f32 %v4095_v8 }
0x15fe   :  { %v4098_v15 = vpop.xlane.xlu0 %4097  ;;  %v3834_v25 = vsel %vm236_vm0, %v3822_v30, 0.0  ;;  %v3849_v12 = vpack.c.bf16 %v3822_v30, %v3821_v37  ;;  %7598 = vmatpush3.bf16.msra.mxu0 %v4172_v36 }
0x15ff   :  { %8512 = vrcp.f32 %v4098_v15  ;;  %v3835_v21 = vadd.f32 %v3834_v25, %v3833_v32  ;;  %7599 = vmatprep.subr.bf16.mxu0 %v10641_v22 }
0x1600   :  { %v4104_v33 = vpop.xlane.xlu1 %4103  ;;  %7573 = vmatprep.mubr.msk.bf16.mxu0 %vm236_vm0, %v3849_v12 }
0x1601   :  { %8514 = vrcp.f32 %v4104_v33  ;;  %v3837_v20 = vadd.f32 %v3836_v40, %v3835_v21  ;;  %7574 = vmatmul.mubr.msk.bf16.gmra.mrb[100].mxu0 %vm236_vm0, %v3850_v34 }
0x1602   :  { %7600 = vmatpush3.bf16.msra.mxu0 %v10641_v22 }
0x1603   :  { %v3839_v50 = vadd.f32 %v3838_v2, %v3837_v20  ;;  %7877 = vmatprep.subr.msk.bf16.mxu0 %vm531_vm2, %v10643_v61  ;;  %v8509_v36 = vpop.eup %8508 }
0x1604   :  { %v4135_v57 = vmul.f32 %v8509_v36, %v10573_v38  ;;  %v4285_v38 = vsel %vm531_vm2, %v10643_v61, 0 }
0x1605   :  { %v3840_v33 = vrot.slane %v3839_v50, 4 }
0x1606   :  { %v4144_v26 = vsel %vm236_vm0, %v4135_v57, 0.0 }
0x1607   :  { %v8511_v28 = vpop.eup %8510 }
0x1608   :  { %v4133_v4 = vmul.f32 %v8511_v28, %v10577_v42 }
0x1609   :  { %v8513_v35 = vpop.eup %8512 }
0x160a   :  { %v4134_v37 = vmul.f32 %v8513_v35, %v10583_v1  ;;  %v4141_v55 = vsel %vm236_vm0, %v4133_v4, 0.0  ;;  %v4269_v1 = vpop.permute.xlu1 %4268 }
0x160b   :  { %v8515_v14 = vpop.eup %8514 }
0x160c   :  { %v4136_v11 = vmul.f32 %v8515_v14, %v10579_v7  ;;  %v4142_v46 = vsel %vm236_vm0, %v4134_v37, 0.0  ;;  %v4163_v22 = vpack.c.bf16 %v4134_v37, %v4133_v4 }
0x160d   :  { %v4143_v43 = vadd.f32 %v4142_v46, %v4141_v55 }
0x160e   :  { %v4164_v5 = vpack.c.bf16 %v4136_v11, %v4135_v57  ;;  %7601 = vmatprep.mubr.msk.bf16.mxu0 %vm236_vm0, %v4163_v22  ;;  %v4146_v32 = vsel %vm236_vm0, %v4136_v11, 0.0  ;;  %v3841_v57 = vadd.f32 %v3840_v33, %v3839_v50 }
0x160f   :  { %v4145_v42 = vadd.f32 %v4144_v26, %v4143_v43 }
0x1610   :  { %7602 = vmatmul.mubr.msk.bf16.vlgmr.msra.gmra.mrb[104].mxu0 %vm236_vm0, %v4164_v5  ;;  %v3842_v22 = vrot.slane %v3841_v57, 2 }
0x1611   :  { %7610 = vmatpush3.bf16.xpose.msra.mxu0 %v4285_v38  ;;  %v4147_v7 = vadd.f32 %v4146_v32, %v4145_v42 }
0x1612   :  { %v3843_v50 = vadd.f32 %v3842_v22, %v3841_v57 }
0x1614   :  { %v3844_v38 = vrot.slane %v3843_v50, 1 }
0x1635   :  { %v4113_v49 = vpop.xlane.xlu0 %4112 }
0x1637   :  { %v4110_v19 = vpop.xlane.xlu1 %4109 }
0x1638   :  { %8516 = vrcp.f32 %v4110_v19  ;;  %v3845_v19 = vadd.f32 %v3844_v38, %v3843_v50 }
0x1639   :  { %8518 = vrcp.f32 %v4113_v49  ;;  %v4107_v8 = vpop.xlane.xlu0 %4106 }
0x163a   :  { %8520 = vrcp.f32 %v4107_v8 }
0x163b   :  { %v4271_v14 = vpop.permute.xlu1 %4270 }
0x163c   :  { %v4294_v5 = vsel %vm531_vm2, %v4271_v14, 0 }
0x163d   :  { %v4116_v30 = vpop.xlane.xlu0 %4115 }
0x163e   :  { %8522 = vrcp.f32 %v4116_v30 }
0x1641   :  { %v4267_v3 = vpop.permute.xlu0 %4266 }
0x1642   :  { %v8517_v15 = vpop.eup %8516  ;;  %7878 = vmatprep.subr.msk.bf16.mxu0 %vm531_vm2, %v4267_v3  ;;  %v4288_v25 = vsel %vm531_vm2, %v4267_v3, 0 }
0x1643   :  { %v8519_v12 = vpop.eup %8518  ;;  %7612 = vmatpush3.bf16.xpose.msra.mxu0 %v4288_v25  ;;  %v4138_v34 = vmul.f32 %v8517_v15, %v10617_v0 }
0x1644   :  { %v8521_v61 = vpop.eup %8520  ;;  %7879 = vmatprep.subr.msk.bf16.mxu0 %vm531_vm2, %v4269_v1  ;;  %v4139_v2 = vmul.f32 %v8519_v12, %v10613_v6 }
0x1645   :  { %v4137_v21 = vmul.f32 %v8521_v61, %v10621_v24  ;;  %v4150_v4 = vsel %vm236_vm0, %v4138_v34, 0.0  ;;  %v4291_v24 = vsel %vm531_vm2, %v4269_v1, 0  ;;  %v4257_v55 = vpop.permute.xlu0 %4256  ;;  %v4259_v1 = vpop.permute.xlu1 %4258 }
0x1646   :  { %v4152_v0 = vsel %vm236_vm0, %v4139_v2, 0.0 }
0x1647   :  { %v4148_v40 = vsel %vm236_vm0, %v4137_v21, 0.0  ;;  %v4165_v20 = vpack.c.bf16 %v4138_v34, %v4137_v21 }
0x1648   :  { %v8523_v36 = vpop.eup %8522  ;;  %v4149_v28 = vadd.f32 %v4148_v40, %v4147_v7 }
0x1649   :  { %7605 = vmatprep.mubr.msk.bf16.mxu0 %vm236_vm0, %v4165_v20  ;;  %v4140_v35 = vmul.f32 %v8523_v36, %v10625_v31  ;;  %v4261_v49 = vpop.permute.xlu0 %4260  ;;  %v4263_v3 = vpop.permute.xlu1 %4262 }
0x164a   :  { %v4151_v37 = vadd.f32 %v4150_v4, %v4149_v28 }
0x164b   :  { %7614 = vmatpush3.bf16.xpose.msra.mxu0 %v4291_v24  ;;  %v4166_v11 = vpack.c.bf16 %v4140_v35, %v4139_v2  ;;  %v4154_v46 = vsel %vm236_vm0, %v4140_v35, 0.0 }
0x164c   :  { %7880 = vmatprep.subr.msk.bf16.mxu0 %vm531_vm2, %v4271_v14  ;;  %v4153_v6 = vadd.f32 %v4152_v0, %v4151_v37 }
0x164d   :  { %7606 = vmatmul.mubr.msk.bf16.gmra.mrb[108].mxu0 %vm236_vm0, %v4166_v11 }
0x164e   :  { %v4155_v43 = vadd.f32 %v4154_v46, %v4153_v6  ;;  %7617 = vmatprep.mubr.msk.bf16.mxu0 %vm531_vm2, %v4257_v55 }
0x1650   :  { %v4156_v31 = vrot.slane %v4155_v43, 4 }
0x1652   :  { %v4157_v26 = vadd.f32 %v4156_v31, %v4155_v43 }
0x1653   :  { %7616 = vmatpush3.bf16.xpose.msra.mxu0 %v4294_v5 }
0x1654   :  { %v4158_v42 = vrot.slane %v4157_v26, 2 }
0x1656   :  { %v4159_v32 = vadd.f32 %v4158_v42, %v4157_v26 }
0x1658   :  { %v4160_v7 = vrot.slane %v4159_v32, 1 }
0x165a   :  { %7618 = vmatmul.mubr.msk.bf16.vlgmr.msra.gmra.mrb[112].mxu0 %vm531_vm2, %v4259_v1  ;;  %v4161_v8 = vadd.f32 %v4160_v7, %v4159_v32 }
0x165b   :  { %7621 = vmatprep.mubr.msk.bf16.mxu0 %vm531_vm2, %v4261_v49 }
0x165c   :  { %v10703_v30 = vadd.f32 %v4161_v8, %v3845_v19 }
0x1662   :  { %7622 = vmatmul.mubr.msk.bf16.gmra.mrb[116].mxu0 %vm531_vm2, %v4263_v3 }
0x16c8   :  { %v10706_v15 = vpop.f32.mrb[96].mxu0 }
0x16c9   :  { %11769 = vst [vmem:[#allocation25_spill] sm:$0xff] %v10706_v15  ;;  %v10708_v25 = vpop.f32.mrb[97].mxu0 }
0x16ca   :  { %11770 = vst [vmem:[#allocation23_spill] sm:$0xff] %v10708_v25  ;;  %v10710_v12 = vpop.f32.mrb[98].mxu0 }
0x16cb   :  { %11771 = vst [vmem:[#allocation26_spill] sm:$0xff] %v10710_v12  ;;  %v10712_v61 = vpop.f32.mrb[99].mxu0 }
0x16cc   :  { %11772 = vst [vmem:[#allocation24_spill] sm:$0xff] %v10712_v61 }
0x16d4   :  { %v10714_v21 = vpop.f32.mrb[100].mxu0 }
0x16d5   :  { %11773 = vst [vmem:[#allocation30_spill] sm:$0xff] %v10714_v21  ;;  %v10716_v34 = vpop.f32.mrb[101].mxu0 }
0x16d6   :  { %11774 = vst [vmem:[#allocation28_spill] sm:$0xff] %v10716_v34  ;;  %v10718_v33 = vpop.f32.mrb[102].mxu0 }
0x16d7   :  { %11775 = vst [vmem:[#allocation29_spill] sm:$0xff] %v10718_v33  ;;  %v10720_v40 = vpop.f32.mrb[103].mxu0 }
0x16d8   :  { %11776 = vst [vmem:[#allocation27_spill] sm:$0xff] %v10720_v40 }
0x16e3   :  { %v10722_v20 = vpop.f32.mrb[104].mxu0 }
0x16e4   :  { %v10724_v2 = vpop.f32.mrb[105].mxu0 }
0x16e5   :  { %v10726_v36 = vpop.f32.mrb[106].mxu0 }
0x16e6   :  { %v10730_v4 = vpop.f32.mrb[107].mxu0 }
0x1720   :  { %v10734_v57 = vpop.f32.mrb[108].mxu0 }
0x1721   :  { %v10736_v37 = vpop.f32.mrb[109].mxu0 }
0x1722   :  { %v10738_v24 = vpop.f32.mrb[110].mxu0 }
0x1723   :  { %v10742_v0 = vpop.f32.mrb[111].mxu0 }
0x172d   :  { %v7619_v6 = vpop.f32.mrb[112].mxu0 }
0x172e   :  { %v4330_v55 = vpop.f32.mrb[113].mxu0  ;;  %v4367_v46 = vsel %vm236_vm0, %v7619_v6, -inf }
0x172f   :  { %4368 = vmax.xlane.f32.xlu0 %v4367_v46  ;;  %v7620_v22 = vpop.f32.mrb[114].mxu0  ;;  %v4361_v50 = vsel %vm236_vm0, %v4330_v55, -inf }
0x1730   :  { %v4333_v43 = vpop.f32.mrb[115].mxu0  ;;  %v4370_v42 = vsel %vm236_vm0, %v7620_v22, -inf }
0x1731   :  { %v4364_v31 = vsel %vm236_vm0, %v4333_v43, -inf }
0x1732   :  { %4365 = vmax.xlane.f32.xlu1 %v4364_v31 }
0x1733   :  { %4362 = vmax.xlane.f32.xlu0 %v4361_v50 }
0x1735   :  { %v7623_v26 = vpop.f32.mrb[116].mxu0 }
0x1736   :  { %v4346_v5 = vpop.f32.mrb[117].mxu0  ;;  %v4379_v32 = vsel %vm236_vm0, %v7623_v26, -inf }
0x1737   :  { %4371 = vmax.xlane.f32.xlu0 %v4370_v42  ;;  %4380 = vmax.xlane.f32.xlu1 %v4379_v32  ;;  %v7624_v38 = vpop.f32.mrb[118].mxu0  ;;  %v4373_v49 = vsel %vm236_vm0, %v4346_v5, -inf }
0x1738   :  { %v10751_v7 = vpop.f32.mrb[119].mxu0  ;;  %v4382_v19 = vsel %vm236_vm0, %v7624_v38, -inf }
0x1739   :  { %v4376_v1 = vsel %vm236_vm0, %v10751_v7, -inf }
0x173b   :  { %4374 = vmax.xlane.f32.xlu1 %v4373_v49  ;;  %4377 = vmax.xlane.f32.xlu0 %v4376_v1 }
0x173f   :  { %4383 = vmax.xlane.f32.xlu0 %v4382_v19 }
0x174c   :  { %4483 = vrot.lane.b32.xlu1 %v10270_v17, %s8726_s24 }
0x1750   :  { %4487 = vrot.lane.b32.xlu1 %v10290_v45, %s8726_s24 }
0x1754   :  { %4489 = vrot.lane.b32.xlu1 %v10288_v52, %s8726_s24 }
0x1755   :  { %4485 = vrot.lane.b32.xlu0 %v10268_v60, %s8726_s24 }
0x1758   :  { %4580 = vrot.lane.b32.xlu1 %v10270_v17, %s8722_s20 }
0x17bc   :  { %v4369_v8 = vpop.xlane.xlu0 %4368 }
0x17bd   :  { %v4387_v3 = vsub.f32 %v7619_v6, %v4369_v8 }
0x17bf   :  { %v4397_v46 = vmul.f32 1.442695, %v4387_v3  ;;  %v4366_v31 = vpop.xlane.xlu1 %4365 }
0x17c0   :  { %v4363_v50 = vpop.xlane.xlu0 %4362  ;;  %v4386_v32 = vsub.f32 %v4333_v43, %v4366_v31 }
0x17c1   :  { %8524 = vpow2.f32 %v4397_v46  ;;  %v4385_v42 = vsub.f32 %v4330_v55, %v4363_v50 }
0x17c2   :  { %v4395_v14 = vmul.f32 1.442695, %v4386_v32 }
0x17c3   :  { %v4393_v1 = vmul.f32 1.442695, %v4385_v42 }
0x17c4   :  { %v4372_v49 = vpop.xlane.xlu0 %4371  ;;  %v4381_v19 = vpop.xlane.xlu1 %4380 }
0x17c5   :  { %8526 = vpow2.f32 %v4393_v1  ;;  %v4388_v11 = vsub.f32 %v7620_v22, %v4372_v49  ;;  %v4391_v28 = vsub.f32 %v7623_v26, %v4381_v19 }
0x17c7   :  { %v4399_v35 = vmul.f32 1.442695, %v4388_v11  ;;  %v4405_v6 = vmul.f32 1.442695, %v4391_v28 }
0x17c8   :  { %v4375_v62 = vpop.xlane.xlu1 %4374  ;;  %v4378_v51 = vpop.xlane.xlu0 %4377 }
0x17c9   :  { %8528 = vpow2.f32 %v4399_v35  ;;  %v4389_v8 = vsub.f32 %v4346_v5, %v4375_v62 }
0x17ca   :  { %8530 = vpow2.f32 %v4395_v14 }
0x17cb   :  { %v10767_v16 = vpop.eup %8524  ;;  %8532 = vpow2.f32 %v4405_v6  ;;  %v4401_v11 = vmul.f32 1.442695, %v4389_v8 }
0x17cc   :  { %v4484_v3 = vpop.permute.xlu1 %4483  ;;  %v4384_v46 = vpop.xlane.xlu0 %4383  ;;  %v4415_v55 = vsel %vm236_vm0, %v10767_v16, 0.0 }
0x17cd   :  { %4416 = vadd.xlane.f32.xlu1 %v4415_v55  ;;  %7625 = vmatprep.subr.bf16.mxu1 %v4484_v3  ;;  %v4392_v43 = vsub.f32 %v7624_v38, %v4384_v46  ;;  %8534 = vpow2.f32 %v4401_v11 }
0x17ce   :  { %7626 = vmatpush3.bf16.msra.mxu1 %v4484_v3  ;;  %v4390_v3 = vsub.f32 %v10751_v7, %v4378_v51 }
0x17cf   :  { %v8527_v22 = vpop.eup %8526  ;;  %v4407_v28 = vmul.f32 1.442695, %v4392_v43 }
0x17d0   :  { %v4488_v26 = vpop.permute.xlu1 %4487  ;;  %v4486_v31 = vpop.permute.xlu0 %4485  ;;  %v4409_v35 = vsel %vm236_vm0, %v8527_v22, 0.0  ;;  %v4403_v46 = vmul.f32 1.442695, %v4390_v3 }
0x17d1   :  { %4410 = vadd.xlane.f32.xlu1 %v4409_v35  ;;  %7627 = vmatprep.subr.bf16.mxu1 %v4486_v31  ;;  %8536 = vpow2.f32 %v4407_v28 }
0x17d2   :  { %7628 = vmatpush3.bf16.msra.mxu1 %v4486_v31  ;;  %8538 = vpow2.f32 %v4403_v46 }
0x17d3   :  { %v8529_v62 = vpop.eup %8528  ;;  %7629 = vmatprep.subr.bf16.mxu1 %v4488_v26 }
0x17d4   :  { %v4490_v14 = vpop.permute.xlu1 %4489  ;;  %v4418_v5 = vsel %vm236_vm0, %v8529_v62, 0.0  ;;  %v8531_v50 = vpop.eup %8530 }
0x17d5   :  { %4419 = vadd.xlane.f32.xlu0 %v4418_v5  ;;  %v4412_v38 = vsel %vm236_vm0, %v8531_v50, 0.0  ;;  %v10774_v42 = vpop.eup %8532 }
0x17d6   :  { %7630 = vmatpush3.bf16.msra.mxu1 %v4488_v26  ;;  %v4427_v1 = vsel %vm236_vm0, %v10774_v42, 0.0 }
0x17d7   :  { %7631 = vmatprep.subr.bf16.mxu1 %v4490_v14  ;;  %v8535_v49 = vpop.eup %8534 }
0x17d8   :  { %v4581_v32 = vpop.permute.xlu1 %4580  ;;  %v4421_v19 = vsel %vm236_vm0, %v8535_v49, 0.0 }
0x17d9   :  { %4413 = vadd.xlane.f32.xlu0 %v4412_v38 }
0x17da   :  { %7632 = vmatpush3.bf16.msra.mxu1 %v4490_v14 }
0x17db   :  { %7881 = vmatprep.subr.msk.bf16.mxu1 %vm531_vm2, %v4581_v32  ;;  %v10780_v6 = vpop.eup %8536 }
0x17dc   :  { %v4430_v8 = vsel %vm236_vm0, %v10780_v6, 0.0  ;;  %v10791_v55 = vpop.eup %8538 }
0x17dd   :  { %4428 = vadd.xlane.f32.xlu0 %v4427_v1  ;;  %v4424_v11 = vsel %vm236_vm0, %v10791_v55, 0.0 }
0x17e1   :  { %4422 = vadd.xlane.f32.xlu0 %v4421_v19 }
0x17e2   :  { %4584 = vrot.lane.b32.xlu1 %v10290_v45, %s8722_s20 }
0x17e5   :  { %4431 = vadd.xlane.f32.xlu0 %v4430_v8 }
0x17fb   :  { %4582 = vrot.lane.b32.xlu0 %v10268_v60, %s8722_s20 }
0x17ff   :  { %4572 = vrot.lane.b32.xlu0 %v10270_v17, %s8724_s22 }
0x1803   :  { %4576 = vrot.lane.b32.xlu0 %v10290_v45, %s8724_s22 }
0x1806   :  { %4425 = vadd.xlane.f32.xlu1 %v4424_v11 }
0x1817   :  { %4586 = vrot.lane.b32.xlu1 %v10288_v52, %s8722_s20 }
0x181b   :  { %4574 = vrot.lane.b32.xlu1 %v10268_v60, %s8724_s22 }
0x181f   :  { %4578 = vrot.lane.b32.xlu1 %v10288_v52, %s8724_s22 }
0x185a   :  { %v4417_v51 = vpop.xlane.xlu1 %4416 }
0x185e   :  { %v4411_v7 = vpop.xlane.xlu1 %4410 }
0x185f   :  { %8540 = vrcp.f32 %v4411_v7 }
0x1862   :  { %v4420_v43 = vpop.xlane.xlu0 %4419 }
0x1863   :  { %8542 = vrcp.f32 %v4420_v43 }
0x1864   :  { %8544 = vrcp.f32 %v4417_v51 }
0x1866   :  { %v4414_v26 = vpop.xlane.xlu0 %4413 }
0x1867   :  { %8546 = vrcp.f32 %v4414_v26 }
0x1869   :  { %v8541_v35 = vpop.eup %8540 }
0x186a   :  { %v4429_v31 = vpop.xlane.xlu0 %4428  ;;  %v4449_v38 = vmul.f32 %v8541_v35, %v8527_v22  ;;  %v4601_v22 = vsel %vm531_vm2, %v4581_v32, 0 }
0x186c   :  { %v4457_v11 = vsel %vm236_vm0, %v4449_v38, 0.0 }
0x186d   :  { %v8543_v28 = vpop.eup %8542 }
0x186e   :  { %v4423_v14 = vpop.xlane.xlu0 %4422  ;;  %v8545_v5 = vpop.eup %8544  ;;  %v4452_v19 = vmul.f32 %v8543_v28, %v8529_v62 }
0x186f   :  { %8548 = vrcp.f32 %v4423_v14  ;;  %v4451_v8 = vmul.f32 %v8545_v5, %v10767_v16 }
0x1870   :  { %v4462_v16 = vsel %vm236_vm0, %v4452_v19, 0.0 }
0x1871   :  { %v8547_v1 = vpop.eup %8546  ;;  %v4480_v43 = vpack.c.bf16 %v4452_v19, %v4451_v8  ;;  %v4460_v56 = vsel %vm236_vm0, %v4451_v8, 0.0 }
0x1872   :  { %v4432_v3 = vpop.xlane.xlu0 %4431  ;;  %v4450_v46 = vmul.f32 %v8547_v1, %v8531_v50  ;;  %v4585_v1 = vpop.permute.xlu1 %4584 }
0x1873   :  { %8550 = vrcp.f32 %v4432_v3 }
0x1874   :  { %v4458_v7 = vsel %vm236_vm0, %v4450_v46, 0.0  ;;  %v4479_v51 = vpack.c.bf16 %v4450_v46, %v4449_v38  ;;  %8552 = vrcp.f32 %v4429_v31 }
0x1875   :  { %v4459_v26 = vadd.f32 %v4458_v7, %v4457_v11 }
0x1876   :  { %7633 = vmatprep.mubr.msk.bf16.mxu1 %vm236_vm0, %v4479_v51  ;;  %v4583_v41 = vpop.permute.xlu0 %4582 }
0x1877   :  { %v4461_v14 = vadd.f32 %v4460_v56, %v4459_v26  ;;  %7634 = vmatmul.mubr.msk.bf16.vlgmr.msra.gmra.mrb[128].mxu1 %vm236_vm0, %v4480_v43  ;;  %v4604_v38 = vsel %vm531_vm2, %v4583_v41, 0  ;;  %v4607_v56 = vsel %vm531_vm2, %v4585_v1, 0 }
0x1878   :  { %7642 = vmatpush3.bf16.xpose.msra.mxu1 %v4601_v22 }
0x1879   :  { %v8549_v62 = vpop.eup %8548  ;;  %7882 = vmatprep.subr.msk.bf16.mxu1 %vm531_vm2, %v4583_v41  ;;  %v4463_v50 = vadd.f32 %v4462_v16, %v4461_v14 }
0x187a   :  { %v4453_v35 = vmul.f32 %v8549_v62, %v8535_v49  ;;  %v4573_v22 = vpop.permute.xlu0 %4572 }
0x187c   :  { %v4464_v28 = vsel %vm236_vm0, %v4453_v35, 0.0 }
0x187d   :  { %v4465_v5 = vadd.f32 %v4464_v28, %v4463_v50  ;;  %v8551_v8 = vpop.eup %8550 }
0x187e   :  { %v8553_v46 = vpop.eup %8552  ;;  %v4456_v11 = vmul.f32 %v8551_v8, %v10780_v6  ;;  %v4577_v28 = vpop.permute.xlu0 %4576 }
0x187f   :  { %v4455_v51 = vmul.f32 %v8553_v46, %v10774_v42 }
0x1880   :  { %7644 = vmatpush3.bf16.xpose.msra.mxu1 %v4604_v38  ;;  %v4470_v62 = vsel %vm236_vm0, %v4456_v11, 0.0 }
0x1881   :  { %7883 = vmatprep.subr.msk.bf16.mxu1 %vm531_vm2, %v4585_v1  ;;  %v4482_v26 = vpack.c.bf16 %v4456_v11, %v4455_v51  ;;  %v4468_v14 = vsel %vm236_vm0, %v4455_v51, 0.0 }
0x1888   :  { %7646 = vmatpush3.bf16.xpose.msra.mxu1 %v4607_v56 }
0x1893   :  { %v4426_v32 = vpop.xlane.xlu1 %4425 }
0x1894   :  { %8554 = vrcp.f32 %v4426_v32 }
0x1897   :  { %v4587_v19 = vpop.permute.xlu1 %4586 }
0x1898   :  { %7884 = vmatprep.subr.msk.bf16.mxu1 %vm531_vm2, %v4587_v19  ;;  %v4610_v49 = vsel %vm531_vm2, %v4587_v19, 0 }
0x1899   :  { %7648 = vmatpush3.bf16.xpose.msra.mxu1 %v4610_v49 }
0x189b   :  { %v4575_v50 = vpop.permute.xlu1 %4574 }
0x189e   :  { %v8555_v41 = vpop.eup %8554 }
0x189f   :  { %v4454_v7 = vmul.f32 %v8555_v41, %v10791_v55  ;;  %v4579_v56 = vpop.permute.xlu1 %4578 }
0x18a1   :  { %v4466_v3 = vsel %vm236_vm0, %v4454_v7, 0.0  ;;  %v4481_v31 = vpack.c.bf16 %v4454_v7, %v4453_v35 }
0x18a2   :  { %v4467_v43 = vadd.f32 %v4466_v3, %v4465_v5 }
0x18a3   :  { %7637 = vmatprep.mubr.msk.bf16.mxu1 %vm236_vm0, %v4481_v31 }
0x18a4   :  { %v4469_v16 = vadd.f32 %v4468_v14, %v4467_v43  ;;  %7638 = vmatmul.mubr.msk.bf16.gmra.mrb[132].mxu1 %vm236_vm0, %v4482_v26 }
0x18a5   :  { %7649 = vmatprep.mubr.msk.bf16.mxu1 %vm531_vm2, %v4573_v22 }
0x18a6   :  { %v4471_v6 = vadd.f32 %v4470_v62, %v4469_v16 }
0x18a8   :  { %v4472_v55 = vrot.slane %v4471_v6, 4 }
0x18aa   :  { %v4473_v42 = vadd.f32 %v4472_v55, %v4471_v6 }
0x18ac   :  { %v4474_v35 = vrot.slane %v4473_v42, 2  ;;  %7650 = vmatmul.mubr.msk.bf16.vlgmr.msra.gmra.mrb[136].mxu1 %vm531_vm2, %v4575_v50 }
0x18ad   :  { %7653 = vmatprep.mubr.msk.bf16.mxu1 %vm531_vm2, %v4577_v28 }
0x18ae   :  { %v4475_v5 = vadd.f32 %v4474_v35, %v4473_v42 }
0x18b0   :  { %v4476_v38 = vrot.slane %v4475_v5, 1 }
0x18b2   :  { %v4477_v1 = vadd.f32 %v4476_v38, %v4475_v5 }
0x18b4   :  { %7654 = vmatmul.mubr.msk.bf16.gmra.mrb[140].mxu1 %vm531_vm2, %v4579_v56  ;;  %v10831_v32 = vadd.f32 %v4477_v1, %v10703_v30 }
0x194a   :  { %v10833_v19 = vpop.f32.mrb[128].mxu1 }
0x194b   :  { %v10835_v49 = vpop.f32.mrb[129].mxu1 }
0x194c   :  { %v10837_v8 = vpop.f32.mrb[130].mxu1 }
0x194d   :  { %v10841_v41 = vpop.f32.mrb[131].mxu1 }
0x1977   :  { %v10845_v7 = vpop.f32.mrb[132].mxu1 }
0x1978   :  { %v10847_v51 = vpop.f32.mrb[133].mxu1 }
0x1979   :  { %v10849_v30 = vpop.f32.mrb[134].mxu1 }
0x197a   :  { %v10853_v31 = vpop.f32.mrb[135].mxu1 }
0x197f   :  { %v7651_v26 = vpop.f32.mrb[136].mxu1 }
0x1980   :  { %v4646_v14 = vpop.f32.mrb[137].mxu1  ;;  %v4683_v22 = vsel %vm236_vm0, %v7651_v26, -inf }
0x1981   :  { %4684 = vmax.xlane.f32.xlu0 %v4683_v22  ;;  %v7652_v16 = vpop.f32.mrb[138].mxu1  ;;  %v4677_v55 = vsel %vm236_vm0, %v4646_v14, -inf }
0x1982   :  { %v4649_v62 = vpop.f32.mrb[139].mxu1  ;;  %v4686_v28 = vsel %vm236_vm0, %v7652_v16, -inf }
0x1983   :  { %v4680_v6 = vsel %vm236_vm0, %v4649_v62, -inf }
0x1984   :  { %4681 = vmax.xlane.f32.xlu1 %v4680_v6 }
0x1985   :  { %4678 = vmax.xlane.f32.xlu0 %v4677_v55 }
0x1987   :  { %v7655_v42 = vpop.f32.mrb[140].mxu1 }
0x1988   :  { %v4662_v50 = vpop.f32.mrb[141].mxu1  ;;  %v4695_v35 = vsel %vm236_vm0, %v7655_v42, -inf }
0x1989   :  { %4687 = vmax.xlane.f32.xlu0 %v4686_v28  ;;  %4696 = vmax.xlane.f32.xlu1 %v4695_v35  ;;  %v7656_v5 = vpop.f32.mrb[142].mxu1  ;;  %v4689_v56 = vsel %vm236_vm0, %v4662_v50, -inf }
0x198a   :  { %v10862_v38 = vpop.f32.mrb[143].mxu1  ;;  %v4698_v22 = vsel %vm236_vm0, %v7656_v5, -inf }
0x198b   :  { %v4692_v1 = vsel %vm236_vm0, %v10862_v38, -inf }
0x198d   :  { %4690 = vmax.xlane.f32.xlu1 %v4689_v56  ;;  %4693 = vmax.xlane.f32.xlu0 %v4692_v1 }
0x1991   :  { %4699 = vmax.xlane.f32.xlu0 %v4698_v22 }
0x199e   :  { %4799 = vrot.lane.b32.xlu1 %v10270_v17, %s8727_s1 }
0x19a2   :  { %4803 = vrot.lane.b32.xlu1 %v10290_v45, %s8727_s1 }
0x19a6   :  { %4805 = vrot.lane.b32.xlu1 %v10288_v52, %s8727_s1 }
0x19a7   :  { %4801 = vrot.lane.b32.xlu0 %v10268_v60, %s8727_s1 }
0x19aa   :  { %5012 = vrot.lane.b32.xlu1 %v10595_v59, %s8717_s3 }
0x1a0e   :  { %v4685_v6 = vpop.xlane.xlu0 %4684 }
0x1a0f   :  { %v4703_v55 = vsub.f32 %v7651_v26, %v4685_v6 }
0x1a11   :  { %v4713_v28 = vmul.f32 1.442695, %v4703_v55  ;;  %v4682_v35 = vpop.xlane.xlu1 %4681 }
0x1a12   :  { %v4679_v1 = vpop.xlane.xlu0 %4678  ;;  %v4702_v22 = vsub.f32 %v4649_v62, %v4682_v35 }
0x1a13   :  { %8556 = vpow2.f32 %v4713_v28  ;;  %v4701_v56 = vsub.f32 %v4646_v14, %v4679_v1 }
0x1a14   :  { %v4711_v11 = vmul.f32 1.442695, %v4702_v22 }
0x1a15   :  { %v4709_v17 = vmul.f32 1.442695, %v4701_v56 }
0x1a16   :  { %v4697_v43 = vpop.xlane.xlu1 %4696  ;;  %v4688_v45 = vpop.xlane.xlu0 %4687 }
0x1a17   :  { %8558 = vpow2.f32 %v4709_v17  ;;  %v4704_v3 = vsub.f32 %v7652_v16, %v4688_v45  ;;  %v4707_v46 = vsub.f32 %v7655_v42, %v4697_v43 }
0x1a19   :  { %v4715_v52 = vmul.f32 1.442695, %v4704_v3  ;;  %v4721_v26 = vmul.f32 1.442695, %v4707_v46 }
0x1a1a   :  { %v4691_v60 = vpop.xlane.xlu1 %4690  ;;  %v4694_v27 = vpop.xlane.xlu0 %4693 }
0x1a1b   :  { %8560 = vpow2.f32 %v4715_v52  ;;  %v4705_v6 = vsub.f32 %v4662_v50, %v4691_v60 }
0x1a1c   :  { %8562 = vpow2.f32 %v4711_v11 }
0x1a1d   :  { %v10878_v47 = vpop.eup %8556  ;;  %8564 = vpow2.f32 %v4721_v26  ;;  %v4717_v3 = vmul.f32 1.442695, %v4705_v6 }
0x1a1e   :  { %v4800_v55 = vpop.permute.xlu1 %4799  ;;  %v4700_v28 = vpop.xlane.xlu0 %4699  ;;  %v4731_v14 = vsel %vm236_vm0, %v10878_v47, 0.0 }
0x1a1f   :  { %7657 = vmatprep.subr.bf16.mxu0 %v4800_v55  ;;  %4732 = vadd.xlane.f32.xlu1 %v4731_v14  ;;  %v4708_v43 = vsub.f32 %v7656_v5, %v4700_v28  ;;  %8566 = vpow2.f32 %v4717_v3 }
0x1a20   :  { %7658 = vmatpush3.bf16.msra.mxu0 %v4800_v55  ;;  %v4706_v55 = vsub.f32 %v10862_v38, %v4694_v27 }
0x1a21   :  { %v8559_v16 = vpop.eup %8558  ;;  %v4723_v11 = vmul.f32 1.442695, %v4708_v43 }
0x1a22   :  { %v4804_v62 = vpop.permute.xlu1 %4803  ;;  %v4802_v42 = vpop.permute.xlu0 %4801  ;;  %v4725_v35 = vsel %vm236_vm0, %v8559_v16, 0.0  ;;  %v4719_v28 = vmul.f32 1.442695, %v4706_v55 }
0x1a23   :  { %4726 = vadd.xlane.f32.xlu1 %v4725_v35  ;;  %7659 = vmatprep.subr.bf16.mxu0 %v4802_v42  ;;  %8568 = vpow2.f32 %v4723_v11 }
0x1a24   :  { %7660 = vmatpush3.bf16.msra.mxu0 %v4802_v42  ;;  %8570 = vpow2.f32 %v4719_v28 }
0x1a25   :  { %7661 = vmatprep.subr.bf16.mxu0 %v4804_v62  ;;  %v8561_v46 = vpop.eup %8560 }
0x1a26   :  { %v4806_v50 = vpop.permute.xlu1 %4805  ;;  %v4734_v1 = vsel %vm236_vm0, %v8561_v46, 0.0  ;;  %v8563_v56 = vpop.eup %8562 }
0x1a27   :  { %4735 = vadd.xlane.f32.xlu0 %v4734_v1  ;;  %v4728_v5 = vsel %vm236_vm0, %v8563_v56, 0.0  ;;  %v10885_v17 = vpop.eup %8564 }
0x1a28   :  { %7662 = vmatpush3.bf16.msra.mxu0 %v4804_v62  ;;  %v4743_v45 = vsel %vm236_vm0, %v10885_v17, 0.0 }
0x1a29   :  { %7663 = vmatprep.subr.bf16.mxu0 %v4806_v50  ;;  %v8567_v52 = vpop.eup %8566 }
0x1a2a   :  { %v5013_v22 = vpop.permute.xlu1 %5012  ;;  %v4737_v60 = vsel %vm236_vm0, %v8567_v52, 0.0 }
0x1a2b   :  { %4729 = vadd.xlane.f32.xlu0 %v4728_v5 }
0x1a2c   :  { %7664 = vmatpush3.bf16.msra.mxu0 %v4806_v50 }
0x1a2d   :  { %7885 = vmatprep.subr.msk.bf16.mxu0 %vm531_vm2, %v5013_v22  ;;  %v10891_v26 = vpop.eup %8568 }
0x1a2e   :  { %v4746_v6 = vsel %vm236_vm0, %v10891_v26, 0.0  ;;  %v8571_v14 = vpop.eup %8570 }
0x1a2f   :  { %4744 = vadd.xlane.f32.xlu0 %v4743_v45  ;;  %v4740_v3 = vsel %vm236_vm0, %v8571_v14, 0.0 }
0x1a33   :  { %4738 = vadd.xlane.f32.xlu0 %v4737_v60 }
0x1a34   :  { %5016 = vrot.lane.b32.xlu1 %v10605_v53, %s8717_s3 }
0x1a37   :  { %4747 = vadd.xlane.f32.xlu0 %v4746_v6 }
0x1a4d   :  { %5014 = vrot.lane.b32.xlu0 %v10593_v63, %s8717_s3 }
0x1a58   :  { %4741 = vadd.xlane.f32.xlu1 %v4740_v3 }
0x1a69   :  { %5018 = vrot.lane.b32.xlu1 %v10603_v10, %s8717_s3 }
0x1aac   :  { %v4733_v43 = vpop.xlane.xlu1 %4732 }
0x1ab0   :  { %v4727_v62 = vpop.xlane.xlu1 %4726 }
0x1ab1   :  { %8572 = vrcp.f32 %v4727_v62 }
0x1ab4   :  { %v4736_v42 = vpop.xlane.xlu0 %4735 }
0x1ab5   :  { %8574 = vrcp.f32 %v4736_v42 }
0x1ab6   :  { %8576 = vrcp.f32 %v4733_v43 }
0x1ab8   :  { %v4730_v35 = vpop.xlane.xlu0 %4729 }
0x1ab9   :  { %8578 = vrcp.f32 %v4730_v35 }
0x1abb   :  { %v8573_v38 = vpop.eup %8572 }
0x1abc   :  { %v4745_v27 = vpop.xlane.xlu0 %4744  ;;  %v4765_v5 = vmul.f32 %v8573_v38, %v8559_v16  ;;  %v5033_v16 = vsel %vm531_vm2, %v5013_v22, 0 }
0x1abe   :  { %v4773_v3 = vsel %vm236_vm0, %v4765_v5, 0.0 }
0x1abf   :  { %v8575_v11 = vpop.eup %8574 }
0x1ac0   :  { %v4739_v50 = vpop.xlane.xlu0 %4738  ;;  %v8577_v1 = vpop.eup %8576  ;;  %v4768_v60 = vmul.f32 %v8575_v11, %v8561_v46 }
0x1ac1   :  { %8580 = vrcp.f32 %v4739_v50  ;;  %v4767_v6 = vmul.f32 %v8577_v1, %v10878_v47 }
0x1ac2   :  { %v4778_v47 = vsel %vm236_vm0, %v4768_v60, 0.0 }
0x1ac3   :  { %v8579_v45 = vpop.eup %8578  ;;  %v4796_v42 = vpack.c.bf16 %v4768_v60, %v4767_v6  ;;  %v4776_v23 = vsel %vm236_vm0, %v4767_v6, 0.0 }
0x1ac4   :  { %v4748_v55 = vpop.xlane.xlu0 %4747  ;;  %v4766_v28 = vmul.f32 %v8579_v45, %v8563_v56  ;;  %v5017_v45 = vpop.permute.xlu1 %5016 }
0x1ac5   :  { %8582 = vrcp.f32 %v4748_v55 }
0x1ac6   :  { %v4774_v62 = vsel %vm236_vm0, %v4766_v28, 0.0  ;;  %v4795_v43 = vpack.c.bf16 %v4766_v28, %v4765_v5  ;;  %8584 = vrcp.f32 %v4745_v27 }
0x1ac7   :  { %v4775_v35 = vadd.f32 %v4774_v62, %v4773_v3 }
0x1ac8   :  { %7665 = vmatprep.mubr.msk.bf16.mxu0 %vm236_vm0, %v4795_v43  ;;  %v5015_v39 = vpop.permute.xlu0 %5014 }
0x1ac9   :  { %v4777_v50 = vadd.f32 %v4776_v23, %v4775_v35  ;;  %7666 = vmatmul.mubr.msk.bf16.vlgmr.msra.gmra.mrb[120].mxu0 %vm236_vm0, %v4796_v42  ;;  %v5036_v5 = vsel %vm531_vm2, %v5015_v39, 0  ;;  %v5039_v23 = vsel %vm531_vm2, %v5017_v45, 0 }
0x1aca   :  { %7674 = vmatpush3.bf16.xpose.msra.mxu0 %v5033_v16 }
0x1acb   :  { %v8581_v46 = vpop.eup %8580  ;;  %7886 = vmatprep.subr.msk.bf16.mxu0 %vm531_vm2, %v5015_v39  ;;  %v4779_v56 = vadd.f32 %v4778_v47, %v4777_v50 }
0x1acc   :  { %v4769_v38 = vmul.f32 %v8581_v46, %v8567_v52 }
0x1ace   :  { %v4780_v11 = vsel %vm236_vm0, %v4769_v38, 0.0 }
0x1acf   :  { %v4781_v1 = vadd.f32 %v4780_v11, %v4779_v56  ;;  %v8583_v6 = vpop.eup %8582 }
0x1ad0   :  { %v8585_v28 = vpop.eup %8584  ;;  %v4772_v3 = vmul.f32 %v8583_v6, %v10891_v26 }
0x1ad1   :  { %v4771_v43 = vmul.f32 %v8585_v28, %v10885_v17 }
0x1ad2   :  { %7676 = vmatpush3.bf16.xpose.msra.mxu0 %v5036_v5  ;;  %v4786_v47 = vsel %vm236_vm0, %v4772_v3, 0.0 }
0x1ad3   :  { %7887 = vmatprep.subr.msk.bf16.mxu0 %vm531_vm2, %v5017_v45  ;;  %v4798_v35 = vpack.c.bf16 %v4772_v3, %v4771_v43  ;;  %v4784_v50 = vsel %vm236_vm0, %v4771_v43, 0.0 }
0x1ada   :  { %7678 = vmatpush3.bf16.xpose.msra.mxu0 %v5039_v23 }
0x1ae5   :  { %v4742_v22 = vpop.xlane.xlu1 %4741 }
0x1ae6   :  { %8586 = vrcp.f32 %v4742_v22 }
0x1ae9   :  { %v5019_v60 = vpop.permute.xlu1 %5018 }
0x1aea   :  { %7888 = vmatprep.subr.msk.bf16.mxu0 %vm531_vm2, %v5019_v60  ;;  %v5042_v52 = vsel %vm531_vm2, %v5019_v60, 0 }
0x1aeb   :  { %7680 = vmatpush3.bf16.xpose.msra.mxu0 %v5042_v52 }
0x1af0   :  { %v8587_v39 = vpop.eup %8586 }
0x1af1   :  { %v4770_v62 = vmul.f32 %v8587_v39, %v8571_v14 }
0x1af3   :  { %v4782_v42 = vsel %vm236_vm0, %v4770_v62, 0.0  ;;  %v4797_v55 = vpack.c.bf16 %v4770_v62, %v4769_v38 }
0x1af4   :  { %v4783_v27 = vadd.f32 %v4782_v42, %v4781_v1 }
0x1af5   :  { %7669 = vmatprep.mubr.msk.bf16.mxu0 %vm236_vm0, %v4797_v55 }
0x1af6   :  { %v4785_v16 = vadd.f32 %v4784_v50, %v4783_v27  ;;  %7670 = vmatmul.mubr.msk.bf16.gmra.mrb[124].mxu0 %vm236_vm0, %v4798_v35 }
0x1af7   :  { %7681 = vmatprep.mubr.msk.bf16.mxu0 %vm531_vm2, %v10595_v59 }
0x1af8   :  { %v4787_v26 = vadd.f32 %v4786_v47, %v4785_v16 }
0x1afa   :  { %v4788_v14 = vrot.slane %v4787_v26, 4 }
0x1afc   :  { %v4789_v17 = vadd.f32 %v4788_v14, %v4787_v26 }
0x1afe   :  { %7682 = vmatmul.mubr.msk.bf16.vlgmr.msra.gmra.mrb[128].mxu0 %vm531_vm2, %v10593_v63  ;;  %v4790_v46 = vrot.slane %v4789_v17, 2 }
0x1aff   :  { %7685 = vmatprep.mubr.msk.bf16.mxu0 %vm531_vm2, %v10605_v53 }
0x1b00   :  { %v4791_v56 = vadd.f32 %v4790_v46, %v4789_v17 }
0x1b02   :  { %v4792_v38 = vrot.slane %v4791_v56, 1 }
0x1b04   :  { %v4793_v11 = vadd.f32 %v4792_v38, %v4791_v56 }
0x1b06   :  { %7686 = vmatmul.mubr.msk.bf16.gmra.mrb[132].mxu0 %vm531_vm2, %v10603_v10  ;;  %v10934_v1 = vadd.f32 %v4793_v11, %v10831_v32 }
0x1b08   :  { %11777 = vst [vmem:[#allocation10_spill] sm:$0xff] %v10934_v1 }
0x1b9c   :  { %v10936_v5 = vpop.f32.mrb[120].mxu0 }
0x1b9d   :  { %v10938_v45 = vpop.f32.mrb[121].mxu0 }
0x1b9e   :  { %v10940_v23 = vpop.f32.mrb[122].mxu0 }
0x1b9f   :  { %v10944_v60 = vpop.f32.mrb[123].mxu0 }
0x1bc9   :  { %v10948_v6 = vpop.f32.mrb[124].mxu0 }
0x1bca   :  { %v10950_v28 = vpop.f32.mrb[125].mxu0 }
0x1bcb   :  { %v10952_v32 = vpop.f32.mrb[126].mxu0 }
0x1bcc   :  { %v10956_v3 = vpop.f32.mrb[127].mxu0 }
0x1bd1   :  { %v7683_v43 = vpop.f32.mrb[128].mxu0 }
0x1bd2   :  { %v5078_v42 = vpop.f32.mrb[129].mxu0  ;;  %v5115_v55 = vsel %vm236_vm0, %v7683_v43, -inf }
0x1bd3   :  { %5116 = vmax.xlane.f32.xlu0 %v5115_v55  ;;  %v7684_v27 = vpop.f32.mrb[130].mxu0  ;;  %v5109_v16 = vsel %vm236_vm0, %v5078_v42, -inf }
0x1bd4   :  { %v5081_v35 = vpop.f32.mrb[131].mxu0  ;;  %v5118_v14 = vsel %vm236_vm0, %v7684_v27, -inf }
0x1bd5   :  { %v5112_v50 = vsel %vm236_vm0, %v5081_v35, -inf }
0x1bd6   :  { %5113 = vmax.xlane.f32.xlu1 %v5112_v50 }
0x1bd7   :  { %5110 = vmax.xlane.f32.xlu0 %v5109_v16 }
0x1bd9   :  { %v7687_v47 = vpop.f32.mrb[132].mxu0 }
0x1bda   :  { %v5094_v26 = vpop.f32.mrb[133].mxu0  ;;  %v5127_v17 = vsel %vm236_vm0, %v7687_v47, -inf }
0x1bdb   :  { %5119 = vmax.xlane.f32.xlu0 %v5118_v14  ;;  %5128 = vmax.xlane.f32.xlu1 %v5127_v17  ;;  %v7688_v46 = vpop.f32.mrb[134].mxu0  ;;  %v5121_v11 = vsel %vm236_vm0, %v5094_v26, -inf }
0x1bdc   :  { %v10965_v56 = vpop.f32.mrb[135].mxu0  ;;  %v5130_v55 = vsel %vm236_vm0, %v7688_v46, -inf }
0x1bdd   :  { %v5124_v38 = vsel %vm236_vm0, %v10965_v56, -inf }
0x1bdf   :  { %5122 = vmax.xlane.f32.xlu1 %v5121_v11  ;;  %5125 = vmax.xlane.f32.xlu0 %v5124_v38 }
0x1be3   :  { %5131 = vmax.xlane.f32.xlu0 %v5130_v55 }
0x1bf0   :  { %5231 = vrot.lane.b32.xlu1 %v10595_v59, %s8718_s4 }
0x1bf4   :  { %5235 = vrot.lane.b32.xlu1 %v10605_v53, %s8718_s4 }
0x1bf8   :  { %5237 = vrot.lane.b32.xlu1 %v10603_v10, %s8718_s4 }
0x1bf9   :  { %5233 = vrot.lane.b32.xlu0 %v10593_v63, %s8718_s4 }
0x1bfc   :  { %5328 = vrot.lane.b32.xlu1 %v10595_v59, %s8719_s17 }
0x1c60   :  { %v5117_v50 = vpop.xlane.xlu0 %5116 }
0x1c61   :  { %v5135_v16 = vsub.f32 %v7683_v43, %v5117_v50 }
0x1c63   :  { %v5145_v14 = vmul.f32 1.442695, %v5135_v16  ;;  %v5114_v17 = vpop.xlane.xlu1 %5113 }
0x1c64   :  { %v5111_v38 = vpop.xlane.xlu0 %5110  ;;  %v5134_v55 = vsub.f32 %v5081_v35, %v5114_v17 }
0x1c65   :  { %8588 = vpow2.f32 %v5145_v14  ;;  %v5133_v11 = vsub.f32 %v5078_v42, %v5111_v38 }
0x1c66   :  { %v5143_v29 = vmul.f32 1.442695, %v5134_v55 }
0x1c67   :  { %v5141_v62 = vmul.f32 1.442695, %v5133_v11 }
0x1c68   :  { %v5120_v39 = vpop.xlane.xlu0 %5119  ;;  %v5129_v52 = vpop.xlane.xlu1 %5128 }
0x1c69   :  { %8590 = vpow2.f32 %v5141_v62  ;;  %v5136_v22 = vsub.f32 %v7684_v27, %v5120_v39  ;;  %v5139_v48 = vsub.f32 %v7687_v47, %v5129_v52 }
0x1c6b   :  { %v5147_v44 = vmul.f32 1.442695, %v5136_v22  ;;  %v5153_v43 = vmul.f32 1.442695, %v5139_v48 }
0x1c6c   :  { %v5123_v54 = vpop.xlane.xlu1 %5122  ;;  %v5126_v9 = vpop.xlane.xlu0 %5125 }
0x1c6d   :  { %8592 = vpow2.f32 %v5147_v44  ;;  %v5137_v50 = vsub.f32 %v5094_v26, %v5123_v54 }
0x1c6e   :  { %8594 = vpow2.f32 %v5143_v29 }
0x1c6f   :  { %v10981_v58 = vpop.eup %8588  ;;  %8596 = vpow2.f32 %v5153_v43  ;;  %v5149_v22 = vmul.f32 1.442695, %v5137_v50 }
0x1c70   :  { %v5232_v16 = vpop.permute.xlu1 %5231  ;;  %v5132_v14 = vpop.xlane.xlu0 %5131  ;;  %v5163_v42 = vsel %vm236_vm0, %v10981_v58, 0.0 }
0x1c71   :  { %5164 = vadd.xlane.f32.xlu1 %v5163_v42  ;;  %7689 = vmatprep.subr.bf16.mxu1 %v5232_v16  ;;  %v5140_v52 = vsub.f32 %v7688_v46, %v5132_v14  ;;  %8598 = vpow2.f32 %v5149_v22 }
0x1c72   :  { %7690 = vmatpush3.bf16.msra.mxu1 %v5232_v16  ;;  %v5138_v16 = vsub.f32 %v10965_v56, %v5126_v9 }
0x1c73   :  { %v8591_v39 = vpop.eup %8590  ;;  %v5155_v29 = vmul.f32 1.442695, %v5140_v52 }
0x1c74   :  { %v5236_v62 = vpop.permute.xlu1 %5235  ;;  %v5234_v27 = vpop.permute.xlu0 %5233  ;;  %v5157_v44 = vsel %vm236_vm0, %v8591_v39, 0.0  ;;  %v5151_v14 = vmul.f32 1.442695, %v5138_v16 }
0x1c75   :  { %5158 = vadd.xlane.f32.xlu1 %v5157_v44  ;;  %7691 = vmatprep.subr.bf16.mxu1 %v5234_v27  ;;  %8600 = vpow2.f32 %v5155_v29 }
0x1c76   :  { %7692 = vmatpush3.bf16.msra.mxu1 %v5234_v27  ;;  %8602 = vpow2.f32 %v5151_v14 }
0x1c77   :  { %v8593_v54 = vpop.eup %8592  ;;  %7693 = vmatprep.subr.bf16.mxu1 %v5236_v62 }
0x1c78   :  { %v5238_v48 = vpop.permute.xlu1 %5237  ;;  %v5166_v35 = vsel %vm236_vm0, %v8593_v54, 0.0  ;;  %v8595_v47 = vpop.eup %8594 }
0x1c79   :  { %5167 = vadd.xlane.f32.xlu0 %v5166_v35  ;;  %v5160_v26 = vsel %vm236_vm0, %v8595_v47, 0.0  ;;  %v10988_v46 = vpop.eup %8596 }
0x1c7a   :  { %7694 = vmatpush3.bf16.msra.mxu1 %v5236_v62  ;;  %v5175_v38 = vsel %vm236_vm0, %v10988_v46, 0.0 }
0x1c7b   :  { %7695 = vmatprep.subr.bf16.mxu1 %v5238_v48  ;;  %v8599_v11 = vpop.eup %8598 }
0x1c7c   :  { %v5329_v17 = vpop.permute.xlu1 %5328  ;;  %v5169_v55 = vsel %vm236_vm0, %v8599_v11, 0.0 }
0x1c7d   :  { %5161 = vadd.xlane.f32.xlu0 %v5160_v26 }
0x1c7e   :  { %7696 = vmatpush3.bf16.msra.mxu1 %v5238_v48 }
0x1c7f   :  { %7889 = vmatprep.subr.msk.bf16.mxu1 %vm531_vm2, %v5329_v17  ;;  %v10994_v43 = vpop.eup %8600 }
0x1c80   :  { %v5178_v50 = vsel %vm236_vm0, %v10994_v43, 0.0  ;;  %v11005_v42 = vpop.eup %8602 }
0x1c81   :  { %5176 = vadd.xlane.f32.xlu0 %v5175_v38  ;;  %v5172_v22 = vsel %vm236_vm0, %v11005_v42, 0.0 }
0x1c85   :  { %5170 = vadd.xlane.f32.xlu0 %v5169_v55 }
0x1c86   :  { %5332 = vrot.lane.b32.xlu1 %v10605_v53, %s8719_s17 }
0x1c89   :  { %5179 = vadd.xlane.f32.xlu0 %v5178_v50 }
0x1c9f   :  { %5330 = vrot.lane.b32.xlu0 %v10593_v63, %s8719_s17 }
0x1ca3   :  { %5320 = vrot.lane.b32.xlu0 %v10595_v59, %s8721_s19 }
0x1ca7   :  { %5324 = vrot.lane.b32.xlu0 %v10605_v53, %s8721_s19 }
0x1caa   :  { %5173 = vadd.xlane.f32.xlu1 %v5172_v22 }
0x1cbb   :  { %5334 = vrot.lane.b32.xlu1 %v10603_v10, %s8719_s17 }
0x1cbf   :  { %5322 = vrot.lane.b32.xlu1 %v10593_v63, %s8721_s19 }
0x1cc3   :  { %5326 = vrot.lane.b32.xlu1 %v10603_v10, %s8721_s19 }
0x1cfe   :  { %v5165_v9 = vpop.xlane.xlu1 %5164 }
0x1d02   :  { %v5159_v56 = vpop.xlane.xlu1 %5158 }
0x1d03   :  { %8604 = vrcp.f32 %v5159_v56 }
0x1d06   :  { %v5168_v52 = vpop.xlane.xlu0 %5167 }
0x1d07   :  { %8606 = vrcp.f32 %v5168_v52 }
0x1d08   :  { %8608 = vrcp.f32 %v5165_v9 }
0x1d0a   :  { %v5162_v62 = vpop.xlane.xlu0 %5161 }
0x1d0b   :  { %8610 = vrcp.f32 %v5162_v62 }
0x1d0d   :  { %v8605_v44 = vpop.eup %8604 }
0x1d0e   :  { %v5177_v27 = vpop.xlane.xlu0 %5176  ;;  %v5197_v26 = vmul.f32 %v8605_v44, %v8591_v39  ;;  %v5349_v39 = vsel %vm531_vm2, %v5329_v17, 0 }
0x1d10   :  { %v5205_v22 = vsel %vm236_vm0, %v5197_v26, 0.0 }
0x1d11   :  { %v8607_v29 = vpop.eup %8606 }
0x1d12   :  { %v5171_v48 = vpop.xlane.xlu0 %5170  ;;  %v8609_v35 = vpop.eup %8608  ;;  %v5200_v55 = vmul.f32 %v8607_v29, %v8593_v54 }
0x1d13   :  { %8612 = vrcp.f32 %v5171_v48  ;;  %v5199_v50 = vmul.f32 %v8609_v35, %v10981_v58 }
0x1d14   :  { %v5210_v58 = vsel %vm236_vm0, %v5200_v55, 0.0 }
0x1d15   :  { %v8611_v38 = vpop.eup %8610  ;;  %v5228_v52 = vpack.c.bf16 %v5200_v55, %v5199_v50  ;;  %v5208_v13 = vsel %vm236_vm0, %v5199_v50, 0.0 }
0x1d16   :  { %v5180_v16 = vpop.xlane.xlu0 %5179  ;;  %v5198_v14 = vmul.f32 %v8611_v38, %v8595_v47  ;;  %v5333_v38 = vpop.permute.xlu1 %5332 }
0x1d17   :  { %8614 = vrcp.f32 %v5180_v16 }
0x1d18   :  { %v5206_v56 = vsel %vm236_vm0, %v5198_v14, 0.0  ;;  %v5227_v9 = vpack.c.bf16 %v5198_v14, %v5197_v26  ;;  %8616 = vrcp.f32 %v5177_v27 }
0x1d19   :  { %v5207_v62 = vadd.f32 %v5206_v56, %v5205_v22 }
0x1d1a   :  { %7697 = vmatprep.mubr.msk.bf16.mxu1 %vm236_vm0, %v5227_v9  ;;  %v5331_v18 = vpop.permute.xlu0 %5330 }
0x1d1b   :  { %v5209_v48 = vadd.f32 %v5208_v13, %v5207_v62  ;;  %7698 = vmatmul.mubr.msk.bf16.vlgmr.msra.gmra.mrb[144].mxu1 %vm236_vm0, %v5228_v52  ;;  %v5352_v26 = vsel %vm531_vm2, %v5331_v18, 0  ;;  %v5355_v13 = vsel %vm531_vm2, %v5333_v38, 0 }
0x1d1c   :  { %7706 = vmatpush3.bf16.xpose.msra.mxu1 %v5349_v39 }
0x1d1d   :  { %v8613_v54 = vpop.eup %8612  ;;  %7890 = vmatprep.subr.msk.bf16.mxu1 %vm531_vm2, %v5331_v18  ;;  %v5211_v47 = vadd.f32 %v5210_v58, %v5209_v48 }
0x1d1e   :  { %v5201_v44 = vmul.f32 %v8613_v54, %v8599_v11  ;;  %v5321_v39 = vpop.permute.xlu0 %5320 }
0x1d20   :  { %v5212_v29 = vsel %vm236_vm0, %v5201_v44, 0.0 }
0x1d21   :  { %v5213_v35 = vadd.f32 %v5212_v29, %v5211_v47  ;;  %v8615_v50 = vpop.eup %8614 }
0x1d22   :  { %v8617_v14 = vpop.eup %8616  ;;  %v5204_v22 = vmul.f32 %v8615_v50, %v10994_v43 }
0x1d23   :  { %v5203_v9 = vmul.f32 %v8617_v14, %v10988_v46 }
0x1d24   :  { %7708 = vmatpush3.bf16.xpose.msra.mxu1 %v5352_v26  ;;  %v5218_v54 = vsel %vm236_vm0, %v5204_v22, 0.0 }
0x1d25   :  { %7891 = vmatprep.subr.msk.bf16.mxu1 %vm531_vm2, %v5333_v38  ;;  %v5230_v62 = vpack.c.bf16 %v5204_v22, %v5203_v9  ;;  %v5216_v48 = vsel %vm236_vm0, %v5203_v9, 0.0 }
0x1d2c   :  { %7710 = vmatpush3.bf16.xpose.msra.mxu1 %v5355_v13 }
0x1d37   :  { %v5174_v17 = vpop.xlane.xlu1 %5173 }
0x1d38   :  { %8618 = vrcp.f32 %v5174_v17 }
0x1d3b   :  { %v5335_v55 = vpop.permute.xlu1 %5334 }
0x1d3c   :  { %7892 = vmatprep.subr.msk.bf16.mxu1 %vm531_vm2, %v5335_v55  ;;  %v5358_v11 = vsel %vm531_vm2, %v5335_v55, 0 }
0x1d3d   :  { %7712 = vmatpush3.bf16.xpose.msra.mxu1 %v5358_v11 }
0x1d3f   :  { %v5323_v46 = vpop.permute.xlu1 %5322 }
0x1d42   :  { %v8619_v18 = vpop.eup %8618 }
0x1d43   :  { %v5202_v56 = vmul.f32 %v8619_v18, %v11005_v42  ;;  %v5325_v42 = vpop.permute.xlu0 %5324  ;;  %v5327_v47 = vpop.permute.xlu1 %5326 }
0x1d45   :  { %v5214_v16 = vsel %vm236_vm0, %v5202_v56, 0.0  ;;  %v5229_v27 = vpack.c.bf16 %v5202_v56, %v5201_v44 }
0x1d46   :  { %v5215_v52 = vadd.f32 %v5214_v16, %v5213_v35 }
0x1d47   :  { %7701 = vmatprep.mubr.msk.bf16.mxu1 %vm236_vm0, %v5229_v27 }
0x1d48   :  { %v5217_v58 = vadd.f32 %v5216_v48, %v5215_v52  ;;  %7702 = vmatmul.mubr.msk.bf16.gmra.mrb[148].mxu1 %vm236_vm0, %v5230_v62 }
0x1d49   :  { %7713 = vmatprep.mubr.msk.bf16.mxu1 %vm531_vm2, %v5321_v39 }
0x1d4a   :  { %v11041_v43 = vadd.f32 %v5218_v54, %v5217_v58 }
0x1d50   :  { %7714 = vmatmul.mubr.msk.bf16.vlgmr.msra.gmra.mrb[152].mxu1 %vm531_vm2, %v5323_v46 }
0x1d51   :  { %7717 = vmatprep.mubr.msk.bf16.mxu1 %vm531_vm2, %v5325_v42 }
0x1d58   :  { %7718 = vmatmul.mubr.msk.bf16.gmra.mrb[156].mxu1 %vm531_vm2, %v5327_v47 }
0x1dee   :  { %v11046_v44 = vpop.f32.mrb[144].mxu1 }
0x1def   :  { %11778 = vst [vmem:[#allocation12_spill] sm:$0xff] %v11046_v44  ;;  %v11048_v29 = vpop.f32.mrb[145].mxu1 }
0x1df0   :  { %11779 = vst [vmem:[#allocation13_spill] sm:$0xff] %v11048_v29  ;;  %v11050_v35 = vpop.f32.mrb[146].mxu1 }
0x1df1   :  { %11780 = vst [vmem:[#allocation11_spill] sm:$0xff] %v11050_v35  ;;  %v11052_v26 = vpop.f32.mrb[147].mxu1 }
0x1df2   :  { %11781 = vst [vmem:[#allocation14_spill] sm:$0xff] %v11052_v26 }
0x1e1b   :  { %v11054_v38 = vpop.f32.mrb[148].mxu1 }
0x1e1c   :  { %11782 = vst [vmem:[#allocation16_spill] sm:$0xff] %v11054_v38  ;;  %v11056_v13 = vpop.f32.mrb[149].mxu1 }
0x1e1d   :  { %11783 = vst [vmem:[#allocation17_spill] sm:$0xff] %v11056_v13  ;;  %v11058_v17 = vpop.f32.mrb[150].mxu1 }
0x1e1e   :  { %11784 = vst [vmem:[#allocation15_spill] sm:$0xff] %v11058_v17  ;;  %v11060_v55 = vpop.f32.mrb[151].mxu1 }
0x1e1f   :  { %11785 = vst [vmem:[#allocation35_spill] sm:$0xff] %v11060_v55 }
0x1e23   :  { %v7715_v11 = vpop.f32.mrb[152].mxu1 }
0x1e24   :  { %v5394_v50 = vpop.f32.mrb[153].mxu1  ;;  %v5431_v14 = vsel %vm236_vm0, %v7715_v11, -inf }
0x1e25   :  { %5432 = vmax.xlane.f32.xlu0 %v5431_v14  ;;  %v7716_v18 = vpop.f32.mrb[154].mxu1  ;;  %v5425_v9 = vsel %vm236_vm0, %v5394_v50, -inf }
0x1e26   :  { %v5397_v22 = vpop.f32.mrb[155].mxu1  ;;  %v5434_v52 = vsel %vm236_vm0, %v7716_v18, -inf }
0x1e27   :  { %v5428_v56 = vsel %vm236_vm0, %v5397_v22, -inf }
0x1e28   :  { %5429 = vmax.xlane.f32.xlu1 %v5428_v56 }
0x1e29   :  { %5426 = vmax.xlane.f32.xlu0 %v5425_v9 }
0x1e2b   :  { %v7719_v16 = vpop.f32.mrb[156].mxu1 }
0x1e2c   :  { %v5410_v27 = vpop.f32.mrb[157].mxu1  ;;  %v5443_v62 = vsel %vm236_vm0, %v7719_v16, -inf }
0x1e2d   :  { %5435 = vmax.xlane.f32.xlu0 %v5434_v52  ;;  %5444 = vmax.xlane.f32.xlu1 %v5443_v62  ;;  %v7720_v48 = vpop.f32.mrb[158].mxu1  ;;  %v5437_v54 = vsel %vm236_vm0, %v5410_v27, -inf }
0x1e2e   :  { %v11067_v39 = vpop.f32.mrb[159].mxu1  ;;  %v5446_v46 = vsel %vm236_vm0, %v7720_v48, -inf }
0x1e2f   :  { %v5440_v58 = vsel %vm236_vm0, %v11067_v39, -inf }
0x1e31   :  { %5438 = vmax.xlane.f32.xlu1 %v5437_v54  ;;  %5441 = vmax.xlane.f32.xlu0 %v5440_v58 }
0x1e35   :  { %5447 = vmax.xlane.f32.xlu0 %v5446_v46 }
0x1e42   :  { %5547 = vrot.lane.b32.xlu1 %v10595_v59, %s8725_s23 }
0x1e46   :  { %5551 = vrot.lane.b32.xlu1 %v10605_v53, %s8725_s23 }
0x1e4a   :  { %5553 = vrot.lane.b32.xlu1 %v10603_v10, %s8725_s23 }
0x1e4b   :  { %5549 = vrot.lane.b32.xlu0 %v10593_v63, %s8725_s23 }
0x1e4e   :  { %5644 = vrot.lane.b32.xlu1 %v10595_v59, %s8720_s18 }
0x1eb2   :  { %v5433_v42 = vpop.xlane.xlu0 %5432 }
0x1eb3   :  { %v5451_v47 = vsub.f32 %v7715_v11, %v5433_v42 }
0x1eb5   :  { %v5461_v14 = vmul.f32 1.442695, %v5451_v47  ;;  %v5430_v56 = vpop.xlane.xlu1 %5429 }
0x1eb6   :  { %v5427_v9 = vpop.xlane.xlu0 %5426  ;;  %v5450_v58 = vsub.f32 %v5397_v22, %v5430_v56 }
0x1eb7   :  { %8620 = vpow2.f32 %v5461_v14  ;;  %v5449_v52 = vsub.f32 %v5394_v50, %v5427_v9 }
0x1eb8   :  { %v5459_v38 = vmul.f32 1.442695, %v5450_v58 }
0x1eb9   :  { %v5457_v62 = vmul.f32 1.442695, %v5449_v52 }
0x1eba   :  { %v5445_v54 = vpop.xlane.xlu1 %5444  ;;  %v5436_v46 = vpop.xlane.xlu0 %5435 }
0x1ebb   :  { %8622 = vpow2.f32 %v5457_v62  ;;  %v5452_v13 = vsub.f32 %v7716_v18, %v5436_v46  ;;  %v5455_v17 = vsub.f32 %v7719_v16, %v5445_v54 }
0x1ebd   :  { %v5463_v55 = vmul.f32 1.442695, %v5452_v13  ;;  %v5469_v11 = vmul.f32 1.442695, %v5455_v17 }
0x1ebe   :  { %v5439_v29 = vpop.xlane.xlu1 %5438  ;;  %v5442_v26 = vpop.xlane.xlu0 %5441 }
0x1ebf   :  { %8624 = vpow2.f32 %v5463_v55  ;;  %v5453_v42 = vsub.f32 %v5410_v27, %v5439_v29 }
0x1ec0   :  { %8626 = vpow2.f32 %v5459_v38 }
0x1ec1   :  { %v11083_v44 = vpop.eup %8620  ;;  %8628 = vpow2.f32 %v5469_v11  ;;  %v5465_v13 = vmul.f32 1.442695, %v5453_v42 }
0x1ec2   :  { %v5548_v47 = vpop.permute.xlu1 %5547  ;;  %v5448_v14 = vpop.xlane.xlu0 %5447  ;;  %v5479_v50 = vsel %vm236_vm0, %v11083_v44, 0.0 }
0x1ec3   :  { %7721 = vmatprep.subr.bf16.mxu0 %v5548_v47  ;;  %5480 = vadd.xlane.f32.xlu1 %v5479_v50  ;;  %v5456_v22 = vsub.f32 %v7720_v48, %v5448_v14  ;;  %8630 = vpow2.f32 %v5465_v13 }
0x1ec4   :  { %7722 = vmatpush3.bf16.msra.mxu0 %v5548_v47  ;;  %v5454_v47 = vsub.f32 %v11067_v39, %v5442_v26 }
0x1ec5   :  { %v8623_v18 = vpop.eup %8622  ;;  %v5471_v38 = vmul.f32 1.442695, %v5456_v22 }
0x1ec6   :  { %v5552_v16 = vpop.permute.xlu1 %5551  ;;  %v5550_v56 = vpop.permute.xlu0 %5549  ;;  %v5473_v55 = vsel %vm236_vm0, %v8623_v18, 0.0  ;;  %v5467_v14 = vmul.f32 1.442695, %v5454_v47 }
0x1ec7   :  { %5474 = vadd.xlane.f32.xlu1 %v5473_v55  ;;  %7723 = vmatprep.subr.bf16.mxu0 %v5550_v56  ;;  %8632 = vpow2.f32 %v5471_v38 }
0x1ec8   :  { %7724 = vmatpush3.bf16.msra.mxu0 %v5550_v56  ;;  %8634 = vpow2.f32 %v5467_v14 }
0x1ec9   :  { %7725 = vmatprep.subr.bf16.mxu0 %v5552_v16  ;;  %v8625_v29 = vpop.eup %8624 }
0x1eca   :  { %v5554_v17 = vpop.permute.xlu1 %5553  ;;  %v5482_v27 = vsel %vm236_vm0, %v8625_v29, 0.0  ;;  %v8627_v9 = vpop.eup %8626 }
0x1ecb   :  { %5483 = vadd.xlane.f32.xlu0 %v5482_v27  ;;  %v5476_v48 = vsel %vm236_vm0, %v8627_v9, 0.0  ;;  %v11090_v52 = vpop.eup %8628 }
0x1ecc   :  { %7726 = vmatpush3.bf16.msra.mxu0 %v5552_v16  ;;  %v5491_v58 = vsel %vm236_vm0, %v11090_v52, 0.0 }
0x1ecd   :  { %7727 = vmatprep.subr.bf16.mxu0 %v5554_v17  ;;  %v8631_v54 = vpop.eup %8630 }
0x1ece   :  { %v5645_v62 = vpop.permute.xlu1 %5644  ;;  %v5485_v46 = vsel %vm236_vm0, %v8631_v54, 0.0 }
0x1ecf   :  { %5477 = vadd.xlane.f32.xlu0 %v5476_v48 }
0x1ed0   :  { %7728 = vmatpush3.bf16.msra.mxu0 %v5554_v17 }
0x1ed1   :  { %7893 = vmatprep.subr.msk.bf16.mxu0 %vm531_vm2, %v5645_v62  ;;  %v11096_v11 = vpop.eup %8632 }
0x1ed2   :  { %v5494_v42 = vsel %vm236_vm0, %v11096_v11, 0.0  ;;  %v11107_v50 = vpop.eup %8634 }
0x1ed3   :  { %5492 = vadd.xlane.f32.xlu0 %v5491_v58  ;;  %v5488_v13 = vsel %vm236_vm0, %v11107_v50, 0.0 }
0x1ed7   :  { %5486 = vadd.xlane.f32.xlu0 %v5485_v46 }
0x1ed8   :  { %5648 = vrot.lane.b32.xlu1 %v10605_v53, %s8720_s18 }
0x1edb   :  { %5495 = vadd.xlane.f32.xlu0 %v5494_v42 }
0x1ef1   :  { %5646 = vrot.lane.b32.xlu0 %v10593_v63, %s8720_s18 }
0x1ef5   :  { %5636 = vrot.lane.b32.xlu0 %v10595_v59, %s8723_s21 }
0x1ef9   :  { %5640 = vrot.lane.b32.xlu0 %v10605_v53, %s8723_s21 }
0x1efc   :  { %5489 = vadd.xlane.f32.xlu1 %v5488_v13 }
0x1f0d   :  { %5650 = vrot.lane.b32.xlu1 %v10603_v10, %s8720_s18 }
0x1f11   :  { %5638 = vrot.lane.b32.xlu1 %v10593_v63, %s8723_s21 }
0x1f15   :  { %5642 = vrot.lane.b32.xlu1 %v10603_v10, %s8723_s21 }
0x1f50   :  { %v5481_v26 = vpop.xlane.xlu1 %5480 }
0x1f54   :  { %v5475_v39 = vpop.xlane.xlu1 %5474 }
0x1f55   :  { %8636 = vrcp.f32 %v5475_v39 }
0x1f58   :  { %v5484_v22 = vpop.xlane.xlu0 %5483 }
0x1f59   :  { %8638 = vrcp.f32 %v5484_v22 }
0x1f5a   :  { %8640 = vrcp.f32 %v5481_v26 }
0x1f5c   :  { %v5478_v16 = vpop.xlane.xlu0 %5477 }
0x1f5d   :  { %8642 = vrcp.f32 %v5478_v16 }
0x1f5f   :  { %v8637_v55 = vpop.eup %8636 }
0x1f60   :  { %v5493_v56 = vpop.xlane.xlu0 %5492  ;;  %v5513_v48 = vmul.f32 %v8637_v55, %v8623_v18  ;;  %v5665_v18 = vsel %vm531_vm2, %v5645_v62, 0 }
0x1f62   :  { %v5521_v13 = vsel %vm236_vm0, %v5513_v48, 0.0 }
0x1f63   :  { %v8639_v38 = vpop.eup %8638 }
0x1f64   :  { %v5487_v17 = vpop.xlane.xlu0 %5486  ;;  %v8641_v27 = vpop.eup %8640  ;;  %v5516_v46 = vmul.f32 %v8639_v38, %v8625_v29 }
0x1f65   :  { %8644 = vrcp.f32 %v5487_v17  ;;  %v5515_v42 = vmul.f32 %v8641_v27, %v11083_v44 }
0x1f66   :  { %v5526_v44 = vsel %vm236_vm0, %v5516_v46, 0.0 }
0x1f67   :  { %v8643_v58 = vpop.eup %8642  ;;  %v5544_v22 = vpack.c.bf16 %v5516_v46, %v5515_v42  ;;  %v5524_v35 = vsel %vm236_vm0, %v5515_v42, 0.0 }
0x1f68   :  { %v5496_v47 = vpop.xlane.xlu0 %5495  ;;  %v5514_v14 = vmul.f32 %v8643_v58, %v8627_v9  ;;  %v5649_v58 = vpop.permute.xlu1 %5648 }
0x1f69   :  { %8646 = vrcp.f32 %v5496_v47 }
0x1f6a   :  { %v5522_v39 = vsel %vm236_vm0, %v5514_v14, 0.0  ;;  %v5543_v26 = vpack.c.bf16 %v5514_v14, %v5513_v48  ;;  %8648 = vrcp.f32 %v5493_v56 }
0x1f6b   :  { %v5523_v16 = vadd.f32 %v5522_v39, %v5521_v13  ;;  %v5220_v13 = vrot.slane %v11041_v43, 4 }
0x1f6c   :  { %7729 = vmatprep.mubr.msk.bf16.mxu0 %vm236_vm0, %v5543_v26  ;;  %v5647_v1 = vpop.permute.xlu0 %5646 }
0x1f6d   :  { %v5525_v55 = vadd.f32 %v5524_v35, %v5523_v16  ;;  %7730 = vmatmul.mubr.msk.bf16.vlgmr.msra.gmra.mrb[136].mxu0 %vm236_vm0, %v5544_v22  ;;  %v5668_v48 = vsel %vm531_vm2, %v5647_v1, 0  ;;  %v5671_v35 = vsel %vm531_vm2, %v5649_v58, 0  ;;  %v5221_v16 = vadd.f32 %v5220_v13, %v11041_v43 }
0x1f6e   :  { %7738 = vmatpush3.bf16.xpose.msra.mxu0 %v5665_v18 }
0x1f6f   :  { %v8645_v29 = vpop.eup %8644  ;;  %7894 = vmatprep.subr.msk.bf16.mxu0 %vm531_vm2, %v5647_v1  ;;  %v5527_v9 = vadd.f32 %v5526_v44, %v5525_v55 }
0x1f70   :  { %v5517_v38 = vmul.f32 %v8645_v29, %v8631_v54  ;;  %v5637_v29 = vpop.permute.xlu0 %5636 }
0x1f72   :  { %v5528_v17 = vsel %vm236_vm0, %v5517_v38, 0.0 }
0x1f73   :  { %v5529_v27 = vadd.f32 %v5528_v17, %v5527_v9  ;;  %v8647_v54 = vpop.eup %8646 }
0x1f74   :  { %v8649_v14 = vpop.eup %8648  ;;  %v5520_v39 = vmul.f32 %v8647_v54, %v11096_v11 }
0x1f75   :  { %v5519_v47 = vmul.f32 %v8649_v14, %v11090_v52  ;;  %v5222_v52 = vrot.slane %v5221_v16, 2 }
0x1f76   :  { %7740 = vmatpush3.bf16.xpose.msra.mxu0 %v5668_v48  ;;  %v5534_v11 = vsel %vm236_vm0, %v5520_v39, 0.0 }
0x1f77   :  { %7895 = vmatprep.subr.msk.bf16.mxu0 %vm531_vm2, %v5649_v58  ;;  %v5546_v55 = vpack.c.bf16 %v5520_v39, %v5519_v47  ;;  %v5532_v44 = vsel %vm236_vm0, %v5519_v47, 0.0 }
0x1f7e   :  { %7742 = vmatpush3.bf16.xpose.msra.mxu0 %v5671_v35 }
0x1f89   :  { %v5490_v62 = vpop.xlane.xlu1 %5489 }
0x1f8a   :  { %8650 = vrcp.f32 %v5490_v62 }
0x1f8d   :  { %v5651_v46 = vpop.permute.xlu1 %5650 }
0x1f8e   :  { %v5674_v42 = vsel %vm531_vm2, %v5651_v46, 0  ;;  %7896 = vmatprep.subr.msk.bf16.mxu0 %vm531_vm2, %v5651_v46 }
0x1f8f   :  { %7744 = vmatpush3.bf16.xpose.msra.mxu0 %v5674_v42 }
0x1f91   :  { %v5639_v43 = vpop.permute.xlu1 %5638 }
0x1f94   :  { %v8651_v1 = vpop.eup %8650 }
0x1f95   :  { %v5518_v26 = vmul.f32 %v8651_v1, %v11107_v50  ;;  %v5643_v14 = vpop.permute.xlu1 %5642 }
0x1f97   :  { %v5530_v56 = vsel %vm236_vm0, %v5518_v26, 0.0  ;;  %v5545_v22 = vpack.c.bf16 %v5518_v26, %v5517_v38  ;;  %v5223_v38 = vadd.f32 %v5222_v52, %v5221_v16 }
0x1f98   :  { %v5531_v18 = vadd.f32 %v5530_v56, %v5529_v27  ;;  %v5641_v27 = vpop.permute.xlu0 %5640 }
0x1f99   :  { %7733 = vmatprep.mubr.msk.bf16.mxu0 %vm236_vm0, %v5545_v22  ;;  %v5224_v62 = vrot.slane %v5223_v38, 1 }
0x1f9a   :  { %v5533_v9 = vadd.f32 %v5532_v44, %v5531_v18  ;;  %7734 = vmatmul.mubr.msk.bf16.gmra.mrb[140].mxu0 %vm236_vm0, %v5546_v55 }
0x1f9b   :  { %7745 = vmatprep.mubr.msk.bf16.mxu0 %vm531_vm2, %v5637_v29  ;;  %v5225_v42 = vadd.f32 %v5224_v62, %v5223_v38 }
0x1f9c   :  { %v5535_v50 = vadd.f32 %v5534_v11, %v5533_v9 }
0x1f9e   :  { %v5536_v17 = vrot.slane %v5535_v50, 4 }
0x1fa0   :  { %v5537_v48 = vadd.f32 %v5536_v17, %v5535_v50 }
0x1fa2   :  { %v5538_v58 = vrot.slane %v5537_v48, 2  ;;  %7746 = vmatmul.mubr.msk.bf16.vlgmr.msra.gmra.mrb[144].mxu0 %vm531_vm2, %v5639_v43 }
0x1fa3   :  { %7749 = vmatprep.mubr.msk.bf16.mxu0 %vm531_vm2, %v5641_v27 }
0x1fa4   :  { %v5539_v35 = vadd.f32 %v5538_v58, %v5537_v48 }
0x1fa6   :  { %v5540_v46 = vrot.slane %v5539_v35, 1 }
0x1fa8   :  { %v5541_v54 = vadd.f32 %v5540_v46, %v5539_v35 }
0x1faa   :  { %7750 = vmatmul.mubr.msk.bf16.gmra.mrb[148].mxu0 %vm531_vm2, %v5643_v14  ;;  %v11148_v1 = vadd.f32 %v5541_v54, %v5225_v42 }
0x2040   :  { %v11150_v13 = vpop.f32.mrb[136].mxu0 }
0x2041   :  { %v11152_v39 = vpop.f32.mrb[137].mxu0 }
0x2042   :  { %v11154_v26 = vpop.f32.mrb[138].mxu0 }
0x2043   :  { %v11158_v56 = vpop.f32.mrb[139].mxu0 }
0x206d   :  { %v11162_v16 = vpop.f32.mrb[140].mxu0 }
0x206e   :  { %v11164_v18 = vpop.f32.mrb[141].mxu0 }
0x206f   :  { %11786 = vst [vmem:[#allocation36_spill] sm:$0xff] %v11164_v18  ;;  %v11166_v55 = vpop.f32.mrb[142].mxu0 }
0x2070   :  { %v11170_v29 = vpop.f32.mrb[143].mxu0 }
0x2075   :  { %v7747_v11 = vpop.f32.mrb[144].mxu0 }
0x2076   :  { %v5710_v52 = vpop.f32.mrb[145].mxu0  ;;  %v5747_v50 = vsel %vm236_vm0, %v7747_v11, -inf }
0x2077   :  { %5748 = vmax.xlane.f32.xlu0 %v5747_v50  ;;  %v7748_v17 = vpop.f32.mrb[146].mxu0  ;;  %v5741_v43 = vsel %vm236_vm0, %v5710_v52, -inf }
0x2078   :  { %v5713_v38 = vpop.f32.mrb[147].mxu0  ;;  %v5750_v35 = vsel %vm236_vm0, %v7748_v17, -inf }
0x2079   :  { %v5744_v48 = vsel %vm236_vm0, %v5713_v38, -inf }
0x207a   :  { %5745 = vmax.xlane.f32.xlu1 %v5744_v48 }
0x207b   :  { %5742 = vmax.xlane.f32.xlu0 %v5741_v43 }
0x207d   :  { %v7751_v27 = vpop.f32.mrb[148].mxu0 }
0x207e   :  { %v5726_v58 = vpop.f32.mrb[149].mxu0  ;;  %v5759_v62 = vsel %vm236_vm0, %v7751_v27, -inf }
0x207f   :  { %5751 = vmax.xlane.f32.xlu0 %v5750_v35  ;;  %5760 = vmax.xlane.f32.xlu1 %v5759_v62  ;;  %v7752_v46 = vpop.f32.mrb[150].mxu0  ;;  %v5753_v14 = vsel %vm236_vm0, %v5726_v58, -inf }
0x2080   :  { %v11179_v42 = vpop.f32.mrb[151].mxu0  ;;  %v5762_v50 = vsel %vm236_vm0, %v7752_v46, -inf }
0x2081   :  { %v5756_v54 = vsel %vm236_vm0, %v11179_v42, -inf }
0x2083   :  { %5754 = vmax.xlane.f32.xlu1 %v5753_v14  ;;  %5757 = vmax.xlane.f32.xlu0 %v5756_v54 }
0x2087   :  { %5763 = vmax.xlane.f32.xlu0 %v5762_v50 }
0x2094   :  { %5863 = vrot.lane.b32.xlu1 %v10595_v59, %s8726_s24 }
0x2098   :  { %5867 = vrot.lane.b32.xlu1 %v10605_v53, %s8726_s24 }
0x209c   :  { %5869 = vrot.lane.b32.xlu1 %v10603_v10, %s8726_s24 }
0x209d   :  { %5865 = vrot.lane.b32.xlu0 %v10593_v63, %s8726_s24 }
0x20a0   :  { %5960 = vrot.lane.b32.xlu1 %v10595_v59, %s8722_s20 }
0x2104   :  { %v5749_v48 = vpop.xlane.xlu0 %5748 }
0x2105   :  { %v5767_v43 = vsub.f32 %v7747_v11, %v5749_v48 }
0x2107   :  { %v5777_v35 = vmul.f32 1.442695, %v5767_v43  ;;  %v5746_v62 = vpop.xlane.xlu1 %5745 }
0x2108   :  { %v5743_v54 = vpop.xlane.xlu0 %5742  ;;  %v5766_v9 = vsub.f32 %v5713_v38, %v5746_v62 }
0x2109   :  { %8652 = vpow2.f32 %v5777_v35  ;;  %v5765_v14 = vsub.f32 %v5710_v52, %v5743_v54 }
0x210a   :  { %v5775_v40 = vmul.f32 1.442695, %v5766_v9 }
0x210b   :  { %v5773_v50 = vmul.f32 1.442695, %v5765_v14 }
0x210c   :  { %v5761_v44 = vpop.xlane.xlu1 %5760  ;;  %v5752_v22 = vpop.xlane.xlu0 %5751 }
0x210d   :  { %8654 = vpow2.f32 %v5773_v50  ;;  %v5768_v47 = vsub.f32 %v7748_v17, %v5752_v22  ;;  %v5771_v21 = vsub.f32 %v7751_v27, %v5761_v44 }
0x210f   :  { %v5779_v34 = vmul.f32 1.442695, %v5768_v47  ;;  %v5785_v11 = vmul.f32 1.442695, %v5771_v21 }
0x2110   :  { %v5755_v33 = vpop.xlane.xlu1 %5754  ;;  %v5758_v25 = vpop.xlane.xlu0 %5757 }
0x2111   :  { %8656 = vpow2.f32 %v5779_v34  ;;  %v5769_v48 = vsub.f32 %v5726_v58, %v5755_v33 }
0x2112   :  { %8658 = vpow2.f32 %v5775_v40 }
0x2113   :  { %v11195_v61 = vpop.eup %8652  ;;  %8660 = vpow2.f32 %v5785_v11  ;;  %v5781_v47 = vmul.f32 1.442695, %v5769_v48 }
0x2114   :  { %v5864_v43 = vpop.permute.xlu1 %5863  ;;  %v5764_v35 = vpop.xlane.xlu0 %5763  ;;  %v5795_v52 = vsel %vm236_vm0, %v11195_v61, 0.0 }
0x2115   :  { %7753 = vmatprep.subr.bf16.mxu1 %v5864_v43  ;;  %5796 = vadd.xlane.f32.xlu1 %v5795_v52  ;;  %v5772_v44 = vsub.f32 %v7752_v46, %v5764_v35  ;;  %8662 = vpow2.f32 %v5781_v47 }
0x2116   :  { %7754 = vmatpush3.bf16.msra.mxu1 %v5864_v43  ;;  %v5770_v43 = vsub.f32 %v11179_v42, %v5758_v25 }
0x2117   :  { %v8655_v22 = vpop.eup %8654  ;;  %v5787_v33 = vmul.f32 1.442695, %v5772_v44 }
0x2118   :  { %v5868_v9 = vpop.permute.xlu1 %5867  ;;  %v5866_v17 = vpop.permute.xlu0 %5865  ;;  %v5789_v34 = vsel %vm236_vm0, %v8655_v22, 0.0  ;;  %v5783_v35 = vmul.f32 1.442695, %v5770_v43 }
0x2119   :  { %5790 = vadd.xlane.f32.xlu1 %v5789_v34  ;;  %7755 = vmatprep.subr.bf16.mxu1 %v5866_v17  ;;  %8664 = vpow2.f32 %v5787_v33 }
0x211a   :  { %7756 = vmatpush3.bf16.msra.mxu1 %v5866_v17  ;;  %8666 = vpow2.f32 %v5783_v35 }
0x211b   :  { %7757 = vmatprep.subr.bf16.mxu1 %v5868_v9  ;;  %v8657_v21 = vpop.eup %8656 }
0x211c   :  { %v5870_v40 = vpop.permute.xlu1 %5869  ;;  %v5798_v38 = vsel %vm236_vm0, %v8657_v21, 0.0  ;;  %v8659_v27 = vpop.eup %8658 }
0x211d   :  { %5799 = vadd.xlane.f32.xlu0 %v5798_v38  ;;  %v5792_v58 = vsel %vm236_vm0, %v8659_v27, 0.0  ;;  %v11202_v46 = vpop.eup %8660 }
0x211e   :  { %7758 = vmatpush3.bf16.msra.mxu1 %v5868_v9  ;;  %v5807_v54 = vsel %vm236_vm0, %v11202_v46, 0.0 }
0x211f   :  { %7759 = vmatprep.subr.bf16.mxu1 %v5870_v40  ;;  %v8663_v14 = vpop.eup %8662 }
0x2120   :  { %v5961_v62 = vpop.permute.xlu1 %5960  ;;  %v5801_v50 = vsel %vm236_vm0, %v8663_v14, 0.0 }
0x2121   :  { %5793 = vadd.xlane.f32.xlu0 %v5792_v58 }
0x2122   :  { %7760 = vmatpush3.bf16.msra.mxu1 %v5870_v40 }
0x2123   :  { %7897 = vmatprep.subr.msk.bf16.mxu1 %vm531_vm2, %v5961_v62  ;;  %v11208_v11 = vpop.eup %8664 }
0x2124   :  { %v5810_v48 = vsel %vm236_vm0, %v11208_v11, 0.0  ;;  %v11219_v52 = vpop.eup %8666 }
0x2125   :  { %5808 = vadd.xlane.f32.xlu0 %v5807_v54  ;;  %v5804_v47 = vsel %vm236_vm0, %v11219_v52, 0.0 }
0x2129   :  { %5802 = vadd.xlane.f32.xlu0 %v5801_v50 }
0x212a   :  { %5964 = vrot.lane.b32.xlu1 %v10605_v53, %s8722_s20 }
0x212d   :  { %5811 = vadd.xlane.f32.xlu0 %v5810_v48 }
0x2143   :  { %5962 = vrot.lane.b32.xlu0 %v10593_v63, %s8722_s20 }
0x2147   :  { %5952 = vrot.lane.b32.xlu0 %v10595_v59, %s8724_s22 }
0x214b   :  { %5956 = vrot.lane.b32.xlu0 %v10605_v53, %s8724_s22 }
0x214e   :  { %5805 = vadd.xlane.f32.xlu1 %v5804_v47 }
0x215f   :  { %5966 = vrot.lane.b32.xlu1 %v10603_v10, %s8722_s20 }
0x2163   :  { %5954 = vrot.lane.b32.xlu1 %v10593_v63, %s8724_s22 }
0x2167   :  { %5958 = vrot.lane.b32.xlu1 %v10603_v10, %s8724_s22 }
0x21a2   :  { %v5797_v25 = vpop.xlane.xlu1 %5796 }
0x21a6   :  { %v5791_v42 = vpop.xlane.xlu1 %5790 }
0x21a7   :  { %8668 = vrcp.f32 %v5791_v42 }
0x21aa   :  { %v5800_v44 = vpop.xlane.xlu0 %5799 }
0x21ab   :  { %8670 = vrcp.f32 %v5800_v44 }
0x21ac   :  { %8672 = vrcp.f32 %v5797_v25 }
0x21ae   :  { %v5794_v9 = vpop.xlane.xlu0 %5793 }
0x21af   :  { %8674 = vrcp.f32 %v5794_v9 }
0x21b1   :  { %v8669_v34 = vpop.eup %8668 }
0x21b2   :  { %v5809_v17 = vpop.xlane.xlu0 %5808  ;;  %v5829_v58 = vmul.f32 %v8669_v34, %v8655_v22  ;;  %v5981_v22 = vsel %vm531_vm2, %v5961_v62, 0 }
0x21b4   :  { %v5837_v47 = vsel %vm236_vm0, %v5829_v58, 0.0 }
0x21b5   :  { %v8671_v33 = vpop.eup %8670 }
0x21b6   :  { %v5803_v40 = vpop.xlane.xlu0 %5802  ;;  %v8673_v38 = vpop.eup %8672  ;;  %v5832_v50 = vmul.f32 %v8671_v33, %v8657_v21 }
0x21b7   :  { %8676 = vrcp.f32 %v5803_v40  ;;  %v5831_v48 = vmul.f32 %v8673_v38, %v11195_v61 }
0x21b8   :  { %v5842_v61 = vsel %vm236_vm0, %v5832_v50, 0.0 }
0x21b9   :  { %v8675_v54 = vpop.eup %8674  ;;  %v5860_v44 = vpack.c.bf16 %v5832_v50, %v5831_v48  ;;  %v5840_v15 = vsel %vm236_vm0, %v5831_v48, 0.0 }
0x21ba   :  { %v5812_v43 = vpop.xlane.xlu0 %5811  ;;  %v5830_v35 = vmul.f32 %v8675_v54, %v8659_v27  ;;  %v5965_v54 = vpop.permute.xlu1 %5964 }
0x21bb   :  { %8678 = vrcp.f32 %v5812_v43 }
0x21bc   :  { %v5838_v42 = vsel %vm236_vm0, %v5830_v35, 0.0  ;;  %v5859_v25 = vpack.c.bf16 %v5830_v35, %v5829_v58  ;;  %8680 = vrcp.f32 %v5809_v17 }
0x21bd   :  { %v5839_v9 = vadd.f32 %v5838_v42, %v5837_v47 }
0x21be   :  { %7761 = vmatprep.mubr.msk.bf16.mxu1 %vm236_vm0, %v5859_v25  ;;  %v5963_v12 = vpop.permute.xlu0 %5962 }
0x21bf   :  { %v5841_v34 = vadd.f32 %v5840_v15, %v5839_v9  ;;  %7762 = vmatmul.mubr.msk.bf16.vlgmr.msra.gmra.mrb[160].mxu1 %vm236_vm0, %v5860_v44  ;;  %v5984_v58 = vsel %vm531_vm2, %v5963_v12, 0  ;;  %v5987_v15 = vsel %vm531_vm2, %v5965_v54, 0 }
0x21c0   :  { %7770 = vmatpush3.bf16.xpose.msra.mxu1 %v5981_v22 }
0x21c1   :  { %v8677_v21 = vpop.eup %8676  ;;  %7898 = vmatprep.subr.msk.bf16.mxu1 %vm531_vm2, %v5963_v12  ;;  %v5843_v27 = vadd.f32 %v5842_v61, %v5841_v34 }
0x21c2   :  { %v5833_v33 = vmul.f32 %v8677_v21, %v8663_v14  ;;  %v5953_v34 = vpop.permute.xlu0 %5952 }
0x21c4   :  { %v5844_v40 = vsel %vm236_vm0, %v5833_v33, 0.0 }
0x21c5   :  { %v5845_v38 = vadd.f32 %v5844_v40, %v5843_v27  ;;  %v8679_v14 = vpop.eup %8678 }
0x21c6   :  { %v8681_v35 = vpop.eup %8680  ;;  %v5836_v47 = vmul.f32 %v8679_v14, %v11208_v11  ;;  %v5957_v40 = vpop.permute.xlu0 %5956 }
0x21c7   :  { %v5835_v25 = vmul.f32 %v8681_v35, %v11202_v46 }
0x21c8   :  { %7772 = vmatpush3.bf16.xpose.msra.mxu1 %v5984_v58  ;;  %v5850_v21 = vsel %vm236_vm0, %v5836_v47, 0.0 }
0x21c9   :  { %7899 = vmatprep.subr.msk.bf16.mxu1 %vm531_vm2, %v5965_v54  ;;  %v5862_v9 = vpack.c.bf16 %v5836_v47, %v5835_v25  ;;  %v5848_v22 = vsel %vm236_vm0, %v5835_v25, 0.0 }
0x21d0   :  { %7774 = vmatpush3.bf16.xpose.msra.mxu1 %v5987_v15 }
0x21db   :  { %v5806_v62 = vpop.xlane.xlu1 %5805 }
0x21dc   :  { %8682 = vrcp.f32 %v5806_v62 }
0x21df   :  { %v5967_v50 = vpop.permute.xlu1 %5966 }
0x21e0   :  { %v5990_v48 = vsel %vm531_vm2, %v5967_v50, 0  ;;  %7900 = vmatprep.subr.msk.bf16.mxu1 %vm531_vm2, %v5967_v50 }
0x21e1   :  { %7776 = vmatpush3.bf16.xpose.msra.mxu1 %v5990_v48 }
0x21e3   :  { %v5955_v27 = vpop.permute.xlu1 %5954 }
0x21e6   :  { %v8683_v12 = vpop.eup %8682 }
0x21e7   :  { %v5834_v42 = vmul.f32 %v8683_v12, %v11219_v52  ;;  %v5959_v15 = vpop.permute.xlu1 %5958 }
0x21e9   :  { %v5846_v43 = vsel %vm236_vm0, %v5834_v42, 0.0  ;;  %v5861_v17 = vpack.c.bf16 %v5834_v42, %v5833_v33 }
0x21ea   :  { %v5847_v44 = vadd.f32 %v5846_v43, %v5845_v38 }
0x21eb   :  { %7765 = vmatprep.mubr.msk.bf16.mxu1 %vm236_vm0, %v5861_v17 }
0x21ec   :  { %v5849_v61 = vadd.f32 %v5848_v22, %v5847_v44  ;;  %7766 = vmatmul.mubr.msk.bf16.gmra.mrb[164].mxu1 %vm236_vm0, %v5862_v9 }
0x21ed   :  { %7777 = vmatprep.mubr.msk.bf16.mxu1 %vm531_vm2, %v5953_v34 }
0x21ee   :  { %v5851_v11 = vadd.f32 %v5850_v21, %v5849_v61 }
0x21f0   :  { %v5852_v52 = vrot.slane %v5851_v11, 4 }
0x21f2   :  { %v5853_v46 = vadd.f32 %v5852_v52, %v5851_v11 }
0x21f4   :  { %v5854_v33 = vrot.slane %v5853_v46, 2  ;;  %7778 = vmatmul.mubr.msk.bf16.vlgmr.msra.gmra.mrb[168].mxu1 %vm531_vm2, %v5955_v27 }
0x21f5   :  { %7781 = vmatprep.mubr.msk.bf16.mxu1 %vm531_vm2, %v5957_v40 }
0x21f6   :  { %v5855_v38 = vadd.f32 %v5854_v33, %v5853_v46 }
0x21f8   :  { %v5856_v58 = vrot.slane %v5855_v38, 1 }
0x21fa   :  { %v5857_v54 = vadd.f32 %v5856_v58, %v5855_v38 }
0x21fc   :  { %7782 = vmatmul.mubr.msk.bf16.gmra.mrb[172].mxu1 %vm531_vm2, %v5959_v15  ;;  %v11259_v62 = vadd.f32 %v5857_v54, %v11148_v1 }
0x21fe   :  { %11787 = vst [vmem:[#allocation37_spill] sm:$0xff] %v11259_v62 }
0x2292   :  { %v11261_v50 = vpop.f32.mrb[160].mxu1 }
0x2293   :  { %v11263_v48 = vpop.f32.mrb[161].mxu1 }
0x2294   :  { %v11265_v14 = vpop.f32.mrb[162].mxu1 }
0x2295   :  { %v11269_v12 = vpop.f32.mrb[163].mxu1 }
0x22bf   :  { %v11273_v42 = vpop.f32.mrb[164].mxu1 }
0x22c0   :  { %11788 = vst [vmem:[#allocation38_spill] sm:$0xff] %v11273_v42  ;;  %v11275_v25 = vpop.f32.mrb[165].mxu1 }
0x22c1   :  { %11789 = vst [vmem:[#allocation39_spill] sm:$0xff] %v11275_v25  ;;  %v11277_v1 = vpop.f32.mrb[166].mxu1 }
0x22c2   :  { %11790 = vst [vmem:[#allocation40_spill] sm:$0xff] %v11277_v1  ;;  %v11281_v17 = vpop.f32.mrb[167].mxu1 }
0x22c3   :  { %11791 = vst [vmem:[#allocation41_spill] sm:$0xff] %v11281_v17 }
0x22c7   :  { %v7779_v9 = vpop.f32.mrb[168].mxu1 }
0x22c8   :  { %v6026_v22 = vpop.f32.mrb[169].mxu1  ;;  %v6063_v52 = vsel %vm236_vm0, %v7779_v9, -inf }
0x22c9   :  { %v7780_v34 = vpop.f32.mrb[170].mxu1  ;;  %v6057_v61 = vsel %vm236_vm0, %v6026_v22, -inf }
0x22ca   :  { %6058 = vmax.xlane.f32.xlu0 %v6057_v61  ;;  %v6029_v21 = vpop.f32.mrb[171].mxu1  ;;  %v6066_v33 = vsel %vm236_vm0, %v7780_v34, -inf }
0x22cb   :  { %v6060_v11 = vsel %vm236_vm0, %v6029_v21, -inf }
0x22cc   :  { %6061 = vmax.xlane.f32.xlu1 %v6060_v11 }
0x22ce   :  { %6064 = vmax.xlane.f32.xlu0 %v6063_v52 }
0x22cf   :  { %v7783_v46 = vpop.f32.mrb[172].mxu1 }
0x22d0   :  { %v6042_v27 = vpop.f32.mrb[173].mxu1  ;;  %v6075_v54 = vsel %vm236_vm0, %v7783_v46, -inf }
0x22d1   :  { %v7784_v40 = vpop.f32.mrb[174].mxu1  ;;  %v6069_v38 = vsel %vm236_vm0, %v6042_v27, -inf }
0x22d2   :  { %6067 = vmax.xlane.f32.xlu0 %v6066_v33  ;;  %6070 = vmax.xlane.f32.xlu1 %v6069_v38  ;;  %v6045_v58 = vpop.f32.mrb[175].mxu1  ;;  %v6078_v61 = vsel %vm236_vm0, %v7784_v40, -inf }
0x22d3   :  { %v6072_v15 = vsel %vm236_vm0, %v6045_v58, -inf }
0x22d6   :  { %6076 = vmax.xlane.f32.xlu1 %v6075_v54  ;;  %6073 = vmax.xlane.f32.xlu0 %v6072_v15 }
0x22da   :  { %6079 = vmax.xlane.f32.xlu0 %v6078_v61 }
0x22e7   :  { %6179 = vrot.lane.b32.xlu1 %v10595_v59, %s8727_s1 }
0x2357   :  { %v6059_v11 = vpop.xlane.xlu0 %6058 }
0x2358   :  { %v6081_v52 = vsub.f32 %v6026_v22, %v6059_v11 }
0x2359   :  { %v6062_v44 = vpop.xlane.xlu1 %6061 }
0x235a   :  { %v6089_v33 = vmul.f32 1.442695, %v6081_v52  ;;  %v6082_v35 = vsub.f32 %v6029_v21, %v6062_v44 }
0x235b   :  { %v6065_v43 = vpop.xlane.xlu0 %6064 }
0x235c   :  { %v6083_v47 = vsub.f32 %v7779_v9, %v6065_v43  ;;  %v6091_v1 = vmul.f32 1.442695, %v6082_v35 }
0x235e   :  { %v6093_v38 = vmul.f32 1.442695, %v6083_v47 }
0x235f   :  { %v6071_v25 = vpop.xlane.xlu1 %6070  ;;  %v6068_v17 = vpop.xlane.xlu0 %6067 }
0x2360   :  { %8684 = vpow2.f32 %v6093_v38  ;;  %v6084_v42 = vsub.f32 %v7780_v34, %v6068_v17  ;;  %v6085_v54 = vsub.f32 %v6042_v27, %v6071_v25 }
0x2361   :  { %8686 = vpow2.f32 %v6089_v33 }
0x2362   :  { %v6095_v15 = vmul.f32 1.442695, %v6084_v42  ;;  %v6097_v59 = vmul.f32 1.442695, %v6085_v54 }
0x2363   :  { %v6077_v61 = vpop.xlane.xlu1 %6076  ;;  %v6074_v62 = vpop.xlane.xlu0 %6073 }
0x2364   :  { %v6087_v18 = vsub.f32 %v7783_v46, %v6077_v61  ;;  %8688 = vpow2.f32 %v6095_v15  ;;  %v6086_v11 = vsub.f32 %v6045_v58, %v6074_v62  ;;  %v11792_v15 = vpack.i.bf16 %v10726_v36, %v10722_v20 }
0x2365   :  { %8690 = vpow2.f32 %v6091_v1  ;;  %v11793_v61 = vpack.i.bf16 %v10837_v8, %v10833_v19  ;;  %v11796_v20 = vpack.i.bf16 %v10841_v41, %v10835_v49  ;;  %v11799_v36 = vpack.i.bf16 %v10849_v30, %v10845_v7  ;;  %v11809_v7 = vld [vmem:[#allocation36_spill] sm:$0xff] }
0x2366   :  { %v6101_v22 = vmul.f32 1.442695, %v6087_v18  ;;  %v6099_v42 = vmul.f32 1.442695, %v6086_v11  ;;  %v11803_v19 = vpack.i.bf16 %v11154_v26, %v11150_v13  ;;  %v11806_v49 = vpack.i.bf16 %v11158_v56, %v11152_v39 }
0x2367   :  { %v6180_v43 = vpop.permute.xlu1 %6179  ;;  %v6080_v9 = vpop.xlane.xlu0 %6079  ;;  %v11807_v8 = vpack.i.bf16 %v11166_v55, %v11162_v16  ;;  %v11808_v41 = vpack.i.bf16 %v11269_v12, %v11263_v48 }
0x2368   :  { %8692 = vpow2.f32 %v6101_v22  ;;  %v6088_v47 = vsub.f32 %v7784_v40, %v6080_v9  ;;  %7785 = vmatprep.subr.bf16.mxu0 %v6180_v43  ;;  %7829 = vmatprep.subr.bf16.mxu1 %v6180_v43 }
0x2369   :  { %7786 = vmatpush3.bf16.msra.mxu0 %v6180_v43  ;;  %7833 = vmatpush3.bf16.msra.mxu1 %v6180_v43  ;;  %8694 = vpow2.f32 %v6097_v59 }
0x236a   :  { %v11295_v17 = vpop.eup %8684  ;;  %v6103_v35 = vmul.f32 1.442695, %v6088_v47 }
0x236b   :  { %v6111_v25 = vsel %vm236_vm0, %v11295_v17, 0.0  ;;  %v11299_v44 = vpop.eup %8686 }
0x236c   :  { %8696 = vpow2.f32 %v6103_v35  ;;  %6112 = vadd.xlane.f32.xlu1 %v6111_v25  ;;  %v6105_v62 = vsel %vm236_vm0, %v11299_v44, 0.0 }
0x236d   :  { %8698 = vpow2.f32 %v6099_v42 }
0x236e   :  { %v11301_v18 = vpop.eup %8688 }
0x236f   :  { %v6114_v1 = vsel %vm236_vm0, %v11301_v18, 0.0  ;;  %v11307_v34 = vpop.eup %8690 }
0x2370   :  { %6106 = vadd.xlane.f32.xlu1 %v6105_v62  ;;  %6115 = vadd.xlane.f32.xlu0 %v6114_v1  ;;  %v6108_v40 = vsel %vm236_vm0, %v11307_v34, 0.0 }
0x2372   :  { %v11309_v21 = vpop.eup %8692 }
0x2373   :  { %v6123_v46 = vsel %vm236_vm0, %v11309_v21, 0.0  ;;  %v11313_v27 = vpop.eup %8694 }
0x2374   :  { %6124 = vadd.xlane.f32.xlu1 %v6123_v46  ;;  %6109 = vadd.xlane.f32.xlu0 %v6108_v40  ;;  %v6117_v52 = vsel %vm236_vm0, %v11313_v27, 0.0 }
0x2376   :  { %v11317_v58 = vpop.eup %8696 }
0x2377   :  { %v6126_v33 = vsel %vm236_vm0, %v11317_v58, 0.0  ;;  %v11323_v38 = vpop.eup %8698 }
0x2378   :  { %6118 = vadd.xlane.f32.xlu1 %v6117_v52  ;;  %6127 = vadd.xlane.f32.xlu0 %v6126_v33  ;;  %v6120_v54 = vsel %vm236_vm0, %v11323_v38, 0.0  ;;  %v8200_v33 = vld [vmem:[%s11620_s9] sm:$0xff]  }
0x237c   :  { %6121 = vadd.xlane.f32.xlu0 %v6120_v54 }
0x2389   :  { %6183 = vrot.lane.b32.xlu1 %v10605_v53, %s8727_s1  ;;  %v11794_v53 = vpack.i.bf16 %v10730_v4, %v10724_v2  ;;  %v11798_v2 = vpack.i.bf16 %v10944_v60, %v10938_v45  ;;  %v11800_v4 = vpack.i.bf16 %v10742_v0, %v10736_v37  ;;  %v11804_v37 = vpack.i.bf16 %v10956_v3, %v10950_v28 }
0x238a   :  { %v11805_v0 = vpack.i.bf16 %v11265_v14, %v11261_v50 }
0x238d   :  { %6185 = vrot.lane.b32.xlu1 %v10603_v10, %s8727_s1  ;;  %v11795_v10 = vpack.i.bf16 %v10940_v23, %v10936_v5 }
0x2391   :  { %8044 = vrot.lane.b32.xlu1 %v11792_v15, %s8728_s25 }
0x2392   :  { %6181 = vrot.lane.b32.xlu0 %v10593_v63, %s8727_s1  ;;  %v11797_v63 = vpack.i.bf16 %v10738_v24, %v10734_v57  ;;  %v11801_v57 = vpack.i.bf16 %v10952_v32, %v10948_v6  ;;  %v11802_v24 = vpack.i.bf16 %v10853_v31, %v10847_v51  ;;  %v11810_v51 = vpack.i.bf16 %v11170_v29, %v11809_v7 }
0x2395   :  { %8054 = vrot.lane.b32.xlu1 %v11793_v61, %s8729_s26 }
0x2396   :  { %8039 = vrot.lane.b32.xlu0 %v11794_v53, %s8728_s25 }
0x2399   :  { %8064 = vrot.lane.b32.xlu1 %v11795_v10, %s8730_s27 }
0x239a   :  { %8049 = vrot.lane.b32.xlu0 %v11796_v20, %s8729_s26 }
0x239d   :  { %8074 = vrot.lane.b32.xlu1 %v11797_v63, %s8728_s25 }
0x239e   :  { %8059 = vrot.lane.b32.xlu0 %v11798_v2, %s8730_s27 }
0x23a1   :  { %8084 = vrot.lane.b32.xlu1 %v11799_v36, %s8729_s26 }
0x23a2   :  { %8069 = vrot.lane.b32.xlu0 %v11800_v4, %s8728_s25 }
0x23a5   :  { %8094 = vrot.lane.b32.xlu1 %v11801_v57, %s8730_s27 }
0x23a6   :  { %8079 = vrot.lane.b32.xlu0 %v11802_v24, %s8729_s26 }
0x23a9   :  { %8104 = vrot.lane.b32.xlu1 %v11803_v19, %s8728_s25 }
0x23aa   :  { %8089 = vrot.lane.b32.xlu0 %v11804_v37, %s8730_s27  ;;  %v11811_v37 = vld [vmem:[#allocation26_spill] sm:$0xff] }
0x23ad   :  { %8114 = vrot.lane.b32.xlu1 %v11805_v0, %s8729_s26 }
0x23ae   :  { %8099 = vrot.lane.b32.xlu0 %v11806_v49, %s8728_s25  ;;  %v11812_v49 = vld [vmem:[#allocation25_spill] sm:$0xff] }
0x23b1   :  { %8124 = vrot.lane.b32.xlu1 %v11807_v8, %s8728_s25  ;;  %v11813_v8 = vld [vmem:[#allocation24_spill] sm:$0xff] }
0x23b2   :  { %8109 = vrot.lane.b32.xlu0 %v11808_v41, %s8729_s26 }
0x23b6   :  { %8119 = vrot.lane.b32.xlu0 %v11810_v51, %s8728_s25 }
0x23f9   :  { %v6113_v30 = vpop.xlane.xlu1 %6112 }
0x23fd   :  { %v6107_v31 = vpop.xlane.xlu1 %6106  ;;  %v6116_v5 = vpop.xlane.xlu0 %6115 }
0x23fe   :  { %8700 = vrcp.f32 %v6107_v31  ;;  %v11814_v31 = vld [vmem:[#allocation23_spill] sm:$0xff] }
0x23ff   :  { %8702 = vrcp.f32 %v6113_v30  ;;  %v8201_v30 = vld [vmem:[%s11620_s9 + $0x8] sm:$0xff]  }
0x2400   :  { %8704 = vrcp.f32 %v6116_v5 }
0x2401   :  { %v6125_v45 = vpop.xlane.xlu1 %6124  ;;  %v6110_v23 = vpop.xlane.xlu0 %6109 }
0x2402   :  { %8706 = vrcp.f32 %v6125_v45 }
0x2403   :  { %8708 = vrcp.f32 %v6110_v23 }
0x2405   :  { %v6119_v60 = vpop.xlane.xlu1 %6118  ;;  %v6128_v6 = vpop.xlane.xlu0 %6127 }
0x2406   :  { %8710 = vrcp.f32 %v6119_v60 }
0x2407   :  { %8712 = vrcp.f32 %v6128_v6 }
0x2408   :  { %v8701_v28 = vpop.eup %8700 }
0x2409   :  { %v6184_v32 = vpop.permute.xlu1 %6183  ;;  %v8703_v3 = vpop.eup %8702  ;;  %v6145_v56 = vmul.f32 %v8701_v28, %v11299_v44 }
0x240a   :  { %v6122_v13 = vpop.xlane.xlu0 %6121  ;;  %v8705_v39 = vpop.eup %8704  ;;  %v11407_v29 = vmul.f32 %v8703_v3, %v11295_v17 }
0x240b   :  { %8714 = vrcp.f32 %v6122_v13  ;;  %v11411_v14 = vmul.f32 %v8705_v39, %v11301_v18  ;;  %v6153_v22 = vsel %vm236_vm0, %v6145_v56, 0.0 }
0x240c   :  { %v8707_v26 = vpop.eup %8706  ;;  %v6156_v35 = vsel %vm236_vm0, %v11407_v29, 0.0 }
0x240d   :  { %v8709_v16 = vpop.eup %8708  ;;  %v6186_v55 = vpop.permute.xlu1 %6185  ;;  %v11414_v59 = vmul.f32 %v8707_v26, %v11309_v21  ;;  %v6158_v62 = vsel %vm236_vm0, %v11411_v14, 0.0  ;;  %v6176_v1 = vpack.c.bf16 %v11411_v14, %v11407_v29 }
0x240e   :  { %v6182_v50 = vpop.permute.xlu0 %6181  ;;  %v6146_v48 = vmul.f32 %v8709_v16, %v11307_v34 }
0x240f   :  { %7787 = vmatprep.subr.bf16.mxu0 %v6182_v50  ;;  %7830 = vmatprep.subr.bf16.mxu1 %v6182_v50  ;;  %v6164_v34 = vsel %vm236_vm0, %v11414_v59, 0.0 }
0x2410   :  { %v8711_v12 = vpop.eup %8710  ;;  %7788 = vmatpush3.bf16.msra.mxu0 %v6182_v50  ;;  %7834 = vmatpush3.bf16.msra.mxu1 %v6182_v50  ;;  %v6154_v11 = vsel %vm236_vm0, %v6146_v48, 0.0  ;;  %v6175_v43 = vpack.c.bf16 %v6146_v48, %v6145_v56 }
0x2411   :  { %v8713_v9 = vpop.eup %8712  ;;  %7789 = vmatprep.subr.bf16.mxu0 %v6184_v32  ;;  %7831 = vmatprep.subr.bf16.mxu1 %v6184_v32  ;;  %v8045_v47 = vpop.permute.xlu1 %8044  ;;  %v6155_v17 = vadd.f32 %v6154_v11, %v6153_v22  ;;  %v6149_v25 = vmul.f32 %v8711_v12, %v11313_v27 }
0x2412   :  { %7793 = vmatprep.mubr.msk.bf16.mxu0 %vm236_vm0, %v6175_v43  ;;  %v8040_v42 = vpop.permute.xlu0 %8039  ;;  %v6152_v44 = vmul.f32 %v8713_v9, %v11317_v58  ;;  %v8047_v46 = vunpack.i.h.bf16 %v8045_v47  ;;  %v8046_v40 = vunpack.i.l.bf16 %v8045_v47 }
0x2413   :  { %v6157_v18 = vadd.f32 %v6156_v35, %v6155_v17  ;;  %v8042_v52 = vunpack.i.h.bf16 %v8040_v42  ;;  %v8041_v54 = vunpack.i.l.bf16 %v8040_v42  ;;  %v6160_v10 = vsel %vm236_vm0, %v6149_v25, 0.0 }
0x2414   :  { %7790 = vmatpush3.bf16.msra.mxu0 %v6184_v32  ;;  %7835 = vmatpush3.bf16.msra.mxu1 %v6184_v32  ;;  %v6166_v20 = vsel %vm236_vm0, %v6152_v44, 0.0  ;;  %v6178_v63 = vpack.c.bf16 %v6152_v44, %v11414_v59  ;;  %v4987_v0 = vsel %vm531_vm2, %v11811_v37, %v8047_v46  ;;  %v11816_v46 = vld [vmem:[#allocation30_spill] sm:$0xff] }
0x2415   :  { %v8715_v21 = vpop.eup %8714  ;;  %7791 = vmatprep.subr.bf16.mxu0 %v6186_v55  ;;  %7832 = vmatprep.subr.bf16.mxu1 %v6186_v55  ;;  %v8055_v27 = vpop.permute.xlu1 %8054  ;;  %v6159_v58 = vadd.f32 %v6158_v62, %v6157_v18  ;;  %v4985_v41 = vsel %vm531_vm2, %v11813_v8, %v8042_v52  ;;  %v4984_v5 = vsel %vm531_vm2, %v11814_v31, %v8041_v54  ;;  %v11817_v52 = vld [vmem:[#allocation27_spill] sm:$0xff]  ;;  %v11818_v54 = vld [vmem:[#allocation28_spill] sm:$0xff] }
0x2416   :  { %v8056_v15 = vunpack.i.l.bf16 %v8055_v27  ;;  %v8050_v61 = vpop.permute.xlu0 %8049  ;;  %v6150_v53 = vmul.f32 %v8715_v21, %v11323_v38  ;;  %v8057_v2 = vunpack.i.h.bf16 %v8055_v27  ;;  %v4986_v38 = vsel %vm531_vm2, %v11812_v49, %v8046_v40 }
0x2417   :  { %v6161_v36 = vadd.f32 %v6160_v10, %v6159_v58  ;;  %v8052_v4 = vunpack.i.h.bf16 %v8050_v61  ;;  %v8051_v57 = vunpack.i.l.bf16 %v8050_v61 }
0x2418   :  { %7792 = vmatpush3.bf16.msra.mxu0 %v6186_v55  ;;  %7836 = vmatpush3.bf16.msra.mxu1 %v6186_v55  ;;  %v6162_v24 = vsel %vm236_vm0, %v6150_v53, 0.0  ;;  %v6177_v19 = vpack.c.bf16 %v6150_v53, %v6149_v25  ;;  %v4994_v45 = vsel %vm1884_vm3, %v4986_v38, %v8056_v15  ;;  %v4995_v28 = vsel %vm1884_vm3, %v4987_v0, %v8057_v2 }
0x2419   :  { %v8065_v7 = vpop.permute.xlu1 %8064  ;;  %v6163_v51 = vadd.f32 %v6162_v24, %v6161_v36  ;;  %7801 = vmatprep.subr.bf16.mxu0 %v8200_v33  ;;  %v4992_v39 = vsel %vm1884_vm3, %v4984_v5, %v8051_v57  ;;  %v4993_v26 = vsel %vm1884_vm3, %v4985_v41, %v8052_v4  ;;  %v11821_v5 = vld [vmem:[#allocation20_spill] sm:$0xff] }
0x241a   :  { %v8067_v23 = vunpack.i.h.bf16 %v8065_v7  ;;  %v8066_v60 = vunpack.i.l.bf16 %v8065_v7  ;;  %7797 = vmatprep.mubr.msk.bf16.mxu1 %vm236_vm0, %v6177_v19  ;;  %v8060_v6 = vpop.permute.xlu0 %8059  ;;  %v11819_v7 = vld [vmem:[#allocation37_spill] sm:$0xff] }
0x241b   :  { %v6165_v32 = vadd.f32 %v6164_v34, %v6163_v51  ;;  %v8062_v3 = vunpack.i.h.bf16 %v8060_v6  ;;  %v8061_v13 = vunpack.i.l.bf16 %v8060_v6  ;;  %7794 = vmatmul.mubr.msk.bf16.vlgmr.msra.gmra.mrb[152].mxu0 %vm236_vm0, %v6176_v1  ;;  %7798 = vmatmul.mubr.msk.bf16.vlgmr.msra.gmra.mrb[176].mxu1 %vm236_vm0, %v6178_v63  ;;  %v11815_v34 = vld [vmem:[#allocation29_spill] sm:$0xff] }
0x241c   :  { %v5002_v56 = vsel %vm1893_vm4, %v4994_v45, %v8066_v60  ;;  %v5003_v16 = vsel %vm1893_vm4, %v4995_v28, %v8067_v23  ;;  %7802 = vmatpush3.bf16.msra.mxu0 %v8200_v33 }
0x241d   :  { %v6390_v55 = vpack.c.bf16 %v5003_v16, %v5002_v56  ;;  %v6167_v29 = vadd.f32 %v6166_v20, %v6165_v32  ;;  %v5000_v50 = vsel %vm1893_vm4, %v4992_v39, %v8061_v13  ;;  %v5001_v48 = vsel %vm1893_vm4, %v4993_v26, %v8062_v3  ;;  %v8075_v14 = vpop.permute.xlu1 %8074  ;;  %7803 = vmatprep.subr.bf16.mxu0 %v8201_v30 }
0x241e   :  { %v6389_v12 = vpack.c.bf16 %v5001_v48, %v5000_v50  ;;  %v8070_v59 = vpop.permute.xlu0 %8069  ;;  %v8077_v11 = vunpack.i.h.bf16 %v8075_v14  ;;  %v8076_v43 = vunpack.i.l.bf16 %v8075_v14  ;;  %v8731_v50 = vmov 0.0   ;;  %v11489_v48 = vld [vmem:[%s11621_s10] ss:$0 sm:$0xff]  ;;  %v11822_v14 = vld [vmem:[#allocation40_spill] sm:$0xff] }
0x241f   :  { %v6168_v22 = vrot.slane %v6167_v29, 4  ;;  %v8072_v9 = vunpack.i.h.bf16 %v8070_v59  ;;  %v8071_v35 = vunpack.i.l.bf16 %v8070_v59  ;;  %7821 = vmatprep.subr.bf16.mxu1 %v8731_v50  ;;  %7825 = vmatprep.mubr.msk.bf16.mxu1 %vm8732_vm8, %v8731_v50 }
0x2420   :  { %7804 = vmatpush3.bf16.msra.mxu0 %v8201_v30  ;;  %7805 = vmatprep.mubr.msk.bf16.mxu0 %vm389_vm1, %v6389_v12  ;;  %v4991_v21 = vsel %vm531_vm2, %v11815_v34, %v8077_v11  ;;  %v4990_v40 = vsel %vm531_vm2, %v11816_v46, %v8076_v43  ;;  %v11820_v30 = vld [vmem:[#allocation10_spill] sm:$0xff]  ;;  %v11831_v34 = vld [vmem:[#allocation19_spill] sm:$0xff] }
0x2421   :  { %v8085_v47 = vpop.permute.xlu1 %8084  ;;  %v6169_v17 = vadd.f32 %v6168_v22, %v6167_v29  ;;  %v4989_v27 = vsel %vm531_vm2, %v11817_v52, %v8072_v9  ;;  %v4988_v15 = vsel %vm531_vm2, %v11818_v54, %v8071_v35  ;;  %v11823_v12 = vld [vmem:[#allocation38_spill] sm:$0xff]  ;;  %v11826_v9 = vld [vmem:[#allocation21_spill] sm:$0xff]  ;;  %v11828_v35 = vld [vmem:[#allocation39_spill] sm:$0xff] }
0x2422   :  { %v8086_v42 = vunpack.i.l.bf16 %v8085_v47  ;;  %v8080_v25 = vpop.permute.xlu0 %8079  ;;  %v8087_v44 = vunpack.i.h.bf16 %v8085_v47  ;;  %v11824_v59 = vpack.i.bf16 %v11822_v14, %v11823_v12  ;;  %v11825_v11 = vld [vmem:[#allocation22_spill] sm:$0xff] }
0x2423   :  { %7806 = vmatmul.mubr.msk.bf16.vlgmr.msra.gmra.mrb[156].mxu0 %vm389_vm1, %v6390_v55  ;;  %v6170_v18 = vrot.slane %v6169_v17, 2  ;;  %v8082_v62 = vunpack.i.h.bf16 %v8080_v25  ;;  %v8081_v1 = vunpack.i.l.bf16 %v8080_v25 }
0x2424   :  { %v4998_v61 = vsel %vm1884_vm3, %v4990_v40, %v8086_v42  ;;  %v4999_v63 = vsel %vm1884_vm3, %v4991_v21, %v8087_v44 }
0x2425   :  { %v8095_v58 = vpop.permute.xlu1 %8094  ;;  %v6171_v33 = vadd.f32 %v6170_v18, %v6169_v17  ;;  %v4996_v57 = vsel %vm1884_vm3, %v4988_v15, %v8081_v1  ;;  %v4997_v24 = vsel %vm1884_vm3, %v4989_v27, %v8082_v62  ;;  %v11827_v17 = vld [vmem:[#allocation41_spill] sm:$0xff]  ;;  %v11830_v62 = vld [vmem:[#allocation18_spill] sm:$0xff] }
0x2426   :  { %v8097_v53 = vunpack.i.h.bf16 %v8095_v58  ;;  %v8096_v10 = vunpack.i.l.bf16 %v8095_v58  ;;  %v8090_v20 = vpop.permute.xlu0 %8089  ;;  %v11829_v42 = vpack.i.bf16 %v11827_v17, %v11828_v35  ;;  %v11837_v17 = vld [vmem:[#allocation12_spill] sm:$0xff] }
0x2427   :  { %v8092_v2 = vunpack.i.h.bf16 %v8090_v20  ;;  %v8091_v36 = vunpack.i.l.bf16 %v8090_v20  ;;  %v6172_v4 = vrot.slane %v6171_v33, 1  ;;  %v11832_v20 = vld [vmem:[#allocation3_spill] sm:$0xff] }
0x2428   :  { %v5006_v19 = vsel %vm1893_vm4, %v4998_v61, %v8096_v10  ;;  %v5007_v37 = vsel %vm1893_vm4, %v4999_v63, %v8097_v53 }
0x2429   :  { %v6392_v0 = vpack.c.bf16 %v5007_v37, %v5006_v19  ;;  %v5004_v49 = vsel %vm1893_vm4, %v4996_v57, %v8091_v36  ;;  %v5005_v38 = vsel %vm1893_vm4, %v4997_v24, %v8092_v2  ;;  %v6173_v8 = vadd.f32 %v6172_v4, %v6171_v33  ;;  %v11833_v2 = vld [vmem:[#allocation4_spill] sm:$0xff]  ;;  %v11834_v37 = vld [vmem:[#allocation2_spill] sm:$0xff] }
0x242a   :  { %v6391_v41 = vpack.c.bf16 %v5005_v38, %v5004_v49  ;;  %v11835_v49 = vld [vmem:[#allocation5_spill] sm:$0xff] }
0x242b   :  { %v6174_v51 = vadd.f32 %v6173_v8, %v11819_v7 }
0x242c   :  { %7809 = vmatprep.mubr.msk.bf16.mxu0 %vm389_vm1, %v6391_v41 }
0x242d   :  { %7810 = vmatmul.mubr.msk.bf16.gmra.mrb[160].mxu0 %vm389_vm1, %v6392_v0  ;;  %v6388_v31 = vsel %vm3282_vm5, %v11820_v30, %v6174_v51 }
0x242e   :  { %v6693_v45 = vadd.f32 %v6388_v31, %v11821_v5 }
0x24ee   :  { %v7795_v23 = vpop.f32.mrb[152].mxu0  ;;  %v7799_v60 = vpop.f32.mrb[176].mxu1 }
0x24ef   :  { %v6237_v6 = vpop.f32.mrb[153].mxu0  ;;  %v6253_v28 = vpop.f32.mrb[177].mxu1 }
0x24f0   :  { %v7796_v32 = vpop.f32.mrb[154].mxu0  ;;  %v7800_v3 = vpop.f32.mrb[178].mxu1 }
0x24f1   :  { %v8128_v13 = vpack.i.bf16 %v7796_v32, %v7795_v23  ;;  %v8153_v39 = vpack.i.bf16 %v7800_v3, %v7799_v60  ;;  %v6240_v26 = vpop.f32.mrb[155].mxu0  ;;  %v6256_v56 = vpop.f32.mrb[179].mxu1  ;;  %v11527_v32 = vmul.f32 0.0078125, %v6693_v45  ;;  %v11836_v45 = vld [vmem:[#allocation11_spill] sm:$0xff] }
0x24f2   :  { %v8133_v16 = vpack.i.bf16 %v6240_v26, %v6237_v6  ;;  %v8148_v55 = vpack.i.bf16 %v6256_v56, %v6253_v28 }
0x24f3   :  { %8129 = vrot.lane.b32.xlu1 %v8128_v13, %s8730_s27  ;;  %v6696_v3 = vsel %vm6695_vm6, %v11527_v32, 0.0  ;;  %v8105_v13 = vpop.permute.xlu1 %8104 }
0x24f4   :  { %8134 = vrot.lane.b32.xlu0 %v8133_v16, %s8730_s27  ;;  %v8107_v16 = vunpack.i.h.bf16 %v8105_v13 }
0x24f6   :  { %v7807_v29 = vpop.f32.mrb[156].mxu0 }
0x24f7   :  { %8144 = vrot.lane.b32.xlu1 %v11824_v59, %s8729_s26  ;;  %v6471_v22 = vpop.f32.mrb[157].mxu0  ;;  %v6536_v43 = vadd.f32 %v7807_v29, %v11825_v11  ;;  %v8115_v26 = vpop.permute.xlu1 %8114 }
0x24f8   :  { %v6534_v47 = vadd.f32 %v6471_v22, %v11826_v9  ;;  %8139 = vrot.lane.b32.xlu0 %v11829_v42, %s8729_s26  ;;  %v7808_v25 = vpop.f32.mrb[158].mxu0  ;;  %v8116_v59 = vunpack.i.l.bf16 %v8115_v26  ;;  %v8117_v11 = vunpack.i.h.bf16 %v8115_v26  ;;  %v11838_v42 = vld [vmem:[#allocation14_spill] sm:$0xff] }
0x24f9   :  { %v6474_v44 = vpop.f32.mrb[159].mxu0  ;;  %v6537_v1 = vadd.f32 %v7808_v25, %v11830_v62  ;;  %v6559_v46 = vadd.f32 %v11489_v48, %v6536_v43 }
0x24fa   :  { %v6557_v18 = vadd.f32 %v11489_v48, %v6534_v47  ;;  %v6535_v21 = vadd.f32 %v6474_v44, %v11831_v34  ;;  %v6367_v47 = vsel %vm531_vm2, %v11836_v45, %v8107_v16 }
0x24fb   :  { %8154 = vrot.lane.b32.xlu1 %v8153_v39, %s8730_s27  ;;  %v6560_v27 = vadd.f32 %v11489_v48, %v6537_v1  ;;  %v6576_v54 = vsel %vm389_vm1, %v6559_v46, 0.0  ;;  %v8100_v39 = vpop.permute.xlu0 %8099  ;;  %v8125_v14 = vpop.permute.xlu1 %8124 }
0x24fc   :  { %v6558_v40 = vadd.f32 %v11489_v48, %v6535_v21  ;;  %8149 = vrot.lane.b32.xlu0 %v8148_v55, %s8730_s27  ;;  %v6573_v52 = vsel %vm389_vm1, %v6557_v18, 0.0  ;;  %v8106_v55 = vunpack.i.l.bf16 %v8105_v13  ;;  %v8102_v29 = vunpack.i.h.bf16 %v8100_v39  ;;  %v11839_v18 = vld [vmem:[#allocation13_spill] sm:$0xff] }
0x24fd   :  { %v6578_v10 = vsel %vm389_vm1, %v6560_v27, 0.0  ;;  %v8101_v12 = vunpack.i.l.bf16 %v8100_v39 }
0x24fe   :  { %v6574_v58 = vsel %vm389_vm1, %v6558_v40, 0.0  ;;  %v6366_v35 = vsel %vm531_vm2, %v11837_v17, %v8106_v55  ;;  %v6365_v25 = vsel %vm531_vm2, %v11838_v42, %v8102_v29  ;;  %v6375_v40 = vsel %vm1884_vm3, %v6367_v47, %v8117_v11  ;;  %v8202_v17 = vld [vmem:[%s11622_s11] sm:$0xff]  }
0x24ff   :  { %v6575_v33 = vadd.f32 %v6574_v58, %v6573_v52  ;;  %v8110_v56 = vpop.permute.xlu0 %8109  ;;  %v6364_v62 = vsel %vm531_vm2, %v11839_v18, %v8101_v12  ;;  %v6374_v1 = vsel %vm1884_vm3, %v6366_v35, %v8116_v59  ;;  %7822 = vmatpush3.bf16.msra.mxu1 %v8202_v17  ;;  %v8203_v35 = vld [vmem:[%s11622_s11 + $0x8] sm:$0xff]   ;;  %v11845_v18 = vld [vmem:[#allocation8_spill] sm:$0xff] }
0x2500   :  { %v7811_v15 = vpop.f32.mrb[160].mxu0  ;;  %v8111_v43 = vunpack.i.l.bf16 %v8110_v56  ;;  %v8112_v9 = vunpack.i.h.bf16 %v8110_v56  ;;  %7823 = vmatprep.subr.bf16.mxu1 %v8731_v50 }
0x2501   :  { %v6577_v61 = vadd.f32 %v6576_v54, %v6575_v33  ;;  %v6487_v53 = vpop.f32.mrb[161].mxu0  ;;  %v6540_v63 = vadd.f32 %v7811_v15, %v11832_v20  ;;  %v8127_v54 = vunpack.i.h.bf16 %v8125_v14 }
0x2502   :  { %v6538_v36 = vadd.f32 %v6487_v53, %v11833_v2  ;;  %v7812_v4 = vpop.f32.mrb[162].mxu0  ;;  %v6372_v52 = vsel %vm1884_vm3, %v6364_v62, %v8111_v43  ;;  %v6373_v33 = vsel %vm1884_vm3, %v6365_v25, %v8112_v9  ;;  %v8126_v53 = vunpack.i.l.bf16 %v8125_v14  ;;  %v11844_v25 = vld [vmem:[#allocation7_spill] sm:$0xff] }
0x2503   :  { %v6579_v57 = vadd.f32 %v6578_v10, %v6577_v61  ;;  %v6490_v24 = vpop.f32.mrb[163].mxu0  ;;  %v6541_v0 = vadd.f32 %v7812_v4, %v11834_v37  ;;  %v6563_v8 = vadd.f32 %v11489_v48, %v6540_v63  ;;  %v8120_v22 = vpop.permute.xlu0 %8119  ;;  %7824 = vmatpush3.bf16.msra.mxu1 %v8203_v35 }
0x2504   :  { %v6561_v19 = vadd.f32 %v11489_v48, %v6538_v36  ;;  %v6539_v38 = vadd.f32 %v6490_v24, %v11835_v49  ;;  %v8122_v36 = vunpack.i.h.bf16 %v8120_v22  ;;  %v8121_v4 = vunpack.i.l.bf16 %v8120_v22 }
0x2505   :  { %v6564_v30 = vadd.f32 %v11489_v48, %v6541_v0  ;;  %v6584_v23 = vsel %vm389_vm1, %v6563_v8, 0.0 }
0x2506   :  { %v6580_v41 = vsel %vm389_vm1, %v6561_v19, 0.0  ;;  %v6562_v7 = vadd.f32 %v11489_v48, %v6539_v38  ;;  %v11840_v38 = vld [vmem:[#allocation15_spill] sm:$0xff] }
0x2507   :  { %v6581_v51 = vadd.f32 %v6580_v41, %v6579_v57  ;;  %v6586_v6 = vsel %vm389_vm1, %v6564_v30, 0.0  ;;  %v6371_v8 = vsel %vm531_vm2, %v11840_v38, %v8127_v54  ;;  %v11841_v41 = vld [vmem:[#allocation16_spill] sm:$0xff]  ;;  %v11842_v30 = vld [vmem:[#allocation35_spill] sm:$0xff] }
0x2508   :  { %v6582_v31 = vsel %vm389_vm1, %v6562_v7, 0.0  ;;  %v6370_v7 = vsel %vm531_vm2, %v11841_v41, %v8126_v53 }
0x2509   :  { %v6583_v5 = vadd.f32 %v6582_v31, %v6581_v51  ;;  %v6369_v31 = vsel %vm531_vm2, %v11842_v30, %v8122_v36 }
0x250b   :  { %v6585_v60 = vadd.f32 %v6584_v23, %v6583_v5  ;;  %v11843_v5 = vld [vmem:[#allocation17_spill] sm:$0xff] }
0x250c   :  { %v6368_v23 = vsel %vm531_vm2, %v11843_v5, %v8121_v4  ;;  %v11849_v4 = vld [vmem:[#allocation32_spill] sm:$0xff] }
0x250d   :  { %v11525_v28 = vadd.f32 %v6586_v6, %v6585_v60 }
0x251b   :  { %6697 = vadd.xlane.f32.xlu0 %v6696_v3 }
0x2565   :  { %v8130_v44 = vpop.permute.xlu1 %8129 }
0x2566   :  { %v8132_v34 = vunpack.i.h.bf16 %v8130_v44  ;;  %v8131_v21 = vunpack.i.l.bf16 %v8130_v44  ;;  %v8135_v46 = vpop.permute.xlu0 %8134 }
0x2567   :  { %v8137_v27 = vunpack.i.h.bf16 %v8135_v46  ;;  %v8136_v58 = vunpack.i.l.bf16 %v8135_v46  ;;  %v11846_v46 = vld [vmem:[#allocation6_spill] sm:$0xff] }
0x2568   :  { %v6383_v15 = vsel %vm1893_vm4, %v6375_v40, %v8132_v34  ;;  %v6382_v61 = vsel %vm1893_vm4, %v6374_v1, %v8131_v21 }
0x2569   :  { %v6394_v10 = vpack.c.bf16 %v6383_v15, %v6382_v61  ;;  %v6380_v20 = vsel %vm1893_vm4, %v6372_v52, %v8136_v58  ;;  %v6381_v63 = vsel %vm1893_vm4, %v6373_v33, %v8137_v27  ;;  %v8145_v2 = vpop.permute.xlu1 %8144  ;;  %v11847_v52 = vld [vmem:[#allocation9_spill] sm:$0xff] }
0x256a   :  { %v6393_v57 = vpack.c.bf16 %v6381_v63, %v6380_v20  ;;  %v8140_v24 = vpop.permute.xlu0 %8139  ;;  %v8147_v19 = vunpack.i.h.bf16 %v8145_v2  ;;  %v8146_v37 = vunpack.i.l.bf16 %v8145_v2  ;;  %v11848_v2 = vld [vmem:[#allocation31_spill] sm:$0xff] }
0x256b   :  { %v8142_v0 = vunpack.i.h.bf16 %v8140_v24  ;;  %v8141_v49 = vunpack.i.l.bf16 %v8140_v24 }
0x256c   :  { %7813 = vmatprep.mubr.msk.bf16.mxu0 %vm389_vm1, %v6393_v57  ;;  %v6379_v13 = vsel %vm1884_vm3, %v6371_v8, %v8147_v19  ;;  %v6378_v39 = vsel %vm1884_vm3, %v6370_v7, %v8146_v37  ;;  %v11850_v8 = vld [vmem:[#allocation34_spill] sm:$0xff]  ;;  %v11851_v7 = vld [vmem:[#allocation33_spill] sm:$0xff] }
0x256d   :  { %v8155_v51 = vpop.permute.xlu1 %8154  ;;  %7814 = vmatmul.mubr.msk.bf16.gmra.mrb[164].mxu0 %vm389_vm1, %v6394_v10  ;;  %v6376_v16 = vsel %vm1884_vm3, %v6368_v23, %v8141_v49  ;;  %v6377_v55 = vsel %vm1884_vm3, %v6369_v31, %v8142_v0 }
0x256e   :  { %v8157_v60 = vunpack.i.h.bf16 %v8155_v51  ;;  %v8156_v6 = vunpack.i.l.bf16 %v8155_v51  ;;  %v8150_v3 = vpop.permute.xlu0 %8149 }
0x256f   :  { %v8152_v26 = vunpack.i.h.bf16 %v8150_v3  ;;  %v8151_v56 = vunpack.i.l.bf16 %v8150_v3 }
0x2570   :  { %v6386_v29 = vsel %vm1893_vm4, %v6378_v39, %v8156_v6  ;;  %v6387_v14 = vsel %vm1893_vm4, %v6379_v13, %v8157_v60 }
0x2571   :  { %v6396_v12 = vpack.c.bf16 %v6387_v14, %v6386_v29  ;;  %v6384_v59 = vsel %vm1893_vm4, %v6376_v16, %v8151_v56  ;;  %v6385_v22 = vsel %vm1893_vm4, %v6377_v55, %v8152_v26 }
0x2572   :  { %v6395_v11 = vpack.c.bf16 %v6385_v22, %v6384_v59 }
0x2574   :  { %7817 = vmatprep.mubr.msk.bf16.mxu0 %vm389_vm1, %v6395_v11 }
0x2575   :  { %7818 = vmatmul.mubr.msk.bf16.gmra.mrb[168].mxu0 %vm389_vm1, %v6396_v12 }
0x25a8   :  { %v6698_v43 = vpop.xlane.xlu0 %6697 }
0x25a9   :  { %v6699_v9 = vmul.f32 0.015625, %v6698_v43 }
0x25ab   :  { %v6700_v45 = vmul.f32 0.2, %v6699_v9 }
0x25ad   :  { %vm6701_vm7 = vcmp.gt.f32.partialorder %v11527_v32, %v6700_v45 }
0x25ae   :  { %v6929_v47 = vsel %vm6701_vm7, 1.0, %v8731_v50  ;;  %v6588_v50 = vrot.slane %v11525_v28, 4 }
0x25af   :  { %6705 = vrot.lane.b32.xlu1 %v6929_v47, %s8729_s26 }
0x25b0   :  { %v6589_v19 = vadd.f32 %v6588_v50, %v11525_v28 }
0x25b2   :  { %v6590_v60 = vrot.slane %v6589_v19, 2 }
0x25b4   :  { %v6591_v26 = vadd.f32 %v6590_v60, %v6589_v19 }
0x25b6   :  { %v6592_v29 = vrot.slane %v6591_v26, 1 }
0x25b8   :  { %v6593_v59 = vadd.f32 %v6592_v29, %v6591_v26 }
0x25ba   :  { %v6616_v43 = vmul.f32 0.015625, %v6593_v59 }
0x2640   :  { %v7815_v32 = vpop.f32.mrb[164].mxu0 }
0x2641   :  { %v6503_v42 = vpop.f32.mrb[165].mxu0  ;;  %v6544_v44 = vadd.f32 %v7815_v32, %v11844_v25 }
0x2642   :  { %v6542_v62 = vadd.f32 %v6503_v42, %v11845_v18  ;;  %v7816_v1 = vpop.f32.mrb[166].mxu0 }
0x2643   :  { %v6506_v34 = vpop.f32.mrb[167].mxu0  ;;  %v6545_v40 = vadd.f32 %v7816_v1, %v11846_v46  ;;  %v6567_v58 = vadd.f32 %v11489_v48, %v6544_v44  ;;  %v6925_v44 = vld [vmem:[%s11623_s12] ss:$0 sm:$0xff] }
0x2644   :  { %v6565_v21 = vadd.f32 %v11489_v48, %v6542_v62  ;;  %v6543_v27 = vadd.f32 %v6506_v34, %v11847_v52  ;;  %v6706_v34 = vpop.permute.xlu1 %6705 }
0x2645   :  { %v6568_v15 = vadd.f32 %v11489_v48, %v6545_v40  ;;  %v6597_v63 = vsel %vm389_vm1, %v6567_v58, 0.0 }
0x2646   :  { %v6566_v33 = vadd.f32 %v11489_v48, %v6543_v27  ;;  %v6594_v54 = vsel %vm389_vm1, %v6565_v21, 0.0 }
0x2647   :  { %v6599_v49 = vsel %vm389_vm1, %v6568_v15, 0.0 }
0x2648   :  { %v6595_v61 = vsel %vm389_vm1, %v6566_v33, 0.0  ;;  %v7819_v53 = vpop.f32.mrb[168].mxu0 }
0x2649   :  { %v6596_v10 = vadd.f32 %v6595_v61, %v6594_v54  ;;  %v6519_v20 = vpop.f32.mrb[169].mxu0  ;;  %v6548_v36 = vadd.f32 %v7819_v53, %v11848_v2 }
0x264a   :  { %v6546_v57 = vadd.f32 %v6519_v20, %v11849_v4  ;;  %v7820_v24 = vpop.f32.mrb[170].mxu0 }
0x264b   :  { %v6598_v37 = vadd.f32 %v6597_v63, %v6596_v10  ;;  %v6522_v0 = vpop.f32.mrb[171].mxu0  ;;  %v6549_v41 = vadd.f32 %v7820_v24, %v11850_v8  ;;  %v6571_v31 = vadd.f32 %v11489_v48, %v6548_v36 }
0x264c   :  { %v6569_v38 = vadd.f32 %v11489_v48, %v6546_v57  ;;  %v6547_v51 = vadd.f32 %v6522_v0, %v11851_v7 }
0x264d   :  { %v6600_v30 = vadd.f32 %v6599_v49, %v6598_v37  ;;  %v6572_v28 = vadd.f32 %v11489_v48, %v6549_v41  ;;  %v6605_v39 = vsel %vm389_vm1, %v6571_v31, 0.0 }
0x264e   :  { %v6601_v5 = vsel %vm389_vm1, %v6569_v38, 0.0  ;;  %v6570_v23 = vadd.f32 %v11489_v48, %v6547_v51  ;;  %v6618_v48 = vpack.c.bf16 %v6616_v43, %v6616_v43 }
0x264f   :  { %v6602_v6 = vadd.f32 %v6601_v5, %v6600_v30  ;;  %v6607_v16 = vsel %vm389_vm1, %v6572_v28, 0.0 }
0x2650   :  { %v6603_v3 = vsel %vm389_vm1, %v6570_v23, 0.0  ;;  %v6633_v35 = vunpack.c.l.b16 %v6618_v48 }
0x2651   :  { %v6604_v13 = vadd.f32 %v6603_v3, %v6602_v6 }
0x2653   :  { %v6606_v56 = vadd.f32 %v6605_v39, %v6604_v13 }
0x2655   :  { %v6608_v55 = vadd.f32 %v6607_v16, %v6606_v56 }
0x2657   :  { %v6609_v14 = vrot.slane %v6608_v55, 4 }
0x2659   :  { %v6610_v12 = vadd.f32 %v6609_v14, %v6608_v55 }
0x265b   :  { %v6611_v22 = vrot.slane %v6610_v12, 2 }
0x265d   :  { %v6612_v11 = vadd.f32 %v6611_v22, %v6610_v12 }
0x265f   :  { %v6613_v9 = vrot.slane %v6612_v11, 1 }
0x2661   :  { %v6614_v45 = vadd.f32 %v6613_v9, %v6612_v11 }
0x2663   :  { %v6617_v47 = vmul.f32 0.015625, %v6614_v45 }
0x2665   :  { %v6619_v17 = vpack.c.bf16 %v6617_v47, %v6617_v47 }
0x2667   :  { %v6634_v32 = vunpack.c.l.b16 %v6619_v17 }
0x2669   :  { %v6636_v42 = vsel %vm6635_vm9, %v6634_v32, %v6633_v35 }
0x266a   :  { %v6637_v25 = vpack.c.b16 %v6636_v42, %v6636_v42 }
0x266c   :  { %7826 = vmatmul.mubr.msk.bf16.vlgmr.msra.gmra.mrb[180].mxu1 %vm389_vm1, %v6637_v25 }
0x273f   :  { %v6687_v18 = vpop.f32.mrb[180].mxu1 }
0x2740   :  { %v6688_v62 = vadd.f32 %v6925_v44, %v6687_v18  ;;  %v7827_v1 = vpop.f32.mrb[181].mxu1 }
0x2741   :  { %v6690_v21 = vpop.f32.mrb[182].mxu1 }
0x2742   :  { %v6708_v46 = vsel %vm1884_vm3, %v6688_v62, %v6706_v34  ;;  %v7828_v40 = vpop.f32.mrb[183].mxu1 }
0x2743   :  { %v6710_v52 = vsel %vm6709_vm10, %v6708_v46, 0.0 }
0x2744   :  { %6711 = vst [vmem:[%s11624_s13] sm:$0x3] %v6710_v52 }

</bundles_post_ra>
